<compile_context>
chip_gen: v6e
topology: v6e:2x2x1
jax: 0.10.0
libtpu: 0.0.40
codegen_flags: <defaults>
</compile_context>

<pallas_src>
import functools

import jax
import jax.numpy as jnp
from jax.experimental import pallas as pl
from jax.experimental.pallas import tpu as pltpu

BN_EPS = 1e-5
VMEM_LIMIT_BYTES = 48 * 1024 * 1024

# Matmul operand dtype.  Setting this to jnp.bfloat16 roughly halves MXU time and
# weight DMA/VMEM bytes on v6e/v7x (f32 accumulation is kept via
# preferred_element_type); left at float32 so the forward matches the PyTorch
# module's numerics exactly.
MATMUL_DTYPE = jnp.float32


def _full_spec(shape):
    # whole-array block (the call is gridless)
    return pl.BlockSpec(shape, lambda *_: (0,) * len(shape))


def _mm(a, w):
    return jnp.dot(a.astype(MATMUL_DTYPE), w.astype(MATMUL_DTYPE),
                   preferred_element_type=jnp.float32)


def _relu(x):
    return jnp.maximum(x, 0.0)


def _col_stats(y):
    # Per-column mean / biased variance over all rows, computed as ones-vector
    # matmuls so the reductions run on the MXU (badly underutilized here) instead of
    # the XLU.
    m = y.shape[0]
    ones = jnp.ones((1, m), jnp.float32)
    inv_m = jnp.float32(1.0 / m)
    mean = jnp.dot(ones, y, preferred_element_type=jnp.float32) * inv_m       # (1, C)
    centered = y - mean
    var = jnp.dot(ones, centered * centered,
                  preferred_element_type=jnp.float32) * inv_m                 # (1, C)
    return centered, var


def _bn_relu(y, g, beta):
    # Training-mode BatchNorm1d (batch statistics, the nn.Module-default forward),
    # then affine + ReLU.  The preceding Conv1d bias is omitted by the caller: a
    # per-column constant is exactly cancelled by the mean subtraction.
    centered, var = _col_stats(y)
    return jnp.maximum(centered * jax.lax.rsqrt(var + BN_EPS) * g + beta, 0.0)


# ---------------------------------------------------------------------------
# Single fused kernel: whole QNetwork.forward
# ---------------------------------------------------------------------------
def _qnet_kernel(*refs, batch, n_pts):
    (state_ref, action_ref, x2d_ref,
     w1, g1, be1, w2, g2, be2, w3, g3, be3,
     wt, bt,
     w4, g4, be4, w5, g5, be5,
     wo1, bo1, wo2, bo2,
     ws1, bs1, ws2, bs2, ws3, bs3,
     wa1, ba1, wa2, ba2,
     wl1, bl1, wl2, bl2, wl3, bl3,
     q_ref) = refs

    m = batch * n_pts

    # ---- obs1_layer + t_net1 (points-major: Conv1d(k=1) == matmul) ----------
    y1 = _bn_relu(_mm(x2d_ref[...], w1[...]), g1[...], be1[...])        # (M, 64)
    y2 = _bn_relu(_mm(y1, w2[...]), g2[...], be2[...])                  # (M, 64)
    y3 = _bn_relu(_mm(y2, w3[...]), g3[...], be3[...])                  # (M, 256)

    # ---- torch.max over points + t_net2 (Linear 256->4096 + ReLU) -----------
    tmax = jnp.max(y3.reshape(batch, n_pts, y3.shape[-1]), axis=1)      # (B, 256)
    t = _relu(_mm(tmax, wt[...]) + bt[...])                             # (B, 4096)

    # ---- torch.bmm(T, obs1) in points-major ---------------------------------
    # out[b,n,d] = sum_c obs1[b,n,c] * T[b,d,c] with T = t.view(B,64,64).
    # Contracting on T's LAST dim, so no transpose of T is ever materialized.
    t3 = t.reshape(batch, 64, 64)
    o3 = y1.reshape(batch, n_pts, 64)
    xb = jax.lax.dot_general(
        o3.astype(MATMUL_DTYPE), t3.astype(MATMUL_DTYPE),
        dimension_numbers=(((2,), (2,)), ((0,), (0,))),
        preferred_element_type=jnp.float32)                             # (B, N, 64)
    x = xb.reshape(m, 64)                                               # (M, 64)

    # ---- obs2_layer + max over points + obs3_layer --------------------------
    y4 = _bn_relu(_mm(x, w4[...]), g4[...], be4[...])                   # (M, 128)
    y5 = _bn_relu(_mm(y4, w5[...]), g5[...], be5[...])                  # (M, 512)
    xmax = jnp.max(y5.reshape(batch, n_pts, y5.shape[-1]), axis=1)      # (B, 512)
    h = _relu(_mm(xmax, wo1[...]) + bo1[...])                           # (B, 256)
    x2 = _relu(_mm(h, wo2[...]) + bo2[...])                             # (B, 256)

    # ---- state_layer ---------------------------------------------------------
    s = _relu(_mm(state_ref[...], ws1[...]) + bs1[...])                 # (B, 256)
    s = _relu(_mm(s, ws2[...]) + bs2[...])                              # (B, 128)
    s = _relu(_mm(s, ws3[...]) + bs3[...])                              # (B, 128)

    # ---- action_layer --------------------------------------------------------
    a = _relu(_mm(action_ref[...], wa1[...]) + ba1[...])                # (B, 128)
    a = _relu(_mm(a, wa2[...]) + ba2[...])                              # (B, 128)

    # ---- head: cat([s, a, x2]) @ W_l1 folded into three matmuls against
    # static (tile-aligned) slices of the single l1 weight ref -----------------
    hh = (_mm(s, wl1[0:128, :]) + _mm(a, wl1[128:256, :])
          + _mm(x2, wl1[256:512, :]) + bl1[...])
    hh = _relu(hh)                                                      # (B, 256)
    hh = _relu(_mm(hh, wl2[...]) + bl2[...])                            # (B, 64)
    q_ref[...] = _mm(hh, wl3[...]) + bl3[...]                           # (B, 1)


def qnetwork_fused(state, action, x2d, p, batch, n_pts):
    args = (state, action, x2d,
            p["c1_w"], p["c1_g"], p["c1_be"],
            p["c2_w"], p["c2_g"], p["c2_be"],
            p["c3_w"], p["c3_g"], p["c3_be"],
            p["t2_w"], p["t2_b"],
            p["c4_w"], p["c4_g"], p["c4_be"],
            p["c5_w"], p["c5_g"], p["c5_be"],
            p["o1_w"], p["o1_b"], p["o2_w"], p["o2_b"],
            p["s1_w"], p["s1_b"], p["s2_w"], p["s2_b"], p["s3_w"], p["s3_b"],
            p["a1_w"], p["a1_b"], p["a2_w"], p["a2_b"],
            p["l1_w"], p["l1_b"], p["l2_w"], p["l2_b"], p["l3_w"], p["l3_b"])
    return pl.pallas_call(
        functools.partial(_qnet_kernel, batch=batch, n_pts=n_pts),
        in_specs=[_full_spec(a.shape) for a in args],
        out_specs=_full_spec((batch, 1)),
        out_shape=jax.ShapeDtypeStruct((batch, 1), jnp.float32),
        compiler_params=pltpu.CompilerParams(vmem_limit_bytes=VMEM_LIMIT_BYTES),
    )(*args)


# ---------------------------------------------------------------------------
# Parameters (deterministic init; weights stored pre-transposed as (fan_in, fan_out)).
# Conv biases c1_b..c5_b are kept in the dict but unused: they precede BatchNorm and
# are exactly cancelled by the mean subtraction.
# ---------------------------------------------------------------------------
def init_params(key, n_state=4, n_obs=4, n_action=2):
    dims = {
        # state_layer
        "s1": (n_state, 256), "s2": (256, 128), "s3": (128, 128),
        # obs1_layer, t_net1 (conv k=1 layers)
        "c1": (n_obs, 64), "c2": (64, 64), "c3": (64, 256),
        # t_net2
        "t2": (256, 64 * 64),
        # obs2_layer
        "c4": (64, 128), "c5": (128, 512),
        # obs3_layer
        "o1": (512, 256), "o2": (256, 256),
        # action_layer
        "a1": (n_action, 128), "a2": (128, 128),
        # head
        "l1": (512, 256), "l2": (256, 64), "l3": (64, 1),
    }
    bn_channels = {"c1": 64, "c2": 64, "c3": 256, "c4": 128, "c5": 512}

    params = {}
    keys = jax.random.split(key, 2 * len(dims))
    for i, (name, (fi, fo)) in enumerate(dims.items()):
        bound = 1.0 / float(fi) ** 0.5
        params[name + "_w"] = jax.random.uniform(
            keys[2 * i], (fi, fo), jnp.float32, -bound, bound)
        params[name + "_b"] = jax.random.uniform(
            keys[2 * i + 1], (1, fo), jnp.float32, -bound, bound)
    for name, c in bn_channels.items():
        params[name + "_g"] = jnp.ones((1, c), jnp.float32)    # BN gamma default
        params[name + "_be"] = jnp.zeros((1, c), jnp.float32)  # BN beta default
    return params


# ---------------------------------------------------------------------------
# Forward pass (mirrors QNetwork.forward) — ONE fused pallas_call.
# ---------------------------------------------------------------------------
def qnetwork_forward(params, state, obs, action):
    batch, c_in, n_pts = obs.shape
    # NCW -> points-major 2D.  The only XLA-side data movement left, acting on the
    # smallest tensor in the network (the raw n_obs-channel input).
    x2d = jnp.transpose(obs, (0, 2, 1)).reshape(batch * n_pts, c_in)   # (B*N, n_obs)
    return qnetwork_fused(state, action, x2d, params, batch, n_pts)    # (B, 1)


if __name__ == "__main__":
    key = jax.random.PRNGKey(0)
    k_par, k_state, k_obs, k_action = jax.random.split(key, 4)

    B, N_STATE, N_OBS, N_ACTION, N_POINTS = 2, 4, 4, 2, 8
    params = init_params(k_par, N_STATE, N_OBS, N_ACTION)

    state = jax.random.normal(k_state, (B, N_STATE), jnp.float32)
    obs = jax.random.normal(k_obs, (B, N_OBS, N_POINTS), jnp.float32)  # NCW like PyTorch
    action = jax.random.normal(k_action, (B, N_ACTION), jnp.float32)

    fwd = jax.jit(qnetwork_forward)
    q = fwd(params, state, obs, action)
    jax.block_until_ready(q)

    assert q.shape == (B, 1) and q.dtype == jnp.float32
    print("KERNEL_OK")
</pallas_src>

<mosaic_0001>
module attributes {stable_mosaic.version = 11 : i64} {
  func.func @_qnet_kernel(%arg0: memref<2x4xf32, #tpu.memory_space<vmem>>, %arg1: memref<2x2xf32, #tpu.memory_space<vmem>>, %arg2: memref<16x4xf32, #tpu.memory_space<vmem>>, %arg3: memref<4x64xf32, #tpu.memory_space<vmem>>, %arg4: memref<1x64xf32, #tpu.memory_space<vmem>>, %arg5: memref<1x64xf32, #tpu.memory_space<vmem>>, %arg6: memref<64x64xf32, #tpu.memory_space<vmem>>, %arg7: memref<1x64xf32, #tpu.memory_space<vmem>>, %arg8: memref<1x64xf32, #tpu.memory_space<vmem>>, %arg9: memref<64x256xf32, #tpu.memory_space<vmem>>, %arg10: memref<1x256xf32, #tpu.memory_space<vmem>>, %arg11: memref<1x256xf32, #tpu.memory_space<vmem>>, %arg12: memref<256x4096xf32, #tpu.memory_space<vmem>>, %arg13: memref<1x4096xf32, #tpu.memory_space<vmem>>, %arg14: memref<64x128xf32, #tpu.memory_space<vmem>>, %arg15: memref<1x128xf32, #tpu.memory_space<vmem>>, %arg16: memref<1x128xf32, #tpu.memory_space<vmem>>, %arg17: memref<128x512xf32, #tpu.memory_space<vmem>>, %arg18: memref<1x512xf32, #tpu.memory_space<vmem>>, %arg19: memref<1x512xf32, #tpu.memory_space<vmem>>, %arg20: memref<512x256xf32, #tpu.memory_space<vmem>>, %arg21: memref<1x256xf32, #tpu.memory_space<vmem>>, %arg22: memref<256x256xf32, #tpu.memory_space<vmem>>, %arg23: memref<1x256xf32, #tpu.memory_space<vmem>>, %arg24: memref<4x256xf32, #tpu.memory_space<vmem>>, %arg25: memref<1x256xf32, #tpu.memory_space<vmem>>, %arg26: memref<256x128xf32, #tpu.memory_space<vmem>>, %arg27: memref<1x128xf32, #tpu.memory_space<vmem>>, %arg28: memref<128x128xf32, #tpu.memory_space<vmem>>, %arg29: memref<1x128xf32, #tpu.memory_space<vmem>>, %arg30: memref<2x128xf32, #tpu.memory_space<vmem>>, %arg31: memref<1x128xf32, #tpu.memory_space<vmem>>, %arg32: memref<128x128xf32, #tpu.memory_space<vmem>>, %arg33: memref<1x128xf32, #tpu.memory_space<vmem>>, %arg34: memref<512x256xf32, #tpu.memory_space<vmem>>, %arg35: memref<1x256xf32, #tpu.memory_space<vmem>>, %arg36: memref<256x64xf32, #tpu.memory_space<vmem>>, %arg37: memref<1x64xf32, #tpu.memory_space<vmem>>, %arg38: memref<64x1xf32, #tpu.memory_space<vmem>>, %arg39: memref<1x1xf32, #tpu.memory_space<vmem>>, %arg40: memref<2x1xf32, #tpu.memory_space<vmem>>) attributes {dimension_semantics = [], scalar_prefetch = 0 : i64, scratch_operands = 0 : i64, tpu.core_type = #tpu.core_type<tc>} {
    %c0 = arith.constant 0 : index
    %c0_0 = arith.constant 0 : index
    %0 = vector.load %arg2[%c0, %c0_0] : memref<16x4xf32, #tpu.memory_space<vmem>>, vector<16x4xf32>
    %c0_1 = arith.constant 0 : index
    %c0_2 = arith.constant 0 : index
    %1 = vector.load %arg3[%c0_1, %c0_2] : memref<4x64xf32, #tpu.memory_space<vmem>>, vector<4x64xf32>
    %cst = arith.constant dense<0.000000e+00> : vector<16x64xf32>
    %2 = tpu.matmul %0, %1, %cst {dimension_numbers = #tpu.dot_dimension_numbers<[1], [0], [0], [1], [0, 0, 1, 1], [], []>} : vector<16x4xf32>, vector<4x64xf32>, vector<16x64xf32> -> vector<16x64xf32>
    %c0_3 = arith.constant 0 : index
    %c0_4 = arith.constant 0 : index
    %3 = vector.load %arg4[%c0_3, %c0_4] : memref<1x64xf32, #tpu.memory_space<vmem>>, vector<1x64xf32>
    %c0_5 = arith.constant 0 : index
    %c0_6 = arith.constant 0 : index
    %4 = vector.load %arg5[%c0_5, %c0_6] : memref<1x64xf32, #tpu.memory_space<vmem>>, vector<1x64xf32>
    %cst_7 = arith.constant 1.000000e+00 : f32
    %5 = vector.broadcast %cst_7 : f32 to vector<1x16xf32>
    %cst_8 = arith.constant dense<0.000000e+00> : vector<1x64xf32>
    %6 = tpu.matmul %5, %2, %cst_8 {dimension_numbers = #tpu.dot_dimension_numbers<[1], [0], [0], [1], [0, 0, 1, 1], [], []>} : vector<1x16xf32>, vector<16x64xf32>, vector<1x64xf32> -> vector<1x64xf32>
    %cst_9 = arith.constant 6.250000e-02 : f32
    %7 = vector.broadcast %cst_9 : f32 to vector<1x64xf32>
    %8 = arith.mulf %6, %7 : vector<1x64xf32>
    %9 = vector.broadcast %8 : vector<1x64xf32> to vector<16x64xf32>
    %10 = arith.subf %2, %9 : vector<16x64xf32>
    %11 = arith.mulf %10, %10 : vector<16x64xf32>
    %cst_10 = arith.constant dense<0.000000e+00> : vector<1x64xf32>
    %12 = tpu.matmul %5, %11, %cst_10 {dimension_numbers = #tpu.dot_dimension_numbers<[1], [0], [0], [1], [0, 0, 1, 1], [], []>} : vector<1x16xf32>, vector<16x64xf32>, vector<1x64xf32> -> vector<1x64xf32>
    %cst_11 = arith.constant 6.250000e-02 : f32
    %13 = vector.broadcast %cst_11 : f32 to vector<1x64xf32>
    %14 = arith.mulf %12, %13 : vector<1x64xf32>
    %cst_12 = arith.constant 9.99999974E-6 : f32
    %15 = vector.broadcast %cst_12 : f32 to vector<1x64xf32>
    %16 = arith.addf %14, %15 : vector<1x64xf32>
    %17 = math.rsqrt %16 : vector<1x64xf32>
    %18 = vector.broadcast %17 : vector<1x64xf32> to vector<16x64xf32>
    %19 = arith.mulf %10, %18 : vector<16x64xf32>
    %20 = vector.broadcast %3 : vector<1x64xf32> to vector<16x64xf32>
    %21 = arith.mulf %19, %20 : vector<16x64xf32>
    %22 = vector.broadcast %4 : vector<1x64xf32> to vector<16x64xf32>
    %23 = arith.addf %21, %22 : vector<16x64xf32>
    %cst_13 = arith.constant 0.000000e+00 : f32
    %24 = vector.broadcast %cst_13 : f32 to vector<16x64xf32>
    %25 = arith.maximumf %23, %24 : vector<16x64xf32>
    %c0_14 = arith.constant 0 : index
    %c0_15 = arith.constant 0 : index
    %26 = vector.load %arg6[%c0_14, %c0_15] : memref<64x64xf32, #tpu.memory_space<vmem>>, vector<64x64xf32>
    %cst_16 = arith.constant dense<0.000000e+00> : vector<16x64xf32>
    %27 = tpu.matmul %25, %26, %cst_16 {dimension_numbers = #tpu.dot_dimension_numbers<[1], [0], [0], [1], [0, 0, 1, 1], [], []>} : vector<16x64xf32>, vector<64x64xf32>, vector<16x64xf32> -> vector<16x64xf32>
    %c0_17 = arith.constant 0 : index
    %c0_18 = arith.constant 0 : index
    %28 = vector.load %arg7[%c0_17, %c0_18] : memref<1x64xf32, #tpu.memory_space<vmem>>, vector<1x64xf32>
    %c0_19 = arith.constant 0 : index
    %c0_20 = arith.constant 0 : index
    %29 = vector.load %arg8[%c0_19, %c0_20] : memref<1x64xf32, #tpu.memory_space<vmem>>, vector<1x64xf32>
    %cst_21 = arith.constant 1.000000e+00 : f32
    %30 = vector.broadcast %cst_21 : f32 to vector<1x16xf32>
    %cst_22 = arith.constant dense<0.000000e+00> : vector<1x64xf32>
    %31 = tpu.matmul %30, %27, %cst_22 {dimension_numbers = #tpu.dot_dimension_numbers<[1], [0], [0], [1], [0, 0, 1, 1], [], []>} : vector<1x16xf32>, vector<16x64xf32>, vector<1x64xf32> -> vector<1x64xf32>
    %cst_23 = arith.constant 6.250000e-02 : f32
    %32 = vector.broadcast %cst_23 : f32 to vector<1x64xf32>
    %33 = arith.mulf %31, %32 : vector<1x64xf32>
    %34 = vector.broadcast %33 : vector<1x64xf32> to vector<16x64xf32>
    %35 = arith.subf %27, %34 : vector<16x64xf32>
    %36 = arith.mulf %35, %35 : vector<16x64xf32>
    %cst_24 = arith.constant dense<0.000000e+00> : vector<1x64xf32>
    %37 = tpu.matmul %30, %36, %cst_24 {dimension_numbers = #tpu.dot_dimension_numbers<[1], [0], [0], [1], [0, 0, 1, 1], [], []>} : vector<1x16xf32>, vector<16x64xf32>, vector<1x64xf32> -> vector<1x64xf32>
    %cst_25 = arith.constant 6.250000e-02 : f32
    %38 = vector.broadcast %cst_25 : f32 to vector<1x64xf32>
    %39 = arith.mulf %37, %38 : vector<1x64xf32>
    %cst_26 = arith.constant 9.99999974E-6 : f32
    %40 = vector.broadcast %cst_26 : f32 to vector<1x64xf32>
    %41 = arith.addf %39, %40 : vector<1x64xf32>
    %42 = math.rsqrt %41 : vector<1x64xf32>
    %43 = vector.broadcast %42 : vector<1x64xf32> to vector<16x64xf32>
    %44 = arith.mulf %35, %43 : vector<16x64xf32>
    %45 = vector.broadcast %28 : vector<1x64xf32> to vector<16x64xf32>
    %46 = arith.mulf %44, %45 : vector<16x64xf32>
    %47 = vector.broadcast %29 : vector<1x64xf32> to vector<16x64xf32>
    %48 = arith.addf %46, %47 : vector<16x64xf32>
    %cst_27 = arith.constant 0.000000e+00 : f32
    %49 = vector.broadcast %cst_27 : f32 to vector<16x64xf32>
    %50 = arith.maximumf %48, %49 : vector<16x64xf32>
    %c0_28 = arith.constant 0 : index
    %c0_29 = arith.constant 0 : index
    %51 = vector.load %arg9[%c0_28, %c0_29] : memref<64x256xf32, #tpu.memory_space<vmem>>, vector<64x256xf32>
    %cst_30 = arith.constant dense<0.000000e+00> : vector<16x256xf32>
    %52 = tpu.matmul %50, %51, %cst_30 {dimension_numbers = #tpu.dot_dimension_numbers<[1], [0], [0], [1], [0, 0, 1, 1], [], []>} : vector<16x64xf32>, vector<64x256xf32>, vector<16x256xf32> -> vector<16x256xf32>
    %c0_31 = arith.constant 0 : index
    %c0_32 = arith.constant 0 : index
    %53 = vector.load %arg10[%c0_31, %c0_32] : memref<1x256xf32, #tpu.memory_space<vmem>>, vector<1x256xf32>
    %c0_33 = arith.constant 0 : index
    %c0_34 = arith.constant 0 : index
    %54 = vector.load %arg11[%c0_33, %c0_34] : memref<1x256xf32, #tpu.memory_space<vmem>>, vector<1x256xf32>
    %cst_35 = arith.constant 1.000000e+00 : f32
    %55 = vector.broadcast %cst_35 : f32 to vector<1x16xf32>
    %cst_36 = arith.constant dense<0.000000e+00> : vector<1x256xf32>
    %56 = tpu.matmul %55, %52, %cst_36 {dimension_numbers = #tpu.dot_dimension_numbers<[1], [0], [0], [1], [0, 0, 1, 1], [], []>} : vector<1x16xf32>, vector<16x256xf32>, vector<1x256xf32> -> vector<1x256xf32>
    %cst_37 = arith.constant 6.250000e-02 : f32
    %57 = vector.broadcast %cst_37 : f32 to vector<1x256xf32>
    %58 = arith.mulf %56, %57 : vector<1x256xf32>
    %59 = vector.broadcast %58 : vector<1x256xf32> to vector<16x256xf32>
    %60 = arith.subf %52, %59 : vector<16x256xf32>
    %61 = arith.mulf %60, %60 : vector<16x256xf32>
    %cst_38 = arith.constant dense<0.000000e+00> : vector<1x256xf32>
    %62 = tpu.matmul %55, %61, %cst_38 {dimension_numbers = #tpu.dot_dimension_numbers<[1], [0], [0], [1], [0, 0, 1, 1], [], []>} : vector<1x16xf32>, vector<16x256xf32>, vector<1x256xf32> -> vector<1x256xf32>
    %cst_39 = arith.constant 6.250000e-02 : f32
    %63 = vector.broadcast %cst_39 : f32 to vector<1x256xf32>
    %64 = arith.mulf %62, %63 : vector<1x256xf32>
    %cst_40 = arith.constant 9.99999974E-6 : f32
    %65 = vector.broadcast %cst_40 : f32 to vector<1x256xf32>
    %66 = arith.addf %64, %65 : vector<1x256xf32>
    %67 = math.rsqrt %66 : vector<1x256xf32>
    %68 = vector.broadcast %67 : vector<1x256xf32> to vector<16x256xf32>
    %69 = arith.mulf %60, %68 : vector<16x256xf32>
    %70 = vector.broadcast %53 : vector<1x256xf32> to vector<16x256xf32>
    %71 = arith.mulf %69, %70 : vector<16x256xf32>
    %72 = vector.broadcast %54 : vector<1x256xf32> to vector<16x256xf32>
    %73 = arith.addf %71, %72 : vector<16x256xf32>
    %cst_41 = arith.constant 0.000000e+00 : f32
    %74 = vector.broadcast %cst_41 : f32 to vector<16x256xf32>
    %75 = arith.maximumf %73, %74 : vector<16x256xf32>
    %76 = vector.shape_cast %75 : vector<16x256xf32> to vector<2x8x256xf32>
    %cst_42 = arith.constant dense<0xFF800000> : vector<2x256xf32>
    %77 = vector.multi_reduction <maximumf>, %76, %cst_42 [1] : vector<2x8x256xf32> to vector<2x256xf32>
    %c0_43 = arith.constant 0 : index
    %c0_44 = arith.constant 0 : index
    %78 = vector.load %arg12[%c0_43, %c0_44] : memref<256x4096xf32, #tpu.memory_space<vmem>>, vector<256x4096xf32>
    %cst_45 = arith.constant dense<0.000000e+00> : vector<2x4096xf32>
    %79 = tpu.matmul %77, %78, %cst_45 {dimension_numbers = #tpu.dot_dimension_numbers<[1], [0], [0], [1], [0, 0, 1, 1], [], []>} : vector<2x256xf32>, vector<256x4096xf32>, vector<2x4096xf32> -> vector<2x4096xf32>
    %c0_46 = arith.constant 0 : index
    %c0_47 = arith.constant 0 : index
    %80 = vector.load %arg13[%c0_46, %c0_47] : memref<1x4096xf32, #tpu.memory_space<vmem>>, vector<1x4096xf32>
    %81 = vector.broadcast %80 : vector<1x4096xf32> to vector<2x4096xf32>
    %82 = arith.addf %79, %81 : vector<2x4096xf32>
    %cst_48 = arith.constant 0.000000e+00 : f32
    %83 = vector.broadcast %cst_48 : f32 to vector<2x4096xf32>
    %84 = arith.maximumf %82, %83 : vector<2x4096xf32>
    %85 = vector.shape_cast %84 : vector<2x4096xf32> to vector<2x64x64xf32>
    %86 = vector.shape_cast %25 : vector<16x64xf32> to vector<2x8x64xf32>
    %cst_49 = arith.constant dense<0.000000e+00> : vector<2x8x64xf32>
    %87 = tpu.matmul %86, %85, %cst_49 {dimension_numbers = #tpu.dot_dimension_numbers<[2], [2], [1], [1], [0, 0, 0, 1, 1, 1], [0], [0]>} : vector<2x8x64xf32>, vector<2x64x64xf32>, vector<2x8x64xf32> -> vector<2x8x64xf32>
    %88 = vector.shape_cast %87 : vector<2x8x64xf32> to vector<16x64xf32>
    %c0_50 = arith.constant 0 : index
    %c0_51 = arith.constant 0 : index
    %89 = vector.load %arg14[%c0_50, %c0_51] : memref<64x128xf32, #tpu.memory_space<vmem>>, vector<64x128xf32>
    %cst_52 = arith.constant dense<0.000000e+00> : vector<16x128xf32>
    %90 = tpu.matmul %88, %89, %cst_52 {dimension_numbers = #tpu.dot_dimension_numbers<[1], [0], [0], [1], [0, 0, 1, 1], [], []>} : vector<16x64xf32>, vector<64x128xf32>, vector<16x128xf32> -> vector<16x128xf32>
    %c0_53 = arith.constant 0 : index
    %c0_54 = arith.constant 0 : index
    %91 = vector.load %arg15[%c0_53, %c0_54] : memref<1x128xf32, #tpu.memory_space<vmem>>, vector<1x128xf32>
    %c0_55 = arith.constant 0 : index
    %c0_56 = arith.constant 0 : index
    %92 = vector.load %arg16[%c0_55, %c0_56] : memref<1x128xf32, #tpu.memory_space<vmem>>, vector<1x128xf32>
    %cst_57 = arith.constant 1.000000e+00 : f32
    %93 = vector.broadcast %cst_57 : f32 to vector<1x16xf32>
    %cst_58 = arith.constant dense<0.000000e+00> : vector<1x128xf32>
    %94 = tpu.matmul %93, %90, %cst_58 {dimension_numbers = #tpu.dot_dimension_numbers<[1], [0], [0], [1], [0, 0, 1, 1], [], []>} : vector<1x16xf32>, vector<16x128xf32>, vector<1x128xf32> -> vector<1x128xf32>
    %cst_59 = arith.constant 6.250000e-02 : f32
    %95 = vector.broadcast %cst_59 : f32 to vector<1x128xf32>
    %96 = arith.mulf %94, %95 : vector<1x128xf32>
    %97 = vector.broadcast %96 : vector<1x128xf32> to vector<16x128xf32>
    %98 = arith.subf %90, %97 : vector<16x128xf32>
    %99 = arith.mulf %98, %98 : vector<16x128xf32>
    %cst_60 = arith.constant dense<0.000000e+00> : vector<1x128xf32>
    %100 = tpu.matmul %93, %99, %cst_60 {dimension_numbers = #tpu.dot_dimension_numbers<[1], [0], [0], [1], [0, 0, 1, 1], [], []>} : vector<1x16xf32>, vector<16x128xf32>, vector<1x128xf32> -> vector<1x128xf32>
    %cst_61 = arith.constant 6.250000e-02 : f32
    %101 = vector.broadcast %cst_61 : f32 to vector<1x128xf32>
    %102 = arith.mulf %100, %101 : vector<1x128xf32>
    %cst_62 = arith.constant 9.99999974E-6 : f32
    %103 = vector.broadcast %cst_62 : f32 to vector<1x128xf32>
    %104 = arith.addf %102, %103 : vector<1x128xf32>
    %105 = math.rsqrt %104 : vector<1x128xf32>
    %106 = vector.broadcast %105 : vector<1x128xf32> to vector<16x128xf32>
    %107 = arith.mulf %98, %106 : vector<16x128xf32>
    %108 = vector.broadcast %91 : vector<1x128xf32> to vector<16x128xf32>
    %109 = arith.mulf %107, %108 : vector<16x128xf32>
    %110 = vector.broadcast %92 : vector<1x128xf32> to vector<16x128xf32>
    %111 = arith.addf %109, %110 : vector<16x128xf32>
    %cst_63 = arith.constant 0.000000e+00 : f32
    %112 = vector.broadcast %cst_63 : f32 to vector<16x128xf32>
    %113 = arith.maximumf %111, %112 : vector<16x128xf32>
    %c0_64 = arith.constant 0 : index
    %c0_65 = arith.constant 0 : index
    %114 = vector.load %arg17[%c0_64, %c0_65] : memref<128x512xf32, #tpu.memory_space<vmem>>, vector<128x512xf32>
    %cst_66 = arith.constant dense<0.000000e+00> : vector<16x512xf32>
    %115 = tpu.matmul %113, %114, %cst_66 {dimension_numbers = #tpu.dot_dimension_numbers<[1], [0], [0], [1], [0, 0, 1, 1], [], []>} : vector<16x128xf32>, vector<128x512xf32>, vector<16x512xf32> -> vector<16x512xf32>
    %c0_67 = arith.constant 0 : index
    %c0_68 = arith.constant 0 : index
    %116 = vector.load %arg18[%c0_67, %c0_68] : memref<1x512xf32, #tpu.memory_space<vmem>>, vector<1x512xf32>
    %c0_69 = arith.constant 0 : index
    %c0_70 = arith.constant 0 : index
    %117 = vector.load %arg19[%c0_69, %c0_70] : memref<1x512xf32, #tpu.memory_space<vmem>>, vector<1x512xf32>
    %cst_71 = arith.constant 1.000000e+00 : f32
    %118 = vector.broadcast %cst_71 : f32 to vector<1x16xf32>
    %cst_72 = arith.constant dense<0.000000e+00> : vector<1x512xf32>
    %119 = tpu.matmul %118, %115, %cst_72 {dimension_numbers = #tpu.dot_dimension_numbers<[1], [0], [0], [1], [0, 0, 1, 1], [], []>} : vector<1x16xf32>, vector<16x512xf32>, vector<1x512xf32> -> vector<1x512xf32>
    %cst_73 = arith.constant 6.250000e-02 : f32
    %120 = vector.broadcast %cst_73 : f32 to vector<1x512xf32>
    %121 = arith.mulf %119, %120 : vector<1x512xf32>
    %122 = vector.broadcast %121 : vector<1x512xf32> to vector<16x512xf32>
    %123 = arith.subf %115, %122 : vector<16x512xf32>
    %124 = arith.mulf %123, %123 : vector<16x512xf32>
    %cst_74 = arith.constant dense<0.000000e+00> : vector<1x512xf32>
    %125 = tpu.matmul %118, %124, %cst_74 {dimension_numbers = #tpu.dot_dimension_numbers<[1], [0], [0], [1], [0, 0, 1, 1], [], []>} : vector<1x16xf32>, vector<16x512xf32>, vector<1x512xf32> -> vector<1x512xf32>
    %cst_75 = arith.constant 6.250000e-02 : f32
    %126 = vector.broadcast %cst_75 : f32 to vector<1x512xf32>
    %127 = arith.mulf %125, %126 : vector<1x512xf32>
    %cst_76 = arith.constant 9.99999974E-6 : f32
    %128 = vector.broadcast %cst_76 : f32 to vector<1x512xf32>
    %129 = arith.addf %127, %128 : vector<1x512xf32>
    %130 = math.rsqrt %129 : vector<1x512xf32>
    %131 = vector.broadcast %130 : vector<1x512xf32> to vector<16x512xf32>
    %132 = arith.mulf %123, %131 : vector<16x512xf32>
    %133 = vector.broadcast %116 : vector<1x512xf32> to vector<16x512xf32>
    %134 = arith.mulf %132, %133 : vector<16x512xf32>
    %135 = vector.broadcast %117 : vector<1x512xf32> to vector<16x512xf32>
    %136 = arith.addf %134, %135 : vector<16x512xf32>
    %cst_77 = arith.constant 0.000000e+00 : f32
    %137 = vector.broadcast %cst_77 : f32 to vector<16x512xf32>
    %138 = arith.maximumf %136, %137 : vector<16x512xf32>
    %139 = vector.shape_cast %138 : vector<16x512xf32> to vector<2x8x512xf32>
    %cst_78 = arith.constant dense<0xFF800000> : vector<2x512xf32>
    %140 = vector.multi_reduction <maximumf>, %139, %cst_78 [1] : vector<2x8x512xf32> to vector<2x512xf32>
    %c0_79 = arith.constant 0 : index
    %c0_80 = arith.constant 0 : index
    %141 = vector.load %arg20[%c0_79, %c0_80] : memref<512x256xf32, #tpu.memory_space<vmem>>, vector<512x256xf32>
    %cst_81 = arith.constant dense<0.000000e+00> : vector<2x256xf32>
    %142 = tpu.matmul %140, %141, %cst_81 {dimension_numbers = #tpu.dot_dimension_numbers<[1], [0], [0], [1], [0, 0, 1, 1], [], []>} : vector<2x512xf32>, vector<512x256xf32>, vector<2x256xf32> -> vector<2x256xf32>
    %c0_82 = arith.constant 0 : index
    %c0_83 = arith.constant 0 : index
    %143 = vector.load %arg21[%c0_82, %c0_83] : memref<1x256xf32, #tpu.memory_space<vmem>>, vector<1x256xf32>
    %144 = vector.broadcast %143 : vector<1x256xf32> to vector<2x256xf32>
    %145 = arith.addf %142, %144 : vector<2x256xf32>
    %cst_84 = arith.constant 0.000000e+00 : f32
    %146 = vector.broadcast %cst_84 : f32 to vector<2x256xf32>
    %147 = arith.maximumf %145, %146 : vector<2x256xf32>
    %c0_85 = arith.constant 0 : index
    %c0_86 = arith.constant 0 : index
    %148 = vector.load %arg22[%c0_85, %c0_86] : memref<256x256xf32, #tpu.memory_space<vmem>>, vector<256x256xf32>
    %cst_87 = arith.constant dense<0.000000e+00> : vector<2x256xf32>
    %149 = tpu.matmul %147, %148, %cst_87 {dimension_numbers = #tpu.dot_dimension_numbers<[1], [0], [0], [1], [0, 0, 1, 1], [], []>} : vector<2x256xf32>, vector<256x256xf32>, vector<2x256xf32> -> vector<2x256xf32>
    %c0_88 = arith.constant 0 : index
    %c0_89 = arith.constant 0 : index
    %150 = vector.load %arg23[%c0_88, %c0_89] : memref<1x256xf32, #tpu.memory_space<vmem>>, vector<1x256xf32>
    %151 = vector.broadcast %150 : vector<1x256xf32> to vector<2x256xf32>
    %152 = arith.addf %149, %151 : vector<2x256xf32>
    %cst_90 = arith.constant 0.000000e+00 : f32
    %153 = vector.broadcast %cst_90 : f32 to vector<2x256xf32>
    %154 = arith.maximumf %152, %153 : vector<2x256xf32>
    %c0_91 = arith.constant 0 : index
    %c0_92 = arith.constant 0 : index
    %155 = vector.load %arg0[%c0_91, %c0_92] : memref<2x4xf32, #tpu.memory_space<vmem>>, vector<2x4xf32>
    %c0_93 = arith.constant 0 : index
    %c0_94 = arith.constant 0 : index
    %156 = vector.load %arg24[%c0_93, %c0_94] : memref<4x256xf32, #tpu.memory_space<vmem>>, vector<4x256xf32>
    %cst_95 = arith.constant dense<0.000000e+00> : vector<2x256xf32>
    %157 = tpu.matmul %155, %156, %cst_95 {dimension_numbers = #tpu.dot_dimension_numbers<[1], [0], [0], [1], [0, 0, 1, 1], [], []>} : vector<2x4xf32>, vector<4x256xf32>, vector<2x256xf32> -> vector<2x256xf32>
    %c0_96 = arith.constant 0 : index
    %c0_97 = arith.constant 0 : index
    %158 = vector.load %arg25[%c0_96, %c0_97] : memref<1x256xf32, #tpu.memory_space<vmem>>, vector<1x256xf32>
    %159 = vector.broadcast %158 : vector<1x256xf32> to vector<2x256xf32>
    %160 = arith.addf %157, %159 : vector<2x256xf32>
    %cst_98 = arith.constant 0.000000e+00 : f32
    %161 = vector.broadcast %cst_98 : f32 to vector<2x256xf32>
    %162 = arith.maximumf %160, %161 : vector<2x256xf32>
    %c0_99 = arith.constant 0 : index
    %c0_100 = arith.constant 0 : index
    %163 = vector.load %arg26[%c0_99, %c0_100] : memref<256x128xf32, #tpu.memory_space<vmem>>, vector<256x128xf32>
    %cst_101 = arith.constant dense<0.000000e+00> : vector<2x128xf32>
    %164 = tpu.matmul %162, %163, %cst_101 {dimension_numbers = #tpu.dot_dimension_numbers<[1], [0], [0], [1], [0, 0, 1, 1], [], []>} : vector<2x256xf32>, vector<256x128xf32>, vector<2x128xf32> -> vector<2x128xf32>
    %c0_102 = arith.constant 0 : index
    %c0_103 = arith.constant 0 : index
    %165 = vector.load %arg27[%c0_102, %c0_103] : memref<1x128xf32, #tpu.memory_space<vmem>>, vector<1x128xf32>
    %166 = vector.broadcast %165 : vector<1x128xf32> to vector<2x128xf32>
    %167 = arith.addf %164, %166 : vector<2x128xf32>
    %cst_104 = arith.constant 0.000000e+00 : f32
    %168 = vector.broadcast %cst_104 : f32 to vector<2x128xf32>
    %169 = arith.maximumf %167, %168 : vector<2x128xf32>
    %c0_105 = arith.constant 0 : index
    %c0_106 = arith.constant 0 : index
    %170 = vector.load %arg28[%c0_105, %c0_106] : memref<128x128xf32, #tpu.memory_space<vmem>>, vector<128x128xf32>
    %cst_107 = arith.constant dense<0.000000e+00> : vector<2x128xf32>
    %171 = tpu.matmul %169, %170, %cst_107 {dimension_numbers = #tpu.dot_dimension_numbers<[1], [0], [0], [1], [0, 0, 1, 1], [], []>} : vector<2x128xf32>, vector<128x128xf32>, vector<2x128xf32> -> vector<2x128xf32>
    %c0_108 = arith.constant 0 : index
    %c0_109 = arith.constant 0 : index
    %172 = vector.load %arg29[%c0_108, %c0_109] : memref<1x128xf32, #tpu.memory_space<vmem>>, vector<1x128xf32>
    %173 = vector.broadcast %172 : vector<1x128xf32> to vector<2x128xf32>
    %174 = arith.addf %171, %173 : vector<2x128xf32>
    %cst_110 = arith.constant 0.000000e+00 : f32
    %175 = vector.broadcast %cst_110 : f32 to vector<2x128xf32>
    %176 = arith.maximumf %174, %175 : vector<2x128xf32>
    %c0_111 = arith.constant 0 : index
    %c0_112 = arith.constant 0 : index
    %177 = vector.load %arg1[%c0_111, %c0_112] : memref<2x2xf32, #tpu.memory_space<vmem>>, vector<2x2xf32>
    %c0_113 = arith.constant 0 : index
    %c0_114 = arith.constant 0 : index
    %178 = vector.load %arg30[%c0_113, %c0_114] : memref<2x128xf32, #tpu.memory_space<vmem>>, vector<2x128xf32>
    %cst_115 = arith.constant dense<0.000000e+00> : vector<2x128xf32>
    %179 = tpu.matmul %177, %178, %cst_115 {dimension_numbers = #tpu.dot_dimension_numbers<[1], [0], [0], [1], [0, 0, 1, 1], [], []>} : vector<2x2xf32>, vector<2x128xf32>, vector<2x128xf32> -> vector<2x128xf32>
    %c0_116 = arith.constant 0 : index
    %c0_117 = arith.constant 0 : index
    %180 = vector.load %arg31[%c0_116, %c0_117] : memref<1x128xf32, #tpu.memory_space<vmem>>, vector<1x128xf32>
    %181 = vector.broadcast %180 : vector<1x128xf32> to vector<2x128xf32>
    %182 = arith.addf %179, %181 : vector<2x128xf32>
    %cst_118 = arith.constant 0.000000e+00 : f32
    %183 = vector.broadcast %cst_118 : f32 to vector<2x128xf32>
    %184 = arith.maximumf %182, %183 : vector<2x128xf32>
    %c0_119 = arith.constant 0 : index
    %c0_120 = arith.constant 0 : index
    %185 = vector.load %arg32[%c0_119, %c0_120] : memref<128x128xf32, #tpu.memory_space<vmem>>, vector<128x128xf32>
    %cst_121 = arith.constant dense<0.000000e+00> : vector<2x128xf32>
    %186 = tpu.matmul %184, %185, %cst_121 {dimension_numbers = #tpu.dot_dimension_numbers<[1], [0], [0], [1], [0, 0, 1, 1], [], []>} : vector<2x128xf32>, vector<128x128xf32>, vector<2x128xf32> -> vector<2x128xf32>
    %c0_122 = arith.constant 0 : index
    %c0_123 = arith.constant 0 : index
    %187 = vector.load %arg33[%c0_122, %c0_123] : memref<1x128xf32, #tpu.memory_space<vmem>>, vector<1x128xf32>
    %188 = vector.broadcast %187 : vector<1x128xf32> to vector<2x128xf32>
    %189 = arith.addf %186, %188 : vector<2x128xf32>
    %cst_124 = arith.constant 0.000000e+00 : f32
    %190 = vector.broadcast %cst_124 : f32 to vector<2x128xf32>
    %191 = arith.maximumf %189, %190 : vector<2x128xf32>
    %c0_125 = arith.constant 0 : index
    %c0_126 = arith.constant 0 : index
    %192 = vector.load %arg34[%c0_125, %c0_126] : memref<512x256xf32, #tpu.memory_space<vmem>>, vector<128x256xf32>
    %cst_127 = arith.constant dense<0.000000e+00> : vector<2x256xf32>
    %193 = tpu.matmul %176, %192, %cst_127 {dimension_numbers = #tpu.dot_dimension_numbers<[1], [0], [0], [1], [0, 0, 1, 1], [], []>} : vector<2x128xf32>, vector<128x256xf32>, vector<2x256xf32> -> vector<2x256xf32>
    %c128 = arith.constant 128 : index
    %c0_128 = arith.constant 0 : index
    %194 = vector.load %arg34[%c128, %c0_128] : memref<512x256xf32, #tpu.memory_space<vmem>>, vector<128x256xf32>
    %cst_129 = arith.constant dense<0.000000e+00> : vector<2x256xf32>
    %195 = tpu.matmul %191, %194, %cst_129 {dimension_numbers = #tpu.dot_dimension_numbers<[1], [0], [0], [1], [0, 0, 1, 1], [], []>} : vector<2x128xf32>, vector<128x256xf32>, vector<2x256xf32> -> vector<2x256xf32>
    %196 = arith.addf %193, %195 : vector<2x256xf32>
    %c256 = arith.constant 256 : index
    %c0_130 = arith.constant 0 : index
    %197 = vector.load %arg34[%c256, %c0_130] : memref<512x256xf32, #tpu.memory_space<vmem>>, vector<256x256xf32>
    %cst_131 = arith.constant dense<0.000000e+00> : vector<2x256xf32>
    %198 = tpu.matmul %154, %197, %cst_131 {dimension_numbers = #tpu.dot_dimension_numbers<[1], [0], [0], [1], [0, 0, 1, 1], [], []>} : vector<2x256xf32>, vector<256x256xf32>, vector<2x256xf32> -> vector<2x256xf32>
    %199 = arith.addf %196, %198 : vector<2x256xf32>
    %c0_132 = arith.constant 0 : index
    %c0_133 = arith.constant 0 : index
    %200 = vector.load %arg35[%c0_132, %c0_133] : memref<1x256xf32, #tpu.memory_space<vmem>>, vector<1x256xf32>
    %201 = vector.broadcast %200 : vector<1x256xf32> to vector<2x256xf32>
    %202 = arith.addf %199, %201 : vector<2x256xf32>
    %cst_134 = arith.constant 0.000000e+00 : f32
    %203 = vector.broadcast %cst_134 : f32 to vector<2x256xf32>
    %204 = arith.maximumf %202, %203 : vector<2x256xf32>
    %c0_135 = arith.constant 0 : index
    %c0_136 = arith.constant 0 : index
    %205 = vector.load %arg36[%c0_135, %c0_136] : memref<256x64xf32, #tpu.memory_space<vmem>>, vector<256x64xf32>
    %cst_137 = arith.constant dense<0.000000e+00> : vector<2x64xf32>
    %206 = tpu.matmul %204, %205, %cst_137 {dimension_numbers = #tpu.dot_dimension_numbers<[1], [0], [0], [1], [0, 0, 1, 1], [], []>} : vector<2x256xf32>, vector<256x64xf32>, vector<2x64xf32> -> vector<2x64xf32>
    %c0_138 = arith.constant 0 : index
    %c0_139 = arith.constant 0 : index
    %207 = vector.load %arg37[%c0_138, %c0_139] : memref<1x64xf32, #tpu.memory_space<vmem>>, vector<1x64xf32>
    %208 = vector.broadcast %207 : vector<1x64xf32> to vector<2x64xf32>
    %209 = arith.addf %206, %208 : vector<2x64xf32>
    %cst_140 = arith.constant 0.000000e+00 : f32
    %210 = vector.broadcast %cst_140 : f32 to vector<2x64xf32>
    %211 = arith.maximumf %209, %210 : vector<2x64xf32>
    %c0_141 = arith.constant 0 : index
    %c0_142 = arith.constant 0 : index
    %212 = vector.load %arg38[%c0_141, %c0_142] : memref<64x1xf32, #tpu.memory_space<vmem>>, vector<64x1xf32>
    %cst_143 = arith.constant dense<0.000000e+00> : vector<2x1xf32>
    %213 = tpu.matmul %211, %212, %cst_143 {dimension_numbers = #tpu.dot_dimension_numbers<[1], [0], [0], [1], [0, 0, 1, 1], [], []>} : vector<2x64xf32>, vector<64x1xf32>, vector<2x1xf32> -> vector<2x1xf32>
    %c0_144 = arith.constant 0 : index
    %c0_145 = arith.constant 0 : index
    %214 = vector.load %arg39[%c0_144, %c0_145] : memref<1x1xf32, #tpu.memory_space<vmem>>, vector<1x1xf32>
    %215 = vector.broadcast %214 : vector<1x1xf32> to vector<2x1xf32>
    %216 = arith.addf %213, %215 : vector<2x1xf32>
    %c0_146 = arith.constant 0 : index
    %c0_147 = arith.constant 0 : index
    %217 = vector.load %arg40[%c0_146, %c0_147] : memref<2x1xf32, #tpu.memory_space<vmem>>, vector<2x1xf32>
    tpu.vector_store %arg40[%c0_146, %c0_147], %216 {strides = array<i32>} : memref<2x1xf32, #tpu.memory_space<vmem>>, vector<2x1xf32>,
    return
  }
}

</mosaic_0001>

<bundles_post_ra>
// kernel: qnetwork_forward.1
= control target key start
LH: loop header
LB: loop body
LE: loop exit
PB: predicated region body
PF: predicated region fallthrough
CT: control target
= control target key end

     0   :  { %s8390_s6 = smov 1   ;;  %s8391_s10 = smov 2   ;;  %s9534_s0 = inlined_call_operand.smem [shape: u32[41], index: -1, kind: input, shape index: {}] }
   0x1   :  { %s8487_s5 = sld [smem:[%s9534_s0]]   ;;  %s8392_s14 = smov 3  }
   0x2   :  { %s8492_s9 = sld [smem:[%s9534_s0 + %s8390_s6]]   ;;  %s8393_s18 = smov 4  }
   0x3   :  { %s8497_s13 = sld [smem:[%s9534_s0 + %s8391_s10]]   ;;  %s8394_s22 = smov 5  }
   0x4   :  { %s8502_s17 = sld [smem:[%s9534_s0 + %s8392_s14]]   ;;  %s8395_s26 = smov 6  }
   0x5   :  { %s8507_s21 = sld [smem:[%s9534_s0 + %s8393_s18]]   ;;  %s8396_s30 = smov 7  }
   0x6   :  { %s8512_s25 = sld [smem:[%s9534_s0 + %s8394_s22]]   ;;  %s8397_s4 = smov 8  }
   0x7   :  { %9545 = sst [smem:[#allocation77_spill]] %s8487_s5  ;;  %s8398_s10 = smov 9  }
   0x8   :  { %s8517_s29 = sld [smem:[%s9534_s0 + %s8395_s26]]   ;;  %s8399_s15 = smov 10  }
   0x9   :  { %9546 = sst [smem:[#allocation78_spill]] %s8497_s13  ;;  %s8400_s20 = smov 11  }
   0xa   :  { %9547 = sst [smem:[#allocation79_spill]] %s8502_s17  ;;  %s8401_s26 = smov 12  }
   0xb   :  { %s8522_s3 = sld [smem:[%s9534_s0 + %s8396_s30]]   ;;  %s8402_s1 = smov 13  }
   0xc   :  { %9548 = sst [smem:[#allocation80_spill]] %s8512_s25  ;;  %s8403_s7 = smov 14  }
   0xd   :  { %s8527_s8 = sld [smem:[%s9534_s0 + %s8397_s4]]   ;;  %s8405_s22 = smov 16  }
   0xe   :  { %s8532_s14 = sld [smem:[%s9534_s0 + %s8398_s10]]   ;;  %s8406_s28 = smov 17  }
   0xf   :  { %s8537_s19 = sld [smem:[%s9534_s0 + %s8399_s15]]   ;;  %s8404_s15 = smov 15  }
  0x10   :  { %s8542_s24 = sld [smem:[%s9534_s0 + %s8400_s20]]   ;;  %s8429_s23 = smov 40  }
  0x11   :  { %9549 = sst [smem:[#allocation81_spill]] %s8522_s3 }
  0x12   :  { %s8547_s30 = sld [smem:[%s9534_s0 + %s8401_s26]]  }
  0x13   :  { %s8552_s6 = sld [smem:[%s9534_s0 + %s8402_s1]]  }
  0x14   :  { %9550 = sst [smem:[#allocation82_spill]] %s8532_s14 }
  0x15   :  { %s8557_s12 = sld [smem:[%s9534_s0 + %s8403_s7]]   ;;  %s8407_s7 = smov 18  }
  0x16   :  { %9551 = sst [smem:[#allocation83_spill]] %s8542_s24 }
  0x17   :  { %s8562_s20 = sld [smem:[%s9534_s0 + %s8404_s15]]   ;;  %s8408_s15 = smov 19  }
  0x18   :  { %s8567_s27 = sld [smem:[%s9534_s0 + %s8405_s22]]   ;;  %s8409_s22 = smov 20  }
  0x19   :  { %9552 = sst [smem:[#allocation84_spill]] %s8552_s6 }
  0x1a   :  { %s8572_s4 = sld [smem:[%s9534_s0 + %s8406_s28]]   ;;  %s8410_s28 = smov 21  }
  0x1b   :  { %s8577_s13 = sld [smem:[%s9534_s0 + %s8407_s7]]   ;;  %s8411_s7 = smov 22  }
  0x1c   :  { %s8587_s6 = sld [smem:[%s9534_s0 + %s8409_s22]]   ;;  %s8413_s22 = smov 24  }
  0x1d   :  { %9553 = sst [smem:[#allocation85_spill]] %s8562_s20 }
  0x1e   :  { %s8582_s20 = sld [smem:[%s9534_s0 + %s8408_s15]]   ;;  %s8412_s15 = smov 23  }
  0x1f   :  { %s8597_s24 = sld [smem:[%s9534_s0 + %s8411_s7]]   ;;  %s8415_s7 = smov 26  }
  0x20   :  { %9554 = sst [smem:[#allocation86_spill]] %s8572_s4 }
  0x21   :  { %s8592_s4 = sld [smem:[%s9534_s0 + %s8410_s28]]   ;;  %s8414_s28 = smov 25  }
  0x22   :  { %s8607_s14 = sld [smem:[%s9534_s0 + %s8413_s22]]   ;;  %s8417_s22 = smov 28  }
  0x23   :  { %s8617_s3 = sld [smem:[%s9534_s0 + %s8415_s7]]   ;;  %s8419_s7 = smov 30  }
  0x24   :  { %9555 = sst [smem:[#allocation87_spill]] %s8582_s20 }
  0x25   :  { %s8602_s20 = sld [smem:[%s9534_s0 + %s8412_s15]]   ;;  %s8416_s15 = smov 27  }
  0x26   :  { %s8627_s25 = sld [smem:[%s9534_s0 + %s8417_s22]]   ;;  %s8421_s22 = smov 32  }
  0x27   :  { %9556 = sst [smem:[#allocation88_spill]] %s8592_s4 }
  0x28   :  { %s8612_s4 = sld [smem:[%s9534_s0 + %s8414_s28]]   ;;  %s8418_s28 = smov 29  }
  0x29   :  { %s8637_s17 = sld [smem:[%s9534_s0 + %s8419_s7]]   ;;  %s8423_s7 = smov 34  }
  0x2a   :  { %s8647_s5 = sld [smem:[%s9534_s0 + %s8421_s22]]   ;;  %s8425_s22 = smov 36  }
  0x2b   :  { %9557 = sst [smem:[#allocation89_spill]] %s8602_s20 }
  0x2c   :  { %s8622_s20 = sld [smem:[%s9534_s0 + %s8416_s15]]   ;;  %s8420_s15 = smov 31  }
  0x2e   :  { %9558 = sst [smem:[#allocation90_spill]] %s8612_s4 }
  0x2f   :  { %s8632_s4 = sld [smem:[%s9534_s0 + %s8418_s28]]   ;;  %s8422_s28 = smov 33  }
  0x30   :  { %9561 = sst [smem:[#allocation93_spill]] %s8637_s17 }
  0x31   :  { %9563 = sst [smem:[#allocation95_spill]] %s8647_s5 }
  0x32   :  { %9559 = sst [smem:[#allocation91_spill]] %s8622_s20 }
  0x33   :  { %s8642_s20 = sld [smem:[%s9534_s0 + %s8420_s15]]   ;;  %s8424_s15 = smov 35  }
  0x34   :  { %s8657_s17 = sld [smem:[%s9534_s0 + %s8423_s7]]   ;;  %s8427_s7 = smov 38  }
  0x35   :  { %9560 = sst [smem:[#allocation92_spill]] %s8632_s4 }
  0x36   :  { %s8652_s4 = sld [smem:[%s9534_s0 + %s8422_s28]]   ;;  %s8426_s28 = smov 37  }
  0x37   :  { %s8667_s5 = sld [smem:[%s9534_s0 + %s8425_s22]]  }
  0x39   :  { %9562 = sst [smem:[#allocation94_spill]] %s8642_s20 }
  0x3a   :  { %9565 = sst [smem:[#allocation97_spill]] %s8657_s17 }
  0x3b   :  { %s8662_s20 = sld [smem:[%s9534_s0 + %s8424_s15]]   ;;  %s8428_s15 = smov 39  }
  0x3c   :  { %9564 = sst [smem:[#allocation96_spill]] %s8652_s4 }
  0x3d   :  { %9567 = sst [smem:[#allocation99_spill]] %s8667_s5 }
  0x3e   :  { %s8672_s4 = sld [smem:[%s9534_s0 + %s8426_s28]]  }
  0x3f   :  { %s8677_s17 = sld [smem:[%s9534_s0 + %s8427_s7]]  }
  0x40   :  { %s8685_s5 = sld [smem:[%s9534_s0 + %s8429_s23]]  }
  0x41   :  { %9566 = sst [smem:[#allocation98_spill]] %s8662_s20 }
  0x42   :  { %s7074_s20 = sld [smem:[%s9534_s0 + %s8428_s15]]  }
  0x48   :  { %v86_v0 = vstv %s7074_s20 }
  0x49   :  { %87 = vst [vmem:[#allocation2] sm:$0x1] %v86_v0 }
  0x4a   :  { %88 = vsyncpa [#allocation4], 0 }
  0x4b   :  { %89 = vsyncpa [#allocation6], 0 }
  0x4c   :  { %90 = vsyncpa [#allocation9], 0 }
  0x4d   :  { %91 = vsyncpa [#allocation12], 0 }
  0x4e   :  { %92 = vsyncpa [#allocation15], 0 }
  0x4f   :  { %93 = vsyncpa [#allocation18], 0 }
  0x50   :  { %94 = vsyncpa [#allocation21], 0 }
  0x51   :  { %95 = vsyncpa [#allocation24], 0 }
  0x52   :  { %96 = vsyncpa [#allocation27], 0 }
  0x53   :  { %97 = vsyncpa [#allocation30], 0 }
  0x54   :  { %98 = vsyncpa [#allocation33], 0 }
  0x55   :  { %99 = vsyncpa [#allocation36], 0 }
  0x56   :  { %100 = vsyncpa [#allocation39], 0 }
  0x57   :  { %101 = vsyncpa [#allocation42], 0 }
  0x58   :  { %102 = vsyncpa [#allocation45], 0 }
  0x59   :  { %103 = vsyncpa [#allocation48], 0 }
  0x5a   :  { %104 = vsyncpa [#allocation51], 0 }
  0x5b   :  { %105 = vsyncpa [#allocation54], 0 }
  0x5c   :  { %106 = vsyncpa [#allocation57], 0  ;;  %s8430_s0 = smov [#allocation5]   ;;  %s8431_s28 = smov [#allocation8]  }
  0x5d   :  { %s123_s20 = sshll.u32 %s8430_s0, 4  ;;  %s145_s1 = sshll.u32 %s8431_s28, 4  ;;  %s124_s20 = int_to_ptr.vmem [resolvable:$true] %s123_s20  ;;  %s146_s1 = int_to_ptr.vmem [resolvable:$true] %s145_s1 }
  0x5e   :  { %s7640_s2 = scalar_lea.vmem %s124_s20, 32  ;;  %p7645_p1 = scmp.lt.s32.totalorder %s124_s20, %s124_s20 }
  0x5f   :  { %p7641_p0 = scmp.ne.s32.totalorder %s124_s20, %s7640_s2  ;;  %p7646_p2 = scmp.lt.s32.totalorder %s7640_s2, %s7640_s2 }
  0x61   :  { %p7647_p3 = por %p7646_p2, %p7645_p1 }
  0x63   :  { %p7648_p4 = pnand %p7647_p3, %p7641_p0 }
  0x65   :  { %7651 = shalt.err (!%p7648_p4)
}
  0x66   :  { %126 = dma.hbm_to_vmem [thread:$0]  %s8492_s9, 32, %s124_s20, [#allocation6]  }
  0x67   :  { %s7660_s7 = scalar_lea.vmem %s146_s1, 16  ;;  %s7664_s10 = scalar_lea.vmem %s146_s1, 32 }
  0x68   :  { %p7661_p5 = scmp.ne.s32.totalorder %s146_s1, %s7660_s7  ;;  %p7665_p6 = scmp.lt.s32.totalorder %s146_s1, %s146_s1 }
  0x69   :  { %p7666_p7 = scmp.lt.s32.totalorder %s7664_s10, %s7660_s7 }
  0x6b   :  { %p7667_p8 = por %p7666_p7, %p7665_p6 }
  0x6d   :  { %p7668_p9 = pnand %p7667_p8, %p7661_p5 }
  0x6f   :  { %7671 = shalt.err (!%p7668_p9)
}
  0x70   :  { %148 = dma.hbm_to_vmem [thread:$0]  %s8507_s21, 16, %s146_s1, [#allocation9]  }
  0x71   :  { %s8432_s11 = smov [#allocation11]  }
  0x72   :  { %s164_s15 = sshll.u32 %s8432_s11, 4  ;;  %s165_s15 = int_to_ptr.vmem [resolvable:$true] %s164_s15 }
  0x73   :  { %s7680_s16 = scalar_lea.vmem %s165_s15, 1024  ;;  %p7685_p11 = scmp.lt.s32.totalorder %s165_s15, %s165_s15 }
  0x74   :  { %p7681_p10 = scmp.ne.s32.totalorder %s165_s15, %s7680_s16  ;;  %p7686_p12 = scmp.lt.s32.totalorder %s7680_s16, %s7680_s16 }
  0x76   :  { %p7687_p13 = por %p7686_p12, %p7685_p11 }
  0x78   :  { %p7688_p0 = pnand %p7687_p13, %p7681_p10 }
  0x7a   :  { %7691 = shalt.err (!%p7688_p0)
}
  0x7b   :  { %s8433_s9 = smov 128   ;;  %s8434_s18 = smov 8  }
  0x7c   :  { %170 = dma.hbm_to_vmem [thread:$0]  %s8517_s29, 1024, %s165_s15, [#allocation12], %s8433_s9, %s8433_s9, %s8434_s18  }
  0x7d   :  { %s8435_s23 = smov [#allocation14]   ;;  %s8436_s21 = smov [#allocation17]  }
  0x7e   :  { %s187_s22 = sshll.u32 %s8435_s23, 4  ;;  %s209_s26 = sshll.u32 %s8436_s21, 4  ;;  %s188_s22 = int_to_ptr.vmem [resolvable:$true] %s187_s22  ;;  %s210_s26 = int_to_ptr.vmem [resolvable:$true] %s209_s26 }
  0x7f   :  { %s7700_s0 = scalar_lea.vmem %s188_s22, 16  ;;  %s7704_s20 = scalar_lea.vmem %s188_s22, 32 }
  0x80   :  { %p7701_p1 = scmp.ne.s32.totalorder %s188_s22, %s7700_s0  ;;  %p7705_p2 = scmp.lt.s32.totalorder %s188_s22, %s188_s22 }
  0x81   :  { %p7706_p3 = scmp.lt.s32.totalorder %s7704_s20, %s7700_s0 }
  0x83   :  { %p7707_p4 = por %p7706_p3, %p7705_p2 }
  0x85   :  { %p7708_p5 = pnand %p7707_p4, %p7701_p1 }
  0x87   :  { %7711 = shalt.err (!%p7708_p5)
}
  0x88   :  { %190 = dma.hbm_to_vmem [thread:$0]  %s8527_s8, 16, %s188_s22, [#allocation15]  }
  0x89   :  { %s7720_s28 = scalar_lea.vmem %s210_s26, 32  ;;  %p7725_p7 = scmp.lt.s32.totalorder %s210_s26, %s210_s26 }
  0x8a   :  { %p7721_p6 = scmp.ne.s32.totalorder %s210_s26, %s7720_s28  ;;  %p7726_p8 = scmp.lt.s32.totalorder %s7720_s28, %s7720_s28 }
  0x8c   :  { %p7727_p9 = por %p7726_p8, %p7725_p7 }
  0x8e   :  { %p7728_p10 = pnand %p7727_p9, %p7721_p6 }
  0x90   :  { %7731 = shalt.err (!%p7728_p10)
}
  0x91   :  { %212 = dma.hbm_to_vmem [thread:$0]  %s8537_s19, 32, %s210_s26, [#allocation18]  }
  0x92   :  { %s8437_s29 = smov [#allocation20]   ;;  %s8438_s2 = smov [#allocation23]  }
  0x93   :  { %s228_s1 = sshll.u32 %s8437_s29, 4  ;;  %s250_s7 = sshll.u32 %s8438_s2, 4  ;;  %s229_s1 = int_to_ptr.vmem [resolvable:$true] %s228_s1  ;;  %s251_s7 = int_to_ptr.vmem [resolvable:$true] %s250_s7 }
  0x94   :  { %s7740_s10 = scalar_lea.vmem %s229_s1, 131072  ;;  %p7745_p12 = scmp.lt.s32.totalorder %s229_s1, %s229_s1 }
  0x95   :  { %p7741_p11 = scmp.ne.s32.totalorder %s229_s1, %s7740_s10  ;;  %p7746_p13 = scmp.lt.s32.totalorder %s7740_s10, %s7740_s10 }
  0x97   :  { %p7747_p0 = por %p7746_p13, %p7745_p12 }
  0x99   :  { %p7748_p1 = pnand %p7747_p0, %p7741_p11 }
  0x9b   :  { %7751 = shalt.err (!%p7748_p1)
}
  0x9c   :  { %s8439_s8 = smov 4096   ;;  %s8440_s11 = smov 256  }
  0x9d   :  { %234 = dma.hbm_to_vmem [thread:$0]  %s8547_s30, 131072, %s229_s1, [#allocation21], %s8439_s8, %s8439_s8, %s8440_s11  }
  0x9e   :  { %s7760_s15 = scalar_lea.vmem %s251_s7, 1024  ;;  %p7765_p3 = scmp.lt.s32.totalorder %s251_s7, %s251_s7 }
  0x9f   :  { %p7761_p2 = scmp.ne.s32.totalorder %s251_s7, %s7760_s15  ;;  %p7766_p4 = scmp.lt.s32.totalorder %s7760_s15, %s7760_s15 }
  0xa1   :  { %p7767_p5 = por %p7766_p4, %p7765_p3 }
  0xa3   :  { %p7768_p6 = pnand %p7767_p5, %p7761_p2 }
  0xa5   :  { %7771 = shalt.err (!%p7768_p6)
}
  0xa6   :  { %256 = dma.hbm_to_vmem [thread:$0]  %s8557_s12, 1024, %s251_s7, [#allocation24], %s8433_s9, %s8433_s9, %s8434_s18  }
  0xa7   :  { %s8441_s19 = smov [#allocation26]   ;;  %s8442_s23 = smov [#allocation29]  }
  0xa8   :  { %s273_s16 = sshll.u32 %s8441_s19, 4  ;;  %s295_s22 = sshll.u32 %s8442_s23, 4  ;;  %s274_s16 = int_to_ptr.vmem [resolvable:$true] %s273_s16  ;;  %s296_s22 = int_to_ptr.vmem [resolvable:$true] %s295_s22 }
  0xa9   :  { %s7780_s21 = scalar_lea.vmem %s274_s16, 16  ;;  %s7784_s30 = scalar_lea.vmem %s274_s16, 32 }
  0xaa   :  { %p7781_p7 = scmp.ne.s32.totalorder %s274_s16, %s7780_s21  ;;  %p7785_p8 = scmp.lt.s32.totalorder %s274_s16, %s274_s16 }
  0xab   :  { %p7786_p9 = scmp.lt.s32.totalorder %s7784_s30, %s7780_s21 }
  0xad   :  { %p7787_p10 = por %p7786_p9, %p7785_p8 }
  0xaf   :  { %p7788_p11 = pnand %p7787_p10, %p7781_p7 }
  0xb1   :  { %7791 = shalt.err (!%p7788_p11)
}
  0xb2   :  { %276 = dma.hbm_to_vmem [thread:$0]  %s8567_s27, 16, %s274_s16, [#allocation27]  }
  0xb3   :  { %s7800_s26 = scalar_lea.vmem %s296_s22, 64  ;;  %p7805_p13 = scmp.lt.s32.totalorder %s296_s22, %s296_s22 }
  0xb4   :  { %p7801_p12 = scmp.ne.s32.totalorder %s296_s22, %s7800_s26  ;;  %p7806_p0 = scmp.lt.s32.totalorder %s7800_s26, %s7800_s26 }
  0xb6   :  { %p7807_p1 = por %p7806_p0, %p7805_p13 }
  0xb8   :  { %p7808_p2 = pnand %p7807_p1, %p7801_p12 }
  0xba   :  { %7811 = shalt.err (!%p7808_p2)
}
  0xbb   :  { %298 = dma.hbm_to_vmem [thread:$0]  %s8577_s13, 64, %s296_s22, [#allocation30]  }
  0xbc   :  { %s8443_s12 = smov [#allocation32]   ;;  %s8444_s20 = smov [#allocation35]  }
  0xbd   :  { %s314_s0 = sshll.u32 %s8443_s12, 4  ;;  %s336_s28 = sshll.u32 %s8444_s20, 4  ;;  %s315_s0 = int_to_ptr.vmem [resolvable:$true] %s314_s0  ;;  %s337_s28 = int_to_ptr.vmem [resolvable:$true] %s336_s28 }
  0xbe   :  { %s7820_s29 = scalar_lea.vmem %s315_s0, 16384  ;;  %p7825_p4 = scmp.lt.s32.totalorder %s315_s0, %s315_s0 }
  0xbf   :  { %p7821_p3 = scmp.ne.s32.totalorder %s315_s0, %s7820_s29  ;;  %p7826_p5 = scmp.lt.s32.totalorder %s7820_s29, %s7820_s29 }
  0xc1   :  { %p7827_p6 = por %p7826_p5, %p7825_p4 }
  0xc3   :  { %p7828_p7 = pnand %p7827_p6, %p7821_p3 }
  0xc5   :  { %7831 = shalt.err (!%p7828_p7)
}
  0xc6   :  { %s8445_s27 = smov 16   ;;  %s7840_s13 = scalar_lea.vmem %s337_s28, 8192 }
  0xc7   :  { %320 = dma.hbm_to_vmem [thread:$0]  %s8587_s6, 16384, %s315_s0, [#allocation33], %s8440_s11, %s8440_s11, %s8445_s27  }
  0xc8   :  { %p7841_p8 = scmp.ne.s32.totalorder %s337_s28, %s7840_s13  ;;  %p7845_p9 = scmp.lt.s32.totalorder %s337_s28, %s337_s28 }
  0xc9   :  { %p7846_p10 = scmp.lt.s32.totalorder %s7840_s13, %s7840_s13 }
  0xcb   :  { %p7847_p11 = por %p7846_p10, %p7845_p9 }
  0xcd   :  { %p7848_p12 = pnand %p7847_p11, %p7841_p8 }
  0xcf   :  { %7851 = shalt.err (!%p7848_p12)
}
  0xd0   :  { %342 = dma.hbm_to_vmem [thread:$0]  %s8597_s24, 8192, %s337_s28, [#allocation36], %s8440_s11, %s8440_s11, %s8445_s27  }
  0xd1   :  { %s8446_s1 = smov [#allocation38]   ;;  %s8447_s7 = smov [#allocation41]  }
  0xd2   :  { %s359_s2 = sshll.u32 %s8446_s1, 4  ;;  %s378_s10 = sshll.u32 %s8447_s7, 4  ;;  %s360_s2 = int_to_ptr.vmem [resolvable:$true] %s359_s2  ;;  %s379_s10 = int_to_ptr.vmem [resolvable:$true] %s378_s10 }
  0xd3   :  { %s7860_s8 = scalar_lea.vmem %s360_s2, 128  ;;  %p7865_p0 = scmp.lt.s32.totalorder %s360_s2, %s360_s2 }
  0xd4   :  { %p7861_p13 = scmp.ne.s32.totalorder %s360_s2, %s7860_s8  ;;  %p7866_p1 = scmp.lt.s32.totalorder %s7860_s8, %s7860_s8 }
  0xd6   :  { %p7867_p2 = por %p7866_p1, %p7865_p0 }
  0xd8   :  { %p7868_p3 = pnand %p7867_p2, %p7861_p13 }
  0xda   :  { %7871 = shalt.err (!%p7868_p3)
}
  0xdb   :  { %362 = dma.hbm_to_vmem [thread:$0]  %s8607_s14, 128, %s360_s2, [#allocation39]  }
  0xdc   :  { %s7880_s6 = scalar_lea.vmem %s379_s10, 4096  ;;  %p7885_p5 = scmp.lt.s32.totalorder %s379_s10, %s379_s10 }
  0xdd   :  { %p7881_p4 = scmp.ne.s32.totalorder %s379_s10, %s7880_s6  ;;  %p7886_p6 = scmp.lt.s32.totalorder %s7880_s6, %s7880_s6 }
  0xdf   :  { %p7887_p7 = por %p7886_p6, %p7885_p5 }
  0xe1   :  { %p7888_p8 = pnand %p7887_p7, %p7881_p4 }
  0xe3   :  { %7891 = shalt.err (!%p7888_p8)
}
  0xe4   :  { %384 = dma.hbm_to_vmem [thread:$0]  %s8617_s3, 4096, %s379_s10, [#allocation42], %s8433_s9, %s8433_s9, %s8434_s18  }
  0xe5   :  { %s8448_s24 = smov [#allocation44]   ;;  %s8449_s19 = smov [#allocation47]  }
  0xe6   :  { %s400_s15 = sshll.u32 %s8448_s24, 4  ;;  %s423_s16 = sshll.u32 %s8449_s19, 4  ;;  %s401_s15 = int_to_ptr.vmem [resolvable:$true] %s400_s15  ;;  %s424_s16 = int_to_ptr.vmem [resolvable:$true] %s423_s16 }
  0xe7   :  { %s7900_s23 = scalar_lea.vmem %s401_s15, 2048  ;;  %p7905_p10 = scmp.lt.s32.totalorder %s401_s15, %s401_s15 }
  0xe8   :  { %p7901_p9 = scmp.ne.s32.totalorder %s401_s15, %s7900_s23  ;;  %p7906_p11 = scmp.lt.s32.totalorder %s7900_s23, %s7900_s23 }
  0xea   :  { %p7907_p12 = por %p7906_p11, %p7905_p10 }
  0xec   :  { %p7908_p13 = pnand %p7907_p12, %p7901_p9 }
  0xee   :  { %7911 = shalt.err (!%p7908_p13)
}
  0xef   :  { %406 = dma.hbm_to_vmem [thread:$0]  %s8627_s25, 2048, %s401_s15, [#allocation45], %s8433_s9, %s8433_s9, %s8434_s18  }
  0xf0   :  { %s7920_s14 = scalar_lea.vmem %s424_s16, 32  ;;  %p7925_p1 = scmp.lt.s32.totalorder %s424_s16, %s424_s16 }
  0xf1   :  { %p7921_p0 = scmp.ne.s32.totalorder %s424_s16, %s7920_s14  ;;  %p7926_p2 = scmp.lt.s32.totalorder %s7920_s14, %s7920_s14 }
  0xf3   :  { %p7927_p3 = por %p7926_p2, %p7925_p1 }
  0xf5   :  { %p7928_p4 = pnand %p7927_p3, %p7921_p0 }
  0xf7   :  { %7931 = shalt.err (!%p7928_p4)
}
  0xf8   :  { %s9568_s3 = sld [smem:[#allocation93_spill]]  ;;  %s8450_s22 = smov [#allocation50]  }
  0xf9   :  { %s442_s21 = sshll.u32 %s8450_s22, 4  ;;  %s8451_s30 = smov [#allocation53]   ;;  %s443_s21 = int_to_ptr.vmem [resolvable:$true] %s442_s21 }
  0xfa   :  { %s464_s26 = sshll.u32 %s8451_s30, 4  ;;  %s7940_s12 = scalar_lea.vmem %s443_s21, 2048  ;;  %s465_s26 = int_to_ptr.vmem [resolvable:$true] %s464_s26 }
  0xfb   :  { %p7941_p5 = scmp.ne.s32.totalorder %s443_s21, %s7940_s12  ;;  %p7945_p6 = scmp.lt.s32.totalorder %s443_s21, %s443_s21 }
  0xfc   :  { %p7946_p7 = scmp.lt.s32.totalorder %s7940_s12, %s7940_s12 }
  0xfe   :  { %426 = dma.hbm_to_vmem [thread:$0]  %s9568_s3, 32, %s424_s16, [#allocation48]  }
  0xff   :  { %p7947_p8 = por %p7946_p7, %p7945_p6 }
 0x101   :  { %p7948_p9 = pnand %p7947_p8, %p7941_p5 }
 0x103   :  { %7951 = shalt.err (!%p7948_p9)
}
 0x104   :  { %s9569_s25 = sld [smem:[#allocation95_spill]]  ;;  %s7960_s0 = scalar_lea.vmem %s465_s26, 16384 }
 0x105   :  { %p7961_p10 = scmp.ne.s32.totalorder %s465_s26, %s7960_s0  ;;  %p7965_p11 = scmp.lt.s32.totalorder %s465_s26, %s465_s26 }
 0x106   :  { %p7966_p12 = scmp.lt.s32.totalorder %s7960_s0, %s7960_s0 }
 0x108   :  { %p7967_p13 = por %p7966_p12, %p7965_p11 }
 0x10a   :  { %448 = dma.hbm_to_vmem [thread:$0]  %s9569_s25, 2048, %s443_s21, [#allocation51], %s8433_s9, %s8433_s9, %s8434_s18  }
 0x10b   :  { %p7968_p0 = pnand %p7967_p13, %p7961_p10 }
 0x10d   :  { %7971 = shalt.err (!%p7968_p0)
}
 0x10e   :  { %s9570_s20 = sld [smem:[#allocation97_spill]]  ;;  %s8452_s28 = smov [#allocation3]  }
 0x10f   :  { %s113_s29 = sshll.u32 %s8452_s28, 4  ;;  %s8453_s13 = smov [#allocation7]   ;;  %s114_s29 = int_to_ptr.vmem [resolvable:$true] %s113_s29 }
 0x110   :  { %s135_s1 = sshll.u32 %s8453_s13, 4  ;;  %s7980_s2 = scalar_lea.vmem %s114_s29, 32  ;;  %s136_s1 = int_to_ptr.vmem [resolvable:$true] %s135_s1 }
 0x111   :  { %p7981_p1 = scmp.ne.s32.totalorder %s114_s29, %s7980_s2  ;;  %p7985_p2 = scmp.lt.s32.totalorder %s114_s29, %s114_s29 }
 0x112   :  { %p7986_p3 = scmp.lt.s32.totalorder %s7980_s2, %s7980_s2 }
 0x114   :  { %470 = dma.hbm_to_vmem [thread:$0]  %s9570_s20, 16384, %s465_s26, [#allocation54], %s8440_s11, %s8440_s11, %s8445_s27  }
 0x115   :  { %p7987_p4 = por %p7986_p3, %p7985_p2 }
 0x117   :  { %p7988_p5 = pnand %p7987_p4, %p7981_p1 }
 0x119   :  { %7991 = shalt.err (!%p7988_p5)
}
 0x11a   :  { %s9571_s9 = sld [smem:[#allocation77_spill]]  ;;  %s8000_s18 = scalar_lea.vmem %s136_s1, 64 }
 0x11b   :  { %p8001_p6 = scmp.ne.s32.totalorder %s136_s1, %s8000_s18  ;;  %p8005_p7 = scmp.lt.s32.totalorder %s136_s1, %s136_s1 }
 0x11c   :  { %p8006_p8 = scmp.lt.s32.totalorder %s8000_s18, %s8000_s18 }
 0x11e   :  { %p8007_p9 = por %p8006_p8, %p8005_p7 }
 0x120   :  { %116 = dma.hbm_to_vmem [thread:$0]  %s9571_s9, 32, %s114_s29, [#allocation4]  }
 0x121   :  { %p8008_p10 = pnand %p8007_p9, %p8001_p6 }
 0x123   :  { %8011 = shalt.err (!%p8008_p10)
}
 0x124   :  { %s9572_s7 = sld [smem:[#allocation79_spill]]  ;;  %s8454_s10 = smov [#allocation10]  }
 0x125   :  { %s155_s8 = sshll.u32 %s8454_s10, 4  ;;  %s8455_s6 = smov [#allocation13]   ;;  %s156_s8 = int_to_ptr.vmem [resolvable:$true] %s155_s8 }
 0x126   :  { %s177_s24 = sshll.u32 %s8455_s6, 4  ;;  %s8020_s15 = scalar_lea.vmem %s156_s8, 16  ;;  %s178_s24 = int_to_ptr.vmem [resolvable:$true] %s177_s24 }
 0x127   :  { %p8021_p11 = scmp.ne.s32.totalorder %s156_s8, %s8020_s15  ;;  %s8024_s19 = scalar_lea.vmem %s156_s8, 32 }
 0x128   :  { %p8025_p12 = scmp.lt.s32.totalorder %s156_s8, %s156_s8  ;;  %p8026_p13 = scmp.lt.s32.totalorder %s8024_s19, %s8020_s15 }
 0x12a   :  { %138 = dma.hbm_to_vmem [thread:$0]  %s9572_s7, 64, %s136_s1, [#allocation6]  }
 0x12b   :  { %p8027_p0 = por %p8026_p13, %p8025_p12 }
 0x12d   :  { %p8028_p1 = pnand %p8027_p0, %p8021_p11 }
 0x12f   :  { %8031 = shalt.err (!%p8028_p1)
}
 0x130   :  { %s9573_s16 = sld [smem:[#allocation80_spill]]  ;;  %s8040_s23 = scalar_lea.vmem %s178_s24, 16 }
 0x131   :  { %p8041_p2 = scmp.ne.s32.totalorder %s178_s24, %s8040_s23  ;;  %s8044_s14 = scalar_lea.vmem %s178_s24, 32 }
 0x132   :  { %p8045_p3 = scmp.lt.s32.totalorder %s178_s24, %s178_s24  ;;  %p8046_p4 = scmp.lt.s32.totalorder %s8044_s14, %s8040_s23 }
 0x134   :  { %p8047_p5 = por %p8046_p4, %p8045_p3 }
 0x136   :  { %158 = dma.hbm_to_vmem [thread:$0]  %s9573_s16, 16, %s156_s8, [#allocation9]  }
 0x137   :  { %p8048_p6 = pnand %p8047_p5, %p8041_p2 }
 0x139   :  { %8051 = shalt.err (!%p8048_p6)
}
 0x13a   :  { %s9574_s3 = sld [smem:[#allocation81_spill]]  ;;  %s8456_s22 = smov [#allocation16]  }
 0x13b   :  { %s196_s21 = sshll.u32 %s8456_s22, 4  ;;  %s8457_s30 = smov [#allocation19]   ;;  %s197_s21 = int_to_ptr.vmem [resolvable:$true] %s196_s21 }
 0x13c   :  { %s219_s26 = sshll.u32 %s8457_s30, 4  ;;  %s8060_s12 = scalar_lea.vmem %s197_s21, 2048  ;;  %s220_s26 = int_to_ptr.vmem [resolvable:$true] %s219_s26 }
 0x13d   :  { %p8061_p7 = scmp.ne.s32.totalorder %s197_s21, %s8060_s12  ;;  %p8065_p8 = scmp.lt.s32.totalorder %s197_s21, %s197_s21 }
 0x13e   :  { %p8066_p9 = scmp.lt.s32.totalorder %s8060_s12, %s8060_s12 }
 0x140   :  { %180 = dma.hbm_to_vmem [thread:$0]  %s9574_s3, 16, %s178_s24, [#allocation12]  }
 0x141   :  { %p8067_p10 = por %p8066_p9, %p8065_p8 }
 0x143   :  { %p8068_p11 = pnand %p8067_p10, %p8061_p7 }
 0x145   :  { %8071 = shalt.err (!%p8068_p11)
}
 0x146   :  { %s9575_s25 = sld [smem:[#allocation82_spill]]  ;;  %s8080_s0 = scalar_lea.vmem %s220_s26, 32 }
 0x147   :  { %p8081_p12 = scmp.ne.s32.totalorder %s220_s26, %s8080_s0  ;;  %p8085_p13 = scmp.lt.s32.totalorder %s220_s26, %s220_s26 }
 0x148   :  { %p8086_p0 = scmp.lt.s32.totalorder %s8080_s0, %s8080_s0 }
 0x14a   :  { %p8087_p1 = por %p8086_p0, %p8085_p13 }
 0x14c   :  { %202 = dma.hbm_to_vmem [thread:$0]  %s9575_s25, 2048, %s197_s21, [#allocation15], %s8440_s11, %s8440_s11, %s8445_s27  }
 0x14d   :  { %p8088_p2 = pnand %p8087_p1, %p8081_p12 }
 0x14f   :  { %8091 = shalt.err (!%p8088_p2)
}
 0x150   :  { %s9576_s20 = sld [smem:[#allocation83_spill]]  ;;  %s8458_s28 = smov [#allocation22]  }
 0x151   :  { %s241_s29 = sshll.u32 %s8458_s28, 4  ;;  %s8459_s13 = smov [#allocation25]   ;;  %s242_s29 = int_to_ptr.vmem [resolvable:$true] %s241_s29 }
 0x152   :  { %s263_s1 = sshll.u32 %s8459_s13, 4  ;;  %s8100_s2 = scalar_lea.vmem %s242_s29, 512  ;;  %s264_s1 = int_to_ptr.vmem [resolvable:$true] %s263_s1 }
 0x153   :  { %p8101_p3 = scmp.ne.s32.totalorder %s242_s29, %s8100_s2  ;;  %p8105_p4 = scmp.lt.s32.totalorder %s242_s29, %s242_s29 }
 0x154   :  { %p8106_p5 = scmp.lt.s32.totalorder %s8100_s2, %s8100_s2 }
 0x156   :  { %222 = dma.hbm_to_vmem [thread:$0]  %s9576_s20, 32, %s220_s26, [#allocation18]  }
 0x157   :  { %p8107_p6 = por %p8106_p5, %p8105_p4 }
 0x159   :  { %p8108_p7 = pnand %p8107_p6, %p8101_p3 }
 0x15b   :  { %8111 = shalt.err (!%p8108_p7)
}
 0x15c   :  { %s9577_s11 = sld [smem:[#allocation84_spill]]  ;;  %s8120_s27 = scalar_lea.vmem %s264_s1, 16 }
 0x15d   :  { %p8121_p8 = scmp.ne.s32.totalorder %s264_s1, %s8120_s27  ;;  %s8124_s9 = scalar_lea.vmem %s264_s1, 32 }
 0x15e   :  { %p8125_p9 = scmp.lt.s32.totalorder %s264_s1, %s264_s1  ;;  %p8126_p10 = scmp.lt.s32.totalorder %s8124_s9, %s8120_s27 }
 0x160   :  { %p8127_p11 = por %p8126_p10, %p8125_p9 }
 0x162   :  { %244 = dma.hbm_to_vmem [thread:$0]  %s9577_s11, 512, %s242_s29, [#allocation21]  }
 0x163   :  { %p8128_p12 = pnand %p8127_p11, %p8121_p8 }
 0x165   :  { %8131 = shalt.err (!%p8128_p12)
}
 0x166   :  { %s9578_s18 = sld [smem:[#allocation85_spill]]  ;;  %s8460_s7 = smov [#allocation28]  }
 0x167   :  { %s282_s10 = sshll.u32 %s8460_s7, 4  ;;  %s283_s10 = int_to_ptr.vmem [resolvable:$true] %s282_s10 }
 0x168   :  { %s8140_s8 = scalar_lea.vmem %s283_s10, 8192  ;;  %p8145_p0 = scmp.lt.s32.totalorder %s283_s10, %s283_s10 }
 0x169   :  { %p8141_p13 = scmp.ne.s32.totalorder %s283_s10, %s8140_s8  ;;  %p8146_p1 = scmp.lt.s32.totalorder %s8140_s8, %s8140_s8 }
 0x16b   :  { %p8147_p2 = por %p8146_p1, %p8145_p0 }
 0x16c   :  { %266 = dma.hbm_to_vmem [thread:$0]  %s9578_s18, 16, %s264_s1, [#allocation24]  }
 0x16d   :  { %p8148_p3 = pnand %p8147_p2, %p8141_p13 }
 0x16f   :  { %8151 = shalt.err (!%p8148_p3)
}
 0x170   :  { %s8461_s6 = smov 512   ;;  %s9579_s24 = sld [smem:[#allocation86_spill]] }
 0x171   :  { %s8462_s15 = smov 32   ;;  %s8463_s19 = smov [#allocation31]  }
 0x172   :  { %s305_s16 = sshll.u32 %s8463_s19, 4  ;;  %s8464_s23 = smov [#allocation34]   ;;  %s306_s16 = int_to_ptr.vmem [resolvable:$true] %s305_s16 }
 0x173   :  { %s327_s14 = sshll.u32 %s8464_s23, 4  ;;  %s8160_s3 = scalar_lea.vmem %s306_s16, 64  ;;  %s328_s14 = int_to_ptr.vmem [resolvable:$true] %s327_s14 }
 0x174   :  { %p8161_p4 = scmp.ne.s32.totalorder %s306_s16, %s8160_s3  ;;  %p8165_p5 = scmp.lt.s32.totalorder %s306_s16, %s306_s16 }
 0x175   :  { %p8166_p6 = scmp.lt.s32.totalorder %s8160_s3, %s8160_s3 }
 0x176   :  { %288 = dma.hbm_to_vmem [thread:$0]  %s9579_s24, 8192, %s283_s10, [#allocation27], %s8461_s6, %s8461_s6, %s8462_s15  }
 0x177   :  { %p8167_p7 = por %p8166_p6, %p8165_p5 }
 0x179   :  { %p8168_p8 = pnand %p8167_p7, %p8161_p4 }
 0x17b   :  { %8171 = shalt.err (!%p8168_p8)
}
 0x17c   :  { %s9580_s22 = sld [smem:[#allocation87_spill]]  ;;  %s8180_s21 = scalar_lea.vmem %s328_s14, 32 }
 0x17d   :  { %p8181_p9 = scmp.ne.s32.totalorder %s328_s14, %s8180_s21  ;;  %p8185_p10 = scmp.lt.s32.totalorder %s328_s14, %s328_s14 }
 0x17e   :  { %p8186_p11 = scmp.lt.s32.totalorder %s8180_s21, %s8180_s21 }
 0x180   :  { %p8187_p12 = por %p8186_p11, %p8185_p10 }
 0x182   :  { %308 = dma.hbm_to_vmem [thread:$0]  %s9580_s22, 64, %s306_s16, [#allocation30]  }
 0x183   :  { %p8188_p13 = pnand %p8187_p12, %p8181_p9 }
 0x185   :  { %8191 = shalt.err (!%p8188_p13)
}
 0x186   :  { %s9581_s30 = sld [smem:[#allocation88_spill]]  ;;  %s8465_s26 = smov [#allocation37]  }
 0x187   :  { %s349_s12 = sshll.u32 %s8465_s26, 4  ;;  %s8466_s25 = smov [#allocation40]   ;;  %s350_s12 = int_to_ptr.vmem [resolvable:$true] %s349_s12 }
 0x188   :  { %s369_s0 = sshll.u32 %s8466_s25, 4  ;;  %s8200_s20 = scalar_lea.vmem %s350_s12, 32  ;;  %s370_s0 = int_to_ptr.vmem [resolvable:$true] %s369_s0 }
 0x189   :  { %p8201_p0 = scmp.ne.s32.totalorder %s350_s12, %s8200_s20  ;;  %p8205_p1 = scmp.lt.s32.totalorder %s350_s12, %s350_s12 }
 0x18a   :  { %p8206_p2 = scmp.lt.s32.totalorder %s8200_s20, %s8200_s20 }
 0x18c   :  { %330 = dma.hbm_to_vmem [thread:$0]  %s9581_s30, 32, %s328_s14, [#allocation33]  }
 0x18d   :  { %p8207_p3 = por %p8206_p2, %p8205_p1 }
 0x18f   :  { %p8208_p4 = pnand %p8207_p3, %p8201_p0 }
 0x191   :  { %8211 = shalt.err (!%p8208_p4)
}
 0x192   :  { %s9582_s28 = sld [smem:[#allocation89_spill]]  ;;  %s8220_s29 = scalar_lea.vmem %s370_s0, 32 }
 0x193   :  { %p8221_p5 = scmp.ne.s32.totalorder %s370_s0, %s8220_s29  ;;  %p8225_p6 = scmp.lt.s32.totalorder %s370_s0, %s370_s0 }
 0x194   :  { %p8226_p7 = scmp.lt.s32.totalorder %s8220_s29, %s8220_s29 }
 0x196   :  { %p8227_p8 = por %p8226_p7, %p8225_p6 }
 0x198   :  { %352 = dma.hbm_to_vmem [thread:$0]  %s9582_s28, 32, %s350_s12, [#allocation36]  }
 0x199   :  { %p8228_p9 = pnand %p8227_p8, %p8221_p5 }
 0x19b   :  { %8231 = shalt.err (!%p8228_p9)
}
 0x19c   :  { %s9583_s13 = sld [smem:[#allocation90_spill]]  ;;  %s8467_s1 = smov [#allocation43]  }
 0x19d   :  { %s391_s2 = sshll.u32 %s8467_s1, 4  ;;  %s8468_s11 = smov [#allocation46]   ;;  %s392_s2 = int_to_ptr.vmem [resolvable:$true] %s391_s2 }
 0x19e   :  { %s413_s27 = sshll.u32 %s8468_s11, 4  ;;  %s8240_s9 = scalar_lea.vmem %s392_s2, 16  ;;  %s414_s27 = int_to_ptr.vmem [resolvable:$true] %s413_s27 }
 0x19f   :  { %p8241_p10 = scmp.ne.s32.totalorder %s392_s2, %s8240_s9  ;;  %s8244_s18 = scalar_lea.vmem %s392_s2, 32 }
 0x1a0   :  { %p8245_p11 = scmp.lt.s32.totalorder %s392_s2, %s392_s2  ;;  %p8246_p12 = scmp.lt.s32.totalorder %s8244_s18, %s8240_s9 }
 0x1a2   :  { %372 = dma.hbm_to_vmem [thread:$0]  %s9583_s13, 32, %s370_s0, [#allocation39]  }
 0x1a3   :  { %p8247_p13 = por %p8246_p12, %p8245_p11 }
 0x1a5   :  { %p8248_p0 = pnand %p8247_p13, %p8241_p10 }
 0x1a7   :  { %8251 = shalt.err (!%p8248_p0)
}
 0x1a8   :  { %s9584_s7 = sld [smem:[#allocation91_spill]]  ;;  %s8260_s10 = scalar_lea.vmem %s414_s27, 16 }
 0x1a9   :  { %p8261_p1 = scmp.ne.s32.totalorder %s414_s27, %s8260_s10  ;;  %s8264_s8 = scalar_lea.vmem %s414_s27, 32 }
 0x1aa   :  { %p8265_p2 = scmp.lt.s32.totalorder %s414_s27, %s414_s27  ;;  %p8266_p3 = scmp.lt.s32.totalorder %s8264_s8, %s8260_s10 }
 0x1ac   :  { %p8267_p4 = por %p8266_p3, %p8265_p2 }
 0x1ae   :  { %394 = dma.hbm_to_vmem [thread:$0]  %s9584_s7, 16, %s392_s2, [#allocation42]  }
 0x1af   :  { %p8268_p5 = pnand %p8267_p4, %p8261_p1 }
 0x1b1   :  { %8271 = shalt.err (!%p8268_p5)
}
 0x1b2   :  { %s9585_s6 = sld [smem:[#allocation92_spill]]  ;;  %s8469_s24 = smov [#allocation49]  }
 0x1b3   :  { %s433_s15 = sshll.u32 %s8469_s24, 4  ;;  %s8470_s19 = smov [#allocation52]   ;;  %s434_s15 = int_to_ptr.vmem [resolvable:$true] %s433_s15 }
 0x1b4   :  { %s455_s16 = sshll.u32 %s8470_s19, 4  ;;  %s8280_s23 = scalar_lea.vmem %s434_s15, 16  ;;  %s456_s16 = int_to_ptr.vmem [resolvable:$true] %s455_s16 }
 0x1b5   :  { %p8281_p6 = scmp.ne.s32.totalorder %s434_s15, %s8280_s23  ;;  %s8284_s14 = scalar_lea.vmem %s434_s15, 32 }
 0x1b6   :  { %p8285_p7 = scmp.lt.s32.totalorder %s434_s15, %s434_s15  ;;  %p8286_p8 = scmp.lt.s32.totalorder %s8284_s14, %s8280_s23 }
 0x1b8   :  { %416 = dma.hbm_to_vmem [thread:$0]  %s9585_s6, 16, %s414_s27, [#allocation45]  }
 0x1b9   :  { %p8287_p9 = por %p8286_p8, %p8285_p7 }
 0x1bb   :  { %p8288_p10 = pnand %p8287_p9, %p8281_p6 }
 0x1bd   :  { %8291 = shalt.err (!%p8288_p10)
}
 0x1be   :  { %s9586_s3 = sld [smem:[#allocation94_spill]]  ;;  %s8300_s22 = scalar_lea.vmem %s456_s16, 16 }
 0x1bf   :  { %p8301_p11 = scmp.ne.s32.totalorder %s456_s16, %s8300_s22  ;;  %s8304_s21 = scalar_lea.vmem %s456_s16, 32 }
 0x1c0   :  { %p8305_p12 = scmp.lt.s32.totalorder %s456_s16, %s456_s16  ;;  %p8306_p13 = scmp.lt.s32.totalorder %s8304_s21, %s8300_s22 }
 0x1c2   :  { %p8307_p0 = por %p8306_p13, %p8305_p12 }
 0x1c4   :  { %436 = dma.hbm_to_vmem [thread:$0]  %s9586_s3, 16, %s434_s15, [#allocation48]  }
 0x1c5   :  { %p8308_p1 = pnand %p8307_p0, %p8301_p11 }
 0x1c7   :  { %8311 = shalt.err (!%p8308_p1)
}
 0x1c8   :  { %s9587_s30 = sld [smem:[#allocation96_spill]]  ;;  %s8471_s26 = smov [#allocation55]  }
 0x1c9   :  { %s477_s12 = sshll.u32 %s8471_s26, 4  ;;  %s8472_s25 = smov [#allocation56]   ;;  %s478_s12 = int_to_ptr.vmem [resolvable:$true] %s477_s12 }
 0x1ca   :  { %s489_s0 = sshll.u32 %s8472_s25, 4  ;;  %s8320_s20 = scalar_lea.vmem %s478_s12, 32  ;;  %s490_s0 = int_to_ptr.vmem [resolvable:$true] %s489_s0 }
 0x1cb   :  { %p8321_p2 = scmp.ne.s32.totalorder %s478_s12, %s8320_s20  ;;  %p8325_p3 = scmp.lt.s32.totalorder %s478_s12, %s478_s12 }
 0x1cc   :  { %p8326_p4 = scmp.lt.s32.totalorder %s8320_s20, %s8320_s20 }
 0x1ce   :  { %458 = dma.hbm_to_vmem [thread:$0]  %s9587_s30, 16, %s456_s16, [#allocation51]  }
 0x1cf   :  { %p8327_p5 = por %p8326_p4, %p8325_p3 }
 0x1d1   :  { %p8328_p6 = pnand %p8327_p5, %p8321_p2 }
 0x1d3   :  { %8331 = shalt.err (!%p8328_p6)
}
 0x1d4   :  { %s9588_s28 = sld [smem:[#allocation98_spill]]  ;;  %s8340_s29 = scalar_lea.vmem %s490_s0, 16 }
 0x1d5   :  { %p8341_p7 = scmp.ne.s32.totalorder %s490_s0, %s8340_s29  ;;  %s8344_s13 = scalar_lea.vmem %s490_s0, 32 }
 0x1d6   :  { %p8345_p8 = scmp.lt.s32.totalorder %s490_s0, %s490_s0  ;;  %p8346_p9 = scmp.lt.s32.totalorder %s8344_s13, %s8340_s29 }
 0x1d8   :  { %p8347_p10 = por %p8346_p9, %p8345_p8 }
 0x1da   :  { %480 = dma.hbm_to_vmem [thread:$0]  %s9588_s28, 32, %s478_s12, [#allocation54]  }
 0x1db   :  { %p8348_p11 = pnand %p8347_p10, %p8341_p7 }
 0x1dd   :  { %8351 = shalt.err (!%p8348_p11)
}
 0x1de   :  { %492 = dma.hbm_to_vmem [thread:$0]  %s8672_s4, 16, %s490_s0, [#allocation57]  }
 0x1df   :  { %8352 = dma.done.wait [#allocation4], 32  }
 0x1e0   :  { %8353 = vsyncadd [#allocation4], 4294967264 }
 0x1e1   :  { %8354 = dma.done.wait [#allocation6], 96  }
 0x1e2   :  { %8355 = vsyncadd [#allocation6], 4294967200 }
 0x1e3   :  { %8356 = dma.done.wait [#allocation9], 32  }
 0x1e4   :  { %8357 = vsyncadd [#allocation9], 4294967264 }
 0x1e5   :  { %8358 = dma.done.wait [#allocation12], 1040  }
 0x1e6   :  { %8359 = vsyncadd [#allocation12], 4294966256 }
 0x1e7   :  { %8360 = dma.done.wait [#allocation15], 2064  }
 0x1e8   :  { %8361 = vsyncadd [#allocation15], 4294965232 }
 0x1e9   :  { %8362 = dma.done.wait [#allocation18], 64  }
 0x1ea   :  { %8363 = vsyncadd [#allocation18], 4294967232 }
 0x1eb   :  { %8364 = dma.done.wait [#allocation21], 131584  }
 0x1ec   :  { %8365 = vsyncadd [#allocation21], 4294835712 }
 0x1ed   :  { %8366 = dma.done.wait [#allocation24], 1040  }
 0x1ee   :  { %8367 = vsyncadd [#allocation24], 4294966256 }
 0x1ef   :  { %8368 = dma.done.wait [#allocation27], 8208  }
 0x1f0   :  { %8369 = vsyncadd [#allocation27], 4294959088 }
 0x1f1   :  { %8370 = dma.done.wait [#allocation30], 128  }
 0x1f2   :  { %8371 = vsyncadd [#allocation30], 4294967168 }
 0x1f3   :  { %8372 = dma.done.wait [#allocation33], 16416  }
 0x1f4   :  { %8373 = vsyncadd [#allocation33], 4294950880 }
 0x1f5   :  { %8374 = dma.done.wait [#allocation36], 8224  }
 0x1f6   :  { %8375 = vsyncadd [#allocation36], 4294959072 }
 0x1f7   :  { %8376 = dma.done.wait [#allocation39], 160  }
 0x1f8   :  { %8377 = vsyncadd [#allocation39], 4294967136 }
 0x1f9   :  { %8378 = dma.done.wait [#allocation42], 4112  }
 0x1fa   :  { %8379 = vsyncadd [#allocation42], 4294963184 }
 0x1fb   :  { %8380 = dma.done.wait [#allocation45], 2064  }
 0x1fc   :  { %8381 = vsyncadd [#allocation45], 4294965232 }
 0x1fd   :  { %8382 = dma.done.wait [#allocation48], 48  }
 0x1fe   :  { %8383 = vsyncadd [#allocation48], 4294967248 }
 0x1ff   :  { %8384 = dma.done.wait [#allocation51], 2064  }
 0x200   :  { %8385 = vsyncadd [#allocation51], 4294965232 }
 0x201   :  { %8386 = dma.done.wait [#allocation54], 16416  }
 0x202   :  { %8387 = vsyncadd [#allocation54], 4294950880 }
 0x203   :  { %8388 = dma.done.wait [#allocation57], 16  }
 0x204   :  { %8389 = vsyncadd [#allocation57], 4294967280  ;;  %s9589_s4 = sld [smem:[#allocation78_spill]]  ;;  %vm615_vm0 = vcmask 1043456   ;;  %vm608_vm1 = vcmask 31744   ;;  %v8473_v4 = vmov 0.0   ;;  %v771_v8 = vlaneseq }
 0x205   :  { %v607_v1 = vld [vmem:[#allocation7] sm:$0xf]  ;;  %7312 = vmatprep.subr.mxu1 %v8473_v4  ;;  %vm8474_vm2 = vmmov 0   ;;  %vm696_vm3 = vcmask 130048   ;;  %v9537_v7 = vmov 1.0   ;;  %v882_v20 = vld [vmem:[#allocation11 + $0x30] sm:$0xff] }
 0x206   :  { %7307 = vmatprep.subr.msk.mxu0 %vm615_vm0, %v607_v1  ;;  %7316 = vmatprep.mubr.msk.f32.mxu1 %vm8474_vm2, %v8473_v4  ;;  %v8766_v9 = vshrl.u32 %v771_v8, 7  ;;  %v883_v19 = vld [vmem:[#allocation11 + $0x38] sm:$0xff]  ;;  %v881_v21 = vld [vmem:[#allocation11 + $0x28] sm:$0xff]  ;;  %v880_v22 = vld [vmem:[#allocation11 + $0x20] sm:$0xff]  ;;  %vm884_vm4 = vcmask 523264   ;;  %vm2677_vm5 = vcmask 1041409  }
 0x207   :  { %7308 = vmatpush3.msk.msra.mxu0 %vm615_vm0, %v607_v1  ;;  %v879_v23 = vld [vmem:[#allocation11 + $0x18] sm:$0xff]  ;;  %v878_v24 = vld [vmem:[#allocation11 + $0x10] sm:$0xff]  ;;  %v877_v25 = vld [vmem:[#allocation11 + $0x8] sm:$0xff]  ;;  %s8476_s1 = smov 64   ;;  %vm6285_vm6 = vcmask 1041408   ;;  %vm6281_vm7 = vcmask 15360  }
 0x208   :  { %7319 = vmatprep.subr.mxu0 %v8473_v4  ;;  %v8769_v10 = vsub.s32 0, %v8766_v9  ;;  %v876_v26 = vld [vmem:[#allocation11] sm:$0xff]  ;;  %v7081_v33 = vld [vmem:[#allocation8] ss:$0 sm:$0xff]  ;;  %v7082_v36 = vld [vmem:[#allocation10] ss:$0 sm:$0xff] }
 0x209   :  { %v1159_v53 = vld [vmem:[#allocation16 + $0x78] sm:$0xff]  ;;  %v1158_v54 = vld [vmem:[#allocation16 + $0x70] sm:$0xff]  ;;  %v1157_v55 = vld [vmem:[#allocation16 + $0x68] sm:$0xff]  ;;  %s9599_s2 = sld [smem:[#allocation99_spill]]  ;;  %vm7011_vm8 = vcmask 1024  }
 0x20a   :  { %v605_v2 = vld [vmem:[%s9589_s4] sm:$0xff]  ;;  %v606_v3 = vld [vmem:[%s9589_s4 + $0x8] sm:$0xff]  ;;  %v1156_v56 = vld [vmem:[#allocation16 + $0x60] sm:$0xff] }
 0x20b   :  { %7309 = vmatprep.mubr.msk.f32.mxu0 %vm608_vm1, %v605_v2  ;;  %v1155_v57 = vld [vmem:[#allocation16 + $0x58] sm:$0xff]  ;;  %v1154_v58 = vld [vmem:[#allocation16 + $0x50] sm:$0xff]  ;;  %v1153_v59 = vld [vmem:[#allocation16 + $0x48] sm:$0xff] }
 0x20c   :  { %7310 = vmatmul.mubr.msk.f32.vlgmr.msra.gmra.mxu0 %vm608_vm1, %v606_v3  ;;  %v1152_v60 = vld [vmem:[#allocation16 + $0x40] sm:$0xff]  ;;  %v1151_v61 = vld [vmem:[#allocation16 + $0x38] sm:$0xff]  ;;  %v1150_v62 = vld [vmem:[#allocation16 + $0x30] sm:$0xff] }
 0x20d   :  { %7323 = vmatprep.mubr.msk.f32.mxu0 %vm8474_vm2, %v8473_v4  ;;  %v1149_v63 = vld [vmem:[#allocation16 + $0x28] sm:$0xff]  ;;  %v1148_v0 = vld [vmem:[#allocation16 + $0x20] sm:$0xff]  ;;  %v1147_v1 = vld [vmem:[#allocation16 + $0x18] sm:$0xff] }
 0x20e   :  { %v1146_v2 = vld [vmem:[#allocation16 + $0x10] sm:$0xff]  ;;  %v1145_v3 = vld [vmem:[#allocation16 + $0x8] sm:$0xff] }
 0x2cc   :  { %v7311_v5 = vpop.f32.mrf.mxu0 }
 0x2cd   :  { %7313 = vmatpush3.msra.mxu1 %v7311_v5 }
 0x2ce   :  { %v685_v6 = vpop.f32.mrf.mxu0  ;;  %7314 = vmatprep.subr.mxu1 %v8473_v4 }
 0x2cf   :  { %7315 = vmatpush3.msra.mxu1 %v685_v6 }
 0x2d0   :  { %7317 = vmatmul.mubr.msk.f32.vlgmr.msra.gmra.mxu1 %vm696_vm3, %v9537_v7  ;;  %7326 = vmatprep.subr.mxu1 %v883_v19 }
 0x2d1   :  { %7327 = vmatpush3.msra.mxu1 %v883_v19 }
 0x2d2   :  { %7328 = vmatprep.subr.mxu1 %v882_v20 }
 0x2d3   :  { %7329 = vmatpush3.msra.mxu1 %v882_v20 }
 0x2d4   :  { %7330 = vmatprep.subr.mxu1 %v881_v21 }
 0x2d5   :  { %7331 = vmatpush3.msra.mxu1 %v881_v21 }
 0x2d6   :  { %7332 = vmatprep.subr.mxu1 %v880_v22 }
 0x2d7   :  { %7333 = vmatpush3.msra.mxu1 %v880_v22 }
 0x2d8   :  { %7334 = vmatprep.subr.mxu1 %v879_v23 }
 0x2d9   :  { %7335 = vmatpush3.msra.mxu1 %v879_v23 }
 0x2da   :  { %7336 = vmatprep.subr.mxu1 %v878_v24 }
 0x2db   :  { %7337 = vmatpush3.msra.mxu1 %v878_v24 }
 0x2dc   :  { %7338 = vmatprep.subr.mxu1 %v877_v25 }
 0x2dd   :  { %7339 = vmatpush3.msra.mxu1 %v877_v25 }
 0x2de   :  { %7340 = vmatprep.subr.mxu1 %v876_v26 }
 0x2df   :  { %7341 = vmatpush3.msra.mxu1 %v876_v26 }
 0x390   :  { %v766_v11 = vpop.f32.mrf.mxu1 }
 0x391   :  { %v770_v12 = vmul.f32 0.0625, %v766_v11 }
 0x392   :  { %v7318_v13 = vpop.f32.mrf.mxu1 }
 0x393   :  { %v774_v14 = vrot.slane %v770_v12, %v8769_v10 }
 0x395   :  { %v775_v15 = vsub.f32 %v685_v6, %v774_v14  ;;  %v776_v16 = vsub.f32 %v7311_v5, %v774_v14  ;;  %v1144_v5 = vld [vmem:[#allocation16] sm:$0xff] }
 0x397   :  { %v778_v17 = vmul.f32 %v776_v16, %v776_v16  ;;  %v777_v18 = vmul.f32 %v775_v15, %v775_v15 }
 0x399   :  { %7320 = vmatpush3.msra.mxu0 %v778_v17 }
 0x39a   :  { %7321 = vmatprep.subr.mxu0 %v8473_v4 }
 0x39b   :  { %7322 = vmatpush3.msra.mxu0 %v777_v18  ;;  %v7088_v18 = vld [vmem:[#allocation14] ss:$0 sm:$0xff] }
 0x39c   :  { %7324 = vmatmul.mubr.msk.f32.vlgmr.msra.gmra.mxu0 %vm696_vm3, %v9537_v7  ;;  %7345 = vmatprep.subr.mxu0 %v8473_v4 }
 0x39d   :  { %7349 = vmatprep.mubr.msk.f32.mxu0 %vm8474_vm2, %v8473_v4 }
 0x45c   :  { %v845_v27 = vpop.f32.mrf.mxu0 }
 0x45d   :  { %v849_v28 = vmul.f32 0.0625, %v845_v27 }
 0x45e   :  { %v7325_v29 = vpop.f32.mrf.mxu0 }
 0x45f   :  { %v850_v30 = vadd.f32 1e-05, %v849_v28  ;;  %v1964_v29 = vld [vmem:[#allocation20 + $0xf18] sm:$0xff] }
 0x461   :  { %7614 = vrsqrt.f32 %v850_v30  ;;  %v1963_v30 = vld [vmem:[#allocation20 + $0xf10] sm:$0xff] }
 0x46e   :  { %v7615_v31 = vpop.eup %7614 }
 0x46f   :  { %v855_v32 = vrot.slane %v7615_v31, %v8769_v10  ;;  %v1932_v31 = vld [vmem:[#allocation20 + $0xe18] sm:$0xff] }
 0x471   :  { %v856_v34 = vmul.f32 %v855_v32, %v775_v15  ;;  %v857_v35 = vmul.f32 %v855_v32, %v776_v16  ;;  %v7087_v15 = vld [vmem:[#allocation13] ss:$0 sm:$0xff]  ;;  %v1931_v32 = vld [vmem:[#allocation20 + $0xe10] sm:$0xff] }
 0x473   :  { %v864_v37 = vmul.f32 %v7081_v33, %v856_v34  ;;  %v865_v38 = vmul.f32 %v7081_v33, %v857_v35  ;;  %v1900_v33 = vld [vmem:[#allocation20 + $0xd18] sm:$0xff]  ;;  %v1899_v34 = vld [vmem:[#allocation20 + $0xd10] sm:$0xff] }
 0x474   :  { %v1868_v35 = vld [vmem:[#allocation20 + $0xc18] sm:$0xff] }
 0x475   :  { %v8779_v39 = vadd.f32 %v7082_v36, %v864_v37  ;;  %v8781_v40 = vadd.f32 %v7082_v36, %v865_v38  ;;  %v1867_v36 = vld [vmem:[#allocation20 + $0xc10] sm:$0xff]  ;;  %v1836_v37 = vld [vmem:[#allocation20 + $0xb18] sm:$0xff] }
 0x476   :  { %v1835_v38 = vld [vmem:[#allocation20 + $0xb10] sm:$0xff] }
 0x477   :  { %v9540_v41 = vmax.f32 %v8779_v39, 0.0  ;;  %v9539_v42 = vmax.f32 %v8781_v40, 0.0 }
 0x479   :  { %7342 = vmatprep.mubr.msk.f32.mxu1 %vm884_vm4, %v9540_v41 }
 0x47a   :  { %7343 = vmatmul.mubr.msk.f32.vlgmr.msra.gmra.mxu1 %vm884_vm4, %v9539_v42 }
 0x47b   :  { %1309 = vmatprep.mubr.f32.mxu1 %v8473_v4 }
 0x53a   :  { %v7344_v43 = vpop.f32.mrf.mxu1 }
 0x53b   :  { %7346 = vmatpush3.msra.mxu0 %v7344_v43 }
 0x53c   :  { %v957_v44 = vpop.f32.mrf.mxu1  ;;  %7347 = vmatprep.subr.mxu0 %v8473_v4 }
 0x53d   :  { %7348 = vmatpush3.msra.mxu0 %v957_v44 }
 0x53e   :  { %7350 = vmatmul.mubr.msk.f32.vlgmr.msra.gmra.mxu0 %vm696_vm3, %v9537_v7  ;;  %7352 = vmatprep.subr.mxu0 %v8473_v4 }
 0x53f   :  { %7356 = vmatprep.mubr.msk.f32.mxu0 %vm8474_vm2, %v8473_v4 }
 0x5fe   :  { %v1034_v45 = vpop.f32.mrf.mxu0 }
 0x5ff   :  { %v1038_v46 = vmul.f32 0.0625, %v1034_v45  ;;  %v1772_v45 = vld [vmem:[#allocation20 + $0x918] sm:$0xff] }
 0x600   :  { %v7351_v47 = vpop.f32.mrf.mxu0 }
 0x601   :  { %v1042_v48 = vrot.slane %v1038_v46, %v8769_v10  ;;  %v1771_v46 = vld [vmem:[#allocation20 + $0x910] sm:$0xff]  ;;  %v1740_v47 = vld [vmem:[#allocation20 + $0x818] sm:$0xff] }
 0x603   :  { %v1043_v49 = vsub.f32 %v957_v44, %v1042_v48  ;;  %v1044_v50 = vsub.f32 %v7344_v43, %v1042_v48  ;;  %v1804_v43 = vld [vmem:[#allocation20 + $0xa18] sm:$0xff]  ;;  %v1803_v44 = vld [vmem:[#allocation20 + $0xa10] sm:$0xff] }
 0x604   :  { %v1739_v48 = vld [vmem:[#allocation20 + $0x810] sm:$0xff] }
 0x605   :  { %v1046_v51 = vmul.f32 %v1044_v50, %v1044_v50  ;;  %v1045_v52 = vmul.f32 %v1043_v49, %v1043_v49 }
 0x607   :  { %7353 = vmatpush3.msra.mxu0 %v1046_v51  ;;  %v1676_v51 = vld [vmem:[#allocation20 + $0x618] sm:$0xff] }
 0x608   :  { %7354 = vmatprep.subr.mxu0 %v8473_v4 }
 0x609   :  { %7355 = vmatpush3.msra.mxu0 %v1045_v52  ;;  %v1675_v52 = vld [vmem:[#allocation20 + $0x610] sm:$0xff] }
 0x60a   :  { %7357 = vmatmul.mubr.msk.f32.vlgmr.msra.gmra.mxu0 %vm696_vm3, %v9537_v7  ;;  %1182 = vmatprep.subr.mxu0 %v1159_v53 }
 0x60b   :  { %1230 = vmatprep.mubr.f32.mxu0 %v8473_v4  ;;  %1183 = vmatpush1.msra.mxu0 %v1158_v54 }
 0x60c   :  { %1184 = vmatprep.subr.mxu0 %v1157_v55 }
 0x60d   :  { %1185 = vmatpush1.msra.mxu0 %v1156_v56 }
 0x60e   :  { %1186 = vmatprep.subr.mxu0 %v1155_v57 }
 0x60f   :  { %1187 = vmatpush1.msra.mxu0 %v1154_v58 }
 0x610   :  { %1188 = vmatprep.subr.mxu0 %v1153_v59 }
 0x611   :  { %1189 = vmatpush1.msra.mxu0 %v1152_v60 }
 0x612   :  { %1190 = vmatprep.subr.mxu0 %v1151_v61 }
 0x613   :  { %1191 = vmatpush1.msra.mxu0 %v1150_v62 }
 0x614   :  { %1192 = vmatprep.subr.mxu0 %v1149_v63 }
 0x615   :  { %1193 = vmatpush1.msra.mxu0 %v1148_v0 }
 0x616   :  { %1194 = vmatprep.subr.mxu0 %v1147_v1 }
 0x617   :  { %1195 = vmatpush1.msra.mxu0 %v1146_v2 }
 0x618   :  { %1196 = vmatprep.subr.mxu0 %v1145_v3  ;;  %v1962_v3 = vld [vmem:[#allocation20 + $0xf08] sm:$0xff] }
 0x619   :  { %1197 = vmatpush1.msra.mxu0 %v1144_v5  ;;  %v1961_v5 = vld [vmem:[#allocation20 + $0xf00] sm:$0xff] }
 0x61a   :  { %2753 = vmatprep.subr.mxu0 %v1964_v29  ;;  %v1641_v29 = vld [vmem:[#allocation20 + $0x500] sm:$0xff] }
 0x6ca   :  { %v1113_v6 = vpop.f32.mrf.mxu0 }
 0x6cb   :  { %v1117_v8 = vmul.f32 0.0625, %v1113_v6  ;;  %v1930_v6 = vld [vmem:[#allocation20 + $0xe08] sm:$0xff] }
 0x6cc   :  { %v7358_v11 = vpop.f32.mrf.mxu0 }
 0x6cd   :  { %v1118_v12 = vadd.f32 1e-05, %v1117_v8  ;;  %v1929_v8 = vld [vmem:[#allocation20 + $0xe00] sm:$0xff]  ;;  %v1898_v11 = vld [vmem:[#allocation20 + $0xd08] sm:$0xff] }
 0x6cf   :  { %7616 = vrsqrt.f32 %v1118_v12  ;;  %v1897_v12 = vld [vmem:[#allocation20 + $0xd00] sm:$0xff] }
 0x6dc   :  { %v7617_v13 = vpop.eup %7616 }
 0x6dd   :  { %v1123_v14 = vrot.slane %v7617_v13, %v8769_v10  ;;  %v1866_v13 = vld [vmem:[#allocation20 + $0xc08] sm:$0xff] }
 0x6df   :  { %v1124_v16 = vmul.f32 %v1123_v14, %v1043_v49  ;;  %v1125_v17 = vmul.f32 %v1123_v14, %v1044_v50  ;;  %v1708_v49 = vld [vmem:[#allocation20 + $0x718] sm:$0xff]  ;;  %v1707_v50 = vld [vmem:[#allocation20 + $0x710] sm:$0xff]  ;;  %v1865_v14 = vld [vmem:[#allocation20 + $0xc00] sm:$0xff] }
 0x6e1   :  { %v1132_v19 = vmul.f32 %v7087_v15, %v1124_v16  ;;  %v1133_v20 = vmul.f32 %v7087_v15, %v1125_v17  ;;  %v1834_v15 = vld [vmem:[#allocation20 + $0xb08] sm:$0xff]  ;;  %v1833_v16 = vld [vmem:[#allocation20 + $0xb00] sm:$0xff] }
 0x6e2   :  { %v1802_v17 = vld [vmem:[#allocation20 + $0xa08] sm:$0xff] }
 0x6e3   :  { %v1140_v21 = vadd.f32 %v7088_v18, %v1132_v19  ;;  %v1141_v23 = vadd.f32 %v7088_v18, %v1133_v20  ;;  %v1801_v18 = vld [vmem:[#allocation20 + $0xa00] sm:$0xff]  ;;  %v1770_v19 = vld [vmem:[#allocation20 + $0x908] sm:$0xff] }
 0x6e4   :  { %v1769_v20 = vld [vmem:[#allocation20 + $0x900] sm:$0xff] }
 0x6e5   :  { %v1142_v22 = vmax.f32 %v1140_v21, 0.0  ;;  %v1143_v24 = vmax.f32 %v1141_v23, 0.0  ;;  %v1738_v21 = vld [vmem:[#allocation20 + $0x808] sm:$0xff] }
 0x6e6   :  { %v1706_v23 = vld [vmem:[#allocation20 + $0x708] sm:$0xff] }
 0x6e7   :  { %7089 = vmatmul.mubr.msk.f32.vlgmr.msra.gmra.mxu0 %vm884_vm4, %v1142_v22  ;;  %v1737_v22 = vld [vmem:[#allocation20 + $0x800] sm:$0xff] }
 0x6e8   :  { %1236 = vmatprep.mubr.f32.mxu0 %v8473_v4  ;;  %2754 = vmatpush1.msra.mxu0 %v1963_v30  ;;  %v1643_v30 = vld [vmem:[#allocation20 + $0x510] sm:$0xff] }
 0x6e9   :  { %2755 = vmatprep.subr.mxu0 %v1932_v31  ;;  %v1610_v31 = vld [vmem:[#allocation20 + $0x408] sm:$0xff] }
 0x6ea   :  { %2756 = vmatpush1.msra.mxu0 %v1931_v32  ;;  %v1612_v32 = vld [vmem:[#allocation20 + $0x418] sm:$0xff] }
 0x6eb   :  { %7090 = vmatmul.mubr.msk.f32.gmra.mxu0 %vm884_vm4, %v1143_v24  ;;  %2757 = vmatprep.subr.mxu0 %v1900_v33  ;;  %v1705_v24 = vld [vmem:[#allocation20 + $0x700] sm:$0xff] }
 0x6ec   :  { %2758 = vmatpush1.msra.mxu0 %v1899_v34  ;;  %v1609_v33 = vld [vmem:[#allocation20 + $0x400] sm:$0xff]  ;;  %v1611_v34 = vld [vmem:[#allocation20 + $0x410] sm:$0xff] }
 0x6ed   :  { %2759 = vmatprep.subr.mxu0 %v1868_v35  ;;  %v1578_v35 = vld [vmem:[#allocation20 + $0x308] sm:$0xff] }
 0x6ee   :  { %2760 = vmatpush1.msra.mxu0 %v1867_v36  ;;  %v1580_v36 = vld [vmem:[#allocation20 + $0x318] sm:$0xff] }
 0x6ef   :  { %2761 = vmatprep.subr.mxu0 %v1836_v37  ;;  %v1577_v37 = vld [vmem:[#allocation20 + $0x300] sm:$0xff] }
 0x6f0   :  { %2762 = vmatpush1.msra.mxu0 %v1835_v38  ;;  %v1579_v38 = vld [vmem:[#allocation20 + $0x310] sm:$0xff] }
 0x6f1   :  { %2763 = vmatprep.subr.mxu0 %v1804_v43  ;;  %v1546_v43 = vld [vmem:[#allocation20 + $0x208] sm:$0xff] }
 0x6f2   :  { %2764 = vmatpush1.msra.mxu0 %v1803_v44  ;;  %v1548_v44 = vld [vmem:[#allocation20 + $0x218] sm:$0xff] }
 0x6f3   :  { %2765 = vmatprep.subr.mxu0 %v1772_v45  ;;  %v1545_v45 = vld [vmem:[#allocation20 + $0x200] sm:$0xff] }
 0x6f4   :  { %2766 = vmatpush1.msra.mxu0 %v1771_v46  ;;  %v1547_v46 = vld [vmem:[#allocation20 + $0x210] sm:$0xff] }
 0x6f5   :  { %2767 = vmatprep.subr.mxu0 %v1740_v47  ;;  %v1514_v47 = vld [vmem:[#allocation20 + $0x108] sm:$0xff] }
 0x6f6   :  { %2768 = vmatpush1.msra.mxu0 %v1739_v48  ;;  %v1516_v48 = vld [vmem:[#allocation20 + $0x118] sm:$0xff] }
 0x6f7   :  { %2769 = vmatprep.subr.mxu0 %v1708_v49  ;;  %v1513_v49 = vld [vmem:[#allocation20 + $0x100] sm:$0xff] }
 0x6f8   :  { %2770 = vmatpush1.msra.mxu0 %v1707_v50  ;;  %v1515_v50 = vld [vmem:[#allocation20 + $0x110] sm:$0xff] }
 0x6f9   :  { %2771 = vmatprep.subr.mxu0 %v1676_v51  ;;  %v1482_v51 = vld [vmem:[#allocation20 + $0x8] sm:$0xff] }
 0x6fa   :  { %2772 = vmatpush1.msra.mxu0 %v1675_v52  ;;  %v1484_v52 = vld [vmem:[#allocation20 + $0x18] sm:$0xff] }
 0x7a7   :  { %v1232_v25 = vpop.f32.mrf.mxu0 }
 0x7a9   :  { %v1234_v26 = vpop.f32.mrf.mxu0 }
 0x7ab   :  { %v1238_v27 = vpop.f32.mrf.mxu0 }
 0x7ad   :  { %v1240_v28 = vpop.f32.mrf.mxu0 }
 0x7ae   :  { %1273 = vmatprep.subr.mxu1 %v1240_v28 }
 0x7af   :  { %1274 = vmatpush1.msra.mxu1 %v1238_v27 }
 0x7b0   :  { %1275 = vmatprep.subr.mxu1 %v1234_v26 }
 0x7b1   :  { %1276 = vmatpush1.msra.mxu1 %v1232_v25 }
 0x7b2   :  { %7091 = vmatmul.mubr.msk.f32.vlgmr.msra.gmra.mxu1 %vm696_vm3, %v9537_v7 }
 0x7b3   :  { %1398 = vmatprep.mubr.f32.mxu1 %v8473_v4 }
 0x872   :  { %v1311_v53 = vpop.f32.mrf.mxu1 }
 0x873   :  { %v1316_v54 = vmul.f32 0.0625, %v1311_v53  ;;  %v1481_v53 = vld [vmem:[#allocation20] sm:$0xff] }
 0x874   :  { %v1313_v55 = vpop.f32.mrf.mxu1 }
 0x875   :  { %v1321_v56 = vrot.slane %v1316_v54, %v8769_v10  ;;  %v1317_v57 = vmul.f32 0.0625, %v1313_v55  ;;  %v1483_v54 = vld [vmem:[#allocation20 + $0x10] sm:$0xff]  ;;  %v2474_v55 = vld [vmem:[#allocation20 + $0x1f08] sm:$0xff] }
 0x877   :  { %v1325_v58 = vrot.slane %v1317_v57, %v8769_v10  ;;  %v8812_v59 = vsub.f32 %v1238_v27, %v1321_v56  ;;  %v8818_v62 = vsub.f32 %v1232_v25, %v1321_v56  ;;  %v1674_v25 = vld [vmem:[#allocation20 + $0x608] sm:$0xff]  ;;  %v2476_v56 = vld [vmem:[#allocation20 + $0x1f18] sm:$0xff]  ;;  %v2473_v57 = vld [vmem:[#allocation20 + $0x1f00] sm:$0xff] }
 0x878   :  { %v1642_v27 = vld [vmem:[#allocation20 + $0x508] sm:$0xff] }
 0x879   :  { %v8814_v60 = vsub.f32 %v1234_v26, %v1325_v58  ;;  %v8816_v61 = vsub.f32 %v1240_v28, %v1325_v58  ;;  %v1332_v0 = vmul.f32 %v8812_v59, %v8812_v59  ;;  %v1330_v2 = vmul.f32 %v8818_v62, %v8818_v62  ;;  %v1673_v26 = vld [vmem:[#allocation20 + $0x600] sm:$0xff]  ;;  %v1644_v28 = vld [vmem:[#allocation20 + $0x518] sm:$0xff]  ;;  %v2475_v58 = vld [vmem:[#allocation20 + $0x1f10] sm:$0xff] }
 0x87a   :  { %2773 = vmatprep.subr.mxu0 %v1644_v28  ;;  %v2252_v28 = vld [vmem:[#allocation20 + $0x1818] sm:$0xff] }
 0x87b   :  { %v1333_v63 = vmul.f32 %v8816_v61, %v8816_v61  ;;  %v1331_v1 = vmul.f32 %v8814_v60, %v8814_v60  ;;  %2774 = vmatpush1.msra.mxu0 %v1643_v30  ;;  %v2251_v30 = vld [vmem:[#allocation20 + $0x1810] sm:$0xff] }
 0x87c   :  { %2775 = vmatprep.subr.mxu0 %v1612_v32  ;;  %v2220_v32 = vld [vmem:[#allocation20 + $0x1718] sm:$0xff] }
 0x87d   :  { %1362 = vmatprep.subr.mxu1 %v1333_v63  ;;  %2776 = vmatpush1.msra.mxu0 %v1611_v34  ;;  %v2442_v63 = vld [vmem:[#allocation20 + $0x1e08] sm:$0xff]  ;;  %v2219_v34 = vld [vmem:[#allocation20 + $0x1710] sm:$0xff] }
 0x87e   :  { %1363 = vmatpush1.msra.mxu1 %v1332_v0  ;;  %2777 = vmatprep.subr.mxu0 %v1580_v36  ;;  %v2444_v0 = vld [vmem:[#allocation20 + $0x1e18] sm:$0xff] }
 0x87f   :  { %1364 = vmatprep.subr.mxu1 %v1331_v1  ;;  %2778 = vmatpush1.msra.mxu0 %v1579_v38  ;;  %v2441_v1 = vld [vmem:[#allocation20 + $0x1e00] sm:$0xff]  ;;  %v2188_v36 = vld [vmem:[#allocation20 + $0x1618] sm:$0xff]  ;;  %v2187_v38 = vld [vmem:[#allocation20 + $0x1610] sm:$0xff] }
 0x880   :  { %1365 = vmatpush1.msra.mxu1 %v1330_v2  ;;  %2779 = vmatprep.subr.mxu0 %v1548_v44  ;;  %v2443_v2 = vld [vmem:[#allocation20 + $0x1e10] sm:$0xff]  ;;  %v2156_v44 = vld [vmem:[#allocation20 + $0x1518] sm:$0xff] }
 0x881   :  { %7092 = vmatmul.mubr.msk.f32.vlgmr.msra.gmra.mxu1 %vm696_vm3, %v9537_v7  ;;  %2682 = vmatprep.subr.mxu1 %v1962_v3  ;;  %v2410_v3 = vld [vmem:[#allocation20 + $0x1d08] sm:$0xff] }
 0x882   :  { %2683 = vmatpush1.msra.mxu1 %v1961_v5  ;;  %2780 = vmatpush1.msra.mxu0 %v1547_v46  ;;  %v2412_v5 = vld [vmem:[#allocation20 + $0x1d18] sm:$0xff]  ;;  %v2155_v46 = vld [vmem:[#allocation20 + $0x1510] sm:$0xff] }
 0x883   :  { %2684 = vmatprep.subr.mxu1 %v1930_v6  ;;  %2781 = vmatprep.subr.mxu0 %v1516_v48  ;;  %v2409_v6 = vld [vmem:[#allocation20 + $0x1d00] sm:$0xff]  ;;  %v2124_v48 = vld [vmem:[#allocation20 + $0x1418] sm:$0xff] }
 0x884   :  { %2685 = vmatpush1.msra.mxu1 %v1929_v8  ;;  %2782 = vmatpush1.msra.mxu0 %v1515_v50  ;;  %v2411_v8 = vld [vmem:[#allocation20 + $0x1d10] sm:$0xff] }
 0x885   :  { %2686 = vmatprep.subr.mxu1 %v1898_v11  ;;  %2783 = vmatprep.subr.mxu0 %v1484_v52  ;;  %v2378_v11 = vld [vmem:[#allocation20 + $0x1c08] sm:$0xff]  ;;  %v2123_v50 = vld [vmem:[#allocation20 + $0x1410] sm:$0xff]  ;;  %v2092_v52 = vld [vmem:[#allocation20 + $0x1318] sm:$0xff] }
 0x886   :  { %2687 = vmatpush1.msra.mxu1 %v1897_v12  ;;  %2784 = vmatpush1.msra.mxu0 %v1483_v54  ;;  %v2380_v12 = vld [vmem:[#allocation20 + $0x1c18] sm:$0xff]  ;;  %v2091_v54 = vld [vmem:[#allocation20 + $0x1310] sm:$0xff] }
 0x887   :  { %2688 = vmatprep.subr.mxu1 %v1866_v13  ;;  %2785 = vmatprep.subr.mxu0 %v2476_v56  ;;  %v2377_v13 = vld [vmem:[#allocation20 + $0x1c00] sm:$0xff]  ;;  %v2060_v56 = vld [vmem:[#allocation20 + $0x1218] sm:$0xff] }
 0x888   :  { %2689 = vmatpush1.msra.mxu1 %v1865_v14  ;;  %2786 = vmatpush2.msra.mxu0 %v2475_v58  ;;  %v2379_v14 = vld [vmem:[#allocation20 + $0x1c10] sm:$0xff] }
 0x889   :  { %2690 = vmatprep.subr.mxu1 %v1834_v15  ;;  %2787 = vmatprep.subr.mxu0 %v2444_v0  ;;  %v2346_v15 = vld [vmem:[#allocation20 + $0x1b08] sm:$0xff]  ;;  %v2059_v58 = vld [vmem:[#allocation20 + $0x1210] sm:$0xff]  ;;  %v2028_v0 = vld [vmem:[#allocation20 + $0x1118] sm:$0xff] }
 0x88a   :  { %2691 = vmatpush1.msra.mxu1 %v1833_v16  ;;  %2788 = vmatpush2.msra.mxu0 %v2443_v2  ;;  %v2348_v16 = vld [vmem:[#allocation20 + $0x1b18] sm:$0xff]  ;;  %v2027_v2 = vld [vmem:[#allocation20 + $0x1110] sm:$0xff] }
 0x88b   :  { %2692 = vmatprep.subr.mxu1 %v1802_v17  ;;  %2789 = vmatprep.subr.mxu0 %v2412_v5  ;;  %v2345_v17 = vld [vmem:[#allocation20 + $0x1b00] sm:$0xff]  ;;  %v1996_v5 = vld [vmem:[#allocation20 + $0x1018] sm:$0xff] }
 0x88c   :  { %2693 = vmatpush1.msra.mxu1 %v1801_v18  ;;  %2790 = vmatpush2.msra.mxu0 %v2411_v8  ;;  %v2347_v18 = vld [vmem:[#allocation20 + $0x1b10] sm:$0xff] }
 0x88d   :  { %2694 = vmatprep.subr.mxu1 %v1770_v19  ;;  %2791 = vmatprep.subr.mxu0 %v2380_v12  ;;  %v2314_v19 = vld [vmem:[#allocation20 + $0x1a08] sm:$0xff]  ;;  %v1995_v8 = vld [vmem:[#allocation20 + $0x1010] sm:$0xff]  ;;  %v1968_v12 = vld [vmem:[#allocation20 + $0xf38] sm:$0xff] }
 0x88e   :  { %2695 = vmatpush1.msra.mxu1 %v1769_v20  ;;  %2792 = vmatpush2.msra.mxu0 %v2379_v14  ;;  %v2316_v20 = vld [vmem:[#allocation20 + $0x1a18] sm:$0xff] }
 0x88f   :  { %2696 = vmatprep.subr.mxu1 %v1738_v21  ;;  %2793 = vmatprep.subr.mxu0 %v2348_v16  ;;  %v2313_v21 = vld [vmem:[#allocation20 + $0x1a00] sm:$0xff] }
 0x890   :  { %2697 = vmatpush1.msra.mxu1 %v1737_v22  ;;  %2794 = vmatpush2.msra.mxu0 %v2347_v18  ;;  %v2315_v22 = vld [vmem:[#allocation20 + $0x1a10] sm:$0xff] }
 0x891   :  { %2698 = vmatprep.subr.mxu1 %v1706_v23  ;;  %2795 = vmatprep.subr.mxu0 %v2316_v20  ;;  %v2282_v23 = vld [vmem:[#allocation20 + $0x1908] sm:$0xff]  ;;  %v1244_v20 = vld [vmem:[#allocation19] sm:$0x3] }
 0x892   :  { %2699 = vmatpush1.msra.mxu1 %v1705_v24  ;;  %2796 = vmatpush2.msra.mxu0 %v2315_v22  ;;  %v2284_v24 = vld [vmem:[#allocation20 + $0x1918] sm:$0xff] }
 0x893   :  { %2700 = vmatprep.subr.mxu1 %v1674_v25  ;;  %2797 = vmatprep.subr.mxu0 %v2284_v24  ;;  %v2281_v25 = vld [vmem:[#allocation20 + $0x1900] sm:$0xff] }
 0x894   :  { %2701 = vmatpush1.msra.mxu1 %v1673_v26  ;;  %v2283_v26 = vld [vmem:[#allocation20 + $0x1910] sm:$0xff] }
 0x895   :  { %2702 = vmatprep.subr.mxu1 %v1642_v27  ;;  %2798 = vmatpush2.msra.mxu0 %v2283_v26  ;;  %v2250_v27 = vld [vmem:[#allocation20 + $0x1808] sm:$0xff]  ;;  %v1442_v26 = vrot.slane %v1244_v20, %v8769_v10 }
 0x896   :  { %2703 = vmatpush1.msra.mxu1 %v1641_v29  ;;  %2799 = vmatprep.subr.mxu0 %v2252_v28  ;;  %v2249_v29 = vld [vmem:[#allocation20 + $0x1800] sm:$0xff] }
 0x897   :  { %2704 = vmatprep.subr.mxu1 %v1610_v31  ;;  %2800 = vmatpush2.msra.mxu0 %v2251_v30  ;;  %v2218_v31 = vld [vmem:[#allocation20 + $0x1708] sm:$0xff] }
 0x898   :  { %2705 = vmatpush1.msra.mxu1 %v1609_v33  ;;  %2801 = vmatprep.subr.mxu0 %v2220_v32  ;;  %v2217_v33 = vld [vmem:[#allocation20 + $0x1700] sm:$0xff] }
 0x899   :  { %2706 = vmatprep.subr.mxu1 %v1578_v35  ;;  %2802 = vmatpush2.msra.mxu0 %v2219_v34  ;;  %v2186_v35 = vld [vmem:[#allocation20 + $0x1608] sm:$0xff] }
 0x89a   :  { %2707 = vmatpush1.msra.mxu1 %v1577_v37  ;;  %2803 = vmatprep.subr.mxu0 %v2188_v36  ;;  %v2185_v37 = vld [vmem:[#allocation20 + $0x1600] sm:$0xff] }
 0x89b   :  { %2708 = vmatprep.subr.mxu1 %v1546_v43  ;;  %2804 = vmatpush2.msra.mxu0 %v2187_v38  ;;  %v2154_v43 = vld [vmem:[#allocation20 + $0x1508] sm:$0xff] }
 0x89c   :  { %2709 = vmatpush1.msra.mxu1 %v1545_v45  ;;  %2805 = vmatprep.subr.mxu0 %v2156_v44  ;;  %v2153_v45 = vld [vmem:[#allocation20 + $0x1500] sm:$0xff] }
 0x89d   :  { %2710 = vmatprep.subr.mxu1 %v1514_v47  ;;  %2806 = vmatpush2.msra.mxu0 %v2155_v46  ;;  %v2122_v47 = vld [vmem:[#allocation20 + $0x1408] sm:$0xff] }
 0x89e   :  { %2711 = vmatpush1.msra.mxu1 %v1513_v49  ;;  %2807 = vmatprep.subr.mxu0 %v2124_v48  ;;  %v2121_v49 = vld [vmem:[#allocation20 + $0x1400] sm:$0xff] }
 0x89f   :  { %2712 = vmatprep.subr.mxu1 %v1482_v51  ;;  %2808 = vmatpush2.msra.mxu0 %v2123_v50  ;;  %v2090_v51 = vld [vmem:[#allocation20 + $0x1308] sm:$0xff] }
 0x8a0   :  { %2713 = vmatpush1.msra.mxu1 %v1481_v53  ;;  %2809 = vmatprep.subr.mxu0 %v2092_v52  ;;  %v2089_v53 = vld [vmem:[#allocation20 + $0x1300] sm:$0xff] }
 0x8a1   :  { %2714 = vmatprep.subr.mxu1 %v2474_v55  ;;  %2810 = vmatpush2.msra.mxu0 %v2091_v54  ;;  %v2058_v55 = vld [vmem:[#allocation20 + $0x1208] sm:$0xff] }
 0x8a2   :  { %2715 = vmatpush2.msra.mxu1 %v2473_v57  ;;  %2811 = vmatprep.subr.mxu0 %v2060_v56  ;;  %v2057_v57 = vld [vmem:[#allocation20 + $0x1200] sm:$0xff] }
 0x8a3   :  { %2716 = vmatprep.subr.mxu1 %v2442_v63  ;;  %2812 = vmatpush2.msra.mxu0 %v2059_v58  ;;  %v2026_v63 = vld [vmem:[#allocation20 + $0x1108] sm:$0xff] }
 0x8a4   :  { %2717 = vmatpush2.msra.mxu1 %v2441_v1  ;;  %2813 = vmatprep.subr.mxu0 %v2028_v0  ;;  %v2025_v1 = vld [vmem:[#allocation20 + $0x1100] sm:$0xff] }
 0x8a5   :  { %2718 = vmatprep.subr.mxu1 %v2410_v3  ;;  %2814 = vmatpush2.msra.mxu0 %v2027_v2  ;;  %v1994_v3 = vld [vmem:[#allocation20 + $0x1008] sm:$0xff] }
 0x8a6   :  { %2719 = vmatpush2.msra.mxu1 %v2409_v6  ;;  %2815 = vmatprep.subr.mxu0 %v1996_v5  ;;  %v1993_v6 = vld [vmem:[#allocation20 + $0x1000] sm:$0xff] }
 0x8a7   :  { %2720 = vmatprep.subr.mxu1 %v2378_v11  ;;  %2816 = vmatpush2.msra.mxu0 %v1995_v8  ;;  %v1966_v11 = vld [vmem:[#allocation20 + $0xf28] sm:$0xff] }
 0x8a8   :  { %2721 = vmatpush2.msra.mxu1 %v2377_v13  ;;  %2895 = vmatprep.subr.mxu0 %v1968_v12 }
 0x8a9   :  { %2722 = vmatprep.subr.mxu1 %v2346_v15 }
 0x8aa   :  { %2723 = vmatpush2.msra.mxu1 %v2345_v17 }
 0x8ab   :  { %2724 = vmatprep.subr.mxu1 %v2314_v19  ;;  %v1243_v19 = vld [vmem:[#allocation17] sm:$0x3] }
 0x8ac   :  { %2725 = vmatpush2.msra.mxu1 %v2313_v21  ;;  %v8831_v21 = vsub.s32 1, %v8766_v9  ;;  %v1427_v24 = vrot.slane %v1243_v19, %v8769_v10 }
 0x8ad   :  { %2726 = vmatprep.subr.mxu1 %v2282_v23 }
 0x8ae   :  { %2727 = vmatpush2.msra.mxu1 %v2281_v25  ;;  %v1431_v30 = vrot.slane %v1243_v19, %v8831_v21  ;;  %v1936_v19 = vld [vmem:[#allocation20 + $0xe38] sm:$0xff] }
 0x8af   :  { %2728 = vmatprep.subr.mxu1 %v2250_v27 }
 0x8b0   :  { %2729 = vmatpush2.msra.mxu1 %v2249_v29 }
 0x8b1   :  { %2730 = vmatprep.subr.mxu1 %v2218_v31  ;;  %v1446_v31 = vrot.slane %v1244_v20, %v8831_v21  ;;  %v1933_v20 = vld [vmem:[#allocation20 + $0xe20] sm:$0xff] }
 0x8b2   :  { %2731 = vmatpush2.msra.mxu1 %v2217_v33 }
 0x8b3   :  { %2732 = vmatprep.subr.mxu1 %v2186_v35 }
 0x8b4   :  { %2733 = vmatpush2.msra.mxu1 %v2185_v37 }
 0x8b5   :  { %2734 = vmatprep.subr.mxu1 %v2154_v43 }
 0x8b6   :  { %2735 = vmatpush2.msra.mxu1 %v2153_v45 }
 0x8b7   :  { %2736 = vmatprep.subr.mxu1 %v2122_v47 }
 0x8b8   :  { %2737 = vmatpush2.msra.mxu1 %v2121_v49 }
 0x8b9   :  { %2738 = vmatprep.subr.mxu1 %v2090_v51 }
 0x8ba   :  { %2739 = vmatpush2.msra.mxu1 %v2089_v53 }
 0x8bb   :  { %2740 = vmatprep.subr.mxu1 %v2058_v55 }
 0x8bc   :  { %2741 = vmatpush2.msra.mxu1 %v2057_v57 }
 0x8bd   :  { %2742 = vmatprep.subr.mxu1 %v2026_v63 }
 0x8be   :  { %2743 = vmatpush2.msra.mxu1 %v2025_v1 }
 0x8bf   :  { %2744 = vmatprep.subr.mxu1 %v1994_v3 }
 0x8c0   :  { %2745 = vmatpush2.msra.mxu1 %v1993_v6 }
 0x8c1   :  { %2824 = vmatprep.subr.mxu1 %v1966_v11 }
 0x941   :  { %v1400_v13 = vpop.f32.mrf.mxu1 }
 0x942   :  { %v1405_v14 = vmul.f32 0.0625, %v1400_v13 }
 0x943   :  { %v1402_v15 = vpop.f32.mrf.mxu1 }
 0x944   :  { %v1407_v16 = vadd.f32 1e-05, %v1405_v14  ;;  %v1406_v17 = vmul.f32 0.0625, %v1402_v15  ;;  %v1965_v15 = vld [vmem:[#allocation20 + $0xf20] sm:$0xff] }
 0x946   :  { %7618 = vrsqrt.f32 %v1407_v16  ;;  %v1408_v18 = vadd.f32 1e-05, %v1406_v17  ;;  %v1967_v16 = vld [vmem:[#allocation20 + $0xf30] sm:$0xff] }
 0x948   :  { %7620 = vrsqrt.f32 %v1408_v18  ;;  %v1934_v18 = vld [vmem:[#allocation20 + $0xe28] sm:$0xff] }
 0x953   :  { %v7619_v22 = vpop.eup %7618 }
 0x954   :  { %v1414_v23 = vrot.slane %v7619_v22, %v8769_v10  ;;  %v1935_v22 = vld [vmem:[#allocation20 + $0xe30] sm:$0xff] }
 0x955   :  { %v7621_v25 = vpop.eup %7620 }
 0x956   :  { %v1419_v27 = vmul.f32 %v1414_v23, %v8818_v62  ;;  %v1421_v28 = vmul.f32 %v1414_v23, %v8812_v59  ;;  %v1418_v29 = vrot.slane %v7621_v25, %v8769_v10  ;;  %v1902_v23 = vld [vmem:[#allocation20 + $0xd28] sm:$0xff]  ;;  %v1901_v25 = vld [vmem:[#allocation20 + $0xd20] sm:$0xff] }
 0x958   :  { %v1434_v32 = vmul.f32 %v1427_v24, %v1419_v27  ;;  %v1436_v33 = vmul.f32 %v1427_v24, %v1421_v28  ;;  %v1420_v34 = vmul.f32 %v1418_v29, %v8814_v60  ;;  %v1422_v35 = vmul.f32 %v1418_v29, %v8816_v61  ;;  %v1904_v24 = vld [vmem:[#allocation20 + $0xd38] sm:$0xff]  ;;  %v1870_v27 = vld [vmem:[#allocation20 + $0xc28] sm:$0xff]  ;;  %v1869_v29 = vld [vmem:[#allocation20 + $0xc20] sm:$0xff] }
 0x959   :  { %v1872_v28 = vld [vmem:[#allocation20 + $0xc38] sm:$0xff] }
 0x95a   :  { %v1449_v36 = vadd.f32 %v1442_v26, %v1434_v32  ;;  %v1451_v37 = vadd.f32 %v1442_v26, %v1436_v33  ;;  %v1435_v38 = vmul.f32 %v1431_v30, %v1420_v34  ;;  %v1437_v43 = vmul.f32 %v1431_v30, %v1422_v35  ;;  %v1903_v26 = vld [vmem:[#allocation20 + $0xd30] sm:$0xff]  ;;  %v1840_v32 = vld [vmem:[#allocation20 + $0xb38] sm:$0xff]  ;;  %v1837_v33 = vld [vmem:[#allocation20 + $0xb20] sm:$0xff] }
 0x95b   :  { %v1871_v30 = vld [vmem:[#allocation20 + $0xc30] sm:$0xff]  ;;  %v1806_v35 = vld [vmem:[#allocation20 + $0xa28] sm:$0xff] }
 0x95c   :  { %v1453_v44 = vmax.f32 %v1449_v36, 0.0  ;;  %v1455_v62 = vmax.f32 %v1451_v37, 0.0  ;;  %v1450_v45 = vadd.f32 %v1446_v31, %v1435_v38  ;;  %v1452_v59 = vadd.f32 %v1446_v31, %v1437_v43  ;;  %v1838_v31 = vld [vmem:[#allocation20 + $0xb28] sm:$0xff]  ;;  %v1839_v34 = vld [vmem:[#allocation20 + $0xb30] sm:$0xff]  ;;  %v1808_v36 = vld [vmem:[#allocation20 + $0xa38] sm:$0xff] }
 0x95d   :  { %v1805_v37 = vld [vmem:[#allocation20 + $0xa20] sm:$0xff]  ;;  %v1807_v38 = vld [vmem:[#allocation20 + $0xa30] sm:$0xff]  ;;  %v1774_v43 = vld [vmem:[#allocation20 + $0x928] sm:$0xff] }
 0x95e   :  { %v1457_v46 = vrot.slane %v1453_v44, 4  ;;  %v1469_v47 = vrot.slane %v1455_v62, 4  ;;  %v1454_v48 = vmax.f32 %v1450_v45, 0.0  ;;  %v1456_v49 = vmax.f32 %v1452_v59, 0.0  ;;  %v1775_v45 = vld [vmem:[#allocation20 + $0x930] sm:$0xff]  ;;  %v1742_v59 = vld [vmem:[#allocation20 + $0x828] sm:$0xff] }
 0x960   :  { %v1458_v50 = vmax.f32 %v1453_v44, %v1457_v46  ;;  %v1470_v51 = vmax.f32 %v1455_v62, %v1469_v47  ;;  %v1463_v52 = vrot.slane %v1454_v48, 4  ;;  %v1475_v53 = vrot.slane %v1456_v49, 4  ;;  %v1776_v44 = vld [vmem:[#allocation20 + $0x938] sm:$0xff]  ;;  %v1773_v62 = vld [vmem:[#allocation20 + $0x920] sm:$0xff] }
 0x961   :  { %v1744_v46 = vld [vmem:[#allocation20 + $0x838] sm:$0xff]  ;;  %v1741_v47 = vld [vmem:[#allocation20 + $0x820] sm:$0xff] }
 0x962   :  { %v1459_v54 = vrot.slane %v1458_v50, 2  ;;  %v1471_v60 = vrot.slane %v1470_v51, 2  ;;  %v1464_v55 = vmax.f32 %v1454_v48, %v1463_v52  ;;  %v1476_v61 = vmax.f32 %v1456_v49, %v1475_v53  ;;  %v1743_v48 = vld [vmem:[#allocation20 + $0x830] sm:$0xff]  ;;  %v1710_v49 = vld [vmem:[#allocation20 + $0x728] sm:$0xff] }
 0x963   :  { %v1711_v52 = vld [vmem:[#allocation20 + $0x730] sm:$0xff]  ;;  %v1678_v53 = vld [vmem:[#allocation20 + $0x628] sm:$0xff] }
 0x964   :  { %v1460_v56 = vmax.f32 %v1458_v50, %v1459_v54  ;;  %v1472_v57 = vmax.f32 %v1470_v51, %v1471_v60  ;;  %v1465_v58 = vrot.slane %v1464_v55, 2  ;;  %v1477_v63 = vrot.slane %v1476_v61, 2  ;;  %v1712_v50 = vld [vmem:[#allocation20 + $0x738] sm:$0xff]  ;;  %v1709_v51 = vld [vmem:[#allocation20 + $0x720] sm:$0xff] }
 0x965   :  { %v1680_v54 = vld [vmem:[#allocation20 + $0x638] sm:$0xff]  ;;  %v1677_v60 = vld [vmem:[#allocation20 + $0x620] sm:$0xff] }
 0x966   :  { %v1461_v0 = vrot.slane %v1460_v56, 1  ;;  %v1473_v1 = vrot.slane %v1472_v57, 1  ;;  %v1466_v2 = vmax.f32 %v1464_v55, %v1465_v58  ;;  %v1478_v3 = vmax.f32 %v1476_v61, %v1477_v63  ;;  %v1679_v55 = vld [vmem:[#allocation20 + $0x630] sm:$0xff]  ;;  %v1646_v61 = vld [vmem:[#allocation20 + $0x528] sm:$0xff] }
 0x967   :  { %v1647_v58 = vld [vmem:[#allocation20 + $0x530] sm:$0xff]  ;;  %v1614_v63 = vld [vmem:[#allocation20 + $0x428] sm:$0xff] }
 0x968   :  { %v1467_v5 = vrot.slane %v1466_v2, 1  ;;  %v1479_v6 = vrot.slane %v1478_v3, 1  ;;  %v1462_v8 = vmax.f32 %v1460_v56, %v1461_v0  ;;  %v1474_v11 = vmax.f32 %v1472_v57, %v1473_v1  ;;  %v1648_v56 = vld [vmem:[#allocation20 + $0x538] sm:$0xff]  ;;  %v1645_v57 = vld [vmem:[#allocation20 + $0x520] sm:$0xff] }
 0x969   :  { %v1616_v0 = vld [vmem:[#allocation20 + $0x438] sm:$0xff]  ;;  %v1613_v1 = vld [vmem:[#allocation20 + $0x420] sm:$0xff] }
 0x96a   :  { %v1468_v12 = vmax.f32 %v1466_v2, %v1467_v5  ;;  %v1480_v13 = vmax.f32 %v1478_v3, %v1479_v6  ;;  %v8847_v17 = vsel %vm2677_vm5, %v1474_v11, %v1462_v8  ;;  %v1615_v2 = vld [vmem:[#allocation20 + $0x430] sm:$0xff]  ;;  %v1582_v3 = vld [vmem:[#allocation20 + $0x328] sm:$0xff]  ;;  %v1584_v5 = vld [vmem:[#allocation20 + $0x338] sm:$0xff] }
 0x96b   :  { %v1581_v6 = vld [vmem:[#allocation20 + $0x320] sm:$0xff]  ;;  %v1583_v8 = vld [vmem:[#allocation20 + $0x330] sm:$0xff]  ;;  %v1550_v11 = vld [vmem:[#allocation20 + $0x228] sm:$0xff] }
 0x96c   :  { %v8844_v14 = vsel %vm2677_vm5, %v1480_v13, %v1468_v12  ;;  %v1552_v12 = vld [vmem:[#allocation20 + $0x238] sm:$0xff]  ;;  %v1549_v13 = vld [vmem:[#allocation20 + $0x220] sm:$0xff] }
 0x96d   :  { %2746 = vmatprep.mubr.f32.mxu1 %v8844_v14  ;;  %2817 = vmatprep.mubr.f32.mxu0 %v8844_v14 }
 0x96e   :  { %2747 = vmatmul.mubr.f32.vlgmr.msra.gmra.mxu1 %v8847_v17  ;;  %2818 = vmatmul.mubr.f32.vlgmr.msra.gmra.mxu0 %v8847_v17 }
 0x96f   :  { %2825 = vmatpush1.msra.mxu1 %v1965_v15  ;;  %2896 = vmatpush1.msra.mxu0 %v1967_v16  ;;  %v1551_v15 = vld [vmem:[#allocation20 + $0x230] sm:$0xff]  ;;  %v1518_v16 = vld [vmem:[#allocation20 + $0x128] sm:$0xff] }
 0x970   :  { %2826 = vmatprep.subr.mxu1 %v1934_v18  ;;  %2888 = vmatprep.mubr.f32.mxu1 %v8844_v14  ;;  %v1520_v18 = vld [vmem:[#allocation20 + $0x138] sm:$0xff] }
 0x971   :  { %2897 = vmatprep.subr.mxu0 %v1936_v19  ;;  %2959 = vmatprep.mubr.f32.mxu0 %v8844_v14  ;;  %v1517_v19 = vld [vmem:[#allocation20 + $0x120] sm:$0xff] }
 0x972   :  { %2827 = vmatpush1.msra.mxu1 %v1933_v20  ;;  %2898 = vmatpush1.msra.mxu0 %v1935_v22  ;;  %v1519_v20 = vld [vmem:[#allocation20 + $0x130] sm:$0xff]  ;;  %v1486_v22 = vld [vmem:[#allocation20 + $0x28] sm:$0xff] }
 0x973   :  { %2828 = vmatprep.subr.mxu1 %v1902_v23  ;;  %2899 = vmatprep.subr.mxu0 %v1904_v24  ;;  %v1488_v23 = vld [vmem:[#allocation20 + $0x38] sm:$0xff]  ;;  %v1485_v24 = vld [vmem:[#allocation20 + $0x20] sm:$0xff] }
 0x974   :  { %2829 = vmatpush1.msra.mxu1 %v1901_v25  ;;  %2900 = vmatpush1.msra.mxu0 %v1903_v26  ;;  %v1487_v25 = vld [vmem:[#allocation20 + $0x30] sm:$0xff]  ;;  %v2478_v26 = vld [vmem:[#allocation20 + $0x1f28] sm:$0xff] }
 0x975   :  { %2830 = vmatprep.subr.mxu1 %v1870_v27  ;;  %2901 = vmatprep.subr.mxu0 %v1872_v28  ;;  %v2480_v27 = vld [vmem:[#allocation20 + $0x1f38] sm:$0xff]  ;;  %v2477_v28 = vld [vmem:[#allocation20 + $0x1f20] sm:$0xff] }
 0x976   :  { %2831 = vmatpush1.msra.mxu1 %v1869_v29  ;;  %2902 = vmatpush1.msra.mxu0 %v1871_v30  ;;  %v2479_v29 = vld [vmem:[#allocation20 + $0x1f30] sm:$0xff]  ;;  %v2446_v30 = vld [vmem:[#allocation20 + $0x1e28] sm:$0xff] }
 0x977   :  { %2832 = vmatprep.subr.mxu1 %v1838_v31  ;;  %2903 = vmatprep.subr.mxu0 %v1840_v32  ;;  %v2448_v31 = vld [vmem:[#allocation20 + $0x1e38] sm:$0xff]  ;;  %v2445_v32 = vld [vmem:[#allocation20 + $0x1e20] sm:$0xff] }
 0x978   :  { %2833 = vmatpush1.msra.mxu1 %v1837_v33  ;;  %2904 = vmatpush1.msra.mxu0 %v1839_v34  ;;  %v2447_v33 = vld [vmem:[#allocation20 + $0x1e30] sm:$0xff]  ;;  %v2414_v34 = vld [vmem:[#allocation20 + $0x1d28] sm:$0xff] }
 0x979   :  { %2834 = vmatprep.subr.mxu1 %v1806_v35  ;;  %2905 = vmatprep.subr.mxu0 %v1808_v36  ;;  %v2416_v35 = vld [vmem:[#allocation20 + $0x1d38] sm:$0xff]  ;;  %v2413_v36 = vld [vmem:[#allocation20 + $0x1d20] sm:$0xff] }
 0x97a   :  { %2835 = vmatpush1.msra.mxu1 %v1805_v37  ;;  %2906 = vmatpush1.msra.mxu0 %v1807_v38  ;;  %v2415_v37 = vld [vmem:[#allocation20 + $0x1d30] sm:$0xff]  ;;  %v2382_v38 = vld [vmem:[#allocation20 + $0x1c28] sm:$0xff] }
 0x97b   :  { %2836 = vmatprep.subr.mxu1 %v1774_v43  ;;  %2907 = vmatprep.subr.mxu0 %v1776_v44  ;;  %v2384_v43 = vld [vmem:[#allocation20 + $0x1c38] sm:$0xff]  ;;  %v2381_v44 = vld [vmem:[#allocation20 + $0x1c20] sm:$0xff] }
 0x97c   :  { %2837 = vmatpush1.msra.mxu1 %v1773_v62  ;;  %2908 = vmatpush1.msra.mxu0 %v1775_v45  ;;  %v2383_v62 = vld [vmem:[#allocation20 + $0x1c30] sm:$0xff]  ;;  %v2350_v45 = vld [vmem:[#allocation20 + $0x1b28] sm:$0xff] }
 0x97d   :  { %2838 = vmatprep.subr.mxu1 %v1742_v59  ;;  %2909 = vmatprep.subr.mxu0 %v1744_v46  ;;  %v2352_v59 = vld [vmem:[#allocation20 + $0x1b38] sm:$0xff]  ;;  %v2349_v46 = vld [vmem:[#allocation20 + $0x1b20] sm:$0xff] }
 0x97e   :  { %2839 = vmatpush1.msra.mxu1 %v1741_v47  ;;  %2910 = vmatpush1.msra.mxu0 %v1743_v48  ;;  %v2351_v47 = vld [vmem:[#allocation20 + $0x1b30] sm:$0xff]  ;;  %v2318_v48 = vld [vmem:[#allocation20 + $0x1a28] sm:$0xff] }
 0x97f   :  { %2840 = vmatprep.subr.mxu1 %v1710_v49  ;;  %2911 = vmatprep.subr.mxu0 %v1712_v50  ;;  %v2320_v49 = vld [vmem:[#allocation20 + $0x1a38] sm:$0xff]  ;;  %v2317_v50 = vld [vmem:[#allocation20 + $0x1a20] sm:$0xff] }
 0x980   :  { %2841 = vmatpush1.msra.mxu1 %v1709_v51  ;;  %2912 = vmatpush1.msra.mxu0 %v1711_v52  ;;  %v2319_v51 = vld [vmem:[#allocation20 + $0x1a30] sm:$0xff]  ;;  %v2286_v52 = vld [vmem:[#allocation20 + $0x1928] sm:$0xff] }
 0x981   :  { %2842 = vmatprep.subr.mxu1 %v1678_v53  ;;  %2913 = vmatprep.subr.mxu0 %v1680_v54  ;;  %v2288_v53 = vld [vmem:[#allocation20 + $0x1938] sm:$0xff]  ;;  %v2285_v54 = vld [vmem:[#allocation20 + $0x1920] sm:$0xff] }
 0x982   :  { %2843 = vmatpush1.msra.mxu1 %v1677_v60  ;;  %2914 = vmatpush1.msra.mxu0 %v1679_v55  ;;  %v2287_v60 = vld [vmem:[#allocation20 + $0x1930] sm:$0xff]  ;;  %v2254_v55 = vld [vmem:[#allocation20 + $0x1828] sm:$0xff] }
 0x983   :  { %2844 = vmatprep.subr.mxu1 %v1646_v61  ;;  %2915 = vmatprep.subr.mxu0 %v1648_v56  ;;  %v2256_v61 = vld [vmem:[#allocation20 + $0x1838] sm:$0xff]  ;;  %v2253_v56 = vld [vmem:[#allocation20 + $0x1820] sm:$0xff] }
 0x984   :  { %2845 = vmatpush1.msra.mxu1 %v1645_v57  ;;  %2916 = vmatpush1.msra.mxu0 %v1647_v58  ;;  %v2255_v57 = vld [vmem:[#allocation20 + $0x1830] sm:$0xff]  ;;  %v2222_v58 = vld [vmem:[#allocation20 + $0x1728] sm:$0xff] }
 0x985   :  { %2846 = vmatprep.subr.mxu1 %v1614_v63  ;;  %2917 = vmatprep.subr.mxu0 %v1616_v0  ;;  %v2224_v63 = vld [vmem:[#allocation20 + $0x1738] sm:$0xff]  ;;  %v2221_v0 = vld [vmem:[#allocation20 + $0x1720] sm:$0xff] }
 0x986   :  { %2847 = vmatpush1.msra.mxu1 %v1613_v1  ;;  %2918 = vmatpush1.msra.mxu0 %v1615_v2  ;;  %v2223_v1 = vld [vmem:[#allocation20 + $0x1730] sm:$0xff]  ;;  %v2190_v2 = vld [vmem:[#allocation20 + $0x1628] sm:$0xff] }
 0x987   :  { %2848 = vmatprep.subr.mxu1 %v1582_v3  ;;  %2919 = vmatprep.subr.mxu0 %v1584_v5  ;;  %v2192_v3 = vld [vmem:[#allocation20 + $0x1638] sm:$0xff]  ;;  %v2189_v5 = vld [vmem:[#allocation20 + $0x1620] sm:$0xff] }
 0x988   :  { %2849 = vmatpush1.msra.mxu1 %v1581_v6  ;;  %2920 = vmatpush1.msra.mxu0 %v1583_v8  ;;  %v2191_v6 = vld [vmem:[#allocation20 + $0x1630] sm:$0xff]  ;;  %v2158_v8 = vld [vmem:[#allocation20 + $0x1528] sm:$0xff] }
 0x989   :  { %2850 = vmatprep.subr.mxu1 %v1550_v11  ;;  %2921 = vmatprep.subr.mxu0 %v1552_v12  ;;  %v2160_v11 = vld [vmem:[#allocation20 + $0x1538] sm:$0xff]  ;;  %v2157_v12 = vld [vmem:[#allocation20 + $0x1520] sm:$0xff] }
 0x98a   :  { %2851 = vmatpush1.msra.mxu1 %v1549_v13  ;;  %2922 = vmatpush1.msra.mxu0 %v1551_v15  ;;  %v2159_v13 = vld [vmem:[#allocation20 + $0x1530] sm:$0xff]  ;;  %v2126_v15 = vld [vmem:[#allocation20 + $0x1428] sm:$0xff] }
 0x98b   :  { %2852 = vmatprep.subr.mxu1 %v1518_v16  ;;  %2923 = vmatprep.subr.mxu0 %v1520_v18  ;;  %v2128_v16 = vld [vmem:[#allocation20 + $0x1438] sm:$0xff]  ;;  %v2125_v18 = vld [vmem:[#allocation20 + $0x1420] sm:$0xff] }
 0x98c   :  { %2853 = vmatpush1.msra.mxu1 %v1517_v19  ;;  %2924 = vmatpush1.msra.mxu0 %v1519_v20  ;;  %v2127_v19 = vld [vmem:[#allocation20 + $0x1430] sm:$0xff]  ;;  %v2094_v20 = vld [vmem:[#allocation20 + $0x1328] sm:$0xff] }
 0x98d   :  { %2854 = vmatprep.subr.mxu1 %v1486_v22  ;;  %2925 = vmatprep.subr.mxu0 %v1488_v23  ;;  %v2096_v22 = vld [vmem:[#allocation20 + $0x1338] sm:$0xff]  ;;  %v2093_v23 = vld [vmem:[#allocation20 + $0x1320] sm:$0xff] }
 0x98e   :  { %2855 = vmatpush1.msra.mxu1 %v1485_v24  ;;  %2926 = vmatpush1.msra.mxu0 %v1487_v25  ;;  %v2095_v24 = vld [vmem:[#allocation20 + $0x1330] sm:$0xff]  ;;  %v2062_v25 = vld [vmem:[#allocation20 + $0x1228] sm:$0xff] }
 0x98f   :  { %2856 = vmatprep.subr.mxu1 %v2478_v26  ;;  %2927 = vmatprep.subr.mxu0 %v2480_v27  ;;  %v2064_v26 = vld [vmem:[#allocation20 + $0x1238] sm:$0xff]  ;;  %v2061_v27 = vld [vmem:[#allocation20 + $0x1220] sm:$0xff] }
 0x990   :  { %2857 = vmatpush2.msra.mxu1 %v2477_v28  ;;  %2928 = vmatpush2.msra.mxu0 %v2479_v29  ;;  %v2063_v28 = vld [vmem:[#allocation20 + $0x1230] sm:$0xff]  ;;  %v2030_v29 = vld [vmem:[#allocation20 + $0x1128] sm:$0xff] }
 0x991   :  { %2858 = vmatprep.subr.mxu1 %v2446_v30  ;;  %2929 = vmatprep.subr.mxu0 %v2448_v31  ;;  %v2032_v30 = vld [vmem:[#allocation20 + $0x1138] sm:$0xff]  ;;  %v2029_v31 = vld [vmem:[#allocation20 + $0x1120] sm:$0xff] }
 0x992   :  { %2859 = vmatpush2.msra.mxu1 %v2445_v32  ;;  %2930 = vmatpush2.msra.mxu0 %v2447_v33  ;;  %v2031_v32 = vld [vmem:[#allocation20 + $0x1130] sm:$0xff]  ;;  %v1998_v33 = vld [vmem:[#allocation20 + $0x1028] sm:$0xff] }
 0x993   :  { %2860 = vmatprep.subr.mxu1 %v2414_v34  ;;  %2931 = vmatprep.subr.mxu0 %v2416_v35  ;;  %v2000_v34 = vld [vmem:[#allocation20 + $0x1038] sm:$0xff]  ;;  %v1997_v35 = vld [vmem:[#allocation20 + $0x1020] sm:$0xff] }
 0x994   :  { %2861 = vmatpush2.msra.mxu1 %v2413_v36  ;;  %2932 = vmatpush2.msra.mxu0 %v2415_v37  ;;  %v1999_v36 = vld [vmem:[#allocation20 + $0x1030] sm:$0xff]  ;;  %v1970_v37 = vld [vmem:[#allocation20 + $0xf48] sm:$0xff] }
 0x995   :  { %2862 = vmatprep.subr.mxu1 %v2382_v38  ;;  %2933 = vmatprep.subr.mxu0 %v2384_v43  ;;  %v1972_v38 = vld [vmem:[#allocation20 + $0xf58] sm:$0xff]  ;;  %v1969_v43 = vld [vmem:[#allocation20 + $0xf40] sm:$0xff] }
 0x996   :  { %2863 = vmatpush2.msra.mxu1 %v2381_v44  ;;  %2934 = vmatpush2.msra.mxu0 %v2383_v62  ;;  %v1971_v44 = vld [vmem:[#allocation20 + $0xf50] sm:$0xff]  ;;  %v1938_v62 = vld [vmem:[#allocation20 + $0xe48] sm:$0xff] }
 0x997   :  { %2864 = vmatprep.subr.mxu1 %v2350_v45  ;;  %2935 = vmatprep.subr.mxu0 %v2352_v59  ;;  %v1940_v45 = vld [vmem:[#allocation20 + $0xe58] sm:$0xff]  ;;  %v1937_v59 = vld [vmem:[#allocation20 + $0xe40] sm:$0xff] }
 0x998   :  { %2865 = vmatpush2.msra.mxu1 %v2349_v46  ;;  %2936 = vmatpush2.msra.mxu0 %v2351_v47  ;;  %v1939_v46 = vld [vmem:[#allocation20 + $0xe50] sm:$0xff]  ;;  %v1906_v47 = vld [vmem:[#allocation20 + $0xd48] sm:$0xff] }
 0x999   :  { %2866 = vmatprep.subr.mxu1 %v2318_v48  ;;  %2937 = vmatprep.subr.mxu0 %v2320_v49  ;;  %v1908_v48 = vld [vmem:[#allocation20 + $0xd58] sm:$0xff]  ;;  %v1905_v49 = vld [vmem:[#allocation20 + $0xd40] sm:$0xff] }
 0x99a   :  { %2867 = vmatpush2.msra.mxu1 %v2317_v50  ;;  %2938 = vmatpush2.msra.mxu0 %v2319_v51  ;;  %v1907_v50 = vld [vmem:[#allocation20 + $0xd50] sm:$0xff]  ;;  %v1874_v51 = vld [vmem:[#allocation20 + $0xc48] sm:$0xff] }
 0x99b   :  { %2868 = vmatprep.subr.mxu1 %v2286_v52  ;;  %2939 = vmatprep.subr.mxu0 %v2288_v53  ;;  %v1876_v52 = vld [vmem:[#allocation20 + $0xc58] sm:$0xff]  ;;  %v1873_v53 = vld [vmem:[#allocation20 + $0xc40] sm:$0xff] }
 0x99c   :  { %2869 = vmatpush2.msra.mxu1 %v2285_v54  ;;  %2940 = vmatpush2.msra.mxu0 %v2287_v60  ;;  %v1875_v54 = vld [vmem:[#allocation20 + $0xc50] sm:$0xff]  ;;  %v1842_v60 = vld [vmem:[#allocation20 + $0xb48] sm:$0xff] }
 0x99d   :  { %2870 = vmatprep.subr.mxu1 %v2254_v55  ;;  %2941 = vmatprep.subr.mxu0 %v2256_v61  ;;  %v1844_v55 = vld [vmem:[#allocation20 + $0xb58] sm:$0xff]  ;;  %v1841_v61 = vld [vmem:[#allocation20 + $0xb40] sm:$0xff] }
 0x99e   :  { %2871 = vmatpush2.msra.mxu1 %v2253_v56  ;;  %2942 = vmatpush2.msra.mxu0 %v2255_v57  ;;  %v1843_v56 = vld [vmem:[#allocation20 + $0xb50] sm:$0xff]  ;;  %v1810_v57 = vld [vmem:[#allocation20 + $0xa48] sm:$0xff] }
 0x99f   :  { %2872 = vmatprep.subr.mxu1 %v2222_v58  ;;  %2943 = vmatprep.subr.mxu0 %v2224_v63  ;;  %v1812_v58 = vld [vmem:[#allocation20 + $0xa58] sm:$0xff]  ;;  %v1809_v63 = vld [vmem:[#allocation20 + $0xa40] sm:$0xff] }
 0x9a0   :  { %2873 = vmatpush2.msra.mxu1 %v2221_v0  ;;  %2944 = vmatpush2.msra.mxu0 %v2223_v1  ;;  %v1811_v0 = vld [vmem:[#allocation20 + $0xa50] sm:$0xff]  ;;  %v1778_v1 = vld [vmem:[#allocation20 + $0x948] sm:$0xff] }
 0x9a1   :  { %2874 = vmatprep.subr.mxu1 %v2190_v2  ;;  %2945 = vmatprep.subr.mxu0 %v2192_v3  ;;  %v1780_v2 = vld [vmem:[#allocation20 + $0x958] sm:$0xff]  ;;  %v1777_v3 = vld [vmem:[#allocation20 + $0x940] sm:$0xff] }
 0x9a2   :  { %2875 = vmatpush2.msra.mxu1 %v2189_v5  ;;  %2946 = vmatpush2.msra.mxu0 %v2191_v6  ;;  %v1779_v5 = vld [vmem:[#allocation20 + $0x950] sm:$0xff]  ;;  %v1746_v6 = vld [vmem:[#allocation20 + $0x848] sm:$0xff] }
 0x9a3   :  { %2876 = vmatprep.subr.mxu1 %v2158_v8  ;;  %2947 = vmatprep.subr.mxu0 %v2160_v11  ;;  %v1748_v8 = vld [vmem:[#allocation20 + $0x858] sm:$0xff]  ;;  %v1745_v11 = vld [vmem:[#allocation20 + $0x840] sm:$0xff] }
 0x9a4   :  { %2877 = vmatpush2.msra.mxu1 %v2157_v12  ;;  %2948 = vmatpush2.msra.mxu0 %v2159_v13  ;;  %v1747_v12 = vld [vmem:[#allocation20 + $0x850] sm:$0xff]  ;;  %v1714_v13 = vld [vmem:[#allocation20 + $0x748] sm:$0xff] }
 0x9a5   :  { %2878 = vmatprep.subr.mxu1 %v2126_v15  ;;  %2949 = vmatprep.subr.mxu0 %v2128_v16  ;;  %v1716_v15 = vld [vmem:[#allocation20 + $0x758] sm:$0xff]  ;;  %v1713_v16 = vld [vmem:[#allocation20 + $0x740] sm:$0xff] }
 0x9a6   :  { %2879 = vmatpush2.msra.mxu1 %v2125_v18  ;;  %2950 = vmatpush2.msra.mxu0 %v2127_v19  ;;  %v1715_v18 = vld [vmem:[#allocation20 + $0x750] sm:$0xff]  ;;  %v1682_v19 = vld [vmem:[#allocation20 + $0x648] sm:$0xff] }
 0x9a7   :  { %2880 = vmatprep.subr.mxu1 %v2094_v20  ;;  %2951 = vmatprep.subr.mxu0 %v2096_v22  ;;  %v1684_v20 = vld [vmem:[#allocation20 + $0x658] sm:$0xff]  ;;  %v1681_v22 = vld [vmem:[#allocation20 + $0x640] sm:$0xff] }
 0x9a8   :  { %2881 = vmatpush2.msra.mxu1 %v2093_v23  ;;  %2952 = vmatpush2.msra.mxu0 %v2095_v24  ;;  %v1683_v23 = vld [vmem:[#allocation20 + $0x650] sm:$0xff]  ;;  %v1650_v24 = vld [vmem:[#allocation20 + $0x548] sm:$0xff] }
 0x9a9   :  { %2882 = vmatprep.subr.mxu1 %v2062_v25  ;;  %2953 = vmatprep.subr.mxu0 %v2064_v26  ;;  %v1652_v25 = vld [vmem:[#allocation20 + $0x558] sm:$0xff]  ;;  %v1649_v26 = vld [vmem:[#allocation20 + $0x540] sm:$0xff] }
 0x9aa   :  { %2883 = vmatpush2.msra.mxu1 %v2061_v27  ;;  %2954 = vmatpush2.msra.mxu0 %v2063_v28  ;;  %v1651_v27 = vld [vmem:[#allocation20 + $0x550] sm:$0xff]  ;;  %v1618_v28 = vld [vmem:[#allocation20 + $0x448] sm:$0xff] }
 0x9ab   :  { %2884 = vmatprep.subr.mxu1 %v2030_v29  ;;  %2955 = vmatprep.subr.mxu0 %v2032_v30  ;;  %v1620_v29 = vld [vmem:[#allocation20 + $0x458] sm:$0xff]  ;;  %v1617_v30 = vld [vmem:[#allocation20 + $0x440] sm:$0xff] }
 0x9ac   :  { %2885 = vmatpush2.msra.mxu1 %v2029_v31  ;;  %2956 = vmatpush2.msra.mxu0 %v2031_v32  ;;  %v1619_v31 = vld [vmem:[#allocation20 + $0x450] sm:$0xff]  ;;  %v1586_v32 = vld [vmem:[#allocation20 + $0x348] sm:$0xff] }
 0x9ad   :  { %2886 = vmatprep.subr.mxu1 %v1998_v33  ;;  %2957 = vmatprep.subr.mxu0 %v2000_v34  ;;  %v1588_v33 = vld [vmem:[#allocation20 + $0x358] sm:$0xff]  ;;  %v1585_v34 = vld [vmem:[#allocation20 + $0x340] sm:$0xff] }
 0x9ae   :  { %2887 = vmatpush2.msra.mxu1 %v1997_v35  ;;  %2958 = vmatpush2.msra.mxu0 %v1999_v36  ;;  %v1587_v35 = vld [vmem:[#allocation20 + $0x350] sm:$0xff]  ;;  %v1554_v36 = vld [vmem:[#allocation20 + $0x248] sm:$0xff] }
 0x9af   :  { %2889 = vmatmul.mubr.f32.vlgmr.msra.gmra.mxu1 %v8847_v17  ;;  %2960 = vmatmul.mubr.f32.vlgmr.msra.gmra.mxu0 %v8847_v17 }
 0x9b0   :  { %2966 = vmatprep.subr.mxu1 %v1970_v37  ;;  %3037 = vmatprep.subr.mxu0 %v1972_v38  ;;  %v1556_v37 = vld [vmem:[#allocation20 + $0x258] sm:$0xff]  ;;  %v1553_v38 = vld [vmem:[#allocation20 + $0x240] sm:$0xff] }
 0x9b1   :  { %2967 = vmatpush1.msra.mxu1 %v1969_v43  ;;  %3030 = vmatprep.mubr.f32.mxu1 %v8844_v14  ;;  %v1555_v43 = vld [vmem:[#allocation20 + $0x250] sm:$0xff] }
 0x9b2   :  { %3038 = vmatpush1.msra.mxu0 %v1971_v44  ;;  %3101 = vmatprep.mubr.f32.mxu0 %v8844_v14  ;;  %v1522_v44 = vld [vmem:[#allocation20 + $0x148] sm:$0xff] }
 0x9b3   :  { %2968 = vmatprep.subr.mxu1 %v1938_v62  ;;  %3039 = vmatprep.subr.mxu0 %v1940_v45  ;;  %v1524_v62 = vld [vmem:[#allocation20 + $0x158] sm:$0xff]  ;;  %v1521_v45 = vld [vmem:[#allocation20 + $0x140] sm:$0xff] }
 0x9b4   :  { %2969 = vmatpush1.msra.mxu1 %v1937_v59  ;;  %3040 = vmatpush1.msra.mxu0 %v1939_v46  ;;  %v1523_v59 = vld [vmem:[#allocation20 + $0x150] sm:$0xff]  ;;  %v1490_v46 = vld [vmem:[#allocation20 + $0x48] sm:$0xff] }
 0x9b5   :  { %2970 = vmatprep.subr.mxu1 %v1906_v47  ;;  %3041 = vmatprep.subr.mxu0 %v1908_v48  ;;  %v1492_v47 = vld [vmem:[#allocation20 + $0x58] sm:$0xff]  ;;  %v1489_v48 = vld [vmem:[#allocation20 + $0x40] sm:$0xff] }
 0x9b6   :  { %2971 = vmatpush1.msra.mxu1 %v1905_v49  ;;  %3042 = vmatpush1.msra.mxu0 %v1907_v50  ;;  %v1491_v49 = vld [vmem:[#allocation20 + $0x50] sm:$0xff]  ;;  %v2482_v50 = vld [vmem:[#allocation20 + $0x1f48] sm:$0xff] }
 0x9b7   :  { %2972 = vmatprep.subr.mxu1 %v1874_v51  ;;  %3043 = vmatprep.subr.mxu0 %v1876_v52  ;;  %v2484_v51 = vld [vmem:[#allocation20 + $0x1f58] sm:$0xff]  ;;  %v2481_v52 = vld [vmem:[#allocation20 + $0x1f40] sm:$0xff] }
 0x9b8   :  { %2973 = vmatpush1.msra.mxu1 %v1873_v53  ;;  %3044 = vmatpush1.msra.mxu0 %v1875_v54  ;;  %v2483_v53 = vld [vmem:[#allocation20 + $0x1f50] sm:$0xff]  ;;  %v2450_v54 = vld [vmem:[#allocation20 + $0x1e48] sm:$0xff] }
 0x9b9   :  { %2974 = vmatprep.subr.mxu1 %v1842_v60  ;;  %3045 = vmatprep.subr.mxu0 %v1844_v55  ;;  %v2452_v60 = vld [vmem:[#allocation20 + $0x1e58] sm:$0xff]  ;;  %v2449_v55 = vld [vmem:[#allocation20 + $0x1e40] sm:$0xff] }
 0x9ba   :  { %2975 = vmatpush1.msra.mxu1 %v1841_v61  ;;  %3046 = vmatpush1.msra.mxu0 %v1843_v56  ;;  %v2451_v61 = vld [vmem:[#allocation20 + $0x1e50] sm:$0xff]  ;;  %v2418_v56 = vld [vmem:[#allocation20 + $0x1d48] sm:$0xff] }
 0x9bb   :  { %2976 = vmatprep.subr.mxu1 %v1810_v57  ;;  %3047 = vmatprep.subr.mxu0 %v1812_v58  ;;  %v2420_v57 = vld [vmem:[#allocation20 + $0x1d58] sm:$0xff]  ;;  %v2417_v58 = vld [vmem:[#allocation20 + $0x1d40] sm:$0xff] }
 0x9bc   :  { %2977 = vmatpush1.msra.mxu1 %v1809_v63  ;;  %3048 = vmatpush1.msra.mxu0 %v1811_v0  ;;  %v2419_v63 = vld [vmem:[#allocation20 + $0x1d50] sm:$0xff]  ;;  %v2386_v0 = vld [vmem:[#allocation20 + $0x1c48] sm:$0xff] }
 0x9bd   :  { %2978 = vmatprep.subr.mxu1 %v1778_v1  ;;  %3049 = vmatprep.subr.mxu0 %v1780_v2  ;;  %v2388_v1 = vld [vmem:[#allocation20 + $0x1c58] sm:$0xff]  ;;  %v2385_v2 = vld [vmem:[#allocation20 + $0x1c40] sm:$0xff] }
 0x9be   :  { %2979 = vmatpush1.msra.mxu1 %v1777_v3  ;;  %3050 = vmatpush1.msra.mxu0 %v1779_v5  ;;  %v2387_v3 = vld [vmem:[#allocation20 + $0x1c50] sm:$0xff]  ;;  %v2354_v5 = vld [vmem:[#allocation20 + $0x1b48] sm:$0xff] }
 0x9bf   :  { %2980 = vmatprep.subr.mxu1 %v1746_v6  ;;  %3051 = vmatprep.subr.mxu0 %v1748_v8  ;;  %v2356_v6 = vld [vmem:[#allocation20 + $0x1b58] sm:$0xff]  ;;  %v2353_v8 = vld [vmem:[#allocation20 + $0x1b40] sm:$0xff] }
 0x9c0   :  { %2981 = vmatpush1.msra.mxu1 %v1745_v11  ;;  %3052 = vmatpush1.msra.mxu0 %v1747_v12  ;;  %v2355_v11 = vld [vmem:[#allocation20 + $0x1b50] sm:$0xff]  ;;  %v2322_v12 = vld [vmem:[#allocation20 + $0x1a48] sm:$0xff] }
 0x9c1   :  { %2982 = vmatprep.subr.mxu1 %v1714_v13  ;;  %3053 = vmatprep.subr.mxu0 %v1716_v15  ;;  %v2324_v13 = vld [vmem:[#allocation20 + $0x1a58] sm:$0xff]  ;;  %v2321_v15 = vld [vmem:[#allocation20 + $0x1a40] sm:$0xff] }
 0x9c2   :  { %2983 = vmatpush1.msra.mxu1 %v1713_v16  ;;  %3054 = vmatpush1.msra.mxu0 %v1715_v18  ;;  %v2323_v16 = vld [vmem:[#allocation20 + $0x1a50] sm:$0xff]  ;;  %v2290_v18 = vld [vmem:[#allocation20 + $0x1948] sm:$0xff] }
 0x9c3   :  { %2984 = vmatprep.subr.mxu1 %v1682_v19  ;;  %3055 = vmatprep.subr.mxu0 %v1684_v20  ;;  %v2292_v19 = vld [vmem:[#allocation20 + $0x1958] sm:$0xff]  ;;  %v2289_v20 = vld [vmem:[#allocation20 + $0x1940] sm:$0xff] }
 0x9c4   :  { %2985 = vmatpush1.msra.mxu1 %v1681_v22  ;;  %3056 = vmatpush1.msra.mxu0 %v1683_v23  ;;  %v2291_v22 = vld [vmem:[#allocation20 + $0x1950] sm:$0xff]  ;;  %v2258_v23 = vld [vmem:[#allocation20 + $0x1848] sm:$0xff] }
 0x9c5   :  { %2986 = vmatprep.subr.mxu1 %v1650_v24  ;;  %3057 = vmatprep.subr.mxu0 %v1652_v25  ;;  %v2260_v24 = vld [vmem:[#allocation20 + $0x1858] sm:$0xff]  ;;  %v2257_v25 = vld [vmem:[#allocation20 + $0x1840] sm:$0xff] }
 0x9c6   :  { %2987 = vmatpush1.msra.mxu1 %v1649_v26  ;;  %3058 = vmatpush1.msra.mxu0 %v1651_v27  ;;  %v2259_v26 = vld [vmem:[#allocation20 + $0x1850] sm:$0xff]  ;;  %v2226_v27 = vld [vmem:[#allocation20 + $0x1748] sm:$0xff] }
 0x9c7   :  { %2988 = vmatprep.subr.mxu1 %v1618_v28  ;;  %3059 = vmatprep.subr.mxu0 %v1620_v29  ;;  %v2228_v28 = vld [vmem:[#allocation20 + $0x1758] sm:$0xff]  ;;  %v2225_v29 = vld [vmem:[#allocation20 + $0x1740] sm:$0xff] }
 0x9c8   :  { %2989 = vmatpush1.msra.mxu1 %v1617_v30  ;;  %3060 = vmatpush1.msra.mxu0 %v1619_v31  ;;  %v2227_v30 = vld [vmem:[#allocation20 + $0x1750] sm:$0xff]  ;;  %v2194_v31 = vld [vmem:[#allocation20 + $0x1648] sm:$0xff] }
 0x9c9   :  { %2990 = vmatprep.subr.mxu1 %v1586_v32  ;;  %3061 = vmatprep.subr.mxu0 %v1588_v33  ;;  %v2196_v32 = vld [vmem:[#allocation20 + $0x1658] sm:$0xff]  ;;  %v2193_v33 = vld [vmem:[#allocation20 + $0x1640] sm:$0xff] }
 0x9ca   :  { %2991 = vmatpush1.msra.mxu1 %v1585_v34  ;;  %3062 = vmatpush1.msra.mxu0 %v1587_v35  ;;  %v2195_v34 = vld [vmem:[#allocation20 + $0x1650] sm:$0xff]  ;;  %v2162_v35 = vld [vmem:[#allocation20 + $0x1548] sm:$0xff] }
 0x9cb   :  { %2992 = vmatprep.subr.mxu1 %v1554_v36  ;;  %3063 = vmatprep.subr.mxu0 %v1556_v37  ;;  %v2164_v36 = vld [vmem:[#allocation20 + $0x1558] sm:$0xff]  ;;  %v2161_v37 = vld [vmem:[#allocation20 + $0x1540] sm:$0xff] }
 0x9cc   :  { %2993 = vmatpush1.msra.mxu1 %v1553_v38  ;;  %3064 = vmatpush1.msra.mxu0 %v1555_v43  ;;  %v2163_v38 = vld [vmem:[#allocation20 + $0x1550] sm:$0xff]  ;;  %v2130_v43 = vld [vmem:[#allocation20 + $0x1448] sm:$0xff] }
 0x9cd   :  { %2994 = vmatprep.subr.mxu1 %v1522_v44  ;;  %3065 = vmatprep.subr.mxu0 %v1524_v62  ;;  %v2132_v44 = vld [vmem:[#allocation20 + $0x1458] sm:$0xff]  ;;  %v2129_v62 = vld [vmem:[#allocation20 + $0x1440] sm:$0xff] }
 0x9ce   :  { %2995 = vmatpush1.msra.mxu1 %v1521_v45  ;;  %3066 = vmatpush1.msra.mxu0 %v1523_v59  ;;  %v2131_v45 = vld [vmem:[#allocation20 + $0x1450] sm:$0xff]  ;;  %v2098_v59 = vld [vmem:[#allocation20 + $0x1348] sm:$0xff] }
 0x9cf   :  { %2996 = vmatprep.subr.mxu1 %v1490_v46  ;;  %3067 = vmatprep.subr.mxu0 %v1492_v47  ;;  %v2100_v46 = vld [vmem:[#allocation20 + $0x1358] sm:$0xff]  ;;  %v2097_v47 = vld [vmem:[#allocation20 + $0x1340] sm:$0xff] }
 0x9d0   :  { %2997 = vmatpush1.msra.mxu1 %v1489_v48  ;;  %3068 = vmatpush1.msra.mxu0 %v1491_v49  ;;  %v2099_v48 = vld [vmem:[#allocation20 + $0x1350] sm:$0xff]  ;;  %v2066_v49 = vld [vmem:[#allocation20 + $0x1248] sm:$0xff] }
 0x9d1   :  { %2998 = vmatprep.subr.mxu1 %v2482_v50  ;;  %3069 = vmatprep.subr.mxu0 %v2484_v51  ;;  %v2068_v50 = vld [vmem:[#allocation20 + $0x1258] sm:$0xff]  ;;  %v2065_v51 = vld [vmem:[#allocation20 + $0x1240] sm:$0xff] }
 0x9d2   :  { %2999 = vmatpush2.msra.mxu1 %v2481_v52  ;;  %3070 = vmatpush2.msra.mxu0 %v2483_v53  ;;  %v2067_v52 = vld [vmem:[#allocation20 + $0x1250] sm:$0xff]  ;;  %v2034_v53 = vld [vmem:[#allocation20 + $0x1148] sm:$0xff] }
 0x9d3   :  { %3000 = vmatprep.subr.mxu1 %v2450_v54  ;;  %3071 = vmatprep.subr.mxu0 %v2452_v60  ;;  %v2036_v54 = vld [vmem:[#allocation20 + $0x1158] sm:$0xff]  ;;  %v2033_v60 = vld [vmem:[#allocation20 + $0x1140] sm:$0xff] }
 0x9d4   :  { %3001 = vmatpush2.msra.mxu1 %v2449_v55  ;;  %3072 = vmatpush2.msra.mxu0 %v2451_v61  ;;  %v2035_v55 = vld [vmem:[#allocation20 + $0x1150] sm:$0xff]  ;;  %v2002_v61 = vld [vmem:[#allocation20 + $0x1048] sm:$0xff] }
 0x9d5   :  { %3002 = vmatprep.subr.mxu1 %v2418_v56  ;;  %3073 = vmatprep.subr.mxu0 %v2420_v57  ;;  %v2004_v56 = vld [vmem:[#allocation20 + $0x1058] sm:$0xff]  ;;  %v2001_v57 = vld [vmem:[#allocation20 + $0x1040] sm:$0xff] }
 0x9d6   :  { %3003 = vmatpush2.msra.mxu1 %v2417_v58  ;;  %3074 = vmatpush2.msra.mxu0 %v2419_v63  ;;  %v2003_v58 = vld [vmem:[#allocation20 + $0x1050] sm:$0xff]  ;;  %v1974_v63 = vld [vmem:[#allocation20 + $0xf68] sm:$0xff] }
 0x9d7   :  { %3004 = vmatprep.subr.mxu1 %v2386_v0  ;;  %3075 = vmatprep.subr.mxu0 %v2388_v1  ;;  %v1976_v0 = vld [vmem:[#allocation20 + $0xf78] sm:$0xff]  ;;  %v1973_v1 = vld [vmem:[#allocation20 + $0xf60] sm:$0xff] }
 0x9d8   :  { %3005 = vmatpush2.msra.mxu1 %v2385_v2  ;;  %3076 = vmatpush2.msra.mxu0 %v2387_v3  ;;  %v1975_v2 = vld [vmem:[#allocation20 + $0xf70] sm:$0xff]  ;;  %v1942_v3 = vld [vmem:[#allocation20 + $0xe68] sm:$0xff] }
 0x9d9   :  { %3006 = vmatprep.subr.mxu1 %v2354_v5  ;;  %3077 = vmatprep.subr.mxu0 %v2356_v6  ;;  %v1944_v5 = vld [vmem:[#allocation20 + $0xe78] sm:$0xff]  ;;  %v1941_v6 = vld [vmem:[#allocation20 + $0xe60] sm:$0xff] }
 0x9da   :  { %3007 = vmatpush2.msra.mxu1 %v2353_v8  ;;  %3078 = vmatpush2.msra.mxu0 %v2355_v11  ;;  %v1943_v8 = vld [vmem:[#allocation20 + $0xe70] sm:$0xff]  ;;  %v1910_v11 = vld [vmem:[#allocation20 + $0xd68] sm:$0xff] }
 0x9db   :  { %3008 = vmatprep.subr.mxu1 %v2322_v12  ;;  %3079 = vmatprep.subr.mxu0 %v2324_v13  ;;  %v1912_v12 = vld [vmem:[#allocation20 + $0xd78] sm:$0xff]  ;;  %v1909_v13 = vld [vmem:[#allocation20 + $0xd60] sm:$0xff] }
 0x9dc   :  { %3009 = vmatpush2.msra.mxu1 %v2321_v15  ;;  %3080 = vmatpush2.msra.mxu0 %v2323_v16  ;;  %v1911_v15 = vld [vmem:[#allocation20 + $0xd70] sm:$0xff]  ;;  %v1878_v16 = vld [vmem:[#allocation20 + $0xc68] sm:$0xff] }
 0x9dd   :  { %3010 = vmatprep.subr.mxu1 %v2290_v18  ;;  %3081 = vmatprep.subr.mxu0 %v2292_v19  ;;  %v1880_v18 = vld [vmem:[#allocation20 + $0xc78] sm:$0xff]  ;;  %v1877_v19 = vld [vmem:[#allocation20 + $0xc60] sm:$0xff] }
 0x9de   :  { %3011 = vmatpush2.msra.mxu1 %v2289_v20  ;;  %3082 = vmatpush2.msra.mxu0 %v2291_v22  ;;  %v1879_v20 = vld [vmem:[#allocation20 + $0xc70] sm:$0xff]  ;;  %v1846_v22 = vld [vmem:[#allocation20 + $0xb68] sm:$0xff] }
 0x9df   :  { %3012 = vmatprep.subr.mxu1 %v2258_v23  ;;  %3083 = vmatprep.subr.mxu0 %v2260_v24  ;;  %v1848_v23 = vld [vmem:[#allocation20 + $0xb78] sm:$0xff]  ;;  %v1845_v24 = vld [vmem:[#allocation20 + $0xb60] sm:$0xff] }
 0x9e0   :  { %3013 = vmatpush2.msra.mxu1 %v2257_v25  ;;  %3084 = vmatpush2.msra.mxu0 %v2259_v26  ;;  %v1847_v25 = vld [vmem:[#allocation20 + $0xb70] sm:$0xff]  ;;  %v1814_v26 = vld [vmem:[#allocation20 + $0xa68] sm:$0xff] }
 0x9e1   :  { %3014 = vmatprep.subr.mxu1 %v2226_v27  ;;  %3085 = vmatprep.subr.mxu0 %v2228_v28  ;;  %v1816_v27 = vld [vmem:[#allocation20 + $0xa78] sm:$0xff]  ;;  %v1813_v28 = vld [vmem:[#allocation20 + $0xa60] sm:$0xff] }
 0x9e2   :  { %3015 = vmatpush2.msra.mxu1 %v2225_v29  ;;  %3086 = vmatpush2.msra.mxu0 %v2227_v30  ;;  %v1815_v29 = vld [vmem:[#allocation20 + $0xa70] sm:$0xff]  ;;  %v1782_v30 = vld [vmem:[#allocation20 + $0x968] sm:$0xff] }
 0x9e3   :  { %3016 = vmatprep.subr.mxu1 %v2194_v31  ;;  %3087 = vmatprep.subr.mxu0 %v2196_v32  ;;  %v1784_v31 = vld [vmem:[#allocation20 + $0x978] sm:$0xff]  ;;  %v1781_v32 = vld [vmem:[#allocation20 + $0x960] sm:$0xff] }
 0x9e4   :  { %3017 = vmatpush2.msra.mxu1 %v2193_v33  ;;  %3088 = vmatpush2.msra.mxu0 %v2195_v34  ;;  %v1783_v33 = vld [vmem:[#allocation20 + $0x970] sm:$0xff]  ;;  %v1750_v34 = vld [vmem:[#allocation20 + $0x868] sm:$0xff] }
 0x9e5   :  { %3018 = vmatprep.subr.mxu1 %v2162_v35  ;;  %3089 = vmatprep.subr.mxu0 %v2164_v36  ;;  %v1752_v35 = vld [vmem:[#allocation20 + $0x878] sm:$0xff]  ;;  %v1749_v36 = vld [vmem:[#allocation20 + $0x860] sm:$0xff] }
 0x9e6   :  { %3019 = vmatpush2.msra.mxu1 %v2161_v37  ;;  %3090 = vmatpush2.msra.mxu0 %v2163_v38  ;;  %v1751_v37 = vld [vmem:[#allocation20 + $0x870] sm:$0xff]  ;;  %v1718_v38 = vld [vmem:[#allocation20 + $0x768] sm:$0xff] }
 0x9e7   :  { %3020 = vmatprep.subr.mxu1 %v2130_v43  ;;  %3091 = vmatprep.subr.mxu0 %v2132_v44  ;;  %v1720_v43 = vld [vmem:[#allocation20 + $0x778] sm:$0xff]  ;;  %v1717_v44 = vld [vmem:[#allocation20 + $0x760] sm:$0xff] }
 0x9e8   :  { %3021 = vmatpush2.msra.mxu1 %v2129_v62  ;;  %3092 = vmatpush2.msra.mxu0 %v2131_v45  ;;  %v1719_v62 = vld [vmem:[#allocation20 + $0x770] sm:$0xff]  ;;  %v1686_v45 = vld [vmem:[#allocation20 + $0x668] sm:$0xff] }
 0x9e9   :  { %3022 = vmatprep.subr.mxu1 %v2098_v59  ;;  %3093 = vmatprep.subr.mxu0 %v2100_v46  ;;  %v1688_v59 = vld [vmem:[#allocation20 + $0x678] sm:$0xff]  ;;  %v1685_v46 = vld [vmem:[#allocation20 + $0x660] sm:$0xff] }
 0x9ea   :  { %3023 = vmatpush2.msra.mxu1 %v2097_v47  ;;  %3094 = vmatpush2.msra.mxu0 %v2099_v48  ;;  %v1687_v47 = vld [vmem:[#allocation20 + $0x670] sm:$0xff]  ;;  %v1654_v48 = vld [vmem:[#allocation20 + $0x568] sm:$0xff] }
 0x9eb   :  { %3024 = vmatprep.subr.mxu1 %v2066_v49  ;;  %3095 = vmatprep.subr.mxu0 %v2068_v50  ;;  %v1656_v49 = vld [vmem:[#allocation20 + $0x578] sm:$0xff]  ;;  %v1653_v50 = vld [vmem:[#allocation20 + $0x560] sm:$0xff] }
 0x9ec   :  { %3025 = vmatpush2.msra.mxu1 %v2065_v51  ;;  %3096 = vmatpush2.msra.mxu0 %v2067_v52  ;;  %v1655_v51 = vld [vmem:[#allocation20 + $0x570] sm:$0xff]  ;;  %v1622_v52 = vld [vmem:[#allocation20 + $0x468] sm:$0xff] }
 0x9ed   :  { %3026 = vmatprep.subr.mxu1 %v2034_v53  ;;  %3097 = vmatprep.subr.mxu0 %v2036_v54  ;;  %v1624_v53 = vld [vmem:[#allocation20 + $0x478] sm:$0xff]  ;;  %v1621_v54 = vld [vmem:[#allocation20 + $0x460] sm:$0xff] }
 0x9ee   :  { %3027 = vmatpush2.msra.mxu1 %v2033_v60  ;;  %3098 = vmatpush2.msra.mxu0 %v2035_v55  ;;  %v1623_v60 = vld [vmem:[#allocation20 + $0x470] sm:$0xff]  ;;  %v1590_v55 = vld [vmem:[#allocation20 + $0x368] sm:$0xff] }
 0x9ef   :  { %3028 = vmatprep.subr.mxu1 %v2002_v61  ;;  %3099 = vmatprep.subr.mxu0 %v2004_v56  ;;  %v1592_v61 = vld [vmem:[#allocation20 + $0x378] sm:$0xff]  ;;  %v1589_v56 = vld [vmem:[#allocation20 + $0x360] sm:$0xff] }
 0x9f0   :  { %3029 = vmatpush2.msra.mxu1 %v2001_v57  ;;  %3100 = vmatpush2.msra.mxu0 %v2003_v58  ;;  %v1591_v57 = vld [vmem:[#allocation20 + $0x370] sm:$0xff]  ;;  %v1558_v58 = vld [vmem:[#allocation20 + $0x268] sm:$0xff] }
 0x9f1   :  { %3031 = vmatmul.mubr.f32.vlgmr.msra.gmra.mxu1 %v8847_v17  ;;  %3102 = vmatmul.mubr.f32.vlgmr.msra.gmra.mxu0 %v8847_v17 }
 0x9f2   :  { %3108 = vmatprep.subr.mxu1 %v1974_v63  ;;  %3179 = vmatprep.subr.mxu0 %v1976_v0  ;;  %v1560_v63 = vld [vmem:[#allocation20 + $0x278] sm:$0xff]  ;;  %v1557_v0 = vld [vmem:[#allocation20 + $0x260] sm:$0xff] }
 0x9f3   :  { %3109 = vmatpush1.msra.mxu1 %v1973_v1  ;;  %3172 = vmatprep.mubr.f32.mxu1 %v8844_v14  ;;  %v1559_v1 = vld [vmem:[#allocation20 + $0x270] sm:$0xff] }
 0x9f4   :  { %3180 = vmatpush1.msra.mxu0 %v1975_v2  ;;  %3243 = vmatprep.mubr.f32.mxu0 %v8844_v14  ;;  %v1526_v2 = vld [vmem:[#allocation20 + $0x168] sm:$0xff] }
 0x9f5   :  { %3110 = vmatprep.subr.mxu1 %v1942_v3  ;;  %3181 = vmatprep.subr.mxu0 %v1944_v5  ;;  %v1528_v3 = vld [vmem:[#allocation20 + $0x178] sm:$0xff]  ;;  %v1525_v5 = vld [vmem:[#allocation20 + $0x160] sm:$0xff] }
 0x9f6   :  { %3111 = vmatpush1.msra.mxu1 %v1941_v6  ;;  %3182 = vmatpush1.msra.mxu0 %v1943_v8  ;;  %v1527_v6 = vld [vmem:[#allocation20 + $0x170] sm:$0xff]  ;;  %v1494_v8 = vld [vmem:[#allocation20 + $0x68] sm:$0xff] }
 0x9f7   :  { %3112 = vmatprep.subr.mxu1 %v1910_v11  ;;  %3183 = vmatprep.subr.mxu0 %v1912_v12  ;;  %v1496_v11 = vld [vmem:[#allocation20 + $0x78] sm:$0xff]  ;;  %v1493_v12 = vld [vmem:[#allocation20 + $0x60] sm:$0xff] }
 0x9f8   :  { %3113 = vmatpush1.msra.mxu1 %v1909_v13  ;;  %3184 = vmatpush1.msra.mxu0 %v1911_v15  ;;  %v1495_v13 = vld [vmem:[#allocation20 + $0x70] sm:$0xff]  ;;  %v2486_v15 = vld [vmem:[#allocation20 + $0x1f68] sm:$0xff] }
 0x9f9   :  { %3114 = vmatprep.subr.mxu1 %v1878_v16  ;;  %3185 = vmatprep.subr.mxu0 %v1880_v18  ;;  %v2488_v16 = vld [vmem:[#allocation20 + $0x1f78] sm:$0xff]  ;;  %v2485_v18 = vld [vmem:[#allocation20 + $0x1f60] sm:$0xff] }
 0x9fa   :  { %3115 = vmatpush1.msra.mxu1 %v1877_v19  ;;  %3186 = vmatpush1.msra.mxu0 %v1879_v20  ;;  %v2487_v19 = vld [vmem:[#allocation20 + $0x1f70] sm:$0xff]  ;;  %v2454_v20 = vld [vmem:[#allocation20 + $0x1e68] sm:$0xff] }
 0x9fb   :  { %3116 = vmatprep.subr.mxu1 %v1846_v22  ;;  %3187 = vmatprep.subr.mxu0 %v1848_v23  ;;  %v2456_v22 = vld [vmem:[#allocation20 + $0x1e78] sm:$0xff]  ;;  %v2453_v23 = vld [vmem:[#allocation20 + $0x1e60] sm:$0xff] }
 0x9fc   :  { %3117 = vmatpush1.msra.mxu1 %v1845_v24  ;;  %3188 = vmatpush1.msra.mxu0 %v1847_v25  ;;  %v2455_v24 = vld [vmem:[#allocation20 + $0x1e70] sm:$0xff]  ;;  %v2422_v25 = vld [vmem:[#allocation20 + $0x1d68] sm:$0xff] }
 0x9fd   :  { %3118 = vmatprep.subr.mxu1 %v1814_v26  ;;  %3189 = vmatprep.subr.mxu0 %v1816_v27  ;;  %v2424_v26 = vld [vmem:[#allocation20 + $0x1d78] sm:$0xff]  ;;  %v2421_v27 = vld [vmem:[#allocation20 + $0x1d60] sm:$0xff] }
 0x9fe   :  { %3119 = vmatpush1.msra.mxu1 %v1813_v28  ;;  %3190 = vmatpush1.msra.mxu0 %v1815_v29  ;;  %v2423_v28 = vld [vmem:[#allocation20 + $0x1d70] sm:$0xff]  ;;  %v2390_v29 = vld [vmem:[#allocation20 + $0x1c68] sm:$0xff] }
 0x9ff   :  { %3120 = vmatprep.subr.mxu1 %v1782_v30  ;;  %3191 = vmatprep.subr.mxu0 %v1784_v31  ;;  %v2392_v30 = vld [vmem:[#allocation20 + $0x1c78] sm:$0xff]  ;;  %v2389_v31 = vld [vmem:[#allocation20 + $0x1c60] sm:$0xff] }
 0xa00   :  { %3121 = vmatpush1.msra.mxu1 %v1781_v32  ;;  %3192 = vmatpush1.msra.mxu0 %v1783_v33  ;;  %v2391_v32 = vld [vmem:[#allocation20 + $0x1c70] sm:$0xff]  ;;  %v2358_v33 = vld [vmem:[#allocation20 + $0x1b68] sm:$0xff] }
 0xa01   :  { %3122 = vmatprep.subr.mxu1 %v1750_v34  ;;  %3193 = vmatprep.subr.mxu0 %v1752_v35  ;;  %v2360_v34 = vld [vmem:[#allocation20 + $0x1b78] sm:$0xff]  ;;  %v2357_v35 = vld [vmem:[#allocation20 + $0x1b60] sm:$0xff] }
 0xa02   :  { %3123 = vmatpush1.msra.mxu1 %v1749_v36  ;;  %3194 = vmatpush1.msra.mxu0 %v1751_v37  ;;  %v2359_v36 = vld [vmem:[#allocation20 + $0x1b70] sm:$0xff]  ;;  %v2326_v37 = vld [vmem:[#allocation20 + $0x1a68] sm:$0xff] }
 0xa03   :  { %3124 = vmatprep.subr.mxu1 %v1718_v38  ;;  %3195 = vmatprep.subr.mxu0 %v1720_v43  ;;  %v2328_v38 = vld [vmem:[#allocation20 + $0x1a78] sm:$0xff]  ;;  %v2325_v43 = vld [vmem:[#allocation20 + $0x1a60] sm:$0xff] }
 0xa04   :  { %3125 = vmatpush1.msra.mxu1 %v1717_v44  ;;  %3196 = vmatpush1.msra.mxu0 %v1719_v62  ;;  %v2327_v44 = vld [vmem:[#allocation20 + $0x1a70] sm:$0xff]  ;;  %v2294_v62 = vld [vmem:[#allocation20 + $0x1968] sm:$0xff] }
 0xa05   :  { %3126 = vmatprep.subr.mxu1 %v1686_v45  ;;  %3197 = vmatprep.subr.mxu0 %v1688_v59  ;;  %v2296_v45 = vld [vmem:[#allocation20 + $0x1978] sm:$0xff]  ;;  %v2293_v59 = vld [vmem:[#allocation20 + $0x1960] sm:$0xff] }
 0xa06   :  { %3127 = vmatpush1.msra.mxu1 %v1685_v46  ;;  %3198 = vmatpush1.msra.mxu0 %v1687_v47  ;;  %v2295_v46 = vld [vmem:[#allocation20 + $0x1970] sm:$0xff]  ;;  %v2262_v47 = vld [vmem:[#allocation20 + $0x1868] sm:$0xff] }
 0xa07   :  { %3128 = vmatprep.subr.mxu1 %v1654_v48  ;;  %3199 = vmatprep.subr.mxu0 %v1656_v49  ;;  %v2264_v48 = vld [vmem:[#allocation20 + $0x1878] sm:$0xff]  ;;  %v2261_v49 = vld [vmem:[#allocation20 + $0x1860] sm:$0xff] }
 0xa08   :  { %3129 = vmatpush1.msra.mxu1 %v1653_v50  ;;  %3200 = vmatpush1.msra.mxu0 %v1655_v51  ;;  %v2263_v50 = vld [vmem:[#allocation20 + $0x1870] sm:$0xff]  ;;  %v2230_v51 = vld [vmem:[#allocation20 + $0x1768] sm:$0xff] }
 0xa09   :  { %3130 = vmatprep.subr.mxu1 %v1622_v52  ;;  %3201 = vmatprep.subr.mxu0 %v1624_v53  ;;  %v2232_v52 = vld [vmem:[#allocation20 + $0x1778] sm:$0xff]  ;;  %v2229_v53 = vld [vmem:[#allocation20 + $0x1760] sm:$0xff] }
 0xa0a   :  { %3131 = vmatpush1.msra.mxu1 %v1621_v54  ;;  %3202 = vmatpush1.msra.mxu0 %v1623_v60  ;;  %v2231_v54 = vld [vmem:[#allocation20 + $0x1770] sm:$0xff]  ;;  %v2198_v60 = vld [vmem:[#allocation20 + $0x1668] sm:$0xff] }
 0xa0b   :  { %3132 = vmatprep.subr.mxu1 %v1590_v55  ;;  %3203 = vmatprep.subr.mxu0 %v1592_v61  ;;  %v2200_v55 = vld [vmem:[#allocation20 + $0x1678] sm:$0xff]  ;;  %v2197_v61 = vld [vmem:[#allocation20 + $0x1660] sm:$0xff] }
 0xa0c   :  { %3133 = vmatpush1.msra.mxu1 %v1589_v56  ;;  %3204 = vmatpush1.msra.mxu0 %v1591_v57  ;;  %v2199_v56 = vld [vmem:[#allocation20 + $0x1670] sm:$0xff]  ;;  %v2166_v57 = vld [vmem:[#allocation20 + $0x1568] sm:$0xff] }
 0xa0d   :  { %3134 = vmatprep.subr.mxu1 %v1558_v58  ;;  %3205 = vmatprep.subr.mxu0 %v1560_v63  ;;  %v2168_v58 = vld [vmem:[#allocation20 + $0x1578] sm:$0xff]  ;;  %v2165_v63 = vld [vmem:[#allocation20 + $0x1560] sm:$0xff] }
 0xa0e   :  { %3135 = vmatpush1.msra.mxu1 %v1557_v0  ;;  %3206 = vmatpush1.msra.mxu0 %v1559_v1  ;;  %v2167_v0 = vld [vmem:[#allocation20 + $0x1570] sm:$0xff]  ;;  %v2134_v1 = vld [vmem:[#allocation20 + $0x1468] sm:$0xff] }
 0xa0f   :  { %3136 = vmatprep.subr.mxu1 %v1526_v2  ;;  %3207 = vmatprep.subr.mxu0 %v1528_v3  ;;  %v2136_v2 = vld [vmem:[#allocation20 + $0x1478] sm:$0xff]  ;;  %v2133_v3 = vld [vmem:[#allocation20 + $0x1460] sm:$0xff] }
 0xa10   :  { %3137 = vmatpush1.msra.mxu1 %v1525_v5  ;;  %3208 = vmatpush1.msra.mxu0 %v1527_v6  ;;  %v2135_v5 = vld [vmem:[#allocation20 + $0x1470] sm:$0xff]  ;;  %v2102_v6 = vld [vmem:[#allocation20 + $0x1368] sm:$0xff] }
 0xa11   :  { %3138 = vmatprep.subr.mxu1 %v1494_v8  ;;  %3209 = vmatprep.subr.mxu0 %v1496_v11  ;;  %v2104_v8 = vld [vmem:[#allocation20 + $0x1378] sm:$0xff]  ;;  %v2101_v11 = vld [vmem:[#allocation20 + $0x1360] sm:$0xff] }
 0xa12   :  { %3139 = vmatpush1.msra.mxu1 %v1493_v12  ;;  %3210 = vmatpush1.msra.mxu0 %v1495_v13  ;;  %v2103_v12 = vld [vmem:[#allocation20 + $0x1370] sm:$0xff]  ;;  %v2070_v13 = vld [vmem:[#allocation20 + $0x1268] sm:$0xff] }
 0xa13   :  { %3140 = vmatprep.subr.mxu1 %v2486_v15  ;;  %3211 = vmatprep.subr.mxu0 %v2488_v16  ;;  %v2072_v15 = vld [vmem:[#allocation20 + $0x1278] sm:$0xff]  ;;  %v2069_v16 = vld [vmem:[#allocation20 + $0x1260] sm:$0xff] }
 0xa14   :  { %3141 = vmatpush2.msra.mxu1 %v2485_v18  ;;  %3212 = vmatpush2.msra.mxu0 %v2487_v19  ;;  %v2071_v18 = vld [vmem:[#allocation20 + $0x1270] sm:$0xff]  ;;  %v2038_v19 = vld [vmem:[#allocation20 + $0x1168] sm:$0xff] }
 0xa15   :  { %3142 = vmatprep.subr.mxu1 %v2454_v20  ;;  %3213 = vmatprep.subr.mxu0 %v2456_v22  ;;  %v2040_v20 = vld [vmem:[#allocation20 + $0x1178] sm:$0xff]  ;;  %v2037_v22 = vld [vmem:[#allocation20 + $0x1160] sm:$0xff] }
 0xa16   :  { %3143 = vmatpush2.msra.mxu1 %v2453_v23  ;;  %3214 = vmatpush2.msra.mxu0 %v2455_v24  ;;  %v2039_v23 = vld [vmem:[#allocation20 + $0x1170] sm:$0xff]  ;;  %v2006_v24 = vld [vmem:[#allocation20 + $0x1068] sm:$0xff] }
 0xa17   :  { %3144 = vmatprep.subr.mxu1 %v2422_v25  ;;  %3215 = vmatprep.subr.mxu0 %v2424_v26  ;;  %v2008_v25 = vld [vmem:[#allocation20 + $0x1078] sm:$0xff]  ;;  %v2005_v26 = vld [vmem:[#allocation20 + $0x1060] sm:$0xff] }
 0xa18   :  { %3145 = vmatpush2.msra.mxu1 %v2421_v27  ;;  %3216 = vmatpush2.msra.mxu0 %v2423_v28  ;;  %v2007_v27 = vld [vmem:[#allocation20 + $0x1070] sm:$0xff]  ;;  %v1978_v28 = vld [vmem:[#allocation20 + $0xf88] sm:$0xff] }
 0xa19   :  { %3146 = vmatprep.subr.mxu1 %v2390_v29  ;;  %3217 = vmatprep.subr.mxu0 %v2392_v30  ;;  %v1980_v29 = vld [vmem:[#allocation20 + $0xf98] sm:$0xff]  ;;  %v1977_v30 = vld [vmem:[#allocation20 + $0xf80] sm:$0xff] }
 0xa1a   :  { %3147 = vmatpush2.msra.mxu1 %v2389_v31  ;;  %3218 = vmatpush2.msra.mxu0 %v2391_v32  ;;  %v1979_v31 = vld [vmem:[#allocation20 + $0xf90] sm:$0xff]  ;;  %v1946_v32 = vld [vmem:[#allocation20 + $0xe88] sm:$0xff] }
 0xa1b   :  { %3148 = vmatprep.subr.mxu1 %v2358_v33  ;;  %3219 = vmatprep.subr.mxu0 %v2360_v34  ;;  %v1948_v33 = vld [vmem:[#allocation20 + $0xe98] sm:$0xff]  ;;  %v1945_v34 = vld [vmem:[#allocation20 + $0xe80] sm:$0xff] }
 0xa1c   :  { %3149 = vmatpush2.msra.mxu1 %v2357_v35  ;;  %3220 = vmatpush2.msra.mxu0 %v2359_v36  ;;  %v1947_v35 = vld [vmem:[#allocation20 + $0xe90] sm:$0xff]  ;;  %v1914_v36 = vld [vmem:[#allocation20 + $0xd88] sm:$0xff] }
 0xa1d   :  { %3150 = vmatprep.subr.mxu1 %v2326_v37  ;;  %3221 = vmatprep.subr.mxu0 %v2328_v38  ;;  %v1916_v37 = vld [vmem:[#allocation20 + $0xd98] sm:$0xff]  ;;  %v1913_v38 = vld [vmem:[#allocation20 + $0xd80] sm:$0xff] }
 0xa1e   :  { %3151 = vmatpush2.msra.mxu1 %v2325_v43  ;;  %3222 = vmatpush2.msra.mxu0 %v2327_v44  ;;  %v1915_v43 = vld [vmem:[#allocation20 + $0xd90] sm:$0xff]  ;;  %v1882_v44 = vld [vmem:[#allocation20 + $0xc88] sm:$0xff] }
 0xa1f   :  { %3152 = vmatprep.subr.mxu1 %v2294_v62  ;;  %3223 = vmatprep.subr.mxu0 %v2296_v45  ;;  %v1884_v62 = vld [vmem:[#allocation20 + $0xc98] sm:$0xff]  ;;  %v1881_v45 = vld [vmem:[#allocation20 + $0xc80] sm:$0xff] }
 0xa20   :  { %3153 = vmatpush2.msra.mxu1 %v2293_v59  ;;  %3224 = vmatpush2.msra.mxu0 %v2295_v46  ;;  %v1883_v59 = vld [vmem:[#allocation20 + $0xc90] sm:$0xff]  ;;  %v1850_v46 = vld [vmem:[#allocation20 + $0xb88] sm:$0xff] }
 0xa21   :  { %3154 = vmatprep.subr.mxu1 %v2262_v47  ;;  %3225 = vmatprep.subr.mxu0 %v2264_v48  ;;  %v1852_v47 = vld [vmem:[#allocation20 + $0xb98] sm:$0xff]  ;;  %v1849_v48 = vld [vmem:[#allocation20 + $0xb80] sm:$0xff] }
 0xa22   :  { %3155 = vmatpush2.msra.mxu1 %v2261_v49  ;;  %3226 = vmatpush2.msra.mxu0 %v2263_v50  ;;  %v1851_v49 = vld [vmem:[#allocation20 + $0xb90] sm:$0xff]  ;;  %v1818_v50 = vld [vmem:[#allocation20 + $0xa88] sm:$0xff] }
 0xa23   :  { %3156 = vmatprep.subr.mxu1 %v2230_v51  ;;  %3227 = vmatprep.subr.mxu0 %v2232_v52  ;;  %v1820_v51 = vld [vmem:[#allocation20 + $0xa98] sm:$0xff]  ;;  %v1817_v52 = vld [vmem:[#allocation20 + $0xa80] sm:$0xff] }
 0xa24   :  { %3157 = vmatpush2.msra.mxu1 %v2229_v53  ;;  %3228 = vmatpush2.msra.mxu0 %v2231_v54  ;;  %v1819_v53 = vld [vmem:[#allocation20 + $0xa90] sm:$0xff]  ;;  %v1786_v54 = vld [vmem:[#allocation20 + $0x988] sm:$0xff] }
 0xa25   :  { %3158 = vmatprep.subr.mxu1 %v2198_v60  ;;  %3229 = vmatprep.subr.mxu0 %v2200_v55  ;;  %v1788_v60 = vld [vmem:[#allocation20 + $0x998] sm:$0xff]  ;;  %v1785_v55 = vld [vmem:[#allocation20 + $0x980] sm:$0xff] }
 0xa26   :  { %3159 = vmatpush2.msra.mxu1 %v2197_v61  ;;  %3230 = vmatpush2.msra.mxu0 %v2199_v56  ;;  %v1787_v61 = vld [vmem:[#allocation20 + $0x990] sm:$0xff]  ;;  %v1754_v56 = vld [vmem:[#allocation20 + $0x888] sm:$0xff] }
 0xa27   :  { %3160 = vmatprep.subr.mxu1 %v2166_v57  ;;  %3231 = vmatprep.subr.mxu0 %v2168_v58  ;;  %v1756_v57 = vld [vmem:[#allocation20 + $0x898] sm:$0xff]  ;;  %v1753_v58 = vld [vmem:[#allocation20 + $0x880] sm:$0xff] }
 0xa28   :  { %3161 = vmatpush2.msra.mxu1 %v2165_v63  ;;  %3232 = vmatpush2.msra.mxu0 %v2167_v0  ;;  %v1755_v63 = vld [vmem:[#allocation20 + $0x890] sm:$0xff]  ;;  %v1722_v0 = vld [vmem:[#allocation20 + $0x788] sm:$0xff] }
 0xa29   :  { %3162 = vmatprep.subr.mxu1 %v2134_v1  ;;  %3233 = vmatprep.subr.mxu0 %v2136_v2  ;;  %v1724_v1 = vld [vmem:[#allocation20 + $0x798] sm:$0xff]  ;;  %v1721_v2 = vld [vmem:[#allocation20 + $0x780] sm:$0xff] }
 0xa2a   :  { %3163 = vmatpush2.msra.mxu1 %v2133_v3  ;;  %3234 = vmatpush2.msra.mxu0 %v2135_v5  ;;  %v1723_v3 = vld [vmem:[#allocation20 + $0x790] sm:$0xff]  ;;  %v1690_v5 = vld [vmem:[#allocation20 + $0x688] sm:$0xff] }
 0xa2b   :  { %3164 = vmatprep.subr.mxu1 %v2102_v6  ;;  %3235 = vmatprep.subr.mxu0 %v2104_v8  ;;  %v1692_v6 = vld [vmem:[#allocation20 + $0x698] sm:$0xff]  ;;  %v1689_v8 = vld [vmem:[#allocation20 + $0x680] sm:$0xff] }
 0xa2c   :  { %3165 = vmatpush2.msra.mxu1 %v2101_v11  ;;  %3236 = vmatpush2.msra.mxu0 %v2103_v12  ;;  %v1691_v11 = vld [vmem:[#allocation20 + $0x690] sm:$0xff]  ;;  %v1658_v12 = vld [vmem:[#allocation20 + $0x588] sm:$0xff] }
 0xa2d   :  { %3166 = vmatprep.subr.mxu1 %v2070_v13  ;;  %3237 = vmatprep.subr.mxu0 %v2072_v15  ;;  %v1660_v13 = vld [vmem:[#allocation20 + $0x598] sm:$0xff]  ;;  %v1657_v15 = vld [vmem:[#allocation20 + $0x580] sm:$0xff] }
 0xa2e   :  { %3167 = vmatpush2.msra.mxu1 %v2069_v16  ;;  %3238 = vmatpush2.msra.mxu0 %v2071_v18  ;;  %v1659_v16 = vld [vmem:[#allocation20 + $0x590] sm:$0xff]  ;;  %v1626_v18 = vld [vmem:[#allocation20 + $0x488] sm:$0xff] }
 0xa2f   :  { %3168 = vmatprep.subr.mxu1 %v2038_v19  ;;  %3239 = vmatprep.subr.mxu0 %v2040_v20  ;;  %v1628_v19 = vld [vmem:[#allocation20 + $0x498] sm:$0xff]  ;;  %v1625_v20 = vld [vmem:[#allocation20 + $0x480] sm:$0xff] }
 0xa30   :  { %3169 = vmatpush2.msra.mxu1 %v2037_v22  ;;  %3240 = vmatpush2.msra.mxu0 %v2039_v23  ;;  %v1627_v22 = vld [vmem:[#allocation20 + $0x490] sm:$0xff]  ;;  %v1594_v23 = vld [vmem:[#allocation20 + $0x388] sm:$0xff] }
 0xa31   :  { %3170 = vmatprep.subr.mxu1 %v2006_v24  ;;  %3241 = vmatprep.subr.mxu0 %v2008_v25  ;;  %v1596_v24 = vld [vmem:[#allocation20 + $0x398] sm:$0xff]  ;;  %v1593_v25 = vld [vmem:[#allocation20 + $0x380] sm:$0xff] }
 0xa32   :  { %3171 = vmatpush2.msra.mxu1 %v2005_v26  ;;  %3242 = vmatpush2.msra.mxu0 %v2007_v27  ;;  %v1595_v26 = vld [vmem:[#allocation20 + $0x390] sm:$0xff]  ;;  %v1562_v27 = vld [vmem:[#allocation20 + $0x288] sm:$0xff] }
 0xa33   :  { %3173 = vmatmul.mubr.f32.vlgmr.msra.gmra.mxu1 %v8847_v17  ;;  %3244 = vmatmul.mubr.f32.vlgmr.msra.gmra.mxu0 %v8847_v17 }
 0xa34   :  { %3250 = vmatprep.subr.mxu1 %v1978_v28  ;;  %3321 = vmatprep.subr.mxu0 %v1980_v29  ;;  %v1564_v28 = vld [vmem:[#allocation20 + $0x298] sm:$0xff]  ;;  %v1561_v29 = vld [vmem:[#allocation20 + $0x280] sm:$0xff] }
 0xa35   :  { %3251 = vmatpush1.msra.mxu1 %v1977_v30  ;;  %3314 = vmatprep.mubr.f32.mxu1 %v8844_v14  ;;  %v1563_v30 = vld [vmem:[#allocation20 + $0x290] sm:$0xff] }
 0xa36   :  { %3322 = vmatpush1.msra.mxu0 %v1979_v31  ;;  %3385 = vmatprep.mubr.f32.mxu0 %v8844_v14  ;;  %v1530_v31 = vld [vmem:[#allocation20 + $0x188] sm:$0xff] }
 0xa37   :  { %3252 = vmatprep.subr.mxu1 %v1946_v32  ;;  %3323 = vmatprep.subr.mxu0 %v1948_v33  ;;  %v1532_v32 = vld [vmem:[#allocation20 + $0x198] sm:$0xff]  ;;  %v1529_v33 = vld [vmem:[#allocation20 + $0x180] sm:$0xff] }
 0xa38   :  { %3253 = vmatpush1.msra.mxu1 %v1945_v34  ;;  %3324 = vmatpush1.msra.mxu0 %v1947_v35  ;;  %v1531_v34 = vld [vmem:[#allocation20 + $0x190] sm:$0xff]  ;;  %v1498_v35 = vld [vmem:[#allocation20 + $0x88] sm:$0xff] }
 0xa39   :  { %3254 = vmatprep.subr.mxu1 %v1914_v36  ;;  %3325 = vmatprep.subr.mxu0 %v1916_v37  ;;  %v1500_v36 = vld [vmem:[#allocation20 + $0x98] sm:$0xff]  ;;  %v1497_v37 = vld [vmem:[#allocation20 + $0x80] sm:$0xff] }
 0xa3a   :  { %3255 = vmatpush1.msra.mxu1 %v1913_v38  ;;  %3326 = vmatpush1.msra.mxu0 %v1915_v43  ;;  %v1499_v38 = vld [vmem:[#allocation20 + $0x90] sm:$0xff]  ;;  %v2490_v43 = vld [vmem:[#allocation20 + $0x1f88] sm:$0xff] }
 0xa3b   :  { %3256 = vmatprep.subr.mxu1 %v1882_v44  ;;  %3327 = vmatprep.subr.mxu0 %v1884_v62  ;;  %v2492_v44 = vld [vmem:[#allocation20 + $0x1f98] sm:$0xff]  ;;  %v2489_v62 = vld [vmem:[#allocation20 + $0x1f80] sm:$0xff] }
 0xa3c   :  { %3257 = vmatpush1.msra.mxu1 %v1881_v45  ;;  %3328 = vmatpush1.msra.mxu0 %v1883_v59  ;;  %v2491_v45 = vld [vmem:[#allocation20 + $0x1f90] sm:$0xff]  ;;  %v2458_v59 = vld [vmem:[#allocation20 + $0x1e88] sm:$0xff] }
 0xa3d   :  { %3258 = vmatprep.subr.mxu1 %v1850_v46  ;;  %3329 = vmatprep.subr.mxu0 %v1852_v47  ;;  %v2460_v46 = vld [vmem:[#allocation20 + $0x1e98] sm:$0xff]  ;;  %v2457_v47 = vld [vmem:[#allocation20 + $0x1e80] sm:$0xff] }
 0xa3e   :  { %3259 = vmatpush1.msra.mxu1 %v1849_v48  ;;  %3330 = vmatpush1.msra.mxu0 %v1851_v49  ;;  %v2459_v48 = vld [vmem:[#allocation20 + $0x1e90] sm:$0xff]  ;;  %v2426_v49 = vld [vmem:[#allocation20 + $0x1d88] sm:$0xff] }
 0xa3f   :  { %3260 = vmatprep.subr.mxu1 %v1818_v50  ;;  %3331 = vmatprep.subr.mxu0 %v1820_v51  ;;  %v2428_v50 = vld [vmem:[#allocation20 + $0x1d98] sm:$0xff]  ;;  %v2425_v51 = vld [vmem:[#allocation20 + $0x1d80] sm:$0xff] }
 0xa40   :  { %3261 = vmatpush1.msra.mxu1 %v1817_v52  ;;  %3332 = vmatpush1.msra.mxu0 %v1819_v53  ;;  %v2427_v52 = vld [vmem:[#allocation20 + $0x1d90] sm:$0xff]  ;;  %v2394_v53 = vld [vmem:[#allocation20 + $0x1c88] sm:$0xff] }
 0xa41   :  { %3262 = vmatprep.subr.mxu1 %v1786_v54  ;;  %3333 = vmatprep.subr.mxu0 %v1788_v60  ;;  %v2396_v54 = vld [vmem:[#allocation20 + $0x1c98] sm:$0xff]  ;;  %v2393_v60 = vld [vmem:[#allocation20 + $0x1c80] sm:$0xff] }
 0xa42   :  { %3263 = vmatpush1.msra.mxu1 %v1785_v55  ;;  %3334 = vmatpush1.msra.mxu0 %v1787_v61  ;;  %v2395_v55 = vld [vmem:[#allocation20 + $0x1c90] sm:$0xff]  ;;  %v2362_v61 = vld [vmem:[#allocation20 + $0x1b88] sm:$0xff] }
 0xa43   :  { %3264 = vmatprep.subr.mxu1 %v1754_v56  ;;  %3335 = vmatprep.subr.mxu0 %v1756_v57  ;;  %v2364_v56 = vld [vmem:[#allocation20 + $0x1b98] sm:$0xff]  ;;  %v2361_v57 = vld [vmem:[#allocation20 + $0x1b80] sm:$0xff] }
 0xa44   :  { %3265 = vmatpush1.msra.mxu1 %v1753_v58  ;;  %3336 = vmatpush1.msra.mxu0 %v1755_v63  ;;  %v2363_v58 = vld [vmem:[#allocation20 + $0x1b90] sm:$0xff]  ;;  %v2330_v63 = vld [vmem:[#allocation20 + $0x1a88] sm:$0xff] }
 0xa45   :  { %3266 = vmatprep.subr.mxu1 %v1722_v0  ;;  %3337 = vmatprep.subr.mxu0 %v1724_v1  ;;  %v2332_v0 = vld [vmem:[#allocation20 + $0x1a98] sm:$0xff]  ;;  %v2329_v1 = vld [vmem:[#allocation20 + $0x1a80] sm:$0xff] }
 0xa46   :  { %3267 = vmatpush1.msra.mxu1 %v1721_v2  ;;  %3338 = vmatpush1.msra.mxu0 %v1723_v3  ;;  %v2331_v2 = vld [vmem:[#allocation20 + $0x1a90] sm:$0xff]  ;;  %v2298_v3 = vld [vmem:[#allocation20 + $0x1988] sm:$0xff] }
 0xa47   :  { %3268 = vmatprep.subr.mxu1 %v1690_v5  ;;  %3339 = vmatprep.subr.mxu0 %v1692_v6  ;;  %v2300_v5 = vld [vmem:[#allocation20 + $0x1998] sm:$0xff]  ;;  %v2297_v6 = vld [vmem:[#allocation20 + $0x1980] sm:$0xff] }
 0xa48   :  { %3269 = vmatpush1.msra.mxu1 %v1689_v8  ;;  %3340 = vmatpush1.msra.mxu0 %v1691_v11  ;;  %v2299_v8 = vld [vmem:[#allocation20 + $0x1990] sm:$0xff]  ;;  %v2266_v11 = vld [vmem:[#allocation20 + $0x1888] sm:$0xff] }
 0xa49   :  { %3270 = vmatprep.subr.mxu1 %v1658_v12  ;;  %3341 = vmatprep.subr.mxu0 %v1660_v13  ;;  %v2268_v12 = vld [vmem:[#allocation20 + $0x1898] sm:$0xff]  ;;  %v2265_v13 = vld [vmem:[#allocation20 + $0x1880] sm:$0xff] }
 0xa4a   :  { %3271 = vmatpush1.msra.mxu1 %v1657_v15  ;;  %3342 = vmatpush1.msra.mxu0 %v1659_v16  ;;  %v2267_v15 = vld [vmem:[#allocation20 + $0x1890] sm:$0xff]  ;;  %v2234_v16 = vld [vmem:[#allocation20 + $0x1788] sm:$0xff] }
 0xa4b   :  { %3272 = vmatprep.subr.mxu1 %v1626_v18  ;;  %3343 = vmatprep.subr.mxu0 %v1628_v19  ;;  %v2236_v18 = vld [vmem:[#allocation20 + $0x1798] sm:$0xff]  ;;  %v2233_v19 = vld [vmem:[#allocation20 + $0x1780] sm:$0xff] }
 0xa4c   :  { %3273 = vmatpush1.msra.mxu1 %v1625_v20  ;;  %3344 = vmatpush1.msra.mxu0 %v1627_v22  ;;  %v2235_v20 = vld [vmem:[#allocation20 + $0x1790] sm:$0xff]  ;;  %v2202_v22 = vld [vmem:[#allocation20 + $0x1688] sm:$0xff] }
 0xa4d   :  { %3274 = vmatprep.subr.mxu1 %v1594_v23  ;;  %3345 = vmatprep.subr.mxu0 %v1596_v24  ;;  %v2204_v23 = vld [vmem:[#allocation20 + $0x1698] sm:$0xff]  ;;  %v2201_v24 = vld [vmem:[#allocation20 + $0x1680] sm:$0xff] }
 0xa4e   :  { %3275 = vmatpush1.msra.mxu1 %v1593_v25  ;;  %3346 = vmatpush1.msra.mxu0 %v1595_v26  ;;  %v2203_v25 = vld [vmem:[#allocation20 + $0x1690] sm:$0xff]  ;;  %v2170_v26 = vld [vmem:[#allocation20 + $0x1588] sm:$0xff] }
 0xa4f   :  { %3276 = vmatprep.subr.mxu1 %v1562_v27  ;;  %3347 = vmatprep.subr.mxu0 %v1564_v28  ;;  %v2172_v27 = vld [vmem:[#allocation20 + $0x1598] sm:$0xff]  ;;  %v2169_v28 = vld [vmem:[#allocation20 + $0x1580] sm:$0xff] }
 0xa50   :  { %3277 = vmatpush1.msra.mxu1 %v1561_v29  ;;  %3348 = vmatpush1.msra.mxu0 %v1563_v30  ;;  %v2171_v29 = vld [vmem:[#allocation20 + $0x1590] sm:$0xff]  ;;  %v2138_v30 = vld [vmem:[#allocation20 + $0x1488] sm:$0xff] }
 0xa51   :  { %3278 = vmatprep.subr.mxu1 %v1530_v31  ;;  %3349 = vmatprep.subr.mxu0 %v1532_v32  ;;  %v2140_v31 = vld [vmem:[#allocation20 + $0x1498] sm:$0xff]  ;;  %v2137_v32 = vld [vmem:[#allocation20 + $0x1480] sm:$0xff] }
 0xa52   :  { %3279 = vmatpush1.msra.mxu1 %v1529_v33  ;;  %3350 = vmatpush1.msra.mxu0 %v1531_v34  ;;  %v2139_v33 = vld [vmem:[#allocation20 + $0x1490] sm:$0xff]  ;;  %v2106_v34 = vld [vmem:[#allocation20 + $0x1388] sm:$0xff] }
 0xa53   :  { %3280 = vmatprep.subr.mxu1 %v1498_v35  ;;  %3351 = vmatprep.subr.mxu0 %v1500_v36  ;;  %v2108_v35 = vld [vmem:[#allocation20 + $0x1398] sm:$0xff]  ;;  %v2105_v36 = vld [vmem:[#allocation20 + $0x1380] sm:$0xff] }
 0xa54   :  { %3281 = vmatpush1.msra.mxu1 %v1497_v37  ;;  %3352 = vmatpush1.msra.mxu0 %v1499_v38  ;;  %v2107_v37 = vld [vmem:[#allocation20 + $0x1390] sm:$0xff]  ;;  %v2074_v38 = vld [vmem:[#allocation20 + $0x1288] sm:$0xff] }
 0xa55   :  { %3282 = vmatprep.subr.mxu1 %v2490_v43  ;;  %3353 = vmatprep.subr.mxu0 %v2492_v44  ;;  %v2076_v43 = vld [vmem:[#allocation20 + $0x1298] sm:$0xff]  ;;  %v2073_v44 = vld [vmem:[#allocation20 + $0x1280] sm:$0xff] }
 0xa56   :  { %3283 = vmatpush2.msra.mxu1 %v2489_v62  ;;  %3354 = vmatpush2.msra.mxu0 %v2491_v45  ;;  %v2075_v62 = vld [vmem:[#allocation20 + $0x1290] sm:$0xff]  ;;  %v2042_v45 = vld [vmem:[#allocation20 + $0x1188] sm:$0xff] }
 0xa57   :  { %3284 = vmatprep.subr.mxu1 %v2458_v59  ;;  %3355 = vmatprep.subr.mxu0 %v2460_v46  ;;  %v2044_v59 = vld [vmem:[#allocation20 + $0x1198] sm:$0xff]  ;;  %v2041_v46 = vld [vmem:[#allocation20 + $0x1180] sm:$0xff] }
 0xa58   :  { %3285 = vmatpush2.msra.mxu1 %v2457_v47  ;;  %3356 = vmatpush2.msra.mxu0 %v2459_v48  ;;  %v2043_v47 = vld [vmem:[#allocation20 + $0x1190] sm:$0xff]  ;;  %v2010_v48 = vld [vmem:[#allocation20 + $0x1088] sm:$0xff] }
 0xa59   :  { %3286 = vmatprep.subr.mxu1 %v2426_v49  ;;  %3357 = vmatprep.subr.mxu0 %v2428_v50  ;;  %v2012_v49 = vld [vmem:[#allocation20 + $0x1098] sm:$0xff]  ;;  %v2009_v50 = vld [vmem:[#allocation20 + $0x1080] sm:$0xff] }
 0xa5a   :  { %3287 = vmatpush2.msra.mxu1 %v2425_v51  ;;  %3358 = vmatpush2.msra.mxu0 %v2427_v52  ;;  %v2011_v51 = vld [vmem:[#allocation20 + $0x1090] sm:$0xff]  ;;  %v1982_v52 = vld [vmem:[#allocation20 + $0xfa8] sm:$0xff] }
 0xa5b   :  { %3288 = vmatprep.subr.mxu1 %v2394_v53  ;;  %3359 = vmatprep.subr.mxu0 %v2396_v54  ;;  %v1984_v53 = vld [vmem:[#allocation20 + $0xfb8] sm:$0xff]  ;;  %v1981_v54 = vld [vmem:[#allocation20 + $0xfa0] sm:$0xff] }
 0xa5c   :  { %3289 = vmatpush2.msra.mxu1 %v2393_v60  ;;  %3360 = vmatpush2.msra.mxu0 %v2395_v55  ;;  %v1983_v60 = vld [vmem:[#allocation20 + $0xfb0] sm:$0xff]  ;;  %v1950_v55 = vld [vmem:[#allocation20 + $0xea8] sm:$0xff] }
 0xa5d   :  { %3290 = vmatprep.subr.mxu1 %v2362_v61  ;;  %3361 = vmatprep.subr.mxu0 %v2364_v56  ;;  %v1952_v61 = vld [vmem:[#allocation20 + $0xeb8] sm:$0xff]  ;;  %v1949_v56 = vld [vmem:[#allocation20 + $0xea0] sm:$0xff] }
 0xa5e   :  { %3291 = vmatpush2.msra.mxu1 %v2361_v57  ;;  %3362 = vmatpush2.msra.mxu0 %v2363_v58  ;;  %v1951_v57 = vld [vmem:[#allocation20 + $0xeb0] sm:$0xff]  ;;  %v1918_v58 = vld [vmem:[#allocation20 + $0xda8] sm:$0xff] }
 0xa5f   :  { %3292 = vmatprep.subr.mxu1 %v2330_v63  ;;  %3363 = vmatprep.subr.mxu0 %v2332_v0  ;;  %v1920_v63 = vld [vmem:[#allocation20 + $0xdb8] sm:$0xff]  ;;  %v1917_v0 = vld [vmem:[#allocation20 + $0xda0] sm:$0xff] }
 0xa60   :  { %3293 = vmatpush2.msra.mxu1 %v2329_v1  ;;  %3364 = vmatpush2.msra.mxu0 %v2331_v2  ;;  %v1919_v1 = vld [vmem:[#allocation20 + $0xdb0] sm:$0xff]  ;;  %v1886_v2 = vld [vmem:[#allocation20 + $0xca8] sm:$0xff] }
 0xa61   :  { %3294 = vmatprep.subr.mxu1 %v2298_v3  ;;  %3365 = vmatprep.subr.mxu0 %v2300_v5  ;;  %v1888_v3 = vld [vmem:[#allocation20 + $0xcb8] sm:$0xff]  ;;  %v1885_v5 = vld [vmem:[#allocation20 + $0xca0] sm:$0xff] }
 0xa62   :  { %3295 = vmatpush2.msra.mxu1 %v2297_v6  ;;  %3366 = vmatpush2.msra.mxu0 %v2299_v8  ;;  %v1887_v6 = vld [vmem:[#allocation20 + $0xcb0] sm:$0xff]  ;;  %v1854_v8 = vld [vmem:[#allocation20 + $0xba8] sm:$0xff] }
 0xa63   :  { %3296 = vmatprep.subr.mxu1 %v2266_v11  ;;  %3367 = vmatprep.subr.mxu0 %v2268_v12  ;;  %v1856_v11 = vld [vmem:[#allocation20 + $0xbb8] sm:$0xff]  ;;  %v1853_v12 = vld [vmem:[#allocation20 + $0xba0] sm:$0xff] }
 0xa64   :  { %3297 = vmatpush2.msra.mxu1 %v2265_v13  ;;  %3368 = vmatpush2.msra.mxu0 %v2267_v15  ;;  %v1855_v13 = vld [vmem:[#allocation20 + $0xbb0] sm:$0xff]  ;;  %v1822_v15 = vld [vmem:[#allocation20 + $0xaa8] sm:$0xff] }
 0xa65   :  { %3298 = vmatprep.subr.mxu1 %v2234_v16  ;;  %3369 = vmatprep.subr.mxu0 %v2236_v18  ;;  %v1824_v16 = vld [vmem:[#allocation20 + $0xab8] sm:$0xff]  ;;  %v1821_v18 = vld [vmem:[#allocation20 + $0xaa0] sm:$0xff] }
 0xa66   :  { %3299 = vmatpush2.msra.mxu1 %v2233_v19  ;;  %3370 = vmatpush2.msra.mxu0 %v2235_v20  ;;  %v1823_v19 = vld [vmem:[#allocation20 + $0xab0] sm:$0xff]  ;;  %v1790_v20 = vld [vmem:[#allocation20 + $0x9a8] sm:$0xff] }
 0xa67   :  { %3300 = vmatprep.subr.mxu1 %v2202_v22  ;;  %3371 = vmatprep.subr.mxu0 %v2204_v23  ;;  %v1792_v22 = vld [vmem:[#allocation20 + $0x9b8] sm:$0xff]  ;;  %v1789_v23 = vld [vmem:[#allocation20 + $0x9a0] sm:$0xff] }
 0xa68   :  { %3301 = vmatpush2.msra.mxu1 %v2201_v24  ;;  %3372 = vmatpush2.msra.mxu0 %v2203_v25  ;;  %v1791_v24 = vld [vmem:[#allocation20 + $0x9b0] sm:$0xff]  ;;  %v1758_v25 = vld [vmem:[#allocation20 + $0x8a8] sm:$0xff] }
 0xa69   :  { %3302 = vmatprep.subr.mxu1 %v2170_v26  ;;  %3373 = vmatprep.subr.mxu0 %v2172_v27  ;;  %v1760_v26 = vld [vmem:[#allocation20 + $0x8b8] sm:$0xff]  ;;  %v1757_v27 = vld [vmem:[#allocation20 + $0x8a0] sm:$0xff] }
 0xa6a   :  { %3303 = vmatpush2.msra.mxu1 %v2169_v28  ;;  %3374 = vmatpush2.msra.mxu0 %v2171_v29  ;;  %v1759_v28 = vld [vmem:[#allocation20 + $0x8b0] sm:$0xff]  ;;  %v1726_v29 = vld [vmem:[#allocation20 + $0x7a8] sm:$0xff] }
 0xa6b   :  { %3304 = vmatprep.subr.mxu1 %v2138_v30  ;;  %3375 = vmatprep.subr.mxu0 %v2140_v31  ;;  %v1728_v30 = vld [vmem:[#allocation20 + $0x7b8] sm:$0xff]  ;;  %v1725_v31 = vld [vmem:[#allocation20 + $0x7a0] sm:$0xff] }
 0xa6c   :  { %3305 = vmatpush2.msra.mxu1 %v2137_v32  ;;  %3376 = vmatpush2.msra.mxu0 %v2139_v33  ;;  %v1727_v32 = vld [vmem:[#allocation20 + $0x7b0] sm:$0xff]  ;;  %v1694_v33 = vld [vmem:[#allocation20 + $0x6a8] sm:$0xff] }
 0xa6d   :  { %3306 = vmatprep.subr.mxu1 %v2106_v34  ;;  %3377 = vmatprep.subr.mxu0 %v2108_v35  ;;  %v1696_v34 = vld [vmem:[#allocation20 + $0x6b8] sm:$0xff]  ;;  %v1693_v35 = vld [vmem:[#allocation20 + $0x6a0] sm:$0xff] }
 0xa6e   :  { %3307 = vmatpush2.msra.mxu1 %v2105_v36  ;;  %3378 = vmatpush2.msra.mxu0 %v2107_v37  ;;  %v1695_v36 = vld [vmem:[#allocation20 + $0x6b0] sm:$0xff]  ;;  %v1662_v37 = vld [vmem:[#allocation20 + $0x5a8] sm:$0xff] }
 0xa6f   :  { %3308 = vmatprep.subr.mxu1 %v2074_v38  ;;  %3379 = vmatprep.subr.mxu0 %v2076_v43  ;;  %v1664_v38 = vld [vmem:[#allocation20 + $0x5b8] sm:$0xff]  ;;  %v1661_v43 = vld [vmem:[#allocation20 + $0x5a0] sm:$0xff] }
 0xa70   :  { %3309 = vmatpush2.msra.mxu1 %v2073_v44  ;;  %3380 = vmatpush2.msra.mxu0 %v2075_v62  ;;  %v1663_v44 = vld [vmem:[#allocation20 + $0x5b0] sm:$0xff]  ;;  %v1630_v62 = vld [vmem:[#allocation20 + $0x4a8] sm:$0xff] }
 0xa71   :  { %3310 = vmatprep.subr.mxu1 %v2042_v45  ;;  %3381 = vmatprep.subr.mxu0 %v2044_v59  ;;  %v1632_v45 = vld [vmem:[#allocation20 + $0x4b8] sm:$0xff]  ;;  %v1629_v59 = vld [vmem:[#allocation20 + $0x4a0] sm:$0xff] }
 0xa72   :  { %3311 = vmatpush2.msra.mxu1 %v2041_v46  ;;  %3382 = vmatpush2.msra.mxu0 %v2043_v47  ;;  %v1631_v46 = vld [vmem:[#allocation20 + $0x4b0] sm:$0xff]  ;;  %v1598_v47 = vld [vmem:[#allocation20 + $0x3a8] sm:$0xff] }
 0xa73   :  { %3312 = vmatprep.subr.mxu1 %v2010_v48  ;;  %3383 = vmatprep.subr.mxu0 %v2012_v49  ;;  %v1600_v48 = vld [vmem:[#allocation20 + $0x3b8] sm:$0xff]  ;;  %v1597_v49 = vld [vmem:[#allocation20 + $0x3a0] sm:$0xff] }
 0xa74   :  { %3313 = vmatpush2.msra.mxu1 %v2009_v50  ;;  %3384 = vmatpush2.msra.mxu0 %v2011_v51  ;;  %v1599_v50 = vld [vmem:[#allocation20 + $0x3b0] sm:$0xff]  ;;  %v1566_v51 = vld [vmem:[#allocation20 + $0x2a8] sm:$0xff] }
 0xa75   :  { %3315 = vmatmul.mubr.f32.vlgmr.msra.gmra.mxu1 %v8847_v17  ;;  %3386 = vmatmul.mubr.f32.vlgmr.msra.gmra.mxu0 %v8847_v17 }
 0xa76   :  { %3392 = vmatprep.subr.mxu1 %v1982_v52  ;;  %3463 = vmatprep.subr.mxu0 %v1984_v53  ;;  %v1568_v52 = vld [vmem:[#allocation20 + $0x2b8] sm:$0xff]  ;;  %v1565_v53 = vld [vmem:[#allocation20 + $0x2a0] sm:$0xff] }
 0xa77   :  { %3393 = vmatpush1.msra.mxu1 %v1981_v54  ;;  %3456 = vmatprep.mubr.f32.mxu1 %v8844_v14  ;;  %v1567_v54 = vld [vmem:[#allocation20 + $0x2b0] sm:$0xff] }
 0xa78   :  { %3464 = vmatpush1.msra.mxu0 %v1983_v60  ;;  %3527 = vmatprep.mubr.f32.mxu0 %v8844_v14  ;;  %v1534_v60 = vld [vmem:[#allocation20 + $0x1a8] sm:$0xff] }
 0xa79   :  { %3394 = vmatprep.subr.mxu1 %v1950_v55  ;;  %3465 = vmatprep.subr.mxu0 %v1952_v61  ;;  %v1536_v55 = vld [vmem:[#allocation20 + $0x1b8] sm:$0xff]  ;;  %v1533_v61 = vld [vmem:[#allocation20 + $0x1a0] sm:$0xff] }
 0xa7a   :  { %3395 = vmatpush1.msra.mxu1 %v1949_v56  ;;  %3466 = vmatpush1.msra.mxu0 %v1951_v57  ;;  %v1535_v56 = vld [vmem:[#allocation20 + $0x1b0] sm:$0xff]  ;;  %v1502_v57 = vld [vmem:[#allocation20 + $0xa8] sm:$0xff] }
 0xa7b   :  { %3396 = vmatprep.subr.mxu1 %v1918_v58  ;;  %3467 = vmatprep.subr.mxu0 %v1920_v63  ;;  %v1504_v58 = vld [vmem:[#allocation20 + $0xb8] sm:$0xff]  ;;  %v1501_v63 = vld [vmem:[#allocation20 + $0xa0] sm:$0xff] }
 0xa7c   :  { %3397 = vmatpush1.msra.mxu1 %v1917_v0  ;;  %3468 = vmatpush1.msra.mxu0 %v1919_v1  ;;  %v1503_v0 = vld [vmem:[#allocation20 + $0xb0] sm:$0xff]  ;;  %v2494_v1 = vld [vmem:[#allocation20 + $0x1fa8] sm:$0xff] }
 0xa7d   :  { %3398 = vmatprep.subr.mxu1 %v1886_v2  ;;  %3469 = vmatprep.subr.mxu0 %v1888_v3  ;;  %v2496_v2 = vld [vmem:[#allocation20 + $0x1fb8] sm:$0xff]  ;;  %v2493_v3 = vld [vmem:[#allocation20 + $0x1fa0] sm:$0xff] }
 0xa7e   :  { %3399 = vmatpush1.msra.mxu1 %v1885_v5  ;;  %3470 = vmatpush1.msra.mxu0 %v1887_v6  ;;  %v2495_v5 = vld [vmem:[#allocation20 + $0x1fb0] sm:$0xff]  ;;  %v2462_v6 = vld [vmem:[#allocation20 + $0x1ea8] sm:$0xff] }
 0xa7f   :  { %3400 = vmatprep.subr.mxu1 %v1854_v8  ;;  %3471 = vmatprep.subr.mxu0 %v1856_v11  ;;  %v2464_v8 = vld [vmem:[#allocation20 + $0x1eb8] sm:$0xff]  ;;  %v2461_v11 = vld [vmem:[#allocation20 + $0x1ea0] sm:$0xff] }
 0xa80   :  { %3401 = vmatpush1.msra.mxu1 %v1853_v12  ;;  %3472 = vmatpush1.msra.mxu0 %v1855_v13  ;;  %v2463_v12 = vld [vmem:[#allocation20 + $0x1eb0] sm:$0xff]  ;;  %v2430_v13 = vld [vmem:[#allocation20 + $0x1da8] sm:$0xff] }
 0xa81   :  { %3402 = vmatprep.subr.mxu1 %v1822_v15  ;;  %3473 = vmatprep.subr.mxu0 %v1824_v16  ;;  %v2432_v15 = vld [vmem:[#allocation20 + $0x1db8] sm:$0xff]  ;;  %v2429_v16 = vld [vmem:[#allocation20 + $0x1da0] sm:$0xff] }
 0xa82   :  { %3403 = vmatpush1.msra.mxu1 %v1821_v18  ;;  %3474 = vmatpush1.msra.mxu0 %v1823_v19  ;;  %v2431_v18 = vld [vmem:[#allocation20 + $0x1db0] sm:$0xff]  ;;  %v2398_v19 = vld [vmem:[#allocation20 + $0x1ca8] sm:$0xff] }
 0xa83   :  { %3404 = vmatprep.subr.mxu1 %v1790_v20  ;;  %3475 = vmatprep.subr.mxu0 %v1792_v22  ;;  %v2400_v20 = vld [vmem:[#allocation20 + $0x1cb8] sm:$0xff]  ;;  %v2397_v22 = vld [vmem:[#allocation20 + $0x1ca0] sm:$0xff] }
 0xa84   :  { %3405 = vmatpush1.msra.mxu1 %v1789_v23  ;;  %3476 = vmatpush1.msra.mxu0 %v1791_v24  ;;  %v2399_v23 = vld [vmem:[#allocation20 + $0x1cb0] sm:$0xff]  ;;  %v2366_v24 = vld [vmem:[#allocation20 + $0x1ba8] sm:$0xff] }
 0xa85   :  { %3406 = vmatprep.subr.mxu1 %v1758_v25  ;;  %3477 = vmatprep.subr.mxu0 %v1760_v26  ;;  %v2368_v25 = vld [vmem:[#allocation20 + $0x1bb8] sm:$0xff]  ;;  %v2365_v26 = vld [vmem:[#allocation20 + $0x1ba0] sm:$0xff] }
 0xa86   :  { %3407 = vmatpush1.msra.mxu1 %v1757_v27  ;;  %3478 = vmatpush1.msra.mxu0 %v1759_v28  ;;  %v2367_v27 = vld [vmem:[#allocation20 + $0x1bb0] sm:$0xff]  ;;  %v2334_v28 = vld [vmem:[#allocation20 + $0x1aa8] sm:$0xff] }
 0xa87   :  { %3408 = vmatprep.subr.mxu1 %v1726_v29  ;;  %3479 = vmatprep.subr.mxu0 %v1728_v30  ;;  %v2336_v29 = vld [vmem:[#allocation20 + $0x1ab8] sm:$0xff]  ;;  %v2333_v30 = vld [vmem:[#allocation20 + $0x1aa0] sm:$0xff] }
 0xa88   :  { %3409 = vmatpush1.msra.mxu1 %v1725_v31  ;;  %3480 = vmatpush1.msra.mxu0 %v1727_v32  ;;  %v2335_v31 = vld [vmem:[#allocation20 + $0x1ab0] sm:$0xff]  ;;  %v2302_v32 = vld [vmem:[#allocation20 + $0x19a8] sm:$0xff] }
 0xa89   :  { %3410 = vmatprep.subr.mxu1 %v1694_v33  ;;  %3481 = vmatprep.subr.mxu0 %v1696_v34  ;;  %v2304_v33 = vld [vmem:[#allocation20 + $0x19b8] sm:$0xff]  ;;  %v2301_v34 = vld [vmem:[#allocation20 + $0x19a0] sm:$0xff] }
 0xa8a   :  { %3411 = vmatpush1.msra.mxu1 %v1693_v35  ;;  %3482 = vmatpush1.msra.mxu0 %v1695_v36  ;;  %v2303_v35 = vld [vmem:[#allocation20 + $0x19b0] sm:$0xff]  ;;  %v2270_v36 = vld [vmem:[#allocation20 + $0x18a8] sm:$0xff] }
 0xa8b   :  { %3412 = vmatprep.subr.mxu1 %v1662_v37  ;;  %3483 = vmatprep.subr.mxu0 %v1664_v38  ;;  %v2272_v37 = vld [vmem:[#allocation20 + $0x18b8] sm:$0xff]  ;;  %v2269_v38 = vld [vmem:[#allocation20 + $0x18a0] sm:$0xff] }
 0xa8c   :  { %3413 = vmatpush1.msra.mxu1 %v1661_v43  ;;  %3484 = vmatpush1.msra.mxu0 %v1663_v44  ;;  %v2271_v43 = vld [vmem:[#allocation20 + $0x18b0] sm:$0xff]  ;;  %v2238_v44 = vld [vmem:[#allocation20 + $0x17a8] sm:$0xff] }
 0xa8d   :  { %3414 = vmatprep.subr.mxu1 %v1630_v62  ;;  %3485 = vmatprep.subr.mxu0 %v1632_v45  ;;  %v2240_v62 = vld [vmem:[#allocation20 + $0x17b8] sm:$0xff]  ;;  %v2237_v45 = vld [vmem:[#allocation20 + $0x17a0] sm:$0xff] }
 0xa8e   :  { %3415 = vmatpush1.msra.mxu1 %v1629_v59  ;;  %3486 = vmatpush1.msra.mxu0 %v1631_v46  ;;  %v2239_v59 = vld [vmem:[#allocation20 + $0x17b0] sm:$0xff]  ;;  %v2206_v46 = vld [vmem:[#allocation20 + $0x16a8] sm:$0xff] }
 0xa8f   :  { %3416 = vmatprep.subr.mxu1 %v1598_v47  ;;  %3487 = vmatprep.subr.mxu0 %v1600_v48  ;;  %v2208_v47 = vld [vmem:[#allocation20 + $0x16b8] sm:$0xff]  ;;  %v2205_v48 = vld [vmem:[#allocation20 + $0x16a0] sm:$0xff] }
 0xa90   :  { %3417 = vmatpush1.msra.mxu1 %v1597_v49  ;;  %3488 = vmatpush1.msra.mxu0 %v1599_v50  ;;  %v2207_v49 = vld [vmem:[#allocation20 + $0x16b0] sm:$0xff]  ;;  %v2174_v50 = vld [vmem:[#allocation20 + $0x15a8] sm:$0xff] }
 0xa91   :  { %3418 = vmatprep.subr.mxu1 %v1566_v51  ;;  %3489 = vmatprep.subr.mxu0 %v1568_v52  ;;  %v2176_v51 = vld [vmem:[#allocation20 + $0x15b8] sm:$0xff]  ;;  %v2173_v52 = vld [vmem:[#allocation20 + $0x15a0] sm:$0xff] }
 0xa92   :  { %3419 = vmatpush1.msra.mxu1 %v1565_v53  ;;  %3490 = vmatpush1.msra.mxu0 %v1567_v54  ;;  %v2175_v53 = vld [vmem:[#allocation20 + $0x15b0] sm:$0xff]  ;;  %v2142_v54 = vld [vmem:[#allocation20 + $0x14a8] sm:$0xff] }
 0xa93   :  { %3420 = vmatprep.subr.mxu1 %v1534_v60  ;;  %3491 = vmatprep.subr.mxu0 %v1536_v55  ;;  %v2144_v60 = vld [vmem:[#allocation20 + $0x14b8] sm:$0xff]  ;;  %v2141_v55 = vld [vmem:[#allocation20 + $0x14a0] sm:$0xff] }
 0xa94   :  { %3421 = vmatpush1.msra.mxu1 %v1533_v61  ;;  %3492 = vmatpush1.msra.mxu0 %v1535_v56  ;;  %v2143_v61 = vld [vmem:[#allocation20 + $0x14b0] sm:$0xff]  ;;  %v2110_v56 = vld [vmem:[#allocation20 + $0x13a8] sm:$0xff] }
 0xa95   :  { %3422 = vmatprep.subr.mxu1 %v1502_v57  ;;  %3493 = vmatprep.subr.mxu0 %v1504_v58  ;;  %v2112_v57 = vld [vmem:[#allocation20 + $0x13b8] sm:$0xff]  ;;  %v2109_v58 = vld [vmem:[#allocation20 + $0x13a0] sm:$0xff] }
 0xa96   :  { %3423 = vmatpush1.msra.mxu1 %v1501_v63  ;;  %3494 = vmatpush1.msra.mxu0 %v1503_v0  ;;  %v2111_v63 = vld [vmem:[#allocation20 + $0x13b0] sm:$0xff]  ;;  %v2078_v0 = vld [vmem:[#allocation20 + $0x12a8] sm:$0xff] }
 0xa97   :  { %3424 = vmatprep.subr.mxu1 %v2494_v1  ;;  %3495 = vmatprep.subr.mxu0 %v2496_v2  ;;  %v2080_v1 = vld [vmem:[#allocation20 + $0x12b8] sm:$0xff]  ;;  %v2077_v2 = vld [vmem:[#allocation20 + $0x12a0] sm:$0xff] }
 0xa98   :  { %3425 = vmatpush2.msra.mxu1 %v2493_v3  ;;  %3496 = vmatpush2.msra.mxu0 %v2495_v5  ;;  %v2079_v3 = vld [vmem:[#allocation20 + $0x12b0] sm:$0xff]  ;;  %v2046_v5 = vld [vmem:[#allocation20 + $0x11a8] sm:$0xff] }
 0xa99   :  { %3426 = vmatprep.subr.mxu1 %v2462_v6  ;;  %3497 = vmatprep.subr.mxu0 %v2464_v8  ;;  %v2048_v6 = vld [vmem:[#allocation20 + $0x11b8] sm:$0xff]  ;;  %v2045_v8 = vld [vmem:[#allocation20 + $0x11a0] sm:$0xff] }
 0xa9a   :  { %3427 = vmatpush2.msra.mxu1 %v2461_v11  ;;  %3498 = vmatpush2.msra.mxu0 %v2463_v12  ;;  %v2047_v11 = vld [vmem:[#allocation20 + $0x11b0] sm:$0xff]  ;;  %v2014_v12 = vld [vmem:[#allocation20 + $0x10a8] sm:$0xff] }
 0xa9b   :  { %3428 = vmatprep.subr.mxu1 %v2430_v13  ;;  %3499 = vmatprep.subr.mxu0 %v2432_v15  ;;  %v2016_v13 = vld [vmem:[#allocation20 + $0x10b8] sm:$0xff]  ;;  %v2013_v15 = vld [vmem:[#allocation20 + $0x10a0] sm:$0xff] }
 0xa9c   :  { %3429 = vmatpush2.msra.mxu1 %v2429_v16  ;;  %3500 = vmatpush2.msra.mxu0 %v2431_v18  ;;  %v2015_v16 = vld [vmem:[#allocation20 + $0x10b0] sm:$0xff]  ;;  %v1986_v18 = vld [vmem:[#allocation20 + $0xfc8] sm:$0xff] }
 0xa9d   :  { %3430 = vmatprep.subr.mxu1 %v2398_v19  ;;  %3501 = vmatprep.subr.mxu0 %v2400_v20  ;;  %v1988_v19 = vld [vmem:[#allocation20 + $0xfd8] sm:$0xff]  ;;  %v1985_v20 = vld [vmem:[#allocation20 + $0xfc0] sm:$0xff] }
 0xa9e   :  { %3431 = vmatpush2.msra.mxu1 %v2397_v22  ;;  %3502 = vmatpush2.msra.mxu0 %v2399_v23  ;;  %v1987_v22 = vld [vmem:[#allocation20 + $0xfd0] sm:$0xff]  ;;  %v1954_v23 = vld [vmem:[#allocation20 + $0xec8] sm:$0xff] }
 0xa9f   :  { %3432 = vmatprep.subr.mxu1 %v2366_v24  ;;  %3503 = vmatprep.subr.mxu0 %v2368_v25  ;;  %v1956_v24 = vld [vmem:[#allocation20 + $0xed8] sm:$0xff]  ;;  %v1953_v25 = vld [vmem:[#allocation20 + $0xec0] sm:$0xff] }
 0xaa0   :  { %3433 = vmatpush2.msra.mxu1 %v2365_v26  ;;  %3504 = vmatpush2.msra.mxu0 %v2367_v27  ;;  %v1955_v26 = vld [vmem:[#allocation20 + $0xed0] sm:$0xff]  ;;  %v1922_v27 = vld [vmem:[#allocation20 + $0xdc8] sm:$0xff] }
 0xaa1   :  { %3434 = vmatprep.subr.mxu1 %v2334_v28  ;;  %3505 = vmatprep.subr.mxu0 %v2336_v29  ;;  %v1924_v28 = vld [vmem:[#allocation20 + $0xdd8] sm:$0xff]  ;;  %v1921_v29 = vld [vmem:[#allocation20 + $0xdc0] sm:$0xff] }
 0xaa2   :  { %3435 = vmatpush2.msra.mxu1 %v2333_v30  ;;  %3506 = vmatpush2.msra.mxu0 %v2335_v31  ;;  %v1923_v30 = vld [vmem:[#allocation20 + $0xdd0] sm:$0xff]  ;;  %v1890_v31 = vld [vmem:[#allocation20 + $0xcc8] sm:$0xff] }
 0xaa3   :  { %3436 = vmatprep.subr.mxu1 %v2302_v32  ;;  %3507 = vmatprep.subr.mxu0 %v2304_v33  ;;  %v1892_v32 = vld [vmem:[#allocation20 + $0xcd8] sm:$0xff]  ;;  %v1889_v33 = vld [vmem:[#allocation20 + $0xcc0] sm:$0xff] }
 0xaa4   :  { %3437 = vmatpush2.msra.mxu1 %v2301_v34  ;;  %3508 = vmatpush2.msra.mxu0 %v2303_v35  ;;  %v1891_v34 = vld [vmem:[#allocation20 + $0xcd0] sm:$0xff]  ;;  %v1858_v35 = vld [vmem:[#allocation20 + $0xbc8] sm:$0xff] }
 0xaa5   :  { %3438 = vmatprep.subr.mxu1 %v2270_v36  ;;  %3509 = vmatprep.subr.mxu0 %v2272_v37  ;;  %v1860_v36 = vld [vmem:[#allocation20 + $0xbd8] sm:$0xff]  ;;  %v1857_v37 = vld [vmem:[#allocation20 + $0xbc0] sm:$0xff] }
 0xaa6   :  { %3439 = vmatpush2.msra.mxu1 %v2269_v38  ;;  %3510 = vmatpush2.msra.mxu0 %v2271_v43  ;;  %v1859_v38 = vld [vmem:[#allocation20 + $0xbd0] sm:$0xff]  ;;  %v1826_v43 = vld [vmem:[#allocation20 + $0xac8] sm:$0xff] }
 0xaa7   :  { %3440 = vmatprep.subr.mxu1 %v2238_v44  ;;  %3511 = vmatprep.subr.mxu0 %v2240_v62  ;;  %v1828_v44 = vld [vmem:[#allocation20 + $0xad8] sm:$0xff]  ;;  %v1825_v62 = vld [vmem:[#allocation20 + $0xac0] sm:$0xff] }
 0xaa8   :  { %3441 = vmatpush2.msra.mxu1 %v2237_v45  ;;  %3512 = vmatpush2.msra.mxu0 %v2239_v59  ;;  %v1827_v45 = vld [vmem:[#allocation20 + $0xad0] sm:$0xff]  ;;  %v1794_v59 = vld [vmem:[#allocation20 + $0x9c8] sm:$0xff] }
 0xaa9   :  { %3442 = vmatprep.subr.mxu1 %v2206_v46  ;;  %3513 = vmatprep.subr.mxu0 %v2208_v47  ;;  %v1796_v46 = vld [vmem:[#allocation20 + $0x9d8] sm:$0xff]  ;;  %v1793_v47 = vld [vmem:[#allocation20 + $0x9c0] sm:$0xff] }
 0xaaa   :  { %3443 = vmatpush2.msra.mxu1 %v2205_v48  ;;  %3514 = vmatpush2.msra.mxu0 %v2207_v49  ;;  %v1795_v48 = vld [vmem:[#allocation20 + $0x9d0] sm:$0xff]  ;;  %v1762_v49 = vld [vmem:[#allocation20 + $0x8c8] sm:$0xff] }
 0xaab   :  { %3444 = vmatprep.subr.mxu1 %v2174_v50  ;;  %3515 = vmatprep.subr.mxu0 %v2176_v51  ;;  %v1764_v50 = vld [vmem:[#allocation20 + $0x8d8] sm:$0xff]  ;;  %v1761_v51 = vld [vmem:[#allocation20 + $0x8c0] sm:$0xff] }
 0xaac   :  { %3445 = vmatpush2.msra.mxu1 %v2173_v52  ;;  %3516 = vmatpush2.msra.mxu0 %v2175_v53  ;;  %v1763_v52 = vld [vmem:[#allocation20 + $0x8d0] sm:$0xff]  ;;  %v1730_v53 = vld [vmem:[#allocation20 + $0x7c8] sm:$0xff] }
 0xaad   :  { %3446 = vmatprep.subr.mxu1 %v2142_v54  ;;  %3517 = vmatprep.subr.mxu0 %v2144_v60  ;;  %v1732_v54 = vld [vmem:[#allocation20 + $0x7d8] sm:$0xff]  ;;  %v1729_v60 = vld [vmem:[#allocation20 + $0x7c0] sm:$0xff] }
 0xaae   :  { %3447 = vmatpush2.msra.mxu1 %v2141_v55  ;;  %3518 = vmatpush2.msra.mxu0 %v2143_v61  ;;  %v1731_v55 = vld [vmem:[#allocation20 + $0x7d0] sm:$0xff]  ;;  %v1698_v61 = vld [vmem:[#allocation20 + $0x6c8] sm:$0xff] }
 0xaaf   :  { %3448 = vmatprep.subr.mxu1 %v2110_v56  ;;  %3519 = vmatprep.subr.mxu0 %v2112_v57  ;;  %v1700_v56 = vld [vmem:[#allocation20 + $0x6d8] sm:$0xff]  ;;  %v1697_v57 = vld [vmem:[#allocation20 + $0x6c0] sm:$0xff] }
 0xab0   :  { %3449 = vmatpush2.msra.mxu1 %v2109_v58  ;;  %3520 = vmatpush2.msra.mxu0 %v2111_v63  ;;  %v1699_v58 = vld [vmem:[#allocation20 + $0x6d0] sm:$0xff]  ;;  %v1666_v63 = vld [vmem:[#allocation20 + $0x5c8] sm:$0xff] }
 0xab1   :  { %3450 = vmatprep.subr.mxu1 %v2078_v0  ;;  %3521 = vmatprep.subr.mxu0 %v2080_v1  ;;  %v1668_v0 = vld [vmem:[#allocation20 + $0x5d8] sm:$0xff]  ;;  %v1665_v1 = vld [vmem:[#allocation20 + $0x5c0] sm:$0xff] }
 0xab2   :  { %3451 = vmatpush2.msra.mxu1 %v2077_v2  ;;  %3522 = vmatpush2.msra.mxu0 %v2079_v3  ;;  %v1667_v2 = vld [vmem:[#allocation20 + $0x5d0] sm:$0xff]  ;;  %v1634_v3 = vld [vmem:[#allocation20 + $0x4c8] sm:$0xff] }
 0xab3   :  { %3452 = vmatprep.subr.mxu1 %v2046_v5  ;;  %3523 = vmatprep.subr.mxu0 %v2048_v6  ;;  %v1636_v5 = vld [vmem:[#allocation20 + $0x4d8] sm:$0xff]  ;;  %v1633_v6 = vld [vmem:[#allocation20 + $0x4c0] sm:$0xff] }
 0xab4   :  { %3453 = vmatpush2.msra.mxu1 %v2045_v8  ;;  %3524 = vmatpush2.msra.mxu0 %v2047_v11  ;;  %v1635_v8 = vld [vmem:[#allocation20 + $0x4d0] sm:$0xff]  ;;  %v1602_v11 = vld [vmem:[#allocation20 + $0x3c8] sm:$0xff] }
 0xab5   :  { %3454 = vmatprep.subr.mxu1 %v2014_v12  ;;  %3525 = vmatprep.subr.mxu0 %v2016_v13  ;;  %v1604_v12 = vld [vmem:[#allocation20 + $0x3d8] sm:$0xff]  ;;  %v1601_v13 = vld [vmem:[#allocation20 + $0x3c0] sm:$0xff] }
 0xab6   :  { %3455 = vmatpush2.msra.mxu1 %v2013_v15  ;;  %3526 = vmatpush2.msra.mxu0 %v2015_v16  ;;  %v1603_v15 = vld [vmem:[#allocation20 + $0x3d0] sm:$0xff]  ;;  %v1570_v16 = vld [vmem:[#allocation20 + $0x2c8] sm:$0xff] }
 0xab7   :  { %3457 = vmatmul.mubr.f32.vlgmr.msra.gmra.mxu1 %v8847_v17  ;;  %3528 = vmatmul.mubr.f32.vlgmr.msra.gmra.mxu0 %v8847_v17 }
 0xab8   :  { %3534 = vmatprep.subr.mxu1 %v1986_v18  ;;  %3605 = vmatprep.subr.mxu0 %v1988_v19  ;;  %v1572_v18 = vld [vmem:[#allocation20 + $0x2d8] sm:$0xff]  ;;  %v1569_v19 = vld [vmem:[#allocation20 + $0x2c0] sm:$0xff] }
 0xab9   :  { %3535 = vmatpush1.msra.mxu1 %v1985_v20  ;;  %3598 = vmatprep.mubr.f32.mxu1 %v8844_v14  ;;  %v1571_v20 = vld [vmem:[#allocation20 + $0x2d0] sm:$0xff] }
 0xaba   :  { %3606 = vmatpush1.msra.mxu0 %v1987_v22  ;;  %3669 = vmatprep.mubr.f32.mxu0 %v8844_v14  ;;  %v1538_v22 = vld [vmem:[#allocation20 + $0x1c8] sm:$0xff] }
 0xabb   :  { %3536 = vmatprep.subr.mxu1 %v1954_v23  ;;  %3607 = vmatprep.subr.mxu0 %v1956_v24  ;;  %v1540_v23 = vld [vmem:[#allocation20 + $0x1d8] sm:$0xff]  ;;  %v1537_v24 = vld [vmem:[#allocation20 + $0x1c0] sm:$0xff] }
 0xabc   :  { %3537 = vmatpush1.msra.mxu1 %v1953_v25  ;;  %3608 = vmatpush1.msra.mxu0 %v1955_v26  ;;  %v1539_v25 = vld [vmem:[#allocation20 + $0x1d0] sm:$0xff]  ;;  %v1506_v26 = vld [vmem:[#allocation20 + $0xc8] sm:$0xff] }
 0xabd   :  { %3538 = vmatprep.subr.mxu1 %v1922_v27  ;;  %3609 = vmatprep.subr.mxu0 %v1924_v28  ;;  %v1508_v27 = vld [vmem:[#allocation20 + $0xd8] sm:$0xff]  ;;  %v1505_v28 = vld [vmem:[#allocation20 + $0xc0] sm:$0xff] }
 0xabe   :  { %3539 = vmatpush1.msra.mxu1 %v1921_v29  ;;  %3610 = vmatpush1.msra.mxu0 %v1923_v30  ;;  %v1507_v29 = vld [vmem:[#allocation20 + $0xd0] sm:$0xff]  ;;  %v2498_v30 = vld [vmem:[#allocation20 + $0x1fc8] sm:$0xff] }
 0xabf   :  { %3540 = vmatprep.subr.mxu1 %v1890_v31  ;;  %3611 = vmatprep.subr.mxu0 %v1892_v32  ;;  %v2500_v31 = vld [vmem:[#allocation20 + $0x1fd8] sm:$0xff]  ;;  %v2497_v32 = vld [vmem:[#allocation20 + $0x1fc0] sm:$0xff] }
 0xac0   :  { %3541 = vmatpush1.msra.mxu1 %v1889_v33  ;;  %3612 = vmatpush1.msra.mxu0 %v1891_v34  ;;  %v2499_v33 = vld [vmem:[#allocation20 + $0x1fd0] sm:$0xff]  ;;  %v2466_v34 = vld [vmem:[#allocation20 + $0x1ec8] sm:$0xff] }
 0xac1   :  { %3542 = vmatprep.subr.mxu1 %v1858_v35  ;;  %3613 = vmatprep.subr.mxu0 %v1860_v36  ;;  %v2468_v35 = vld [vmem:[#allocation20 + $0x1ed8] sm:$0xff]  ;;  %v2465_v36 = vld [vmem:[#allocation20 + $0x1ec0] sm:$0xff] }
 0xac2   :  { %3543 = vmatpush1.msra.mxu1 %v1857_v37  ;;  %3614 = vmatpush1.msra.mxu0 %v1859_v38  ;;  %v2467_v37 = vld [vmem:[#allocation20 + $0x1ed0] sm:$0xff]  ;;  %v2434_v38 = vld [vmem:[#allocation20 + $0x1dc8] sm:$0xff] }
 0xac3   :  { %3544 = vmatprep.subr.mxu1 %v1826_v43  ;;  %3615 = vmatprep.subr.mxu0 %v1828_v44  ;;  %v2436_v43 = vld [vmem:[#allocation20 + $0x1dd8] sm:$0xff]  ;;  %v2433_v44 = vld [vmem:[#allocation20 + $0x1dc0] sm:$0xff] }
 0xac4   :  { %3545 = vmatpush1.msra.mxu1 %v1825_v62  ;;  %3616 = vmatpush1.msra.mxu0 %v1827_v45  ;;  %v2435_v62 = vld [vmem:[#allocation20 + $0x1dd0] sm:$0xff]  ;;  %v2402_v45 = vld [vmem:[#allocation20 + $0x1cc8] sm:$0xff] }
 0xac5   :  { %3546 = vmatprep.subr.mxu1 %v1794_v59  ;;  %3617 = vmatprep.subr.mxu0 %v1796_v46  ;;  %v2404_v59 = vld [vmem:[#allocation20 + $0x1cd8] sm:$0xff]  ;;  %v2401_v46 = vld [vmem:[#allocation20 + $0x1cc0] sm:$0xff] }
 0xac6   :  { %3547 = vmatpush1.msra.mxu1 %v1793_v47  ;;  %3618 = vmatpush1.msra.mxu0 %v1795_v48  ;;  %v2403_v47 = vld [vmem:[#allocation20 + $0x1cd0] sm:$0xff]  ;;  %v2370_v48 = vld [vmem:[#allocation20 + $0x1bc8] sm:$0xff] }
 0xac7   :  { %3548 = vmatprep.subr.mxu1 %v1762_v49  ;;  %3619 = vmatprep.subr.mxu0 %v1764_v50  ;;  %v2372_v49 = vld [vmem:[#allocation20 + $0x1bd8] sm:$0xff]  ;;  %v2369_v50 = vld [vmem:[#allocation20 + $0x1bc0] sm:$0xff] }
 0xac8   :  { %3549 = vmatpush1.msra.mxu1 %v1761_v51  ;;  %3620 = vmatpush1.msra.mxu0 %v1763_v52  ;;  %v2371_v51 = vld [vmem:[#allocation20 + $0x1bd0] sm:$0xff]  ;;  %v2338_v52 = vld [vmem:[#allocation20 + $0x1ac8] sm:$0xff] }
 0xac9   :  { %3550 = vmatprep.subr.mxu1 %v1730_v53  ;;  %3621 = vmatprep.subr.mxu0 %v1732_v54  ;;  %v2340_v53 = vld [vmem:[#allocation20 + $0x1ad8] sm:$0xff]  ;;  %v8875_v54 = vpop.f32.mrf.mxu1 }
 0xaca   :  { %3551 = vmatpush1.msra.mxu1 %v1729_v60  ;;  %3622 = vmatpush1.msra.mxu0 %v1731_v55  ;;  %v2337_v60 = vld [vmem:[#allocation20 + $0x1ac0] sm:$0xff]  ;;  %v2339_v55 = vld [vmem:[#allocation20 + $0x1ad0] sm:$0xff] }
 0xacb   :  { %3552 = vmatprep.subr.mxu1 %v1698_v61  ;;  %3623 = vmatprep.subr.mxu0 %v1700_v56  ;;  %v2306_v61 = vld [vmem:[#allocation20 + $0x19c8] sm:$0xff]  ;;  %v2308_v56 = vld [vmem:[#allocation20 + $0x19d8] sm:$0xff] }
 0xacc   :  { %3553 = vmatpush1.msra.mxu1 %v1697_v57  ;;  %3624 = vmatpush1.msra.mxu0 %v1699_v58  ;;  %v2305_v57 = vld [vmem:[#allocation20 + $0x19c0] sm:$0xff]  ;;  %v2307_v58 = vld [vmem:[#allocation20 + $0x19d0] sm:$0xff] }
 0xacd   :  { %3554 = vmatprep.subr.mxu1 %v1666_v63  ;;  %3625 = vmatprep.subr.mxu0 %v1668_v0  ;;  %v2274_v63 = vld [vmem:[#allocation20 + $0x18c8] sm:$0xff]  ;;  %v2276_v0 = vld [vmem:[#allocation20 + $0x18d8] sm:$0xff] }
 0xace   :  { %3555 = vmatpush1.msra.mxu1 %v1665_v1  ;;  %3626 = vmatpush1.msra.mxu0 %v1667_v2  ;;  %v8877_v1 = vpop.f32.mrf.mxu1  ;;  %v2273_v2 = vld [vmem:[#allocation20 + $0x18c0] sm:$0xff] }
 0xacf   :  { %3556 = vmatprep.subr.mxu1 %v1634_v3  ;;  %3627 = vmatprep.subr.mxu0 %v1636_v5  ;;  %v2275_v3 = vld [vmem:[#allocation20 + $0x18d0] sm:$0xff]  ;;  %v2242_v5 = vld [vmem:[#allocation20 + $0x17c8] sm:$0xff] }
 0xad0   :  { %3557 = vmatpush1.msra.mxu1 %v1633_v6  ;;  %3628 = vmatpush1.msra.mxu0 %v1635_v8  ;;  %v2244_v6 = vld [vmem:[#allocation20 + $0x17d8] sm:$0xff]  ;;  %v8879_v8 = vpop.f32.mrf.mxu1 }
 0xad1   :  { %3558 = vmatprep.subr.mxu1 %v1602_v11  ;;  %3629 = vmatprep.subr.mxu0 %v1604_v12  ;;  %v2241_v11 = vld [vmem:[#allocation20 + $0x17c0] sm:$0xff]  ;;  %v2243_v12 = vld [vmem:[#allocation20 + $0x17d0] sm:$0xff] }
 0xad2   :  { %3559 = vmatpush1.msra.mxu1 %v1601_v13  ;;  %3630 = vmatpush1.msra.mxu0 %v1603_v15  ;;  %v2210_v13 = vld [vmem:[#allocation20 + $0x16c8] sm:$0xff]  ;;  %v2212_v15 = vld [vmem:[#allocation20 + $0x16d8] sm:$0xff] }
 0xad3   :  { %3560 = vmatprep.subr.mxu1 %v1570_v16  ;;  %3631 = vmatprep.subr.mxu0 %v1572_v18  ;;  %v2209_v16 = vld [vmem:[#allocation20 + $0x16c0] sm:$0xff]  ;;  %v2211_v18 = vld [vmem:[#allocation20 + $0x16d0] sm:$0xff] }
 0xad4   :  { %3561 = vmatpush1.msra.mxu1 %v1569_v19  ;;  %3632 = vmatpush1.msra.mxu0 %v1571_v20  ;;  %v2178_v19 = vld [vmem:[#allocation20 + $0x15c8] sm:$0xff]  ;;  %v2180_v20 = vld [vmem:[#allocation20 + $0x15d8] sm:$0xff] }
 0xad5   :  { %3562 = vmatprep.subr.mxu1 %v1538_v22  ;;  %3633 = vmatprep.subr.mxu0 %v1540_v23  ;;  %v8881_v22 = vpop.f32.mrf.mxu1  ;;  %v2177_v23 = vld [vmem:[#allocation20 + $0x15c0] sm:$0xff] }
 0xad6   :  { %3563 = vmatpush1.msra.mxu1 %v1537_v24  ;;  %3634 = vmatpush1.msra.mxu0 %v1539_v25  ;;  %v2179_v24 = vld [vmem:[#allocation20 + $0x15d0] sm:$0xff]  ;;  %v2146_v25 = vld [vmem:[#allocation20 + $0x14c8] sm:$0xff] }
 0xad7   :  { %3564 = vmatprep.subr.mxu1 %v1506_v26  ;;  %3635 = vmatprep.subr.mxu0 %v1508_v27  ;;  %v2148_v26 = vld [vmem:[#allocation20 + $0x14d8] sm:$0xff]  ;;  %v8883_v27 = vpop.f32.mrf.mxu1 }
 0xad8   :  { %3565 = vmatpush1.msra.mxu1 %v1505_v28  ;;  %3636 = vmatpush1.msra.mxu0 %v1507_v29  ;;  %v2145_v28 = vld [vmem:[#allocation20 + $0x14c0] sm:$0xff]  ;;  %v2147_v29 = vld [vmem:[#allocation20 + $0x14d0] sm:$0xff] }
 0xad9   :  { %3566 = vmatprep.subr.mxu1 %v2498_v30  ;;  %3637 = vmatprep.subr.mxu0 %v2500_v31  ;;  %v8886_v30 = vsub.s32 4, %v8766_v9  ;;  %v2114_v31 = vld [vmem:[#allocation20 + $0x13c8] sm:$0xff] }
 0xada   :  { %3567 = vmatpush2.msra.mxu1 %v2497_v32  ;;  %3638 = vmatpush2.msra.mxu0 %v2499_v33  ;;  %v2116_v32 = vld [vmem:[#allocation20 + $0x13d8] sm:$0xff]  ;;  %v8888_v33 = vld [vmem:[#allocation22 + $0x8] sm:$0xff] }
 0xadb   :  { %3568 = vmatprep.subr.mxu1 %v2466_v34  ;;  %3639 = vmatprep.subr.mxu0 %v2468_v35  ;;  %v2113_v34 = vld [vmem:[#allocation20 + $0x13c0] sm:$0xff]  ;;  %v2115_v35 = vld [vmem:[#allocation20 + $0x13d0] sm:$0xff] }
 0xadc   :  { %3569 = vmatpush2.msra.mxu1 %v2465_v36  ;;  %3640 = vmatpush2.msra.mxu0 %v2467_v37  ;;  %v8891_v36 = vsub.s32 5, %v8766_v9  ;;  %v2082_v37 = vld [vmem:[#allocation20 + $0x12c8] sm:$0xff] }
 0xadd   :  { %3570 = vmatprep.subr.mxu1 %v2434_v38  ;;  %3641 = vmatprep.subr.mxu0 %v2436_v43  ;;  %v2084_v38 = vld [vmem:[#allocation20 + $0x12d8] sm:$0xff]  ;;  %v2564_v43 = vrot.slane %v8888_v33, %v8886_v30 }
 0xade   :  { %3571 = vmatpush2.msra.mxu1 %v2433_v44  ;;  %3642 = vmatpush2.msra.mxu0 %v2435_v62  ;;  %v8895_v44 = vpop.f32.mrf.mxu1  ;;  %v2081_v62 = vld [vmem:[#allocation20 + $0x12c0] sm:$0xff] }
 0xadf   :  { %3572 = vmatprep.subr.mxu1 %v2402_v45  ;;  %3643 = vmatprep.subr.mxu0 %v2404_v59  ;;  %v2083_v45 = vld [vmem:[#allocation20 + $0x12d0] sm:$0xff]  ;;  %v2050_v59 = vld [vmem:[#allocation20 + $0x11c8] sm:$0xff] }
 0xae0   :  { %3573 = vmatpush2.msra.mxu1 %v2401_v46  ;;  %3644 = vmatpush2.msra.mxu0 %v2403_v47  ;;  %v2052_v46 = vld [vmem:[#allocation20 + $0x11d8] sm:$0xff]  ;;  %v2568_v47 = vrot.slane %v8888_v33, %v8891_v36 }
 0xae1   :  { %3574 = vmatprep.subr.mxu1 %v2370_v48  ;;  %3645 = vmatprep.subr.mxu0 %v2372_v49  ;;  %v2049_v48 = vld [vmem:[#allocation20 + $0x11c0] sm:$0xff]  ;;  %v2051_v49 = vld [vmem:[#allocation20 + $0x11d0] sm:$0xff] }
 0xae2   :  { %3575 = vmatpush2.msra.mxu1 %v2369_v50  ;;  %3646 = vmatpush2.msra.mxu0 %v2371_v51  ;;  %v2018_v51 = vld [vmem:[#allocation20 + $0x10c8] sm:$0xff] }
 0xae3   :  { %3576 = vmatprep.subr.mxu1 %v2338_v52  ;;  %3647 = vmatprep.subr.mxu0 %v2340_v53  ;;  %v2020_v52 = vld [vmem:[#allocation20 + $0x10d8] sm:$0xff] }
 0xae4   :  { %3577 = vmatpush2.msra.mxu1 %v2337_v60  ;;  %3648 = vmatpush2.msra.mxu0 %v2339_v55  ;;  %v2017_v60 = vld [vmem:[#allocation20 + $0x10c0] sm:$0xff]  ;;  %v2019_v55 = vld [vmem:[#allocation20 + $0x10d0] sm:$0xff] }
 0xae5   :  { %3578 = vmatprep.subr.mxu1 %v2306_v61  ;;  %3649 = vmatprep.subr.mxu0 %v2308_v56 }
 0xae6   :  { %3579 = vmatpush2.msra.mxu1 %v2305_v57  ;;  %3650 = vmatpush2.msra.mxu0 %v2307_v58  ;;  %v1990_v57 = vld [vmem:[#allocation20 + $0xfe8] sm:$0xff]  ;;  %v1992_v58 = vld [vmem:[#allocation20 + $0xff8] sm:$0xff] }
 0xae7   :  { %3580 = vmatprep.subr.mxu1 %v2274_v63  ;;  %3651 = vmatprep.subr.mxu0 %v2276_v0  ;;  %v1989_v0 = vld [vmem:[#allocation20 + $0xfe0] sm:$0xff] }
 0xae8   :  { %3581 = vmatpush2.msra.mxu1 %v2273_v2  ;;  %3652 = vmatpush2.msra.mxu0 %v2275_v3  ;;  %v1991_v3 = vld [vmem:[#allocation20 + $0xff0] sm:$0xff] }
 0xae9   :  { %3582 = vmatprep.subr.mxu1 %v2242_v5  ;;  %3653 = vmatprep.subr.mxu0 %v2244_v6  ;;  %v1958_v6 = vld [vmem:[#allocation20 + $0xee8] sm:$0xff] }
 0xaea   :  { %3583 = vmatpush2.msra.mxu1 %v2241_v11  ;;  %3654 = vmatpush2.msra.mxu0 %v2243_v12  ;;  %v1960_v11 = vld [vmem:[#allocation20 + $0xef8] sm:$0xff]  ;;  %v1957_v12 = vld [vmem:[#allocation20 + $0xee0] sm:$0xff] }
 0xaeb   :  { %3584 = vmatprep.subr.mxu1 %v2210_v13  ;;  %3655 = vmatprep.subr.mxu0 %v2212_v15  ;;  %v1959_v13 = vld [vmem:[#allocation20 + $0xef0] sm:$0xff]  ;;  %v1926_v15 = vld [vmem:[#allocation20 + $0xde8] sm:$0xff] }
 0xaec   :  { %3585 = vmatpush2.msra.mxu1 %v2209_v16  ;;  %3656 = vmatpush2.msra.mxu0 %v2211_v18  ;;  %v1928_v16 = vld [vmem:[#allocation20 + $0xdf8] sm:$0xff]  ;;  %v1925_v18 = vld [vmem:[#allocation20 + $0xde0] sm:$0xff] }
 0xaed   :  { %3586 = vmatprep.subr.mxu1 %v2178_v19  ;;  %3657 = vmatprep.subr.mxu0 %v2180_v20  ;;  %v1927_v19 = vld [vmem:[#allocation20 + $0xdf0] sm:$0xff]  ;;  %v1894_v20 = vld [vmem:[#allocation20 + $0xce8] sm:$0xff] }
 0xaee   :  { %3587 = vmatpush2.msra.mxu1 %v2177_v23  ;;  %3658 = vmatpush2.msra.mxu0 %v2179_v24  ;;  %v1896_v23 = vld [vmem:[#allocation20 + $0xcf8] sm:$0xff]  ;;  %v1893_v24 = vld [vmem:[#allocation20 + $0xce0] sm:$0xff] }
 0xaef   :  { %3588 = vmatprep.subr.mxu1 %v2146_v25  ;;  %3659 = vmatprep.subr.mxu0 %v2148_v26  ;;  %v1895_v25 = vld [vmem:[#allocation20 + $0xcf0] sm:$0xff]  ;;  %v1864_v26 = vld [vmem:[#allocation20 + $0xbf8] sm:$0xff] }
 0xaf0   :  { %3589 = vmatpush2.msra.mxu1 %v2145_v28  ;;  %3660 = vmatpush2.msra.mxu0 %v2147_v29  ;;  %v1861_v28 = vld [vmem:[#allocation20 + $0xbe0] sm:$0xff]  ;;  %v1863_v29 = vld [vmem:[#allocation20 + $0xbf0] sm:$0xff] }
 0xaf1   :  { %3590 = vmatprep.subr.mxu1 %v2114_v31  ;;  %3661 = vmatprep.subr.mxu0 %v2116_v32  ;;  %v1830_v31 = vld [vmem:[#allocation20 + $0xae8] sm:$0xff]  ;;  %v1832_v32 = vld [vmem:[#allocation20 + $0xaf8] sm:$0xff] }
 0xaf2   :  { %3591 = vmatpush2.msra.mxu1 %v2113_v34  ;;  %3662 = vmatpush2.msra.mxu0 %v2115_v35  ;;  %v1829_v34 = vld [vmem:[#allocation20 + $0xae0] sm:$0xff]  ;;  %v1831_v35 = vld [vmem:[#allocation20 + $0xaf0] sm:$0xff] }
 0xaf3   :  { %3592 = vmatprep.subr.mxu1 %v2082_v37  ;;  %3663 = vmatprep.subr.mxu0 %v2084_v38  ;;  %v3174_v50 = vpop.f32.mrf.mxu1  ;;  %v1798_v37 = vld [vmem:[#allocation20 + $0x9e8] sm:$0xff]  ;;  %v1800_v38 = vld [vmem:[#allocation20 + $0x9f8] sm:$0xff] }
 0xaf4   :  { %3593 = vmatpush2.msra.mxu1 %v2081_v62  ;;  %3664 = vmatpush2.msra.mxu0 %v2083_v45  ;;  %v3175_v53 = vadd.f32 %v3174_v50, %v2564_v43  ;;  %v1797_v43 = vld [vmem:[#allocation20 + $0x9e0] sm:$0xff]  ;;  %v1799_v62 = vld [vmem:[#allocation20 + $0x9f0] sm:$0xff]  ;;  %v1766_v45 = vld [vmem:[#allocation20 + $0x8e8] sm:$0xff] }
 0xaf5   :  { %3594 = vmatprep.subr.mxu1 %v2050_v59  ;;  %3665 = vmatprep.subr.mxu0 %v2052_v46  ;;  %v3176_v61 = vpop.f32.mrf.mxu1  ;;  %v1768_v59 = vld [vmem:[#allocation20 + $0x8f8] sm:$0xff]  ;;  %v1765_v46 = vld [vmem:[#allocation20 + $0x8e0] sm:$0xff] }
 0xaf6   :  { %3595 = vmatpush2.msra.mxu1 %v2049_v48  ;;  %3666 = vmatpush2.msra.mxu0 %v2051_v49  ;;  %v3177_v56 = vadd.f32 %v3176_v61, %v2568_v47  ;;  %v3830_v63 = vmax.f32 %v3175_v53, 0.0  ;;  %v1767_v47 = vld [vmem:[#allocation20 + $0x8f0] sm:$0xff]  ;;  %v1734_v48 = vld [vmem:[#allocation20 + $0x7e8] sm:$0xff]  ;;  %v1736_v49 = vld [vmem:[#allocation20 + $0x7f8] sm:$0xff] }
 0xaf7   :  { %3596 = vmatprep.subr.mxu1 %v2018_v51  ;;  %3667 = vmatprep.subr.mxu0 %v2020_v52  ;;  %v1733_v50 = vld [vmem:[#allocation20 + $0x7e0] sm:$0xff]  ;;  %v1735_v51 = vld [vmem:[#allocation20 + $0x7f0] sm:$0xff]  ;;  %v1702_v52 = vld [vmem:[#allocation20 + $0x6e8] sm:$0xff] }
 0xaf8   :  { %3597 = vmatpush2.msra.mxu1 %v2017_v60  ;;  %3668 = vmatpush2.msra.mxu0 %v2019_v55  ;;  %v3831_v2 = vmax.f32 %v3177_v56, 0.0  ;;  %v1704_v53 = vld [vmem:[#allocation20 + $0x6f8] sm:$0xff]  ;;  %v1701_v60 = vld [vmem:[#allocation20 + $0x6e0] sm:$0xff]  ;;  %v1703_v55 = vld [vmem:[#allocation20 + $0x6f0] sm:$0xff] }
 0xaf9   :  { %3599 = vmatmul.mubr.f32.vlgmr.msra.gmra.mxu1 %v8847_v17  ;;  %3670 = vmatmul.mubr.f32.vlgmr.msra.gmra.mxu0 %v8847_v17  ;;  %v1670_v61 = vld [vmem:[#allocation20 + $0x5e8] sm:$0xff]  ;;  %v1672_v56 = vld [vmem:[#allocation20 + $0x5f8] sm:$0xff] }
 0xafa   :  { %3676 = vmatprep.subr.mxu1 %v1990_v57  ;;  %3747 = vmatprep.subr.mxu0 %v1992_v58  ;;  %v8901_v5 = vcombine.low %v3830_v63, %v3831_v2  ;;  %v1669_v57 = vld [vmem:[#allocation20 + $0x5e0] sm:$0xff]  ;;  %v1671_v58 = vld [vmem:[#allocation20 + $0x5f0] sm:$0xff] }
 0xafb   :  { %3677 = vmatpush1.msra.mxu1 %v1989_v0  ;;  %3740 = vmatprep.mubr.f32.mxu1 %v8844_v14  ;;  %v1640_v0 = vld [vmem:[#allocation20 + $0x4f8] sm:$0xff] }
 0xafc   :  { %3748 = vmatpush1.msra.mxu0 %v1991_v3  ;;  %3811 = vmatprep.mubr.f32.mxu0 %v8844_v14  ;;  %v1862_v14 = vld [vmem:[#allocation20 + $0xbe8] sm:$0xff]  ;;  %v1639_v3 = vld [vmem:[#allocation20 + $0x4f0] sm:$0xff] }
 0xafd   :  { %3678 = vmatprep.subr.mxu1 %v1958_v6  ;;  %3749 = vmatprep.subr.mxu0 %v1960_v11  ;;  %v1606_v6 = vld [vmem:[#allocation20 + $0x3e8] sm:$0xff]  ;;  %v1608_v11 = vld [vmem:[#allocation20 + $0x3f8] sm:$0xff] }
 0xafe   :  { %3679 = vmatpush1.msra.mxu1 %v1957_v12  ;;  %3750 = vmatpush1.msra.mxu0 %v1959_v13  ;;  %v1605_v12 = vld [vmem:[#allocation20 + $0x3e0] sm:$0xff]  ;;  %v1607_v13 = vld [vmem:[#allocation20 + $0x3f0] sm:$0xff] }
 0xaff   :  { %3680 = vmatprep.subr.mxu1 %v1926_v15  ;;  %3751 = vmatprep.subr.mxu0 %v1928_v16  ;;  %v1574_v15 = vld [vmem:[#allocation20 + $0x2e8] sm:$0xff]  ;;  %v1576_v16 = vld [vmem:[#allocation20 + $0x2f8] sm:$0xff] }
 0xb00   :  { %3681 = vmatpush1.msra.mxu1 %v1925_v18  ;;  %3752 = vmatpush1.msra.mxu0 %v1927_v19  ;;  %v1573_v18 = vld [vmem:[#allocation20 + $0x2e0] sm:$0xff]  ;;  %v1575_v19 = vld [vmem:[#allocation20 + $0x2f0] sm:$0xff] }
 0xb01   :  { %3899 = vrot.lane.b32.xlu0 %v3830_v63, %s8476_s1  ;;  %3682 = vmatprep.subr.mxu1 %v1894_v20  ;;  %v1638_v63 = vld [vmem:[#allocation20 + $0x4e8] sm:$0xff] }
 0xb02   :  { %3753 = vmatprep.subr.mxu0 %v1896_v23  ;;  %3683 = vmatpush1.msra.mxu1 %v1893_v24  ;;  %v1542_v20 = vld [vmem:[#allocation20 + $0x1e8] sm:$0xff]  ;;  %v1544_v23 = vld [vmem:[#allocation20 + $0x1f8] sm:$0xff]  ;;  %v1541_v24 = vld [vmem:[#allocation20 + $0x1e0] sm:$0xff] }
 0xb03   :  { %3754 = vmatpush1.msra.mxu0 %v1895_v25  ;;  %3903 = vrot.lane.b32.xlu1 %v3831_v2, %s8476_s1  ;;  %v1637_v2 = vld [vmem:[#allocation20 + $0x4e0] sm:$0xff]  ;;  %v1543_v25 = vld [vmem:[#allocation20 + $0x1f0] sm:$0xff] }
 0xb04   :  { %3684 = vmatprep.subr.mxu1 %v1862_v14  ;;  %3755 = vmatprep.subr.mxu0 %v1864_v26  ;;  %v1510_v14 = vld [vmem:[#allocation20 + $0xe8] sm:$0xff]  ;;  %v1512_v26 = vld [vmem:[#allocation20 + $0xf8] sm:$0xff] }
 0xb05   :  { %3685 = vmatpush1.msra.mxu1 %v1861_v28  ;;  %3756 = vmatpush1.msra.mxu0 %v1863_v29  ;;  %v1509_v28 = vld [vmem:[#allocation20 + $0xe0] sm:$0xff]  ;;  %v1511_v29 = vld [vmem:[#allocation20 + $0xf0] sm:$0xff] }
 0xb06   :  { %3686 = vmatprep.subr.mxu1 %v1830_v31  ;;  %3757 = vmatprep.subr.mxu0 %v1832_v32  ;;  %v2502_v31 = vld [vmem:[#allocation20 + $0x1fe8] sm:$0xff]  ;;  %v2504_v32 = vld [vmem:[#allocation20 + $0x1ff8] sm:$0xff] }
 0xb07   :  { %3687 = vmatpush1.msra.mxu1 %v1829_v34  ;;  %3758 = vmatpush1.msra.mxu0 %v1831_v35  ;;  %v2501_v34 = vld [vmem:[#allocation20 + $0x1fe0] sm:$0xff]  ;;  %v2503_v35 = vld [vmem:[#allocation20 + $0x1ff0] sm:$0xff] }
 0xb08   :  { %3688 = vmatprep.subr.mxu1 %v1798_v37  ;;  %3759 = vmatprep.subr.mxu0 %v1800_v38  ;;  %v2470_v37 = vld [vmem:[#allocation20 + $0x1ee8] sm:$0xff]  ;;  %v2472_v38 = vld [vmem:[#allocation20 + $0x1ef8] sm:$0xff] }
 0xb09   :  { %3689 = vmatpush1.msra.mxu1 %v1797_v43  ;;  %3760 = vmatpush1.msra.mxu0 %v1799_v62  ;;  %v2469_v43 = vld [vmem:[#allocation20 + $0x1ee0] sm:$0xff]  ;;  %v2471_v62 = vld [vmem:[#allocation20 + $0x1ef0] sm:$0xff] }
 0xb0a   :  { %3690 = vmatprep.subr.mxu1 %v1766_v45  ;;  %3761 = vmatprep.subr.mxu0 %v1768_v59  ;;  %v8907_v45 = vpop.f32.mrf.mxu0  ;;  %v2438_v59 = vld [vmem:[#allocation20 + $0x1de8] sm:$0xff] }
 0xb0b   :  { %3691 = vmatpush1.msra.mxu1 %v1765_v46  ;;  %3762 = vmatpush1.msra.mxu0 %v1767_v47  ;;  %v2440_v46 = vld [vmem:[#allocation20 + $0x1df8] sm:$0xff]  ;;  %v2437_v47 = vld [vmem:[#allocation20 + $0x1de0] sm:$0xff] }
 0xb0c   :  { %3692 = vmatprep.subr.mxu1 %v1734_v48  ;;  %3763 = vmatprep.subr.mxu0 %v1736_v49  ;;  %v2439_v48 = vld [vmem:[#allocation20 + $0x1df0] sm:$0xff]  ;;  %v2406_v49 = vld [vmem:[#allocation20 + $0x1ce8] sm:$0xff] }
 0xb0d   :  { %3693 = vmatpush1.msra.mxu1 %v1733_v50  ;;  %3764 = vmatpush1.msra.mxu0 %v1735_v51  ;;  %v2408_v50 = vld [vmem:[#allocation20 + $0x1cf8] sm:$0xff]  ;;  %v2405_v51 = vld [vmem:[#allocation20 + $0x1ce0] sm:$0xff] }
 0xb0e   :  { %3694 = vmatprep.subr.mxu1 %v1702_v52  ;;  %3765 = vmatprep.subr.mxu0 %v1704_v53  ;;  %v2407_v52 = vld [vmem:[#allocation20 + $0x1cf0] sm:$0xff]  ;;  %v8909_v53 = vpop.f32.mrf.mxu0 }
 0xb0f   :  { %3695 = vmatpush1.msra.mxu1 %v1701_v60  ;;  %3766 = vmatpush1.msra.mxu0 %v1703_v55  ;;  %v2374_v60 = vld [vmem:[#allocation20 + $0x1be8] sm:$0xff]  ;;  %v2376_v55 = vld [vmem:[#allocation20 + $0x1bf8] sm:$0xff] }
 0xb10   :  { %3696 = vmatprep.subr.mxu1 %v1670_v61  ;;  %3767 = vmatprep.subr.mxu0 %v1672_v56  ;;  %v2373_v61 = vld [vmem:[#allocation20 + $0x1be0] sm:$0xff]  ;;  %v2375_v56 = vld [vmem:[#allocation20 + $0x1bf0] sm:$0xff] }
 0xb11   :  { %3697 = vmatpush1.msra.mxu1 %v1669_v57  ;;  %3768 = vmatpush1.msra.mxu0 %v1671_v58  ;;  %v8911_v57 = vpop.f32.mrf.mxu0  ;;  %v2342_v58 = vld [vmem:[#allocation20 + $0x1ae8] sm:$0xff] }
 0xb12   :  { %3698 = vmatprep.subr.mxu1 %v1638_v63  ;;  %3769 = vmatprep.subr.mxu0 %v1640_v0  ;;  %v2344_v63 = vld [vmem:[#allocation20 + $0x1af8] sm:$0xff]  ;;  %v2341_v0 = vld [vmem:[#allocation20 + $0x1ae0] sm:$0xff] }
 0xb13   :  { %3699 = vmatpush1.msra.mxu1 %v1637_v2  ;;  %3770 = vmatpush1.msra.mxu0 %v1639_v3  ;;  %v2343_v2 = vld [vmem:[#allocation20 + $0x1af0] sm:$0xff]  ;;  %v2310_v3 = vld [vmem:[#allocation20 + $0x19e8] sm:$0xff] }
 0xb14   :  { %3700 = vmatprep.subr.mxu1 %v1606_v6  ;;  %3771 = vmatprep.subr.mxu0 %v1608_v11  ;;  %v2312_v6 = vld [vmem:[#allocation20 + $0x19f8] sm:$0xff]  ;;  %v2309_v11 = vld [vmem:[#allocation20 + $0x19e0] sm:$0xff] }
 0xb15   :  { %3701 = vmatpush1.msra.mxu1 %v1605_v12  ;;  %3772 = vmatpush1.msra.mxu0 %v1607_v13  ;;  %v2311_v12 = vld [vmem:[#allocation20 + $0x19f0] sm:$0xff]  ;;  %v8913_v13 = vpop.f32.mrf.mxu0 }
 0xb16   :  { %3702 = vmatprep.subr.mxu1 %v1574_v15  ;;  %3773 = vmatprep.subr.mxu0 %v1576_v16  ;;  %v2278_v15 = vld [vmem:[#allocation20 + $0x18e8] sm:$0xff]  ;;  %v2280_v16 = vld [vmem:[#allocation20 + $0x18f8] sm:$0xff] }
 0xb17   :  { %3703 = vmatpush1.msra.mxu1 %v1573_v18  ;;  %3774 = vmatpush1.msra.mxu0 %v1575_v19  ;;  %v2277_v18 = vld [vmem:[#allocation20 + $0x18e0] sm:$0xff]  ;;  %v2279_v19 = vld [vmem:[#allocation20 + $0x18f0] sm:$0xff] }
 0xb18   :  { %3704 = vmatprep.subr.mxu1 %v1542_v20  ;;  %3775 = vmatprep.subr.mxu0 %v1544_v23  ;;  %v8915_v20 = vpop.f32.mrf.mxu0  ;;  %v2246_v23 = vld [vmem:[#allocation20 + $0x17e8] sm:$0xff] }
 0xb19   :  { %3705 = vmatpush1.msra.mxu1 %v1541_v24  ;;  %3776 = vmatpush1.msra.mxu0 %v1543_v25  ;;  %v2248_v24 = vld [vmem:[#allocation20 + $0x17f8] sm:$0xff]  ;;  %v2245_v25 = vld [vmem:[#allocation20 + $0x17e0] sm:$0xff] }
 0xb1a   :  { %3706 = vmatprep.subr.mxu1 %v1510_v14  ;;  %3777 = vmatprep.subr.mxu0 %v1512_v26  ;;  %v2247_v14 = vld [vmem:[#allocation20 + $0x17f0] sm:$0xff]  ;;  %v2214_v26 = vld [vmem:[#allocation20 + $0x16e8] sm:$0xff] }
 0xb1b   :  { %3707 = vmatpush1.msra.mxu1 %v1509_v28  ;;  %3778 = vmatpush1.msra.mxu0 %v1511_v29  ;;  %v2216_v28 = vld [vmem:[#allocation20 + $0x16f8] sm:$0xff]  ;;  %v2213_v29 = vld [vmem:[#allocation20 + $0x16e0] sm:$0xff] }
 0xb1c   :  { %3708 = vmatprep.subr.mxu1 %v2502_v31  ;;  %3779 = vmatprep.subr.mxu0 %v2504_v32  ;;  %v2215_v31 = vld [vmem:[#allocation20 + $0x16f0] sm:$0xff]  ;;  %v8917_v32 = vpop.f32.mrf.mxu0 }
 0xb1d   :  { %3709 = vmatpush2.msra.mxu1 %v2501_v34  ;;  %3780 = vmatpush2.msra.mxu0 %v2503_v35  ;;  %v2182_v34 = vld [vmem:[#allocation20 + $0x15e8] sm:$0xff]  ;;  %v2184_v35 = vld [vmem:[#allocation20 + $0x15f8] sm:$0xff] }
 0xb1e   :  { %3710 = vmatprep.subr.mxu1 %v2470_v37  ;;  %3781 = vmatprep.subr.mxu0 %v2472_v38  ;;  %v2181_v37 = vld [vmem:[#allocation20 + $0x15e0] sm:$0xff]  ;;  %v2183_v38 = vld [vmem:[#allocation20 + $0x15f0] sm:$0xff] }
 0xb1f   :  { %3711 = vmatpush2.msra.mxu1 %v2469_v43  ;;  %3782 = vmatpush2.msra.mxu0 %v2471_v62  ;;  %v8919_v43 = vpop.f32.mrf.mxu0  ;;  %v2150_v62 = vld [vmem:[#allocation20 + $0x14e8] sm:$0xff] }
 0xb20   :  { %3712 = vmatprep.subr.mxu1 %v2438_v59  ;;  %3783 = vmatprep.subr.mxu0 %v2440_v46  ;;  %v2152_v59 = vld [vmem:[#allocation20 + $0x14f8] sm:$0xff]  ;;  %v8921_v46 = vld [vmem:[#allocation22 + $0x10] sm:$0xff] }
 0xb21   :  { %3713 = vmatpush2.msra.mxu1 %v2437_v47  ;;  %3784 = vmatpush2.msra.mxu0 %v2439_v48  ;;  %v8924_v47 = vsub.s32 2, %v8766_v9  ;;  %v2149_v48 = vld [vmem:[#allocation20 + $0x14e0] sm:$0xff] }
 0xb22   :  { %3714 = vmatprep.subr.mxu1 %v2406_v49  ;;  %3785 = vmatprep.subr.mxu0 %v2408_v50  ;;  %v2151_v49 = vld [vmem:[#allocation20 + $0x14f0] sm:$0xff]  ;;  %v2118_v50 = vld [vmem:[#allocation20 + $0x13e8] sm:$0xff] }
 0xb23   :  { %3715 = vmatpush2.msra.mxu1 %v2405_v51  ;;  %3786 = vmatpush2.msra.mxu0 %v2407_v52  ;;  %v2120_v51 = vld [vmem:[#allocation20 + $0x13f8] sm:$0xff]  ;;  %v8927_v52 = vsub.s32 3, %v8766_v9 }
 0xb24   :  { %3716 = vmatprep.subr.mxu1 %v2374_v60  ;;  %3787 = vmatprep.subr.mxu0 %v2376_v55  ;;  %v2117_v60 = vld [vmem:[#allocation20 + $0x13e0] sm:$0xff]  ;;  %v2119_v55 = vld [vmem:[#allocation20 + $0x13f0] sm:$0xff] }
 0xb25   :  { %3717 = vmatpush2.msra.mxu1 %v2373_v61  ;;  %3788 = vmatpush2.msra.mxu0 %v2375_v56  ;;  %v2580_v61 = vrot.slane %v8921_v46, %v8769_v10  ;;  %v2588_v56 = vrot.slane %v8921_v46, %v8924_v47 }
 0xb26   :  { %3718 = vmatprep.subr.mxu1 %v2342_v58  ;;  %3789 = vmatprep.subr.mxu0 %v2344_v63  ;;  %v8933_v58 = vpop.f32.mrf.mxu0  ;;  %v2086_v63 = vld [vmem:[#allocation20 + $0x12e8] sm:$0xff] }
 0xb27   :  { %3719 = vmatpush2.msra.mxu1 %v2341_v0  ;;  %3790 = vmatpush2.msra.mxu0 %v2343_v2  ;;  %v2088_v0 = vld [vmem:[#allocation20 + $0x12f8] sm:$0xff]  ;;  %v2085_v2 = vld [vmem:[#allocation20 + $0x12e0] sm:$0xff] }
 0xb28   :  { %3720 = vmatprep.subr.mxu1 %v2310_v3  ;;  %3791 = vmatprep.subr.mxu0 %v2312_v6  ;;  %v2087_v3 = vld [vmem:[#allocation20 + $0x12f0] sm:$0xff]  ;;  %v2584_v6 = vrot.slane %v8921_v46, %v8831_v21 }
 0xb29   :  { %3721 = vmatpush2.msra.mxu1 %v2309_v11  ;;  %3792 = vmatpush2.msra.mxu0 %v2311_v12  ;;  %v2592_v11 = vrot.slane %v8921_v46, %v8927_v52  ;;  %v2054_v12 = vld [vmem:[#allocation20 + $0x11e8] sm:$0xff] }
 0xb2a   :  { %3722 = vmatprep.subr.mxu1 %v2278_v15  ;;  %3793 = vmatprep.subr.mxu0 %v2280_v16  ;;  %v2056_v15 = vld [vmem:[#allocation20 + $0x11f8] sm:$0xff] }
 0xb2b   :  { %3723 = vmatpush2.msra.mxu1 %v2277_v18  ;;  %3794 = vmatpush2.msra.mxu0 %v2279_v19  ;;  %v2053_v19 = vld [vmem:[#allocation20 + $0x11e0] sm:$0xff] }
 0xb2c   :  { %3724 = vmatprep.subr.mxu1 %v2246_v23  ;;  %3795 = vmatprep.subr.mxu0 %v2248_v24  ;;  %v2055_v23 = vld [vmem:[#allocation20 + $0x11f0] sm:$0xff] }
 0xb2d   :  { %3725 = vmatpush2.msra.mxu1 %v2245_v25  ;;  %3796 = vmatpush2.msra.mxu0 %v2247_v14  ;;  %v2022_v14 = vld [vmem:[#allocation20 + $0x10e8] sm:$0xff] }
 0xb2e   :  { %3726 = vmatprep.subr.mxu1 %v2214_v26  ;;  %3797 = vmatprep.subr.mxu0 %v2216_v28  ;;  %v2024_v26 = vld [vmem:[#allocation20 + $0x10f8] sm:$0xff] }
 0xb2f   :  { %3727 = vmatpush2.msra.mxu1 %v2213_v29  ;;  %3798 = vmatpush2.msra.mxu0 %v2215_v31  ;;  %v2021_v31 = vld [vmem:[#allocation20 + $0x10e0] sm:$0xff] }
 0xb30   :  { %3728 = vmatprep.subr.mxu1 %v2182_v34  ;;  %3799 = vmatprep.subr.mxu0 %v2184_v35  ;;  %v2023_v34 = vld [vmem:[#allocation20 + $0x10f0] sm:$0xff] }
 0xb31   :  { %3729 = vmatpush2.msra.mxu1 %v2181_v37  ;;  %3800 = vmatpush2.msra.mxu0 %v2183_v38 }
 0xb32   :  { %3730 = vmatprep.subr.mxu1 %v2150_v62  ;;  %3801 = vmatprep.subr.mxu0 %v2152_v59 }
 0xb33   :  { %3731 = vmatpush2.msra.mxu1 %v2149_v48  ;;  %3802 = vmatpush2.msra.mxu0 %v2151_v49 }
 0xb34   :  { %3732 = vmatprep.subr.mxu1 %v2118_v50  ;;  %3803 = vmatprep.subr.mxu0 %v2120_v51  ;;  %v2596_v51 = vrot.slane %v8921_v46, %v8886_v30 }
 0xb35   :  { %3733 = vmatpush2.msra.mxu1 %v2117_v60  ;;  %3804 = vmatpush2.msra.mxu0 %v2119_v55  ;;  %v3316_v16 = vpop.f32.mrf.mxu1  ;;  %v3387_v18 = vpop.f32.mrf.mxu0  ;;  %v8957_v60 = vsub.s32 7, %v8766_v9 }
 0xb36   :  { %3734 = vmatprep.subr.mxu1 %v2086_v63  ;;  %3805 = vmatprep.subr.mxu0 %v2088_v0  ;;  %v3317_v24 = vadd.f32 %v3316_v16, %v2580_v61  ;;  %v3388_v25 = vadd.f32 %v3387_v18, %v2588_v56  ;;  %v2600_v61 = vrot.slane %v8921_v46, %v8891_v36 }
 0xb37   :  { %3735 = vmatpush2.msra.mxu1 %v2085_v2  ;;  %3806 = vmatpush2.msra.mxu0 %v2087_v3  ;;  %v3318_v28 = vpop.f32.mrf.mxu1  ;;  %v3389_v29 = vpop.f32.mrf.mxu0  ;;  %v2608_v0 = vrot.slane %v8921_v46, %v8957_v60 }
 0xb38   :  { %3736 = vmatprep.subr.mxu1 %v2054_v12  ;;  %3807 = vmatprep.subr.mxu0 %v2056_v15  ;;  %v3319_v35 = vadd.f32 %v3318_v28, %v2584_v6  ;;  %v3390_v37 = vadd.f32 %v3389_v29, %v2592_v11  ;;  %v3834_v38 = vmax.f32 %v3317_v24, 0.0  ;;  %v3836_v62 = vmax.f32 %v3388_v25, 0.0 }
 0xb39   :  { %3737 = vmatpush2.msra.mxu1 %v2053_v19  ;;  %3808 = vmatpush2.msra.mxu0 %v2055_v23 }
 0xb3a   :  { %3738 = vmatprep.subr.mxu1 %v2022_v14  ;;  %3809 = vmatprep.subr.mxu0 %v2024_v26  ;;  %v3835_v59 = vmax.f32 %v3319_v35, 0.0  ;;  %v3837_v48 = vmax.f32 %v3390_v37, 0.0  ;;  %v8478_v37 = vmov 1934713408  }
 0xb3b   :  { %3739 = vmatpush2.msra.mxu1 %v2021_v31  ;;  %3810 = vmatpush2.msra.mxu0 %v2023_v34 }
 0xb3c   :  { %3741 = vmatmul.mubr.f32.vlgmr.msra.gmra.mxu1 %v8847_v17  ;;  %3812 = vmatmul.mubr.f32.vlgmr.msra.gmra.mxu0 %v8847_v17  ;;  %v4178_v49 = vcombine.low %v3834_v38, %v3835_v59  ;;  %v4194_v50 = vcombine.low %v3836_v62, %v3837_v48  ;;  %v8952_v17 = vsub.s32 6, %v8766_v9 }
 0xb3d   :  { %3915 = vrot.lane.b32.xlu0 %v3834_v38, %s8476_s1  ;;  %3919 = vrot.lane.b32.xlu1 %v3835_v59, %s8476_s1  ;;  %v4012_v38 = vunpack.c.l.s4 %v8478_v37 }
 0xb3e   :  { %7359 = vmatprep.subr.mxu1 %v8473_v4  ;;  %7378 = vmatprep.subr.mxu0 %v8473_v4  ;;  %v2604_v55 = vrot.slane %v8921_v46, %v8952_v17  ;;  %v8477_v46 = vmov 1983009808  }
 0xb3f   :  { %7375 = vmatprep.mubr.msk.f32.mxu1 %vm8474_vm2, %v8473_v4  ;;  %7394 = vmatprep.mubr.msk.f32.mxu0 %vm8474_vm2, %v8473_v4  ;;  %v3980_v14 = vunpack.c.l.s4 %v8477_v46 }
 0xb41   :  { %3923 = vrot.lane.b32.xlu0 %v3836_v62, %s8476_s1  ;;  %3927 = vrot.lane.b32.xlu1 %v3837_v48, %s8476_s1  ;;  %v3981_v29 = vunpack.c.0.s8 %v3980_v14 }
 0xb43   :  { %v8978_v35 = vsub.s32 %v3981_v29, %v8766_v9 }
 0xb73   :  { %v8973_v26 = vpop.permute.xlu0 %3899 }
 0xb75   :  { %v8975_v28 = vpop.permute.xlu1 %3903 }
 0xb77   :  { %v3458_v56 = vpop.f32.mrf.mxu1  ;;  %v3529_v63 = vpop.f32.mrf.mxu0 }
 0xb78   :  { %v3459_v2 = vadd.f32 %v3458_v56, %v2596_v51  ;;  %v3530_v3 = vadd.f32 %v3529_v63, %v2604_v55  ;;  %v8981_v55 = vld [vmem:[#allocation22 + $0x18] sm:$0xff]  ;;  %v4013_v56 = vunpack.c.0.s8 %v4012_v38 }
 0xb79   :  { %v3460_v6 = vpop.f32.mrf.mxu1  ;;  %v3531_v11 = vpop.f32.mrf.mxu0 }
 0xb7a   :  { %v3838_v12 = vmax.f32 %v3459_v2, 0.0  ;;  %v3461_v15 = vadd.f32 %v3460_v6, %v2600_v61  ;;  %v3532_v16 = vadd.f32 %v3531_v11, %v2608_v0  ;;  %v3840_v19 = vmax.f32 %v3530_v3, 0.0 }
 0xb7b   :  { %v4185_v61 = vrot.slane %v4178_v49, %v8978_v35  ;;  %v4201_v0 = vrot.slane %v4194_v50, %v8978_v35  ;;  %v2612_v6 = vrot.slane %v8981_v55, %v8769_v10  ;;  %v2620_v11 = vrot.slane %v8981_v55, %v8924_v47 }
 0xb7c   :  { %v3839_v18 = vmax.f32 %v3461_v15, 0.0  ;;  %3931 = vrot.lane.b32.xlu0 %v3838_v12, %s8476_s1  ;;  %v3841_v23 = vmax.f32 %v3532_v16, 0.0  ;;  %v2616_v49 = vrot.slane %v8981_v55, %v8831_v21  ;;  %v2624_v50 = vrot.slane %v8981_v55, %v8927_v52 }
 0xb7e   :  { %v8966_v24 = vcombine.low %v3838_v12, %v3839_v18  ;;  %3935 = vrot.lane.b32.xlu1 %v3839_v18, %s8476_s1  ;;  %v8969_v25 = vcombine.low %v3840_v19, %v3841_v23  ;;  %v8991_v12 = vsub.s32 %v4013_v56, %v8766_v9 }
 0xb80   :  { %3939 = vrot.lane.b32.xlu0 %v3840_v19, %s8476_s1 }
 0xb82   :  { %3943 = vrot.lane.b32.xlu1 %v3841_v23, %s8476_s1 }
 0xbaf   :  { %v3916_v31 = vpop.permute.xlu0 %3915  ;;  %v3920_v34 = vpop.permute.xlu1 %3919 }
 0xbb0   :  { %v4186_v62 = vcombine.low %v3916_v31, %v3920_v34 }
 0xbb2   :  { %v4193_v59 = vrot.slane %v4186_v62, %v8978_v35 }
 0xbb3   :  { %v3924_v48 = vpop.permute.xlu0 %3923  ;;  %v3928_v51 = vpop.permute.xlu1 %3927 }
 0xbb4   :  { %v4202_v63 = vcombine.low %v3924_v48, %v3928_v51  ;;  %v4210_v2 = vcombine.low %v4185_v61, %v4193_v59 }
 0xbb6   :  { %v4209_v3 = vrot.slane %v4202_v63, %v8978_v35  ;;  %v8998_v19 = vrot.slane %v4210_v2, %v8991_v12 }
 0xbb8   :  { %v4218_v15 = vcombine.low %v4201_v0, %v4209_v3 }
 0xbb9   :  { %v3600_v16 = vpop.f32.mrf.mxu1  ;;  %v3671_v18 = vpop.f32.mrf.mxu0 }
 0xbba   :  { %v9001_v23 = vrot.slane %v4218_v15, %v8991_v12  ;;  %v3601_v46 = vadd.f32 %v3600_v16, %v2612_v6  ;;  %v3672_v14 = vadd.f32 %v3671_v18, %v2620_v11  ;;  %v4235_v15 = vrot.slane %v8966_v24, %v8978_v35 }
 0xbbb   :  { %v3602_v29 = vpop.f32.mrf.mxu1  ;;  %v3673_v9 = vpop.f32.mrf.mxu0  ;;  %v4251_v18 = vrot.slane %v8969_v25, %v8978_v35  ;;  %v2632_v24 = vrot.slane %v8981_v55, %v8891_v36  ;;  %v2640_v25 = vrot.slane %v8981_v55, %v8957_v60 }
 0xbbc   :  { %v3842_v37 = vmax.f32 %v3601_v46, 0.0  ;;  %v3603_v38 = vadd.f32 %v3602_v29, %v2616_v49  ;;  %v3674_v62 = vadd.f32 %v3673_v9, %v2624_v50  ;;  %v3844_v59 = vmax.f32 %v3672_v14, 0.0 }
 0xbbd   :  { %v2628_v14 = vrot.slane %v8981_v55, %v8886_v30  ;;  %v2636_v29 = vrot.slane %v8981_v55, %v8952_v17 }
 0xbbe   :  { %3947 = vrot.lane.b32.xlu0 %v3842_v37, %s8476_s1  ;;  %v3843_v48 = vmax.f32 %v3603_v38, 0.0  ;;  %v3845_v51 = vmax.f32 %v3674_v62, 0.0 }
 0xbc0   :  { %v9008_v61 = vcombine.low %v3842_v37, %v3843_v48  ;;  %v9010_v56 = vcombine.low %v3844_v59, %v3845_v51  ;;  %3951 = vrot.lane.b32.xlu1 %v3843_v48, %s8476_s1 }
 0xbc2   :  { %3955 = vrot.lane.b32.xlu0 %v3844_v59, %s8476_s1 }
 0xbc4   :  { %3959 = vrot.lane.b32.xlu1 %v3845_v51, %s8476_s1 }
 0xbee   :  { %v3932_v63 = vpop.permute.xlu0 %3931 }
 0xbf0   :  { %v3936_v0 = vpop.permute.xlu1 %3935 }
 0xbf1   :  { %v4236_v2 = vcombine.low %v3932_v63, %v3936_v0  ;;  %v2572_v0 = vrot.slane %v8888_v33, %v8952_v17 }
 0xbf2   :  { %v3940_v6 = vpop.permute.xlu0 %3939 }
 0xbf3   :  { %v4243_v3 = vrot.slane %v4236_v2, %v8978_v35  ;;  %v2576_v2 = vrot.slane %v8888_v33, %v8957_v60 }
 0xbf4   :  { %v3944_v11 = vpop.permute.xlu1 %3943 }
 0xbf5   :  { %v4252_v16 = vcombine.low %v3940_v6, %v3944_v11  ;;  %v4260_v49 = vcombine.low %v4235_v15, %v4243_v3 }
 0xbf7   :  { %v4259_v50 = vrot.slane %v4252_v16, %v8978_v35  ;;  %v9026_v9 = vrot.slane %v4260_v49, %v8991_v12 }
 0xbf9   :  { %v4268_v46 = vcombine.low %v4251_v18, %v4259_v50  ;;  %v2548_v50 = vrot.slane %v8888_v33, %v8769_v10 }
 0xbfb   :  { %v9029_v37 = vrot.slane %v4268_v46, %v8991_v12  ;;  %v2552_v46 = vrot.slane %v8888_v33, %v8831_v21 }
 0xbfc   :  { %v3742_v38 = vpop.f32.mrf.mxu1  ;;  %v3813_v62 = vpop.f32.mrf.mxu0 }
 0xbfd   :  { %v4276_v59 = vcombine.low %v9026_v9, %v9029_v37  ;;  %v4277_v48 = vcombine.high %v9026_v9, %v9029_v37  ;;  %v3743_v51 = vadd.f32 %v3742_v38, %v2628_v14  ;;  %v3814_v63 = vadd.f32 %v3813_v62, %v2636_v29 }
 0xbfe   :  { %v3744_v3 = vpop.f32.mrf.mxu1  ;;  %v3815_v6 = vpop.f32.mrf.mxu0  ;;  %v9050_v14 = vadd.f32 %v8919_v43, %v2572_v0  ;;  %v9053_v29 = vadd.f32 %v8933_v58, %v2576_v2  ;;  %v2556_v38 = vrot.slane %v8888_v33, %v8924_v47  ;;  %v2560_v62 = vrot.slane %v8888_v33, %v8927_v52  ;;  %v2505_v0 = vld [vmem:[#allocation22] sm:$0xff] }
 0xbff   :  { %v3846_v11 = vmax.f32 %v3743_v51, 0.0  ;;  %v3848_v55 = vmax.f32 %v3814_v63, 0.0  ;;  %v3745_v15 = vadd.f32 %v3744_v3, %v2632_v24  ;;  %v3816_v16 = vadd.f32 %v3815_v6, %v2640_v25 }
 0xc00   :  { %v9066_v43 = vadd.f32 %v8883_v27, %v2548_v50  ;;  %v9069_v58 = vadd.f32 %v8895_v44, %v2552_v46  ;;  %v3832_v51 = vmax.f32 %v9050_v14, 0.0  ;;  %v3833_v63 = vmax.f32 %v9053_v29, 0.0 }
 0xc01   :  { %v3847_v18 = vmax.f32 %v3745_v15, 0.0  ;;  %v3849_v49 = vmax.f32 %v3816_v16, 0.0  ;;  %3971 = vrot.lane.b32.xlu1 %v3848_v55, %s8476_s1  ;;  %3963 = vrot.lane.b32.xlu0 %v3846_v11, %s8476_s1  ;;  %v2532_v33 = vrot.slane %v2505_v0, %v8886_v30  ;;  %v2536_v27 = vrot.slane %v2505_v0, %v8891_v36 }
 0xc02   :  { %v3826_v44 = vmax.f32 %v9066_v43, 0.0  ;;  %v9083_v2 = vadd.f32 %v8915_v20, %v2556_v38  ;;  %v3827_v3 = vmax.f32 %v9069_v58, 0.0  ;;  %v9087_v6 = vadd.f32 %v8917_v32, %v2560_v62 }
 0xc03   :  { %v9055_v24 = vcombine.low %v3846_v11, %v3847_v18  ;;  %v9057_v25 = vcombine.low %v3848_v55, %v3849_v49  ;;  %v2540_v30 = vrot.slane %v2505_v0, %v8952_v17  ;;  %v2544_v36 = vrot.slane %v2505_v0, %v8957_v60 }
 0xc04   :  { %v9098_v20 = vadd.f32 %v8879_v8, %v2532_v33  ;;  %v9101_v11 = vadd.f32 %v8881_v22, %v2536_v27  ;;  %v3828_v32 = vmax.f32 %v9083_v2, 0.0  ;;  %v3829_v55 = vmax.f32 %v9087_v6, 0.0 }
 0xc05   :  { %3975 = vrot.lane.b32.xlu1 %v3849_v49, %s8476_s1  ;;  %3967 = vrot.lane.b32.xlu0 %v3847_v18, %s8476_s1  ;;  %v2516_v17 = vrot.slane %v2505_v0, %v8769_v10  ;;  %v2520_v8 = vrot.slane %v2505_v0, %v8831_v21  ;;  %v9115_v22 = vadd.f32 %v8911_v57, %v2540_v30 }
 0xc06   :  { %v3822_v60 = vmax.f32 %v9098_v20, 0.0  ;;  %v3823_v15 = vmax.f32 %v9101_v11, 0.0  ;;  %v9119_v16 = vadd.f32 %v8913_v13, %v2544_v36  ;;  %v2524_v18 = vrot.slane %v2505_v0, %v8924_v47 }
 0xc07   :  { %v2528_v49 = vrot.slane %v2505_v0, %v8927_v52  ;;  %v9130_v57 = vadd.f32 %v8875_v54, %v2516_v17  ;;  %v9133_v50 = vadd.f32 %v8877_v1, %v2520_v8  ;;  %v3824_v13 = vmax.f32 %v9115_v22, 0.0 }
 0xc08   :  { %v3825_v46 = vmax.f32 %v9119_v16, 0.0  ;;  %v9145_v54 = vadd.f32 %v8907_v45, %v2524_v18  ;;  %v4285_v8 = vrot.slane %v9008_v61, %v8978_v35  ;;  %v4078_v2 = vcombine.low %v3826_v44, %v3827_v3 }
 0xc09   :  { %3911 = vrot.lane.b32.xlu1 %v3833_v63, %s8476_s1  ;;  %3907 = vrot.lane.b32.xlu0 %v3832_v51, %s8476_s1  ;;  %v9543_v38 = vmax.f32 %v9130_v57, 0.0  ;;  %v9544_v1 = vmax.f32 %v9133_v50, 0.0  ;;  %v9149_v62 = vadd.f32 %v8909_v53, %v2528_v49  ;;  %v4301_v49 = vrot.slane %v9010_v56, %v8978_v35 }
 0xc0a   :  { %v9541_v0 = vmax.f32 %v9145_v54, 0.0  ;;  %v4351_v56 = vrot.slane %v9057_v25, %v8978_v35  ;;  %v4136_v25 = vcombine.low %v8973_v26, %v8975_v28  ;;  %v4094_v26 = vcombine.low %v3828_v32, %v3829_v55 }
 0xc0b   :  { %v9542_v33 = vmax.f32 %v9149_v62, 0.0  ;;  %v4028_v43 = vcombine.low %v3822_v60, %v3823_v15 }
 0xc0c   :  { %v4143_v14 = vrot.slane %v4136_v25, %v8978_v35 }
 0xc0d   :  { %3887 = vrot.lane.b32.xlu1 %v3827_v3, %s8476_s1  ;;  %3883 = vrot.lane.b32.xlu0 %v3826_v44, %s8476_s1 }
 0xc11   :  { %3895 = vrot.lane.b32.xlu1 %v3829_v55, %s8476_s1  ;;  %3891 = vrot.lane.b32.xlu0 %v3828_v32, %s8476_s1  ;;  %v4044_v32 = vcombine.low %v3824_v13, %v3825_v46  ;;  %v4101_v55 = vrot.slane %v4094_v26, %v8978_v35 }
 0xc13   :  { %v4051_v9 = vrot.slane %v4044_v32, %v8978_v35  ;;  %v9597_v32 = vmax.f32 %v8781_v40, 0.0  ;;  %v4566_v40 = vld [vmem:[#allocation23] sm:$0xff] }
 0xc15   :  { %3871 = vrot.lane.b32.xlu1 %v3823_v15, %s8476_s1  ;;  %3867 = vrot.lane.b32.xlu0 %v3822_v60, %s8476_s1  ;;  %v9590_v60 = vcombine.low %v8998_v19, %v9001_v23  ;;  %v9591_v15 = vcombine.high %v8998_v19, %v9001_v23 }
 0xc19   :  { %3879 = vrot.lane.b32.xlu1 %v3825_v46, %s8476_s1  ;;  %3875 = vrot.lane.b32.xlu0 %v3824_v13, %s8476_s1  ;;  %v9592_v13 = vmax.f32 %v9133_v50, 0.0  ;;  %v9593_v46 = vmax.f32 %v9130_v57, 0.0  ;;  %v9595_v50 = vmax.f32 %v9145_v54, 0.0 }
 0xc1d   :  { %3855 = vrot.lane.b32.xlu1 %v9544_v1, %s8476_s1  ;;  %3851 = vrot.lane.b32.xlu0 %v9543_v38, %s8476_s1 }
 0xc21   :  { %3863 = vrot.lane.b32.xlu1 %v9542_v33, %s8476_s1  ;;  %3859 = vrot.lane.b32.xlu0 %v9541_v0, %s8476_s1 }
 0xc30   :  { %v3948_v45 = vpop.permute.xlu0 %3947 }
 0xc32   :  { %v3952_v53 = vpop.permute.xlu1 %3951 }
 0xc33   :  { %v4286_v27 = vcombine.low %v3948_v45, %v3952_v53 }
 0xc34   :  { %v3956_v36 = vpop.permute.xlu0 %3955 }
 0xc35   :  { %v4293_v30 = vrot.slane %v4286_v27, %v8978_v35 }
 0xc36   :  { %v3960_v17 = vpop.permute.xlu1 %3959 }
 0xc37   :  { %v4302_v18 = vcombine.low %v3956_v36, %v3960_v17  ;;  %v4310_v7 = vcombine.low %v4285_v8, %v4293_v30  ;;  %v4335_v36 = vrot.slane %v9055_v24, %v8978_v35 }
 0xc39   :  { %v4309_v42 = vrot.slane %v4302_v18, %v8978_v35  ;;  %v4317_v0 = vrot.slane %v4310_v7, %v8991_v12 }
 0xc3b   :  { %v4318_v41 = vcombine.low %v4301_v49, %v4309_v42 }
 0xc3d   :  { %v4325_v33 = vrot.slane %v4318_v41, %v8991_v12 }
 0xc3f   :  { %v4326_v45 = vcombine.low %v4317_v0, %v4325_v33  ;;  %v4327_v53 = vcombine.high %v4317_v0, %v4325_v33 }
 0xc73   :  { %v3972_v27 = vpop.permute.xlu1 %3971  ;;  %v3964_v38 = vpop.permute.xlu0 %3963 }
 0xc77   :  { %v3976_v1 = vpop.permute.xlu1 %3975  ;;  %v3968_v34 = vpop.permute.xlu0 %3967 }
 0xc78   :  { %v4352_v31 = vcombine.low %v3972_v27, %v3976_v1  ;;  %v4336_v61 = vcombine.low %v3964_v38, %v3968_v34 }
 0xc7a   :  { %v4359_v42 = vrot.slane %v4352_v31, %v8978_v35  ;;  %v4343_v7 = vrot.slane %v4336_v61, %v8978_v35  ;;  %v4144_v31 = vcombine.low %v3832_v51, %v3833_v63  ;;  %v4135_v51 = vrot.slane %v8901_v5, %v8978_v35 }
 0xc7b   :  { %v3912_v30 = vpop.permute.xlu1 %3911  ;;  %v3908_v41 = vpop.permute.xlu0 %3907 }
 0xc7c   :  { %v4368_v17 = vcombine.low %v4351_v56, %v4359_v42  ;;  %v4360_v0 = vcombine.low %v4335_v36, %v4343_v7  ;;  %v4152_v1 = vcombine.low %v3908_v41, %v3912_v30  ;;  %v4151_v29 = vrot.slane %v4144_v31, %v8978_v35 }
 0xc7d   :  { %v4160_v5 = vcombine.low %v4135_v51, %v4143_v14  ;;  %v3978_v7 = vcombine.low %v9593_v46, %v9592_v13  ;;  %v4035_v30 = vrot.slane %v4028_v43, %v8978_v35 }
 0xc7e   :  { %v4375_v33 = vrot.slane %v4368_v17, %v8991_v12  ;;  %v4367_v8 = vrot.slane %v4360_v0, %v8991_v12  ;;  %v4159_v49 = vrot.slane %v4152_v1, %v8978_v35  ;;  %v9594_v1 = vmax.f32 %v9149_v62, 0.0 }
 0xc7f   :  { %v3888_v34 = vpop.permute.xlu1 %3887  ;;  %v3884_v38 = vpop.permute.xlu0 %3883  ;;  %v4167_v37 = vrot.slane %v4160_v5, %v8991_v12  ;;  %v4571_v5 = vld [vmem:[#allocation23 + $0x28] sm:$0xff] }
 0xc80   :  { %v4376_v18 = vcombine.low %v4367_v8, %v4375_v33  ;;  %v4377_v24 = vcombine.high %v4367_v8, %v4375_v33  ;;  %v4086_v28 = vcombine.low %v3884_v38, %v3888_v34  ;;  %v4168_v63 = vcombine.low %v4151_v29, %v4159_v49 }
 0xc81   :  { %v3994_v57 = vcombine.low %v9595_v50, %v9594_v1  ;;  %v4885_v1 = vld [vmem:[#allocation28 + $0x1a0] sm:$0xff]  ;;  %v4887_v50 = vld [vmem:[#allocation28 + $0x1b0] sm:$0xff] }
 0xc82   :  { %7360 = vmatpush3.xpose.msk.msra.mxu1 %vm884_vm4, %v4376_v18  ;;  %7379 = vmatpush3.xpose.msk.msra.mxu0 %vm884_vm4, %v4377_v24  ;;  %v4175_v58 = vrot.slane %v4168_v63, %v8991_v12  ;;  %v3985_v24 = vrot.slane %v3978_v7, %v8978_v35 }
 0xc83   :  { %v3896_v27 = vpop.permute.xlu1 %3895  ;;  %v3892_v61 = vpop.permute.xlu0 %3891  ;;  %7361 = vmatprep.subr.mxu1 %v8473_v4  ;;  %7380 = vmatprep.subr.mxu0 %v8473_v4 }
 0xc84   :  { %v4102_v36 = vcombine.low %v3892_v61, %v3896_v27  ;;  %v4176_v41 = vcombine.low %v4167_v37, %v4175_v58  ;;  %v4177_v33 = vcombine.high %v4167_v37, %v4175_v58  ;;  %v4001_v61 = vrot.slane %v3994_v57, %v8978_v35  ;;  %v4895_v37 = vld [vmem:[#allocation28 + $0x1f0] sm:$0xff]  ;;  %v4882_v57 = vld [vmem:[#allocation28 + $0x188] sm:$0xff] }
 0xc86   :  { %7362 = vmatpush3.xpose.msk.msra.mxu1 %vm884_vm4, %v4326_v45  ;;  %7381 = vmatpush3.xpose.msk.msra.mxu0 %vm884_vm4, %v4327_v53  ;;  %v4109_v6 = vrot.slane %v4102_v36, %v8978_v35  ;;  %v4093_v45 = vrot.slane %v4086_v28, %v8978_v35 }
 0xc87   :  { %v3872_v56 = vpop.permute.xlu1 %3871  ;;  %v3868_v42 = vpop.permute.xlu0 %3867  ;;  %7363 = vmatprep.subr.mxu1 %v8473_v4  ;;  %7382 = vmatprep.subr.mxu0 %v8473_v4 }
 0xc88   :  { %v4036_v53 = vcombine.low %v3868_v42, %v3872_v56  ;;  %v4118_v22 = vcombine.low %v4101_v55, %v4109_v6  ;;  %v4572_v6 = vld [vmem:[#allocation23 + $0x30] sm:$0xff]  ;;  %v4570_v55 = vld [vmem:[#allocation23 + $0x20] sm:$0xff] }
 0xc8a   :  { %7364 = vmatpush3.xpose.msk.msra.mxu1 %vm884_vm4, %v4276_v59  ;;  %7383 = vmatpush3.xpose.msk.msra.mxu0 %vm884_vm4, %v4277_v48  ;;  %v4085_v59 = vrot.slane %v4078_v2, %v8978_v35  ;;  %v4043_v20 = vrot.slane %v4036_v53, %v8978_v35  ;;  %v4125_v8 = vrot.slane %v4118_v22, %v8991_v12  ;;  %v4573_v2 = vld [vmem:[#allocation23 + $0x38] sm:$0xff]  ;;  %v4567_v53 = vld [vmem:[#allocation23 + $0x8] sm:$0xff] }
 0xc8b   :  { %v3880_v44 = vpop.permute.xlu1 %3879  ;;  %v3876_v3 = vpop.permute.xlu0 %3875  ;;  %7365 = vmatprep.subr.mxu1 %v8473_v4  ;;  %7384 = vmatprep.subr.mxu0 %v8473_v4 }
 0xc8c   :  { %v4052_v16 = vcombine.low %v3876_v3, %v3880_v44  ;;  %v4110_v48 = vcombine.low %v4085_v59, %v4093_v45  ;;  %v4060_v38 = vcombine.low %v4035_v30, %v4043_v20  ;;  %v4569_v45 = vld [vmem:[#allocation23 + $0x18] sm:$0xff] }
 0xc8e   :  { %v4059_v11 = vrot.slane %v4052_v16, %v8978_v35  ;;  %7366 = vmatpush3.xpose.msk.msra.mxu1 %vm884_vm4, %v9590_v60  ;;  %7385 = vmatpush3.xpose.msk.msra.mxu0 %vm884_vm4, %v9591_v15  ;;  %v4117_v34 = vrot.slane %v4110_v48, %v8991_v12  ;;  %v4067_v36 = vrot.slane %v4060_v38, %v8991_v12  ;;  %v9598_v16 = vmov 1.0   ;;  %v4892_v48 = vld [vmem:[#allocation28 + $0x1d8] sm:$0xff]  ;;  %v4881_v38 = vld [vmem:[#allocation28 + $0x180] sm:$0xff] }
 0xc8f   :  { %v3856_v17 = vpop.permute.xlu1 %3855  ;;  %v3852_v0 = vpop.permute.xlu0 %3851  ;;  %7367 = vmatprep.subr.mxu1 %v8473_v4  ;;  %7386 = vmatprep.subr.mxu0 %v8473_v4 }
 0xc90   :  { %v4068_v19 = vcombine.low %v4051_v9, %v4059_v11  ;;  %v3986_v23 = vcombine.low %v3852_v0, %v3856_v17  ;;  %v4126_v62 = vcombine.low %v4117_v34, %v4125_v8  ;;  %v4127_v54 = vcombine.high %v4117_v34, %v4125_v8  ;;  %v4896_v9 = vld [vmem:[#allocation28 + $0x1f8] sm:$0xff]  ;;  %v4893_v17 = vld [vmem:[#allocation28 + $0x1e0] sm:$0xff]  ;;  %v4890_v0 = vld [vmem:[#allocation28 + $0x1c8] sm:$0xff] }
 0xc91   :  { %v4891_v8 = vld [vmem:[#allocation28 + $0x1d0] sm:$0xff]  ;;  %v4884_v34 = vld [vmem:[#allocation28 + $0x198] sm:$0xff] }
 0xc92   :  { %v3993_v18 = vrot.slane %v3986_v23, %v8978_v35  ;;  %7368 = vmatpush3.xpose.msk.msra.mxu1 %vm884_vm4, %v4176_v41  ;;  %7387 = vmatpush3.xpose.msk.msra.mxu0 %vm884_vm4, %v4177_v33  ;;  %v4075_v49 = vrot.slane %v4068_v19, %v8991_v12  ;;  %v4894_v41 = vld [vmem:[#allocation28 + $0x1e8] sm:$0xff]  ;;  %v4889_v33 = vld [vmem:[#allocation28 + $0x1c0] sm:$0xff]  ;;  %v4888_v23 = vld [vmem:[#allocation28 + $0x1b8] sm:$0xff] }
 0xc93   :  { %v3864_v31 = vpop.permute.xlu1 %3863  ;;  %v3860_v25 = vpop.permute.xlu0 %3859  ;;  %7369 = vmatprep.subr.mxu1 %v8473_v4  ;;  %7388 = vmatprep.subr.mxu0 %v8473_v4  ;;  %v4886_v19 = vld [vmem:[#allocation28 + $0x1a8] sm:$0xff] }
 0xc94   :  { %v4002_v27 = vcombine.low %v3860_v25, %v3864_v31  ;;  %v4010_v29 = vcombine.low %v3985_v24, %v3993_v18  ;;  %v4076_v26 = vcombine.low %v4067_v36, %v4075_v49  ;;  %v4077_v28 = vcombine.high %v4067_v36, %v4075_v49  ;;  %v4883_v18 = vld [vmem:[#allocation28 + $0x190] sm:$0xff]  ;;  %v4878_v24 = vld [vmem:[#allocation28 + $0x168] sm:$0xff]  ;;  %v4880_v31 = vld [vmem:[#allocation28 + $0x178] sm:$0xff] }
 0xc95   :  { %v4877_v25 = vld [vmem:[#allocation28 + $0x160] sm:$0xff]  ;;  %v4876_v49 = vld [vmem:[#allocation28 + $0x158] sm:$0xff]  ;;  %v4870_v36 = vld [vmem:[#allocation28 + $0x128] sm:$0xff] }
 0xc96   :  { %v4009_v14 = vrot.slane %v4002_v27, %v8978_v35  ;;  %7370 = vmatpush3.xpose.msk.msra.mxu1 %vm884_vm4, %v4126_v62  ;;  %7389 = vmatpush3.xpose.msk.msra.mxu0 %vm884_vm4, %v4127_v54  ;;  %v4017_v63 = vrot.slane %v4010_v29, %v8991_v12  ;;  %v4879_v62 = vld [vmem:[#allocation28 + $0x170] sm:$0xff]  ;;  %v4874_v54 = vld [vmem:[#allocation28 + $0x148] sm:$0xff]  ;;  %v4873_v27 = vld [vmem:[#allocation28 + $0x140] sm:$0xff] }
 0xc97   :  { %7371 = vmatprep.subr.mxu1 %v8473_v4  ;;  %7390 = vmatprep.subr.mxu0 %v8473_v4  ;;  %v4872_v29 = vld [vmem:[#allocation28 + $0x138] sm:$0xff] }
 0xc98   :  { %v4018_v51 = vcombine.low %v4001_v61, %v4009_v14  ;;  %v4875_v61 = vld [vmem:[#allocation28 + $0x150] sm:$0xff]  ;;  %v4869_v14 = vld [vmem:[#allocation28 + $0x120] sm:$0xff] }
 0xc9a   :  { %v4025_v56 = vrot.slane %v4018_v51, %v8991_v12  ;;  %7372 = vmatpush3.xpose.msk.msra.mxu1 %vm884_vm4, %v4076_v26  ;;  %7391 = vmatpush3.xpose.msk.msra.mxu0 %vm884_vm4, %v4077_v28  ;;  %v9596_v12 = vmax.f32 %v8779_v39, 0.0  ;;  %v4568_v39 = vld [vmem:[#allocation23 + $0x10] sm:$0xff]  ;;  %v4868_v51 = vld [vmem:[#allocation28 + $0x118] sm:$0xff] }
 0xc9b   :  { %7373 = vmatprep.subr.mxu1 %v8473_v4  ;;  %7392 = vmatprep.subr.mxu0 %v8473_v4  ;;  %v4871_v26 = vld [vmem:[#allocation28 + $0x130] sm:$0xff]  ;;  %v4866_v28 = vld [vmem:[#allocation28 + $0x108] sm:$0xff] }
 0xc9c   :  { %v4026_v35 = vcombine.low %v4017_v63, %v4025_v56  ;;  %v4027_v42 = vcombine.high %v4017_v63, %v4025_v56  ;;  %v4865_v63 = vld [vmem:[#allocation28 + $0x100] sm:$0xff]  ;;  %v4867_v56 = vld [vmem:[#allocation28 + $0x110] sm:$0xff] }
 0xc9e   :  { %7374 = vmatpush3.xpose.msk.msra.mxu1 %vm884_vm4, %v4026_v35  ;;  %7393 = vmatpush3.xpose.msk.msra.mxu0 %vm884_vm4, %v4027_v42  ;;  %v4862_v35 = vld [vmem:[#allocation28 + $0xe8] sm:$0xff]  ;;  %v4864_v42 = vld [vmem:[#allocation28 + $0xf8] sm:$0xff] }
 0xc9f   :  { %7397 = vmatprep.subr.mxu1 %v4573_v2  ;;  %7416 = vmatprep.subr.mxu0 %v8473_v4 }
 0xca1   :  { %7376 = vmatmul.mubr.msk.f32.vlgmr.msra.gmra.mxu1 %vm884_vm4, %v9596_v12  ;;  %7395 = vmatmul.mubr.msk.f32.vlgmr.msra.gmra.mxu0 %vm884_vm4, %v9597_v32  ;;  %v4858_v12 = vld [vmem:[#allocation28 + $0xc8] sm:$0xff]  ;;  %v4860_v32 = vld [vmem:[#allocation28 + $0xd8] sm:$0xff] }
 0xca2   :  { %7398 = vmatpush3.msra.mxu1 %v4573_v2  ;;  %7420 = vmatprep.mubr.msk.f32.mxu0 %vm8474_vm2, %v8473_v4  ;;  %v4861_v2 = vld [vmem:[#allocation28 + $0xe0] sm:$0xff] }
 0xca3   :  { %7399 = vmatprep.subr.mxu1 %v4572_v6 }
 0xca4   :  { %7400 = vmatpush3.msra.mxu1 %v4572_v6  ;;  %v4863_v6 = vld [vmem:[#allocation28 + $0xf0] sm:$0xff] }
 0xca5   :  { %7401 = vmatprep.subr.mxu1 %v4571_v5 }
 0xca6   :  { %7402 = vmatpush3.msra.mxu1 %v4571_v5  ;;  %v4857_v5 = vld [vmem:[#allocation28 + $0xc0] sm:$0xff] }
 0xca7   :  { %7403 = vmatprep.subr.mxu1 %v4570_v55 }
 0xca8   :  { %7404 = vmatpush3.msra.mxu1 %v4570_v55  ;;  %v4859_v55 = vld [vmem:[#allocation28 + $0xd0] sm:$0xff] }
 0xca9   :  { %7405 = vmatprep.subr.mxu1 %v4569_v45 }
 0xcaa   :  { %7406 = vmatpush3.msra.mxu1 %v4569_v45  ;;  %v4854_v45 = vld [vmem:[#allocation28 + $0xa8] sm:$0xff] }
 0xcab   :  { %7407 = vmatprep.subr.mxu1 %v4568_v39 }
 0xcac   :  { %7408 = vmatpush3.msra.mxu1 %v4568_v39  ;;  %v4856_v39 = vld [vmem:[#allocation28 + $0xb8] sm:$0xff] }
 0xcad   :  { %7409 = vmatprep.subr.mxu1 %v4567_v53 }
 0xcae   :  { %7410 = vmatpush3.msra.mxu1 %v4567_v53  ;;  %v4853_v53 = vld [vmem:[#allocation28 + $0xa0] sm:$0xff] }
 0xcaf   :  { %7411 = vmatprep.subr.mxu1 %v4566_v40 }
 0xcb0   :  { %7412 = vmatpush3.msra.mxu1 %v4566_v40  ;;  %v4855_v40 = vld [vmem:[#allocation28 + $0xb0] sm:$0xff] }
 0xcb1   :  { %4974 = vmatprep.subr.mxu1 %v4896_v9  ;;  %v4845_v9 = vld [vmem:[#allocation28 + $0x60] sm:$0xff] }
 0xd61   :  { %v4468_v43 = vpop.f32.mrf.mxu1  ;;  %v4562_v58 = vpop.f32.mrf.mxu0 }
 0xd62   :  { %7413 = vmatprep.mubr.msk.f32.mxu1 %vm884_vm4, %v4468_v43  ;;  %v4850_v43 = vld [vmem:[#allocation28 + $0x88] sm:$0xff] }
 0xd63   :  { %v7377_v44 = vpop.f32.mrf.mxu1  ;;  %v7396_v3 = vpop.f32.mrf.mxu0  ;;  %7414 = vmatmul.mubr.msk.f32.vlgmr.msra.gmra.mxu1 %vm884_vm4, %v4562_v58  ;;  %v4852_v58 = vld [vmem:[#allocation28 + $0x98] sm:$0xff] }
 0xd64   :  { %5038 = vmatprep.mubr.f32.mxu1 %v8473_v4  ;;  %4975 = vmatpush1.msra.mxu1 %v4895_v37  ;;  %v4849_v44 = vld [vmem:[#allocation28 + $0x80] sm:$0xff]  ;;  %v4851_v3 = vld [vmem:[#allocation28 + $0x90] sm:$0xff] }
 0xd65   :  { %4976 = vmatprep.subr.mxu1 %v4892_v48  ;;  %v4847_v37 = vld [vmem:[#allocation28 + $0x70] sm:$0xff]  ;;  %v4842_v48 = vld [vmem:[#allocation28 + $0x48] sm:$0xff] }
 0xd66   :  { %4977 = vmatpush1.msra.mxu1 %v4891_v8  ;;  %v4835_v8 = vld [vmem:[#allocation28 + $0x10] sm:$0xff] }
 0xd67   :  { %4978 = vmatprep.subr.mxu1 %v4888_v23 }
 0xd68   :  { %4979 = vmatpush1.msra.mxu1 %v4887_v50 }
 0xd69   :  { %4980 = vmatprep.subr.mxu1 %v4884_v34 }
 0xd6a   :  { %4981 = vmatpush1.msra.mxu1 %v4883_v18 }
 0xd6b   :  { %4982 = vmatprep.subr.mxu1 %v4880_v31  ;;  %v7116_v31 = vld [vmem:[#allocation26] ss:$0 sm:$0xff] }
 0xd6c   :  { %4983 = vmatpush1.msra.mxu1 %v4879_v62 }
 0xd6d   :  { %4984 = vmatprep.subr.mxu1 %v4876_v49 }
 0xd6e   :  { %4985 = vmatpush1.msra.mxu1 %v4875_v61 }
 0xd6f   :  { %4986 = vmatprep.subr.mxu1 %v4872_v29 }
 0xd70   :  { %4987 = vmatpush1.msra.mxu1 %v4871_v26 }
 0xd71   :  { %4988 = vmatprep.subr.mxu1 %v4868_v51 }
 0xd72   :  { %4989 = vmatpush1.msra.mxu1 %v4867_v56  ;;  %v5553_v56 = vld [vmem:[#allocation32 + $0xf0] sm:$0xff] }
 0xd73   :  { %4990 = vmatprep.subr.mxu1 %v4864_v42  ;;  %v5551_v42 = vld [vmem:[#allocation32 + $0xe0] sm:$0xff] }
 0xd74   :  { %4991 = vmatpush1.msra.mxu1 %v4863_v6  ;;  %v5549_v6 = vld [vmem:[#allocation32 + $0xd0] sm:$0xff] }
 0xd75   :  { %4992 = vmatprep.subr.mxu1 %v4860_v32  ;;  %v5547_v32 = vld [vmem:[#allocation32 + $0xc0] sm:$0xff] }
 0xd76   :  { %4993 = vmatpush1.msra.mxu1 %v4859_v55  ;;  %v5545_v55 = vld [vmem:[#allocation32 + $0xb0] sm:$0xff] }
 0xd77   :  { %4994 = vmatprep.subr.mxu1 %v4856_v39  ;;  %v5543_v39 = vld [vmem:[#allocation32 + $0xa0] sm:$0xff] }
 0xd78   :  { %4995 = vmatpush1.msra.mxu1 %v4855_v40  ;;  %v5541_v40 = vld [vmem:[#allocation32 + $0x90] sm:$0xff] }
 0xd79   :  { %4996 = vmatprep.subr.mxu1 %v4852_v58  ;;  %v5539_v58 = vld [vmem:[#allocation32 + $0x80] sm:$0xff] }
 0xd7a   :  { %4997 = vmatpush1.msra.mxu1 %v4851_v3  ;;  %v5537_v3 = vld [vmem:[#allocation32 + $0x70] sm:$0xff] }
 0xe23   :  { %v7415_v59 = vpop.f32.mrf.mxu1 }
 0xe24   :  { %7417 = vmatpush3.msra.mxu0 %v7415_v59 }
 0xe25   :  { %v4646_v22 = vpop.f32.mrf.mxu1  ;;  %7418 = vmatprep.subr.mxu0 %v8473_v4 }
 0xe26   :  { %7419 = vmatpush3.msra.mxu0 %v4646_v22 }
 0xe27   :  { %7421 = vmatmul.mubr.msk.f32.vlgmr.msra.gmra.mxu0 %vm696_vm3, %v9598_v16  ;;  %7423 = vmatprep.subr.mxu0 %v8473_v4 }
 0xe28   :  { %7427 = vmatprep.mubr.msk.f32.mxu0 %vm8474_vm2, %v8473_v4 }
 0xee7   :  { %v4723_v20 = vpop.f32.mrf.mxu0 }
 0xee8   :  { %v4727_v11 = vmul.f32 0.0625, %v4723_v20  ;;  %v4844_v20 = vld [vmem:[#allocation28 + $0x58] sm:$0xff] }
 0xee9   :  { %v7422_v60 = vpop.f32.mrf.mxu0 }
 0xeea   :  { %v4731_v15 = vrot.slane %v4727_v11, %v8769_v10  ;;  %v4841_v11 = vld [vmem:[#allocation28 + $0x40] sm:$0xff]  ;;  %v4843_v60 = vld [vmem:[#allocation28 + $0x50] sm:$0xff] }
 0xeec   :  { %v9297_v13 = vsub.f32 %v4646_v22, %v4731_v15  ;;  %v9299_v46 = vsub.f32 %v7415_v59, %v4731_v15  ;;  %v4846_v59 = vld [vmem:[#allocation28 + $0x68] sm:$0xff]  ;;  %v4848_v22 = vld [vmem:[#allocation28 + $0x78] sm:$0xff] }
 0xeed   :  { %4998 = vmatprep.subr.mxu1 %v4848_v22  ;;  %v4838_v15 = vld [vmem:[#allocation28 + $0x28] sm:$0xff] }
 0xeee   :  { %v4735_v7 = vmul.f32 %v9299_v46, %v9299_v46  ;;  %v4734_v30 = vmul.f32 %v9297_v13, %v9297_v13  ;;  %4999 = vmatpush1.msra.mxu1 %v4847_v37 }
 0xeef   :  { %5000 = vmatprep.subr.mxu1 %v4844_v20 }
 0xef0   :  { %7424 = vmatpush3.msra.mxu0 %v4735_v7  ;;  %v4840_v7 = vld [vmem:[#allocation28 + $0x38] sm:$0xff]  ;;  %5001 = vmatpush1.msra.mxu1 %v4843_v60 }
 0xef1   :  { %7425 = vmatprep.subr.mxu0 %v8473_v4  ;;  %5002 = vmatprep.subr.mxu1 %v4840_v7 }
 0xef2   :  { %7426 = vmatpush3.msra.mxu0 %v4734_v30  ;;  %v4837_v30 = vld [vmem:[#allocation28 + $0x20] sm:$0xff] }
 0xef3   :  { %7428 = vmatmul.mubr.msk.f32.vlgmr.msra.gmra.mxu0 %vm696_vm3, %v9598_v16  ;;  %4897 = vmatprep.subr.mxu0 %v4894_v41  ;;  %v4839_v41 = vld [vmem:[#allocation28 + $0x30] sm:$0xff] }
 0xef4   :  { %4898 = vmatpush1.msra.mxu0 %v4893_v17  ;;  %4961 = vmatprep.mubr.f32.mxu0 %v8473_v4  ;;  %v4834_v17 = vld [vmem:[#allocation28 + $0x8] sm:$0xff] }
 0xef5   :  { %4899 = vmatprep.subr.mxu0 %v4890_v0  ;;  %v4836_v0 = vld [vmem:[#allocation28 + $0x18] sm:$0xff]  ;;  %5003 = vmatpush1.msra.mxu1 %v4839_v41 }
 0xef6   :  { %4900 = vmatpush1.msra.mxu0 %v4889_v33  ;;  %v4833_v33 = vld [vmem:[#allocation28] sm:$0xff]  ;;  %5004 = vmatprep.subr.mxu1 %v4836_v0 }
 0xef7   :  { %4901 = vmatprep.subr.mxu0 %v4886_v19  ;;  %5005 = vmatpush1.msra.mxu1 %v4835_v8 }
 0xef8   :  { %4902 = vmatpush1.msra.mxu0 %v4885_v1 }
 0xef9   :  { %4903 = vmatprep.subr.mxu0 %v4882_v57 }
 0xefa   :  { %4904 = vmatpush1.msra.mxu0 %v4881_v38  ;;  %v7115_v38 = vld [vmem:[#allocation25] ss:$0 sm:$0xff] }
 0xefb   :  { %4905 = vmatprep.subr.mxu0 %v4878_v24 }
 0xefc   :  { %4906 = vmatpush1.msra.mxu0 %v4877_v25 }
 0xefd   :  { %4907 = vmatprep.subr.mxu0 %v4874_v54 }
 0xefe   :  { %4908 = vmatpush1.msra.mxu0 %v4873_v27 }
 0xeff   :  { %4909 = vmatprep.subr.mxu0 %v4870_v36 }
 0xf00   :  { %4910 = vmatpush1.msra.mxu0 %v4869_v14 }
 0xf01   :  { %4911 = vmatprep.subr.mxu0 %v4866_v28 }
 0xf02   :  { %4912 = vmatpush1.msra.mxu0 %v4865_v63  ;;  %v5554_v63 = vld [vmem:[#allocation32 + $0xf8] sm:$0xff] }
 0xf03   :  { %4913 = vmatprep.subr.mxu0 %v4862_v35  ;;  %v5552_v35 = vld [vmem:[#allocation32 + $0xe8] sm:$0xff]  ;;  %5679 = vmatprep.subr.mxu1 %v5554_v63  ;;  %v5607_v63 = vld [vmem:[#allocation32 + $0x2a0] sm:$0xff] }
 0xf04   :  { %4914 = vmatpush1.msra.mxu0 %v4861_v2  ;;  %v5550_v2 = vld [vmem:[#allocation32 + $0xd8] sm:$0xff] }
 0xf05   :  { %4915 = vmatprep.subr.mxu0 %v4858_v12  ;;  %v5548_v12 = vld [vmem:[#allocation32 + $0xc8] sm:$0xff] }
 0xf06   :  { %4916 = vmatpush1.msra.mxu0 %v4857_v5  ;;  %v5546_v5 = vld [vmem:[#allocation32 + $0xb8] sm:$0xff] }
 0xf07   :  { %4917 = vmatprep.subr.mxu0 %v4854_v45  ;;  %v5544_v45 = vld [vmem:[#allocation32 + $0xa8] sm:$0xff] }
 0xf08   :  { %4918 = vmatpush1.msra.mxu0 %v4853_v53  ;;  %v5542_v53 = vld [vmem:[#allocation32 + $0x98] sm:$0xff] }
 0xf09   :  { %4919 = vmatprep.subr.mxu0 %v4850_v43  ;;  %v5540_v43 = vld [vmem:[#allocation32 + $0x88] sm:$0xff] }
 0xf0a   :  { %4920 = vmatpush1.msra.mxu0 %v4849_v44  ;;  %v5538_v44 = vld [vmem:[#allocation32 + $0x78] sm:$0xff] }
 0xf0b   :  { %4921 = vmatprep.subr.mxu0 %v4846_v59  ;;  %v5536_v59 = vld [vmem:[#allocation32 + $0x68] sm:$0xff] }
 0xf0c   :  { %4922 = vmatpush1.msra.mxu0 %v4845_v9 }
 0xf0d   :  { %4923 = vmatprep.subr.mxu0 %v4842_v48 }
 0xf0e   :  { %4924 = vmatpush1.msra.mxu0 %v4841_v11 }
 0xf0f   :  { %4925 = vmatprep.subr.mxu0 %v4838_v15 }
 0xf10   :  { %4926 = vmatpush1.msra.mxu0 %v4837_v30 }
 0xf11   :  { %4927 = vmatprep.subr.mxu0 %v4834_v17 }
 0xf12   :  { %4928 = vmatpush1.msra.mxu0 %v4833_v33 }
 0xfb3   :  { %v4802_v19 = vpop.f32.mrf.mxu0 }
 0xfb4   :  { %v4806_v23 = vmul.f32 0.0625, %v4802_v19 }
 0xfb5   :  { %v7429_v1 = vpop.f32.mrf.mxu0 }
 0xfb6   :  { %v4807_v50 = vadd.f32 1e-05, %v4806_v23 }
 0xfb8   :  { %7622 = vrsqrt.f32 %v4807_v50 }
 0xfc5   :  { %v7623_v57 = vpop.eup %7622 }
 0xfc6   :  { %v4812_v34 = vrot.slane %v7623_v57, %v8769_v10 }
 0xfc8   :  { %v4813_v18 = vmul.f32 %v4812_v34, %v9297_v13  ;;  %v4814_v24 = vmul.f32 %v4812_v34, %v9299_v46 }
 0xfca   :  { %v4821_v25 = vmul.f32 %v7115_v38, %v4813_v18  ;;  %v4822_v62 = vmul.f32 %v7115_v38, %v4814_v24 }
 0xfcc   :  { %v4829_v54 = vadd.f32 %v7116_v31, %v4821_v25  ;;  %v4830_v27 = vadd.f32 %v7116_v31, %v4822_v62 }
 0xfce   :  { %v4831_v49 = vmax.f32 %v4829_v54, 0.0  ;;  %v4832_v61 = vmax.f32 %v4830_v27, 0.0  ;;  %v5617_v27 = vld [vmem:[#allocation32 + $0x2f0] sm:$0xff] }
 0xfd0   :  { %4962 = vmatmul.mubr.f32.vlgmr.msra.gmra.mxu0 %v4831_v49  ;;  %5039 = vmatmul.mubr.f32.vlgmr.msra.gmra.mxu1 %v4831_v49  ;;  %v5618_v49 = vld [vmem:[#allocation32 + $0x2f8] sm:$0xff] }
 0xfd1   :  { %4967 = vmatprep.mubr.f32.mxu0 %v8473_v4  ;;  %5044 = vmatprep.mubr.f32.mxu1 %v8473_v4 }
 0xfd2   :  { %5680 = vmatpush1.msra.mxu1 %v5553_v56  ;;  %v5605_v56 = vld [vmem:[#allocation32 + $0x290] sm:$0xff] }
 0xfd3   :  { %5681 = vmatprep.subr.mxu1 %v5552_v35  ;;  %v5604_v35 = vld [vmem:[#allocation32 + $0x288] sm:$0xff] }
 0xfd4   :  { %4968 = vmatmul.mubr.f32.gmra.mxu0 %v4832_v61  ;;  %5045 = vmatmul.mubr.f32.gmra.mxu1 %v4832_v61  ;;  %v5616_v61 = vld [vmem:[#allocation32 + $0x2e8] sm:$0xff] }
 0xfd5   :  { %5117 = vmatprep.mubr.f32.mxu0 %v8473_v4  ;;  %5682 = vmatpush1.msra.mxu1 %v5551_v42  ;;  %v5535_v42 = vld [vmem:[#allocation32 + $0x60] sm:$0xff] }
 0xfd6   :  { %5683 = vmatprep.subr.mxu1 %v5550_v2  ;;  %v5603_v2 = vld [vmem:[#allocation32 + $0x280] sm:$0xff] }
 0xfd7   :  { %5684 = vmatpush1.msra.mxu1 %v5549_v6  ;;  %v5534_v6 = vld [vmem:[#allocation32 + $0x58] sm:$0xff] }
 0xfd8   :  { %5685 = vmatprep.subr.mxu1 %v5548_v12  ;;  %v5602_v12 = vld [vmem:[#allocation32 + $0x278] sm:$0xff] }
 0xfd9   :  { %5686 = vmatpush1.msra.mxu1 %v5547_v32  ;;  %v5533_v32 = vld [vmem:[#allocation32 + $0x50] sm:$0xff] }
 0xfda   :  { %5687 = vmatprep.subr.mxu1 %v5546_v5  ;;  %v5601_v5 = vld [vmem:[#allocation32 + $0x270] sm:$0xff] }
 0xfdb   :  { %5688 = vmatpush1.msra.mxu1 %v5545_v55  ;;  %v5532_v55 = vld [vmem:[#allocation32 + $0x48] sm:$0xff] }
 0xfdc   :  { %5689 = vmatprep.subr.mxu1 %v5544_v45  ;;  %v5600_v45 = vld [vmem:[#allocation32 + $0x268] sm:$0xff] }
 0xfdd   :  { %5690 = vmatpush1.msra.mxu1 %v5543_v39  ;;  %v5531_v39 = vld [vmem:[#allocation32 + $0x40] sm:$0xff] }
 0xfde   :  { %5691 = vmatprep.subr.mxu1 %v5542_v53  ;;  %v5599_v53 = vld [vmem:[#allocation32 + $0x260] sm:$0xff] }
 0xfdf   :  { %5692 = vmatpush1.msra.mxu1 %v5541_v40  ;;  %v5530_v40 = vld [vmem:[#allocation32 + $0x38] sm:$0xff] }
 0xfe0   :  { %5693 = vmatprep.subr.mxu1 %v5540_v43  ;;  %v5598_v43 = vld [vmem:[#allocation32 + $0x258] sm:$0xff] }
 0xfe1   :  { %5694 = vmatpush1.msra.mxu1 %v5539_v58  ;;  %v5529_v58 = vld [vmem:[#allocation32 + $0x30] sm:$0xff] }
 0xfe2   :  { %5695 = vmatprep.subr.mxu1 %v5538_v44  ;;  %v5597_v44 = vld [vmem:[#allocation32 + $0x250] sm:$0xff] }
 0xfe3   :  { %5696 = vmatpush1.msra.mxu1 %v5537_v3  ;;  %v5528_v3 = vld [vmem:[#allocation32 + $0x28] sm:$0xff] }
 0xfe4   :  { %5697 = vmatprep.subr.mxu1 %v5536_v59  ;;  %v5596_v59 = vld [vmem:[#allocation32 + $0x248] sm:$0xff] }
 0xfe5   :  { %5698 = vmatpush1.msra.mxu1 %v5535_v42  ;;  %v5642_v42 = vld [vmem:[#allocation32 + $0x3b8] sm:$0xff] }
 0xfe6   :  { %5699 = vmatprep.subr.mxu1 %v5534_v6  ;;  %v5641_v6 = vld [vmem:[#allocation32 + $0x3b0] sm:$0xff] }
 0xfe7   :  { %5700 = vmatpush1.msra.mxu1 %v5533_v32  ;;  %v5640_v32 = vld [vmem:[#allocation32 + $0x3a8] sm:$0xff] }
 0xfe8   :  { %5701 = vmatprep.subr.mxu1 %v5532_v55  ;;  %v5639_v55 = vld [vmem:[#allocation32 + $0x3a0] sm:$0xff] }
 0xfe9   :  { %5702 = vmatpush1.msra.mxu1 %v5531_v39  ;;  %v5638_v39 = vld [vmem:[#allocation32 + $0x398] sm:$0xff] }
 0xfea   :  { %5703 = vmatprep.subr.mxu1 %v5530_v40  ;;  %v5637_v40 = vld [vmem:[#allocation32 + $0x390] sm:$0xff] }
 0xfeb   :  { %5704 = vmatpush1.msra.mxu1 %v5529_v58  ;;  %v5636_v58 = vld [vmem:[#allocation32 + $0x388] sm:$0xff] }
 0xfec   :  { %5705 = vmatprep.subr.mxu1 %v5528_v3  ;;  %v5635_v3 = vld [vmem:[#allocation32 + $0x380] sm:$0xff] }
0x1090   :  { %v9315_v13 = vpop.f32.mrf.mxu0  ;;  %v9317_v46 = vpop.f32.mrf.mxu1 }
0x1092   :  { %v9319_v36 = vpop.f32.mrf.mxu0  ;;  %v9321_v29 = vpop.f32.mrf.mxu1 }
0x1094   :  { %v4969_v14 = vpop.f32.mrf.mxu0  ;;  %v9323_v26 = vpop.f32.mrf.mxu1 }
0x1096   :  { %v9325_v28 = vpop.f32.mrf.mxu0  ;;  %v9329_v51 = vpop.f32.mrf.mxu1 }
0x1097   :  { %5081 = vmatprep.subr.mxu0 %v9325_v28 }
0x1098   :  { %5082 = vmatpush1.msra.mxu0 %v4969_v14 }
0x1099   :  { %5083 = vmatprep.subr.mxu0 %v9319_v36 }
0x109a   :  { %5084 = vmatpush1.msra.mxu0 %v9315_v13 }
0x109b   :  { %7117 = vmatmul.mubr.msk.f32.vlgmr.msra.gmra.mxu0 %vm696_vm3, %v9598_v16  ;;  %5152 = vmatprep.subr.mxu0 %v9329_v51 }
0x109c   :  { %5153 = vmatpush1.msra.mxu0 %v9323_v26  ;;  %5188 = vmatprep.mubr.f32.mxu0 %v8473_v4 }
0x109d   :  { %5154 = vmatprep.subr.mxu0 %v9321_v29 }
0x109e   :  { %5155 = vmatpush1.msra.mxu0 %v9317_v46 }
0x109f   :  { %7118 = vmatmul.mubr.msk.f32.vlgmr.msra.gmra.mxu0 %vm696_vm3, %v9598_v16 }
0x10a0   :  { %5295 = vmatprep.mubr.f32.mxu0 %v8473_v4 }
0x115b   :  { %v5119_v22 = vpop.f32.mrf.mxu0 }
0x115c   :  { %v5195_v9 = vmul.f32 0.0625, %v5119_v22  ;;  %v5527_v22 = vld [vmem:[#allocation32 + $0x20] sm:$0xff] }
0x115d   :  { %v5121_v37 = vpop.f32.mrf.mxu0  ;;  %5706 = vmatpush1.msra.mxu1 %v5527_v22  ;;  %v5634_v22 = vld [vmem:[#allocation32 + $0x378] sm:$0xff] }
0x115e   :  { %v5202_v48 = vrot.slane %v5195_v9, %v8769_v10  ;;  %v5196_v20 = vmul.f32 0.0625, %v5121_v37  ;;  %v5595_v9 = vld [vmem:[#allocation32 + $0x240] sm:$0xff]  ;;  %v5526_v37 = vld [vmem:[#allocation32 + $0x18] sm:$0xff] }
0x115f   :  { %v5190_v11 = vpop.f32.mrf.mxu0  ;;  %5707 = vmatprep.subr.mxu1 %v5526_v37  ;;  %v5633_v37 = vld [vmem:[#allocation32 + $0x370] sm:$0xff] }
0x1160   :  { %v5206_v60 = vrot.slane %v5196_v20, %v8769_v10  ;;  %v5197_v15 = vmul.f32 0.0625, %v5190_v11  ;;  %v9344_v7 = vsub.f32 %v4969_v14, %v5202_v48  ;;  %v9353_v0 = vsub.f32 %v9315_v13, %v5202_v48  ;;  %v5615_v13 = vld [vmem:[#allocation32 + $0x2e0] sm:$0xff]  ;;  %v5594_v48 = vld [vmem:[#allocation32 + $0x238] sm:$0xff]  ;;  %v5525_v20 = vld [vmem:[#allocation32 + $0x10] sm:$0xff] }
0x1161   :  { %v5192_v30 = vpop.f32.mrf.mxu0  ;;  %v5611_v14 = vld [vmem:[#allocation32 + $0x2c0] sm:$0xff]  ;;  %v5593_v11 = vld [vmem:[#allocation32 + $0x230] sm:$0xff]  ;;  %5708 = vmatpush1.msra.mxu1 %v5525_v20  ;;  %v5632_v20 = vld [vmem:[#allocation32 + $0x368] sm:$0xff] }
0x1162   :  { %v9347_v41 = vsub.f32 %v9319_v36, %v5206_v60  ;;  %v9350_v17 = vsub.f32 %v9325_v28, %v5206_v60  ;;  %v5210_v33 = vrot.slane %v5197_v15, %v8769_v10  ;;  %v5198_v8 = vmul.f32 0.0625, %v5192_v30  ;;  %v5613_v36 = vld [vmem:[#allocation32 + $0x2d0] sm:$0xff]  ;;  %v5524_v60 = vld [vmem:[#allocation32 + $0x8] sm:$0xff]  ;;  %v5523_v30 = vld [vmem:[#allocation32] sm:$0xff] }
0x1163   :  { %v5227_v23 = vmul.f32 %v9344_v7, %v9344_v7  ;;  %v5223_v34 = vmul.f32 %v9353_v0, %v9353_v0  ;;  %v5609_v28 = vld [vmem:[#allocation32 + $0x2b0] sm:$0xff]  ;;  %v5592_v15 = vld [vmem:[#allocation32 + $0x228] sm:$0xff]  ;;  %5709 = vmatprep.subr.mxu1 %v5524_v60  ;;  %v5631_v60 = vld [vmem:[#allocation32 + $0x360] sm:$0xff] }
0x1164   :  { %v5228_v19 = vmul.f32 %v9350_v17, %v9350_v17  ;;  %v5214_v1 = vrot.slane %v5198_v8, %v8769_v10  ;;  %v9362_v50 = vsub.f32 %v9323_v26, %v5210_v33  ;;  %v5224_v57 = vmul.f32 %v9347_v41, %v9347_v41  ;;  %v5610_v26 = vld [vmem:[#allocation32 + $0x2b8] sm:$0xff]  ;;  %5710 = vmatpush1.msra.mxu1 %v5523_v30 }
0x1165   :  { %v9375_v24 = vsub.f32 %v9317_v46, %v5210_v33  ;;  %v5614_v46 = vld [vmem:[#allocation32 + $0x2d8] sm:$0xff]  ;;  %v5591_v33 = vld [vmem:[#allocation32 + $0x220] sm:$0xff] }
0x1166   :  { %5259 = vmatprep.subr.mxu0 %v5228_v19  ;;  %v9369_v38 = vsub.f32 %v9321_v29, %v5214_v1  ;;  %v9372_v18 = vsub.f32 %v9329_v51, %v5214_v1  ;;  %v5229_v25 = vmul.f32 %v9362_v50, %v9362_v50  ;;  %v5612_v29 = vld [vmem:[#allocation32 + $0x2c8] sm:$0xff]  ;;  %v5586_v8 = vld [vmem:[#allocation32 + $0x1f8] sm:$0xff]  ;;  %v5589_v1 = vld [vmem:[#allocation32 + $0x210] sm:$0xff] }
0x1167   :  { %5260 = vmatpush1.msra.mxu0 %v5227_v23  ;;  %v5225_v54 = vmul.f32 %v9375_v24, %v9375_v24  ;;  %v5608_v51 = vld [vmem:[#allocation32 + $0x2a8] sm:$0xff]  ;;  %v5590_v19 = vld [vmem:[#allocation32 + $0x218] sm:$0xff]  ;;  %5711 = vmatprep.subr.mxu1 %v5586_v8  ;;  %v5585_v23 = vld [vmem:[#allocation32 + $0x1f0] sm:$0xff] }
0x1168   :  { %5261 = vmatprep.subr.mxu0 %v5224_v57  ;;  %v5230_v31 = vmul.f32 %v9372_v18, %v9372_v18  ;;  %v5226_v62 = vmul.f32 %v9369_v38, %v9369_v38  ;;  %5712 = vmatpush2.msra.mxu1 %v5585_v23  ;;  %v5584_v57 = vld [vmem:[#allocation32 + $0x1e8] sm:$0xff]  ;;  %v5630_v30 = vld [vmem:[#allocation32 + $0x358] sm:$0xff]  ;;  %v5629_v8 = vld [vmem:[#allocation32 + $0x350] sm:$0xff] }
0x1169   :  { %5262 = vmatpush1.msra.mxu0 %v5223_v34  ;;  %v5588_v34 = vld [vmem:[#allocation32 + $0x208] sm:$0xff]  ;;  %5713 = vmatprep.subr.mxu1 %v5584_v57  ;;  %v5627_v57 = vld [vmem:[#allocation32 + $0x340] sm:$0xff] }
0x116a   :  { %7119 = vmatmul.mubr.msk.f32.vlgmr.msra.gmra.mxu0 %vm696_vm3, %v9598_v16  ;;  %5330 = vmatprep.subr.mxu0 %v5230_v31  ;;  %v5583_v31 = vld [vmem:[#allocation32 + $0x1e0] sm:$0xff]  ;;  %v5628_v23 = vld [vmem:[#allocation32 + $0x348] sm:$0xff] }
0x116b   :  { %5366 = vmatprep.mubr.f32.mxu0 %v8473_v4  ;;  %5331 = vmatpush1.msra.mxu0 %v5229_v25  ;;  %v5587_v25 = vld [vmem:[#allocation32 + $0x200] sm:$0xff] }
0x116c   :  { %5332 = vmatprep.subr.mxu0 %v5226_v62  ;;  %5714 = vmatpush2.msra.mxu1 %v5583_v31  ;;  %v5582_v62 = vld [vmem:[#allocation32 + $0x1d8] sm:$0xff] }
0x116d   :  { %5333 = vmatpush1.msra.mxu0 %v5225_v54  ;;  %v5650_v54 = vld [vmem:[#allocation32 + $0x3f8] sm:$0xff]  ;;  %5715 = vmatprep.subr.mxu1 %v5582_v62  ;;  %v5625_v62 = vld [vmem:[#allocation32 + $0x330] sm:$0xff] }
0x116e   :  { %7120 = vmatmul.mubr.msk.f32.vlgmr.msra.gmra.mxu0 %vm696_vm3, %v9598_v16  ;;  %5750 = vmatprep.subr.mxu0 %v5618_v49  ;;  %v5606_v16 = vld [vmem:[#allocation32 + $0x298] sm:$0xff]  ;;  %v5581_v49 = vld [vmem:[#allocation32 + $0x1d0] sm:$0xff] }
0x116f   :  { %5751 = vmatpush1.msra.mxu0 %v5617_v27  ;;  %v5649_v27 = vld [vmem:[#allocation32 + $0x3f0] sm:$0xff]  ;;  %5716 = vmatpush2.msra.mxu1 %v5581_v49  ;;  %v5626_v31 = vld [vmem:[#allocation32 + $0x338] sm:$0xff]  ;;  %v5624_v49 = vld [vmem:[#allocation32 + $0x328] sm:$0xff] }
0x1170   :  { %5752 = vmatprep.subr.mxu0 %v5616_v61  ;;  %v5580_v61 = vld [vmem:[#allocation32 + $0x1c8] sm:$0xff] }
0x1171   :  { %5753 = vmatpush1.msra.mxu0 %v5615_v13  ;;  %v5648_v13 = vld [vmem:[#allocation32 + $0x3e8] sm:$0xff]  ;;  %5717 = vmatprep.subr.mxu1 %v5580_v61  ;;  %v5623_v61 = vld [vmem:[#allocation32 + $0x320] sm:$0xff] }
0x1172   :  { %5754 = vmatprep.subr.mxu0 %v5614_v46  ;;  %v5579_v46 = vld [vmem:[#allocation32 + $0x1c0] sm:$0xff] }
0x1173   :  { %5755 = vmatpush1.msra.mxu0 %v5613_v36  ;;  %v5647_v36 = vld [vmem:[#allocation32 + $0x3e0] sm:$0xff]  ;;  %5718 = vmatpush2.msra.mxu1 %v5579_v46  ;;  %v5621_v46 = vld [vmem:[#allocation32 + $0x310] sm:$0xff] }
0x1174   :  { %5756 = vmatprep.subr.mxu0 %v5612_v29  ;;  %v5578_v29 = vld [vmem:[#allocation32 + $0x1b8] sm:$0xff] }
0x1175   :  { %5757 = vmatpush1.msra.mxu0 %v5611_v14  ;;  %v5646_v14 = vld [vmem:[#allocation32 + $0x3d8] sm:$0xff]  ;;  %5719 = vmatprep.subr.mxu1 %v5578_v29  ;;  %v5619_v29 = vld [vmem:[#allocation32 + $0x300] sm:$0xff] }
0x1176   :  { %5758 = vmatprep.subr.mxu0 %v5610_v26  ;;  %v5577_v26 = vld [vmem:[#allocation32 + $0x1b0] sm:$0xff] }
0x1177   :  { %5759 = vmatpush1.msra.mxu0 %v5609_v28  ;;  %v5645_v28 = vld [vmem:[#allocation32 + $0x3d0] sm:$0xff]  ;;  %5720 = vmatpush2.msra.mxu1 %v5577_v26 }
0x1178   :  { %5760 = vmatprep.subr.mxu0 %v5608_v51  ;;  %v5576_v51 = vld [vmem:[#allocation32 + $0x1a8] sm:$0xff] }
0x1179   :  { %5761 = vmatpush1.msra.mxu0 %v5607_v63  ;;  %v5644_v63 = vld [vmem:[#allocation32 + $0x3c8] sm:$0xff]  ;;  %5721 = vmatprep.subr.mxu1 %v5576_v51 }
0x117a   :  { %5762 = vmatprep.subr.mxu0 %v5606_v16  ;;  %v5575_v16 = vld [vmem:[#allocation32 + $0x1a0] sm:$0xff] }
0x117b   :  { %5763 = vmatpush1.msra.mxu0 %v5605_v56  ;;  %v5643_v56 = vld [vmem:[#allocation32 + $0x3c0] sm:$0xff]  ;;  %5722 = vmatpush2.msra.mxu1 %v5575_v16 }
0x117c   :  { %5764 = vmatprep.subr.mxu0 %v5604_v35  ;;  %v5574_v35 = vld [vmem:[#allocation32 + $0x198] sm:$0xff] }
0x117d   :  { %5765 = vmatpush1.msra.mxu0 %v5603_v2  ;;  %5723 = vmatprep.subr.mxu1 %v5574_v35  ;;  %v5573_v2 = vld [vmem:[#allocation32 + $0x190] sm:$0xff] }
0x117e   :  { %5766 = vmatprep.subr.mxu0 %v5602_v12  ;;  %v5572_v12 = vld [vmem:[#allocation32 + $0x188] sm:$0xff]  ;;  %5724 = vmatpush2.msra.mxu1 %v5573_v2 }
0x117f   :  { %5767 = vmatpush1.msra.mxu0 %v5601_v5  ;;  %v5571_v5 = vld [vmem:[#allocation32 + $0x180] sm:$0xff]  ;;  %5725 = vmatprep.subr.mxu1 %v5572_v12 }
0x1180   :  { %5768 = vmatprep.subr.mxu0 %v5600_v45  ;;  %v5570_v45 = vld [vmem:[#allocation32 + $0x178] sm:$0xff]  ;;  %5726 = vmatpush2.msra.mxu1 %v5571_v5 }
0x1181   :  { %5769 = vmatpush1.msra.mxu0 %v5599_v53  ;;  %v5569_v53 = vld [vmem:[#allocation32 + $0x170] sm:$0xff]  ;;  %5727 = vmatprep.subr.mxu1 %v5570_v45  ;;  %v5051_v45 = vld [vmem:[#allocation29] sm:$0xf] }
0x1182   :  { %5770 = vmatprep.subr.mxu0 %v5598_v43  ;;  %v5568_v43 = vld [vmem:[#allocation32 + $0x168] sm:$0xff]  ;;  %5728 = vmatpush2.msra.mxu1 %v5569_v53  ;;  %v5052_v53 = vld [vmem:[#allocation31] sm:$0xf] }
0x1183   :  { %5771 = vmatpush1.msra.mxu0 %v5597_v44  ;;  %v5567_v44 = vld [vmem:[#allocation32 + $0x160] sm:$0xff]  ;;  %5729 = vmatprep.subr.mxu1 %v5568_v43  ;;  %v5413_v43 = vrot.slane %v5051_v45, %v8769_v10 }
0x1184   :  { %5772 = vmatprep.subr.mxu0 %v5596_v59  ;;  %v5566_v59 = vld [vmem:[#allocation32 + $0x158] sm:$0xff]  ;;  %5730 = vmatpush2.msra.mxu1 %v5567_v44  ;;  %v5417_v44 = vrot.slane %v5051_v45, %v8831_v21 }
0x1185   :  { %5773 = vmatpush1.msra.mxu0 %v5595_v9  ;;  %v5565_v9 = vld [vmem:[#allocation32 + $0x150] sm:$0xff]  ;;  %5731 = vmatprep.subr.mxu1 %v5566_v59 }
0x1186   :  { %5774 = vmatprep.subr.mxu0 %v5594_v48  ;;  %v5564_v48 = vld [vmem:[#allocation32 + $0x148] sm:$0xff]  ;;  %5732 = vmatpush2.msra.mxu1 %v5565_v9  ;;  %v5442_v9 = vrot.slane %v5052_v53, %v8769_v10 }
0x1187   :  { %5775 = vmatpush1.msra.mxu0 %v5593_v11  ;;  %v5563_v11 = vld [vmem:[#allocation32 + $0x140] sm:$0xff]  ;;  %5733 = vmatprep.subr.mxu1 %v5564_v48 }
0x1188   :  { %5776 = vmatprep.subr.mxu0 %v5592_v15  ;;  %v5562_v15 = vld [vmem:[#allocation32 + $0x138] sm:$0xff]  ;;  %5734 = vmatpush2.msra.mxu1 %v5563_v11 }
0x1189   :  { %5777 = vmatpush1.msra.mxu0 %v5591_v33  ;;  %v5561_v33 = vld [vmem:[#allocation32 + $0x130] sm:$0xff]  ;;  %5735 = vmatprep.subr.mxu1 %v5562_v15 }
0x118a   :  { %5778 = vmatprep.subr.mxu0 %v5590_v19  ;;  %v5560_v19 = vld [vmem:[#allocation32 + $0x128] sm:$0xff]  ;;  %5736 = vmatpush2.msra.mxu1 %v5561_v33  ;;  %v5425_v33 = vrot.slane %v5051_v45, %v8927_v52 }
0x118b   :  { %5779 = vmatpush1.msra.mxu0 %v5589_v1  ;;  %v5559_v1 = vld [vmem:[#allocation32 + $0x120] sm:$0xff]  ;;  %5737 = vmatprep.subr.mxu1 %v5560_v19 }
0x118c   :  { %5780 = vmatprep.subr.mxu0 %v5588_v34  ;;  %v5558_v34 = vld [vmem:[#allocation32 + $0x118] sm:$0xff]  ;;  %5738 = vmatpush2.msra.mxu1 %v5559_v1 }
0x118d   :  { %5781 = vmatpush1.msra.mxu0 %v5587_v25  ;;  %v5557_v25 = vld [vmem:[#allocation32 + $0x110] sm:$0xff]  ;;  %5739 = vmatprep.subr.mxu1 %v5558_v34 }
0x118e   :  { %5782 = vmatprep.subr.mxu0 %v5650_v54  ;;  %v5556_v54 = vld [vmem:[#allocation32 + $0x108] sm:$0xff]  ;;  %5740 = vmatpush2.msra.mxu1 %v5557_v25 }
0x118f   :  { %5783 = vmatpush2.msra.mxu0 %v5649_v27  ;;  %v5555_v27 = vld [vmem:[#allocation32 + $0x100] sm:$0xff]  ;;  %5741 = vmatprep.subr.mxu1 %v5556_v54 }
0x1190   :  { %5784 = vmatprep.subr.mxu0 %v5648_v13  ;;  %5742 = vmatpush2.msra.mxu1 %v5555_v27  ;;  %v5622_v13 = vld [vmem:[#allocation32 + $0x318] sm:$0xff] }
0x1191   :  { %5785 = vmatpush2.msra.mxu0 %v5647_v36  ;;  %v5620_v36 = vld [vmem:[#allocation32 + $0x308] sm:$0xff] }
0x1192   :  { %5786 = vmatprep.subr.mxu0 %v5646_v14  ;;  %v9390_v14 = vld [vmem:[#allocation38] sm:$0xff] }
0x1193   :  { %5787 = vmatpush2.msra.mxu0 %v5645_v28  ;;  %v5987_v26 = vcombine.high %v9390_v14, %v9390_v14  ;;  %v5854_v28 = vld [vmem:[#allocation35 + $0xf8] sm:$0xff] }
0x1194   :  { %5788 = vmatprep.subr.mxu0 %v5644_v63  ;;  %5899 = vmatprep.subr.mxu1 %v5854_v28 }
0x1195   :  { %5789 = vmatpush2.msra.mxu0 %v5643_v56 }
0x1196   :  { %5790 = vmatprep.subr.mxu0 %v5642_v42 }
0x1197   :  { %5791 = vmatpush2.msra.mxu0 %v5641_v6 }
0x1198   :  { %5792 = vmatprep.subr.mxu0 %v5640_v32 }
0x1199   :  { %5793 = vmatpush2.msra.mxu0 %v5639_v55 }
0x119a   :  { %5794 = vmatprep.subr.mxu0 %v5638_v39 }
0x119b   :  { %5795 = vmatpush2.msra.mxu0 %v5637_v40 }
0x119c   :  { %5796 = vmatprep.subr.mxu0 %v5636_v58 }
0x119d   :  { %5797 = vmatpush2.msra.mxu0 %v5635_v3 }
0x119e   :  { %5798 = vmatprep.subr.mxu0 %v5634_v22 }
0x119f   :  { %5799 = vmatpush2.msra.mxu0 %v5633_v37  ;;  %v5446_v37 = vrot.slane %v5052_v53, %v8831_v21 }
0x11a0   :  { %5800 = vmatprep.subr.mxu0 %v5632_v20 }
0x11a1   :  { %5801 = vmatpush2.msra.mxu0 %v5631_v60 }
0x11a2   :  { %5802 = vmatprep.subr.mxu0 %v5630_v30 }
0x11a3   :  { %5803 = vmatpush2.msra.mxu0 %v5629_v8 }
0x11a4   :  { %5804 = vmatprep.subr.mxu0 %v5628_v23 }
0x11a5   :  { %5805 = vmatpush2.msra.mxu0 %v5627_v57 }
0x11a6   :  { %5806 = vmatprep.subr.mxu0 %v5626_v31  ;;  %v5454_v31 = vrot.slane %v5052_v53, %v8927_v52 }
0x11a7   :  { %5807 = vmatpush2.msra.mxu0 %v5625_v62 }
0x11a8   :  { %5808 = vmatprep.subr.mxu0 %v5624_v49 }
0x11a9   :  { %5809 = vmatpush2.msra.mxu0 %v5623_v61 }
0x11aa   :  { %5810 = vmatprep.subr.mxu0 %v5622_v13 }
0x11ab   :  { %5811 = vmatpush2.msra.mxu0 %v5621_v46 }
0x11ac   :  { %5812 = vmatprep.subr.mxu0 %v5620_v36 }
0x11ad   :  { %5813 = vmatpush2.msra.mxu0 %v5619_v29 }
0x11ae   :  { %7121 = vmatprep.subr.msk.mxu0 %vm615_vm0, %v5987_v26 }
0x122a   :  { %v5297_v51 = vpop.f32.mrf.mxu0 }
0x122b   :  { %v5373_v63 = vmul.f32 0.0625, %v5297_v51 }
0x122c   :  { %v5299_v16 = vpop.f32.mrf.mxu0 }
0x122d   :  { %v5377_v56 = vadd.f32 1e-05, %v5373_v63  ;;  %v5374_v35 = vmul.f32 0.0625, %v5299_v16 }
0x122e   :  { %v5368_v2 = vpop.f32.mrf.mxu0 }
0x122f   :  { %7624 = vrsqrt.f32 %v5377_v56  ;;  %v5378_v42 = vadd.f32 1e-05, %v5374_v35  ;;  %v5375_v6 = vmul.f32 0.0625, %v5368_v2 }
0x1230   :  { %v5370_v12 = vpop.f32.mrf.mxu0 }
0x1231   :  { %7626 = vrsqrt.f32 %v5378_v42  ;;  %v5379_v32 = vadd.f32 1e-05, %v5375_v6  ;;  %v5376_v5 = vmul.f32 0.0625, %v5370_v12 }
0x1233   :  { %7628 = vrsqrt.f32 %v5379_v32  ;;  %v5380_v55 = vadd.f32 1e-05, %v5376_v5 }
0x1235   :  { %7630 = vrsqrt.f32 %v5380_v55 }
0x123c   :  { %v7625_v39 = vpop.eup %7624 }
0x123d   :  { %v5388_v40 = vrot.slane %v7625_v39, %v8769_v10 }
0x123e   :  { %v7627_v58 = vpop.eup %7626 }
0x123f   :  { %v5401_v3 = vmul.f32 %v5388_v40, %v9353_v0  ;;  %v5405_v59 = vmul.f32 %v5388_v40, %v9344_v7  ;;  %v5392_v22 = vrot.slane %v7627_v58, %v8769_v10  ;;  %v5421_v0 = vrot.slane %v5051_v45, %v8924_v47 }
0x1240   :  { %v7629_v48 = vpop.eup %7628  ;;  %v5450_v7 = vrot.slane %v5052_v53, %v8924_v47 }
0x1241   :  { %v5402_v20 = vmul.f32 %v5392_v22, %v9347_v41  ;;  %v5406_v11 = vmul.f32 %v5392_v22, %v9350_v17  ;;  %v5430_v60 = vmul.f32 %v5413_v43, %v5401_v3  ;;  %v5434_v15 = vmul.f32 %v5413_v43, %v5405_v59 }
0x1242   :  { %v5396_v30 = vrot.slane %v7629_v48, %v8769_v10  ;;  %v7631_v8 = vpop.eup %7630 }
0x1243   :  { %v5431_v19 = vmul.f32 %v5417_v44, %v5402_v20  ;;  %v5435_v23 = vmul.f32 %v5417_v44, %v5406_v11  ;;  %v5459_v1 = vadd.f32 %v5442_v9, %v5430_v60  ;;  %v5463_v57 = vadd.f32 %v5442_v9, %v5434_v15 }
0x1244   :  { %v5403_v34 = vmul.f32 %v5396_v30, %v9375_v24  ;;  %v5407_v41 = vmul.f32 %v5396_v30, %v9362_v50  ;;  %v5400_v17 = vrot.slane %v7631_v8, %v8769_v10 }
0x1245   :  { %v5460_v25 = vadd.f32 %v5446_v37, %v5431_v19  ;;  %v5464_v62 = vadd.f32 %v5446_v37, %v5435_v23  ;;  %v5467_v54 = vmax.f32 %v5459_v1, 0.0  ;;  %v5471_v49 = vmax.f32 %v5463_v57, 0.0 }
0x1246   :  { %v5404_v27 = vmul.f32 %v5400_v17, %v9369_v38  ;;  %v5408_v47 = vmul.f32 %v5400_v17, %v9372_v18  ;;  %v5432_v61 = vmul.f32 %v5421_v0, %v5403_v34  ;;  %v5436_v13 = vmul.f32 %v5421_v0, %v5407_v41 }
0x1247   :  { %v5468_v46 = vmax.f32 %v5460_v25, 0.0  ;;  %v5472_v36 = vmax.f32 %v5464_v62, 0.0  ;;  %v5475_v29 = vrot.slane %v5467_v54, 4  ;;  %v5499_v24 = vrot.slane %v5471_v49, 4 }
0x1248   :  { %v5433_v26 = vmul.f32 %v5425_v33, %v5404_v27  ;;  %v5437_v50 = vmul.f32 %v5425_v33, %v5408_v47  ;;  %v5461_v28 = vadd.f32 %v5450_v7, %v5432_v61  ;;  %v5465_v51 = vadd.f32 %v5450_v7, %v5436_v13  ;;  %v5852_v13 = vld [vmem:[#allocation35 + $0xe8] sm:$0xff] }
0x1249   :  { %v5481_v63 = vrot.slane %v5468_v46, 4  ;;  %v5505_v52 = vrot.slane %v5472_v36, 4  ;;  %v5476_v16 = vmax.f32 %v5467_v54, %v5475_v29  ;;  %v5500_v56 = vmax.f32 %v5471_v49, %v5499_v24  ;;  %v5853_v49 = vld [vmem:[#allocation35 + $0xf0] sm:$0xff]  ;;  %v5851_v29 = vld [vmem:[#allocation35 + $0xe0] sm:$0xff] }
0x124a   :  { %v5462_v35 = vadd.f32 %v5454_v31, %v5433_v26  ;;  %v5466_v42 = vadd.f32 %v5454_v31, %v5437_v50  ;;  %v5469_v2 = vmax.f32 %v5461_v28, 0.0  ;;  %v5473_v38 = vmax.f32 %v5465_v51, 0.0  ;;  %v5850_v50 = vld [vmem:[#allocation35 + $0xd8] sm:$0xff]  ;;  %v5849_v28 = vld [vmem:[#allocation35 + $0xd0] sm:$0xff] }
0x124b   :  { %v5482_v6 = vmax.f32 %v5468_v46, %v5481_v63  ;;  %v5506_v18 = vmax.f32 %v5472_v36, %v5505_v52  ;;  %v5477_v12 = vrot.slane %v5476_v16, 2  ;;  %v5501_v32 = vrot.slane %v5500_v56, 2  ;;  %v5848_v52 = vld [vmem:[#allocation35 + $0xc8] sm:$0xff] }
0x124c   :  { %v5470_v5 = vmax.f32 %v5462_v35, 0.0  ;;  %v5474_v55 = vmax.f32 %v5466_v42, 0.0  ;;  %v5487_v45 = vrot.slane %v5469_v2, 4  ;;  %v5511_v39 = vrot.slane %v5473_v38, 4  ;;  %v5972_v35 = vld [vmem:[#allocation3] sm:$0x3] }
0x124d   :  { %v5483_v53 = vrot.slane %v5482_v6, 2  ;;  %v5507_v40 = vrot.slane %v5506_v18, 2  ;;  %v5478_v43 = vmax.f32 %v5476_v16, %v5477_v12  ;;  %v5502_v58 = vmax.f32 %v5500_v56, %v5501_v32  ;;  %v6099_v16 = vld [vmem:[#allocation41 + $0xf8] sm:$0xff]  ;;  %v5846_v42 = vld [vmem:[#allocation35 + $0xb8] sm:$0xff] }
0x124e   :  { %v5493_v44 = vrot.slane %v5470_v5, 4  ;;  %v5517_v3 = vrot.slane %v5474_v55, 4  ;;  %v5488_v59 = vmax.f32 %v5469_v2, %v5487_v45  ;;  %v5512_v22 = vmax.f32 %v5473_v38, %v5511_v39  ;;  %v5847_v56 = vld [vmem:[#allocation35 + $0xc0] sm:$0xff]  ;;  %v5845_v2 = vld [vmem:[#allocation35 + $0xb0] sm:$0xff]  ;;  %v5840_v39 = vld [vmem:[#allocation35 + $0x88] sm:$0xff] }
0x124f   :  { %v5484_v9 = vmax.f32 %v5482_v6, %v5483_v53  ;;  %v5508_v37 = vmax.f32 %v5506_v18, %v5507_v40  ;;  %v5479_v48 = vrot.slane %v5478_v43, 1  ;;  %v5503_v20 = vrot.slane %v5502_v58, 1  ;;  %v6083_v38 = vld [vmem:[#allocation41 + $0x78] sm:$0xff]  ;;  %v6098_v18 = vld [vmem:[#allocation41 + $0xf0] sm:$0xff]  ;;  %v6081_v45 = vld [vmem:[#allocation41 + $0x68] sm:$0xff] }
0x1250   :  { %v5494_v11 = vmax.f32 %v5470_v5, %v5493_v44  ;;  %v5518_v60 = vmax.f32 %v5474_v55, %v5517_v3  ;;  %v5489_v15 = vrot.slane %v5488_v59, 2  ;;  %v5513_v30 = vrot.slane %v5512_v22, 2  ;;  %v5844_v6 = vld [vmem:[#allocation35 + $0xa8] sm:$0xff]  ;;  %v5843_v12 = vld [vmem:[#allocation35 + $0xa0] sm:$0xff]  ;;  %v5842_v5 = vld [vmem:[#allocation35 + $0x98] sm:$0xff] }
0x1251   :  { %v5485_v33 = vrot.slane %v5484_v9, 1  ;;  %v5509_v0 = vrot.slane %v5508_v37, 1  ;;  %v5480_v7 = vmax.f32 %v5478_v43, %v5479_v48  ;;  %v5504_v8 = vmax.f32 %v5502_v58, %v5503_v20  ;;  %v6082_v32 = vld [vmem:[#allocation41 + $0x70] sm:$0xff]  ;;  %v5841_v55 = vld [vmem:[#allocation35 + $0x90] sm:$0xff]  ;;  %v6095_v44 = vld [vmem:[#allocation41 + $0xd8] sm:$0xff] }
0x1252   :  { %v5495_v19 = vrot.slane %v5494_v11, 2  ;;  %v5519_v23 = vrot.slane %v5518_v60, 2  ;;  %v5490_v1 = vmax.f32 %v5488_v59, %v5489_v15  ;;  %v5514_v57 = vmax.f32 %v5512_v22, %v5513_v30  ;;  %v6096_v53 = vld [vmem:[#allocation41 + $0xe0] sm:$0xff]  ;;  %v5839_v40 = vld [vmem:[#allocation35 + $0x80] sm:$0xff]  ;;  %v5838_v58 = vld [vmem:[#allocation35 + $0x78] sm:$0xff] }
0x1253   :  { %v5486_v34 = vmax.f32 %v5484_v9, %v5485_v33  ;;  %v5510_v41 = vmax.f32 %v5508_v37, %v5509_v0  ;;  %v5671_v27 = vsel %vm2677_vm5, %v5504_v8, %v5480_v7  ;;  %v6080_v43 = vld [vmem:[#allocation41 + $0x60] sm:$0xff]  ;;  %v6079_v59 = vld [vmem:[#allocation41 + $0x58] sm:$0xff]  ;;  %v6094_v9 = vld [vmem:[#allocation41 + $0xd0] sm:$0xff] }
0x1254   :  { %v5496_v17 = vmax.f32 %v5494_v11, %v5495_v19  ;;  %v5520_v31 = vmax.f32 %v5518_v60, %v5519_v23  ;;  %v5491_v25 = vrot.slane %v5490_v1, 1  ;;  %v5515_v62 = vrot.slane %v5514_v57, 1  ;;  %v5837_v3 = vld [vmem:[#allocation35 + $0x70] sm:$0xff]  ;;  %v5836_v22 = vld [vmem:[#allocation35 + $0x68] sm:$0xff]  ;;  %v5835_v37 = vld [vmem:[#allocation35 + $0x60] sm:$0xff] }
0x1255   :  { %v5672_v54 = vsel %vm2677_vm5, %v5510_v41, %v5486_v34  ;;  %v6078_v48 = vld [vmem:[#allocation41 + $0x50] sm:$0xff]  ;;  %v6093_v11 = vld [vmem:[#allocation41 + $0xc8] sm:$0xff]  ;;  %v5832_v30 = vld [vmem:[#allocation35 + $0x48] sm:$0xff] }
0x1256   :  { %5743 = vmatprep.mubr.f32.mxu1 %v5672_v54  ;;  %v5497_v47 = vrot.slane %v5496_v17, 1  ;;  %v5521_v61 = vrot.slane %v5520_v31, 1  ;;  %v5492_v46 = vmax.f32 %v5490_v1, %v5491_v25  ;;  %v5516_v36 = vmax.f32 %v5514_v57, %v5515_v62  ;;  %v5834_v20 = vld [vmem:[#allocation35 + $0x58] sm:$0xff]  ;;  %v5833_v60 = vld [vmem:[#allocation35 + $0x50] sm:$0xff]  ;;  %v5831_v0 = vld [vmem:[#allocation35 + $0x40] sm:$0xff] }
0x1257   :  { %5744 = vmatmul.mubr.f32.vlgmr.msra.gmra.mxu1 %v5671_v27  ;;  %v6077_v15 = vld [vmem:[#allocation41 + $0x48] sm:$0xff]  ;;  %v6092_v33 = vld [vmem:[#allocation41 + $0xc0] sm:$0xff]  ;;  %v5827_v1 = vld [vmem:[#allocation35 + $0x20] sm:$0xff] }
0x1258   :  { %v5498_v24 = vmax.f32 %v5496_v17, %v5497_v47  ;;  %v5522_v26 = vmax.f32 %v5520_v31, %v5521_v61  ;;  %5900 = vmatpush1.msra.mxu1 %v5853_v49  ;;  %v5673_v63 = vsel %vm2677_vm5, %v5516_v36, %v5492_v46  ;;  %v6076_v7 = vld [vmem:[#allocation41 + $0x40] sm:$0xff]  ;;  %v5830_v8 = vld [vmem:[#allocation35 + $0x38] sm:$0xff]  ;;  %v5823_v17 = vld [vmem:[#allocation35] sm:$0xff] }
0x1259   :  { %5901 = vmatprep.subr.mxu1 %v5852_v13  ;;  %v5829_v19 = vld [vmem:[#allocation35 + $0x30] sm:$0xff]  ;;  %v5828_v23 = vld [vmem:[#allocation35 + $0x28] sm:$0xff]  ;;  %v5826_v57 = vld [vmem:[#allocation35 + $0x18] sm:$0xff] }
0x125a   :  { %v5674_v51 = vsel %vm2677_vm5, %v5522_v26, %v5498_v24  ;;  %5902 = vmatpush1.msra.mxu1 %v5851_v29  ;;  %v5825_v34 = vld [vmem:[#allocation35 + $0x10] sm:$0xff]  ;;  %v5824_v41 = vld [vmem:[#allocation35 + $0x8] sm:$0xff]  ;;  %v5886_v31 = vld [vmem:[#allocation35 + $0x1f8] sm:$0xff] }
0x125b   :  { %5814 = vmatprep.mubr.f32.mxu0 %v5674_v51  ;;  %5903 = vmatprep.subr.mxu1 %v5850_v50  ;;  %v5885_v25 = vld [vmem:[#allocation35 + $0x1f0] sm:$0xff]  ;;  %v5884_v62 = vld [vmem:[#allocation35 + $0x1e8] sm:$0xff]  ;;  %v5883_v54 = vld [vmem:[#allocation35 + $0x1e0] sm:$0xff] }
0x125c   :  { %5815 = vmatmul.mubr.f32.vlgmr.msra.gmra.mxu0 %v5673_v63  ;;  %5904 = vmatpush1.msra.mxu1 %v5849_v28  ;;  %v5882_v49 = vld [vmem:[#allocation35 + $0x1d8] sm:$0xff]  ;;  %v5881_v27 = vld [vmem:[#allocation35 + $0x1d0] sm:$0xff]  ;;  %v5880_v47 = vld [vmem:[#allocation35 + $0x1c8] sm:$0xff] }
0x125d   :  { %7122 = vmatpush1.msk.msra.mxu0 %vm615_vm0, %v9390_v14  ;;  %6059 = vmatprep.mubr.f32.mxu0 %v8473_v4  ;;  %v6097_v14 = vld [vmem:[#allocation41 + $0xe8] sm:$0xff]  ;;  %v5879_v61 = vld [vmem:[#allocation35 + $0x1c0] sm:$0xff]  ;;  %v5876_v36 = vld [vmem:[#allocation35 + $0x1a8] sm:$0xff] }
0x125e   :  { %5905 = vmatprep.subr.mxu1 %v5848_v52  ;;  %7192 = vmatprep.subr.mxu0 %v6099_v16  ;;  %v5878_v13 = vld [vmem:[#allocation35 + $0x1b8] sm:$0xff]  ;;  %v5877_v46 = vld [vmem:[#allocation35 + $0x1b0] sm:$0xff]  ;;  %v5875_v29 = vld [vmem:[#allocation35 + $0x1a0] sm:$0xff] }
0x125f   :  { %5906 = vmatpush1.msra.mxu1 %v5847_v56  ;;  %v5874_v24 = vld [vmem:[#allocation35 + $0x198] sm:$0xff]  ;;  %v5873_v26 = vld [vmem:[#allocation35 + $0x190] sm:$0xff]  ;;  %v5872_v50 = vld [vmem:[#allocation35 + $0x188] sm:$0xff] }
0x1260   :  { %7123 = vmatmul.mubr.msk.f32.vlgmr.msra.gmra.mxu0 %vm608_vm1, %v5972_v35  ;;  %5907 = vmatprep.subr.mxu1 %v5846_v42  ;;  %v5871_v28 = vld [vmem:[#allocation35 + $0x180] sm:$0xff]  ;;  %v5870_v51 = vld [vmem:[#allocation35 + $0x178] sm:$0xff]  ;;  %v5869_v63 = vld [vmem:[#allocation35 + $0x170] sm:$0xff] }
0x1261   :  { %5908 = vmatpush1.msra.mxu1 %v5845_v2  ;;  %7193 = vmatpush3.msra.mxu0 %v6083_v38  ;;  %v5868_v52 = vld [vmem:[#allocation35 + $0x168] sm:$0xff]  ;;  %v5867_v16 = vld [vmem:[#allocation35 + $0x160] sm:$0xff]  ;;  %v5866_v56 = vld [vmem:[#allocation35 + $0x158] sm:$0xff] }
0x1262   :  { %5909 = vmatprep.subr.mxu1 %v5844_v6  ;;  %7194 = vmatprep.subr.mxu0 %v6098_v18  ;;  %v6091_v35 = vld [vmem:[#allocation41 + $0xb8] sm:$0xff]  ;;  %v5865_v42 = vld [vmem:[#allocation35 + $0x150] sm:$0xff]  ;;  %v6090_v6 = vld [vmem:[#allocation41 + $0xb0] sm:$0xff] }
0x1263   :  { %5910 = vmatpush1.msra.mxu1 %v5843_v12  ;;  %7195 = vmatpush3.msra.mxu0 %v6082_v32  ;;  %v6075_v2 = vld [vmem:[#allocation41 + $0x38] sm:$0xff]  ;;  %v6074_v12 = vld [vmem:[#allocation41 + $0x30] sm:$0xff] }
0x1264   :  { %5911 = vmatprep.subr.mxu1 %v5842_v5  ;;  %7196 = vmatprep.subr.mxu0 %v6097_v14  ;;  %v5864_v38 = vld [vmem:[#allocation35 + $0x148] sm:$0xff]  ;;  %v5863_v18 = vld [vmem:[#allocation35 + $0x140] sm:$0xff]  ;;  %v5862_v32 = vld [vmem:[#allocation35 + $0x138] sm:$0xff] }
0x1265   :  { %5912 = vmatpush1.msra.mxu1 %v5841_v55  ;;  %7197 = vmatpush3.msra.mxu0 %v6081_v45  ;;  %v6089_v5 = vld [vmem:[#allocation41 + $0xa8] sm:$0xff]  ;;  %v5860_v45 = vld [vmem:[#allocation35 + $0x128] sm:$0xff] }
0x1266   :  { %5913 = vmatprep.subr.mxu1 %v5840_v39  ;;  %7198 = vmatprep.subr.mxu0 %v6096_v53  ;;  %v5861_v14 = vld [vmem:[#allocation35 + $0x130] sm:$0xff]  ;;  %v5859_v53 = vld [vmem:[#allocation35 + $0x120] sm:$0xff] }
0x1267   :  { %5914 = vmatpush1.msra.mxu1 %v5839_v40  ;;  %7199 = vmatpush3.msra.mxu0 %v6080_v43  ;;  %v6073_v55 = vld [vmem:[#allocation41 + $0x28] sm:$0xff]  ;;  %v6088_v39 = vld [vmem:[#allocation41 + $0xa0] sm:$0xff] }
0x1268   :  { %5915 = vmatprep.subr.mxu1 %v5838_v58  ;;  %7200 = vmatprep.subr.mxu0 %v6095_v44  ;;  %v6072_v40 = vld [vmem:[#allocation41 + $0x20] sm:$0xff]  ;;  %v5858_v43 = vld [vmem:[#allocation35 + $0x118] sm:$0xff]  ;;  %v6087_v58 = vld [vmem:[#allocation41 + $0x98] sm:$0xff] }
0x1269   :  { %5916 = vmatpush1.msra.mxu1 %v5837_v3  ;;  %7201 = vmatpush3.msra.mxu0 %v6079_v59  ;;  %v5857_v44 = vld [vmem:[#allocation35 + $0x110] sm:$0xff]  ;;  %v6071_v3 = vld [vmem:[#allocation41 + $0x18] sm:$0xff] }
0x126a   :  { %5917 = vmatprep.subr.mxu1 %v5836_v22  ;;  %7202 = vmatprep.subr.mxu0 %v6094_v9  ;;  %v5856_v59 = vld [vmem:[#allocation35 + $0x108] sm:$0xff]  ;;  %v6086_v22 = vld [vmem:[#allocation41 + $0x90] sm:$0xff] }
0x126b   :  { %5918 = vmatpush1.msra.mxu1 %v5835_v37  ;;  %7203 = vmatpush3.msra.mxu0 %v6078_v48  ;;  %v5855_v9 = vld [vmem:[#allocation35 + $0x100] sm:$0xff]  ;;  %v6085_v48 = vld [vmem:[#allocation41 + $0x88] sm:$0xff] }
0x126c   :  { %5919 = vmatprep.subr.mxu1 %v5834_v20  ;;  %7204 = vmatprep.subr.mxu0 %v6093_v11  ;;  %v6070_v37 = vld [vmem:[#allocation41 + $0x10] sm:$0xff]  ;;  %v6069_v20 = vld [vmem:[#allocation41 + $0x8] sm:$0xff]  ;;  %v6084_v11 = vld [vmem:[#allocation41 + $0x80] sm:$0xff] }
0x126d   :  { %5920 = vmatpush1.msra.mxu1 %v5833_v60  ;;  %7205 = vmatpush3.msra.mxu0 %v6077_v15  ;;  %v6068_v60 = vld [vmem:[#allocation41] sm:$0xff]  ;;  %v5651_v15 = vld [vmem:[#allocation34] sm:$0x3] }
0x126e   :  { %5921 = vmatprep.subr.mxu1 %v5832_v30  ;;  %7206 = vmatprep.subr.mxu0 %v6092_v33  ;;  %v5656_v33 = vrot.slane %v5651_v15, %v8769_v10 }
0x126f   :  { %5922 = vmatpush1.msra.mxu1 %v5831_v0  ;;  %7207 = vmatpush3.msra.mxu0 %v6076_v7  ;;  %v5660_v0 = vrot.slane %v5651_v15, %v8831_v21 }
0x1270   :  { %5923 = vmatprep.subr.mxu1 %v5830_v8  ;;  %7208 = vmatprep.subr.mxu0 %v6091_v35  ;;  %v5974_v8 = vld [vmem:[#allocation40] sm:$0x3] }
0x1271   :  { %5924 = vmatpush1.msra.mxu1 %v5829_v19  ;;  %7209 = vmatpush3.msra.mxu0 %v6075_v2  ;;  %v6370_v35 = vld [vmem:[#allocation50 + $0x50] sm:$0xff]  ;;  %v6369_v2 = vld [vmem:[#allocation50 + $0x48] sm:$0xff] }
0x1272   :  { %5925 = vmatprep.subr.mxu1 %v5828_v23  ;;  %7210 = vmatprep.subr.mxu0 %v6090_v6  ;;  %v6368_v6 = vld [vmem:[#allocation50 + $0x40] sm:$0xff] }
0x1273   :  { %5926 = vmatpush1.msra.mxu1 %v5827_v1  ;;  %7211 = vmatpush3.msra.mxu0 %v6074_v12  ;;  %v6367_v12 = vld [vmem:[#allocation50 + $0x38] sm:$0xff] }
0x1274   :  { %5927 = vmatprep.subr.mxu1 %v5826_v57  ;;  %7212 = vmatprep.subr.mxu0 %v6089_v5  ;;  %v5979_v57 = vrot.slane %v5974_v8, %v8769_v10  ;;  %v6366_v5 = vld [vmem:[#allocation50 + $0x30] sm:$0xff] }
0x1275   :  { %5928 = vmatpush1.msra.mxu1 %v5825_v34  ;;  %7213 = vmatpush3.msra.mxu0 %v6073_v55  ;;  %v6184_v55 = vld [vmem:[#allocation44 + $0x30] sm:$0xff] }
0x1276   :  { %5929 = vmatprep.subr.mxu1 %v5824_v41  ;;  %7214 = vmatprep.subr.mxu0 %v6088_v39  ;;  %v6183_v39 = vld [vmem:[#allocation44 + $0x28] sm:$0xff] }
0x1277   :  { %5930 = vmatpush1.msra.mxu1 %v5823_v17  ;;  %7215 = vmatpush3.msra.mxu0 %v6072_v40  ;;  %v6182_v40 = vld [vmem:[#allocation44 + $0x20] sm:$0xff] }
0x1278   :  { %5931 = vmatprep.subr.mxu1 %v5886_v31  ;;  %7216 = vmatprep.subr.mxu0 %v6087_v58  ;;  %v5983_v31 = vrot.slane %v5974_v8, %v8831_v21  ;;  %v6181_v58 = vld [vmem:[#allocation44 + $0x18] sm:$0xff] }
0x1279   :  { %5932 = vmatpush2.msra.mxu1 %v5885_v25  ;;  %7217 = vmatpush3.msra.mxu0 %v6071_v3  ;;  %v6180_v3 = vld [vmem:[#allocation44 + $0x10] sm:$0xff] }
0x127a   :  { %5933 = vmatprep.subr.mxu1 %v5884_v62  ;;  %7218 = vmatprep.subr.mxu0 %v6086_v22  ;;  %v6179_v22 = vld [vmem:[#allocation44 + $0x8] sm:$0xff] }
0x127b   :  { %5934 = vmatpush2.msra.mxu1 %v5883_v54  ;;  %7219 = vmatpush3.msra.mxu0 %v6070_v37  ;;  %v6517_v37 = vld [vmem:[#allocation53 + $0x1f8] sm:$0xff] }
0x127c   :  { %5935 = vmatprep.subr.mxu1 %v5882_v49  ;;  %7220 = vmatprep.subr.mxu0 %v6085_v48  ;;  %v6485_v48 = vld [vmem:[#allocation53 + $0xf8] sm:$0xff] }
0x127d   :  { %5936 = vmatpush2.msra.mxu1 %v5881_v27  ;;  %7221 = vmatpush3.msra.mxu0 %v6069_v20 }
0x127e   :  { %5937 = vmatprep.subr.mxu1 %v5880_v47  ;;  %7222 = vmatprep.subr.mxu0 %v6084_v11  ;;  %v6273_v47 = vld [vmem:[#allocation47] sm:$0x3] }
0x127f   :  { %5938 = vmatpush2.msra.mxu1 %v5879_v61  ;;  %7223 = vmatpush3.msra.mxu0 %v6068_v60  ;;  %v7126_v60 = vld [vmem:[#allocation49] ss:$0 sm:$0xff] }
0x1280   :  { %5939 = vmatprep.subr.mxu1 %v5878_v13  ;;  %7430 = vmatprep.subr.mxu0 %v8473_v4 }
0x1281   :  { %5940 = vmatpush2.msra.mxu1 %v5877_v46 }
0x1282   :  { %5941 = vmatprep.subr.mxu1 %v5876_v36  ;;  %v6272_v36 = vld [vmem:[#allocation5] sm:$0x3] }
0x1283   :  { %5942 = vmatpush2.msra.mxu1 %v5875_v29  ;;  %v6375_v29 = vld [vmem:[#allocation50 + $0x78] sm:$0xff] }
0x1284   :  { %5943 = vmatprep.subr.mxu1 %v5874_v24  ;;  %v6193_v24 = vld [vmem:[#allocation44 + $0x78] sm:$0xff] }
0x1285   :  { %5944 = vmatpush2.msra.mxu1 %v5873_v26  ;;  %v6374_v26 = vld [vmem:[#allocation50 + $0x70] sm:$0xff] }
0x1286   :  { %5945 = vmatprep.subr.mxu1 %v5872_v50  ;;  %v6192_v50 = vld [vmem:[#allocation44 + $0x70] sm:$0xff] }
0x1287   :  { %5946 = vmatpush2.msra.mxu1 %v5871_v28  ;;  %v6373_v28 = vld [vmem:[#allocation50 + $0x68] sm:$0xff] }
0x1288   :  { %5947 = vmatprep.subr.mxu1 %v5870_v51  ;;  %v6191_v51 = vld [vmem:[#allocation44 + $0x68] sm:$0xff] }
0x1289   :  { %5948 = vmatpush2.msra.mxu1 %v5869_v63  ;;  %v6372_v63 = vld [vmem:[#allocation50 + $0x60] sm:$0xff] }
0x128a   :  { %5949 = vmatprep.subr.mxu1 %v5868_v52  ;;  %v6190_v52 = vld [vmem:[#allocation44 + $0x60] sm:$0xff] }
0x128b   :  { %5950 = vmatpush2.msra.mxu1 %v5867_v16  ;;  %v6371_v16 = vld [vmem:[#allocation50 + $0x58] sm:$0xff] }
0x128c   :  { %5951 = vmatprep.subr.mxu1 %v5866_v56  ;;  %v6189_v56 = vld [vmem:[#allocation44 + $0x58] sm:$0xff] }
0x128d   :  { %5952 = vmatpush2.msra.mxu1 %v5865_v42  ;;  %v6188_v42 = vld [vmem:[#allocation44 + $0x50] sm:$0xff] }
0x128e   :  { %5953 = vmatprep.subr.mxu1 %v5864_v38  ;;  %v6187_v38 = vld [vmem:[#allocation44 + $0x48] sm:$0xff] }
0x128f   :  { %5954 = vmatpush2.msra.mxu1 %v5863_v18  ;;  %v6186_v18 = vld [vmem:[#allocation44 + $0x40] sm:$0xff] }
0x1290   :  { %5955 = vmatprep.subr.mxu1 %v5862_v32  ;;  %v6185_v32 = vld [vmem:[#allocation44 + $0x38] sm:$0xff] }
0x1291   :  { %5956 = vmatpush2.msra.mxu1 %v5861_v14  ;;  %v6365_v14 = vld [vmem:[#allocation50 + $0x28] sm:$0xff] }
0x1292   :  { %5957 = vmatprep.subr.mxu1 %v5860_v45  ;;  %v6364_v45 = vld [vmem:[#allocation50 + $0x20] sm:$0xff] }
0x1293   :  { %5958 = vmatpush2.msra.mxu1 %v5859_v53  ;;  %v6363_v53 = vld [vmem:[#allocation50 + $0x18] sm:$0xff] }
0x1294   :  { %5959 = vmatprep.subr.mxu1 %v5858_v43  ;;  %v6362_v43 = vld [vmem:[#allocation50 + $0x10] sm:$0xff] }
0x1295   :  { %5960 = vmatpush2.msra.mxu1 %v5857_v44  ;;  %v6361_v44 = vld [vmem:[#allocation50 + $0x8] sm:$0xff] }
0x1296   :  { %5961 = vmatprep.subr.mxu1 %v5856_v59  ;;  %v6360_v59 = vld [vmem:[#allocation50] sm:$0xff] }
0x1297   :  { %5962 = vmatpush2.msra.mxu1 %v5855_v9  ;;  %v6178_v9 = vld [vmem:[#allocation44] sm:$0xff] }
0x1298   :  { %7465 = vmatprep.subr.mxu1 %v8473_v4 }
0x1317   :  { %v5745_v30 = vpop.f32.mrf.mxu1 }
0x1318   :  { %v5746_v19 = vadd.f32 %v5745_v30, %v5656_v33 }
0x1319   :  { %v5747_v7 = vpop.f32.mrf.mxu1 }
0x131a   :  { %v5748_v1 = vadd.f32 %v5747_v7, %v5660_v0  ;;  %v7124_v0 = vld [vmem:[#allocation43] ss:$0 sm:$0xff] }
0x131c   :  { %v5816_v23 = vpop.f32.mrf.mxu0 }
0x131d   :  { %v5817_v34 = vadd.f32 %v5816_v23, %v5746_v19 }
0x131e   :  { %v5818_v41 = vpop.f32.mrf.mxu0 }
0x131f   :  { %v5819_v17 = vadd.f32 %v5818_v41, %v5748_v1  ;;  %v5821_v49 = vmax.f32 %v5817_v34, 0.0  ;;  %v6484_v1 = vld [vmem:[#allocation53 + $0xf0] sm:$0xff]  ;;  %v6482_v41 = vld [vmem:[#allocation53 + $0xe0] sm:$0xff] }
0x1320   :  { %v6061_v25 = vpop.f32.mrf.mxu0 }
0x1321   :  { %v5822_v62 = vmax.f32 %v5819_v17, 0.0  ;;  %v6062_v54 = vadd.f32 %v6061_v25, %v5979_v57  ;;  %v6483_v57 = vld [vmem:[#allocation53 + $0xe8] sm:$0xff]  ;;  %v6481_v17 = vld [vmem:[#allocation53 + $0xd8] sm:$0xff]  ;;  %v6516_v25 = vld [vmem:[#allocation53 + $0x1f0] sm:$0xff] }
0x1322   :  { %v6063_v27 = vpop.f32.mrf.mxu0 }
0x1323   :  { %v6064_v61 = vadd.f32 %v6063_v27, %v5983_v31  ;;  %5963 = vmatprep.mubr.f32.mxu1 %v5822_v62  ;;  %v6066_v13 = vmax.f32 %v6062_v54, 0.0  ;;  %v6480_v62 = vld [vmem:[#allocation53 + $0xd0] sm:$0xff]  ;;  %v6515_v54 = vld [vmem:[#allocation53 + $0x1e8] sm:$0xff]  ;;  %v6514_v27 = vld [vmem:[#allocation53 + $0x1e0] sm:$0xff] }
0x1324   :  { %5964 = vmatmul.mubr.f32.vlgmr.msra.gmra.mxu1 %v5821_v49  ;;  %v6479_v49 = vld [vmem:[#allocation53 + $0xc8] sm:$0xff] }
0x1325   :  { %v6067_v46 = vmax.f32 %v6064_v61, 0.0  ;;  %7466 = vmatpush3.msk.msra.mxu1 %vm6285_vm6, %v6273_v47  ;;  %7467 = vmatprep.mubr.msk.f32.mxu1 %vm8474_vm2, %v8473_v4  ;;  %v6478_v47 = vld [vmem:[#allocation53 + $0xc0] sm:$0xff]  ;;  %v6513_v61 = vld [vmem:[#allocation53 + $0x1d8] sm:$0xff] }
0x1326   :  { %7470 = vmatprep.subr.mxu1 %v8473_v4 }
0x1327   :  { %6171 = vmatprep.mubr.f32.mxu0 %v6067_v46  ;;  %v6512_v46 = vld [vmem:[#allocation53 + $0x1d0] sm:$0xff] }
0x1328   :  { %6172 = vmatmul.mubr.f32.vlgmr.msra.gmra.mxu0 %v6066_v13  ;;  %7468 = vmatmul.mubr.msk.f32.vlgmr.msra.gmra.mxu1 %vm6281_vm7, %v6272_v36  ;;  %v6477_v13 = vld [vmem:[#allocation53 + $0xb8] sm:$0xff]  ;;  %v6476_v36 = vld [vmem:[#allocation53 + $0xb0] sm:$0xff] }
0x1329   :  { %7471 = vmatpush3.msra.mxu1 %v6375_v29  ;;  %7431 = vmatpush3.msra.mxu0 %v6193_v24  ;;  %v6511_v29 = vld [vmem:[#allocation53 + $0x1c8] sm:$0xff] }
0x132a   :  { %7472 = vmatprep.subr.mxu1 %v8473_v4  ;;  %7432 = vmatprep.subr.mxu0 %v8473_v4  ;;  %v6475_v24 = vld [vmem:[#allocation53 + $0xa8] sm:$0xff] }
0x132b   :  { %7473 = vmatpush3.msra.mxu1 %v6374_v26  ;;  %7433 = vmatpush3.msra.mxu0 %v6192_v50  ;;  %v6510_v26 = vld [vmem:[#allocation53 + $0x1c0] sm:$0xff] }
0x132c   :  { %7474 = vmatprep.subr.mxu1 %v8473_v4  ;;  %7434 = vmatprep.subr.mxu0 %v8473_v4  ;;  %v6474_v50 = vld [vmem:[#allocation53 + $0xa0] sm:$0xff] }
0x132d   :  { %7475 = vmatpush3.msra.mxu1 %v6373_v28  ;;  %7435 = vmatpush3.msra.mxu0 %v6191_v51  ;;  %v6509_v28 = vld [vmem:[#allocation53 + $0x1b8] sm:$0xff] }
0x132e   :  { %7476 = vmatprep.subr.mxu1 %v8473_v4  ;;  %7436 = vmatprep.subr.mxu0 %v8473_v4  ;;  %v6473_v51 = vld [vmem:[#allocation53 + $0x98] sm:$0xff] }
0x132f   :  { %7477 = vmatpush3.msra.mxu1 %v6372_v63  ;;  %7437 = vmatpush3.msra.mxu0 %v6190_v52  ;;  %v6508_v63 = vld [vmem:[#allocation53 + $0x1b0] sm:$0xff] }
0x1330   :  { %7478 = vmatprep.subr.mxu1 %v8473_v4  ;;  %7438 = vmatprep.subr.mxu0 %v8473_v4  ;;  %v6472_v52 = vld [vmem:[#allocation53 + $0x90] sm:$0xff] }
0x1331   :  { %7479 = vmatpush3.msra.mxu1 %v6371_v16  ;;  %7439 = vmatpush3.msra.mxu0 %v6189_v56  ;;  %v6507_v16 = vld [vmem:[#allocation53 + $0x1a8] sm:$0xff] }
0x1332   :  { %7480 = vmatprep.subr.mxu1 %v8473_v4  ;;  %7440 = vmatprep.subr.mxu0 %v8473_v4  ;;  %v6471_v56 = vld [vmem:[#allocation53 + $0x88] sm:$0xff] }
0x1333   :  { %7481 = vmatpush3.msra.mxu1 %v6370_v35  ;;  %7441 = vmatpush3.msra.mxu0 %v6188_v42  ;;  %v6506_v35 = vld [vmem:[#allocation53 + $0x1a0] sm:$0xff] }
0x1334   :  { %7482 = vmatprep.subr.mxu1 %v8473_v4  ;;  %7442 = vmatprep.subr.mxu0 %v8473_v4  ;;  %v6470_v42 = vld [vmem:[#allocation53 + $0x80] sm:$0xff] }
0x1335   :  { %7483 = vmatpush3.msra.mxu1 %v6369_v2  ;;  %7443 = vmatpush3.msra.mxu0 %v6187_v38  ;;  %v6505_v2 = vld [vmem:[#allocation53 + $0x198] sm:$0xff] }
0x1336   :  { %7484 = vmatprep.subr.mxu1 %v8473_v4  ;;  %7444 = vmatprep.subr.mxu0 %v8473_v4  ;;  %v6469_v38 = vld [vmem:[#allocation53 + $0x78] sm:$0xff] }
0x1337   :  { %7485 = vmatpush3.msra.mxu1 %v6368_v6  ;;  %7445 = vmatpush3.msra.mxu0 %v6186_v18  ;;  %v6504_v6 = vld [vmem:[#allocation53 + $0x190] sm:$0xff] }
0x1338   :  { %7486 = vmatprep.subr.mxu1 %v8473_v4  ;;  %7446 = vmatprep.subr.mxu0 %v8473_v4  ;;  %v6468_v18 = vld [vmem:[#allocation53 + $0x70] sm:$0xff] }
0x1339   :  { %7487 = vmatpush3.msra.mxu1 %v6367_v12  ;;  %7447 = vmatpush3.msra.mxu0 %v6185_v32  ;;  %v6503_v12 = vld [vmem:[#allocation53 + $0x188] sm:$0xff] }
0x133a   :  { %7488 = vmatprep.subr.mxu1 %v8473_v4  ;;  %7448 = vmatprep.subr.mxu0 %v8473_v4  ;;  %v6467_v32 = vld [vmem:[#allocation53 + $0x68] sm:$0xff] }
0x133b   :  { %7489 = vmatpush3.msra.mxu1 %v6366_v5  ;;  %7502 = vmatprep.mubr.msk.f32.mxu1 %vm8474_vm2, %v8473_v4  ;;  %v6502_v5 = vld [vmem:[#allocation53 + $0x180] sm:$0xff] }
0x133c   :  { %7490 = vmatprep.subr.mxu1 %v8473_v4  ;;  %7462 = vmatprep.mubr.msk.f32.mxu0 %vm8474_vm2, %v8473_v4 }
0x133d   :  { %7491 = vmatpush3.msra.mxu1 %v6365_v14  ;;  %7449 = vmatpush3.msra.mxu0 %v6184_v55  ;;  %v6466_v14 = vld [vmem:[#allocation53 + $0x60] sm:$0xff]  ;;  %v6501_v55 = vld [vmem:[#allocation53 + $0x178] sm:$0xff] }
0x133e   :  { %7492 = vmatprep.subr.mxu1 %v8473_v4  ;;  %7450 = vmatprep.subr.mxu0 %v8473_v4 }
0x133f   :  { %7493 = vmatpush3.msra.mxu1 %v6364_v45  ;;  %7451 = vmatpush3.msra.mxu0 %v6183_v39  ;;  %v6465_v45 = vld [vmem:[#allocation53 + $0x58] sm:$0xff]  ;;  %v6500_v39 = vld [vmem:[#allocation53 + $0x170] sm:$0xff] }
0x1340   :  { %7494 = vmatprep.subr.mxu1 %v8473_v4  ;;  %7452 = vmatprep.subr.mxu0 %v8473_v4 }
0x1341   :  { %7495 = vmatpush3.msra.mxu1 %v6363_v53  ;;  %7453 = vmatpush3.msra.mxu0 %v6182_v40  ;;  %v6464_v53 = vld [vmem:[#allocation53 + $0x50] sm:$0xff]  ;;  %v6499_v40 = vld [vmem:[#allocation53 + $0x168] sm:$0xff] }
0x1342   :  { %7496 = vmatprep.subr.mxu1 %v8473_v4  ;;  %7454 = vmatprep.subr.mxu0 %v8473_v4 }
0x1343   :  { %7497 = vmatpush3.msra.mxu1 %v6362_v43  ;;  %7455 = vmatpush3.msra.mxu0 %v6181_v58  ;;  %v6463_v43 = vld [vmem:[#allocation53 + $0x48] sm:$0xff]  ;;  %v6498_v58 = vld [vmem:[#allocation53 + $0x160] sm:$0xff] }
0x1344   :  { %7498 = vmatprep.subr.mxu1 %v8473_v4  ;;  %7456 = vmatprep.subr.mxu0 %v8473_v4 }
0x1345   :  { %7499 = vmatpush3.msra.mxu1 %v6361_v44  ;;  %7457 = vmatpush3.msra.mxu0 %v6180_v3  ;;  %v6497_v44 = vld [vmem:[#allocation53 + $0x158] sm:$0xff]  ;;  %v6496_v3 = vld [vmem:[#allocation53 + $0x150] sm:$0xff] }
0x1346   :  { %7500 = vmatprep.subr.mxu1 %v8473_v4  ;;  %7458 = vmatprep.subr.mxu0 %v8473_v4 }
0x1347   :  { %7501 = vmatpush3.msra.mxu1 %v6360_v59  ;;  %7459 = vmatpush3.msra.mxu0 %v6179_v22  ;;  %v6495_v59 = vld [vmem:[#allocation53 + $0x148] sm:$0xff]  ;;  %v6494_v22 = vld [vmem:[#allocation53 + $0x140] sm:$0xff] }
0x1348   :  { %7460 = vmatprep.subr.mxu0 %v8473_v4  ;;  %6589 = vmatprep.subr.mxu1 %v6485_v48  ;;  %v6491_v48 = vld [vmem:[#allocation53 + $0x128] sm:$0xff] }
0x1349   :  { %7461 = vmatpush3.msra.mxu0 %v6178_v9  ;;  %v6493_v9 = vld [vmem:[#allocation53 + $0x138] sm:$0xff] }
0x134a   :  { %6518 = vmatprep.subr.mxu0 %v6517_v37  ;;  %v6492_v37 = vld [vmem:[#allocation53 + $0x130] sm:$0xff] }
0x13e4   :  { %v9466_v20 = vpop.f32.mrf.mxu1 }
0x13e6   :  { %v9468_v11 = vpop.f32.mrf.mxu1 }
0x13e8   :  { %v7224_v15 = vpop.f32.mrf.mxu0  ;;  %v6355_v30 = vpop.f32.mrf.mxu1 }
0x13e9   :  { %v6356_v33 = vadd.f32 %v7126_v60, %v6355_v30  ;;  %v6490_v60 = vld [vmem:[#allocation53 + $0x120] sm:$0xff] }
0x13ea   :  { %v7225_v7 = vpop.f32.mrf.mxu0  ;;  %v7469_v8 = vpop.f32.mrf.mxu1  ;;  %v6462_v30 = vld [vmem:[#allocation53 + $0x40] sm:$0xff] }
0x13eb   :  { %v6359_v19 = vmax.f32 %v6356_v33, 0.0  ;;  %v7226_v23 = vadd.f32 %v7225_v7, %v7224_v15  ;;  %v6489_v15 = vld [vmem:[#allocation53 + $0x118] sm:$0xff]  ;;  %v6488_v33 = vld [vmem:[#allocation53 + $0x110] sm:$0xff]  ;;  %v6487_v7 = vld [vmem:[#allocation53 + $0x108] sm:$0xff] }
0x13ec   :  { %v6460_v8 = vld [vmem:[#allocation53 + $0x30] sm:$0xff] }
0x13ed   :  { %v6174_v34 = vadd.f32 %v7226_v23, %v7124_v0  ;;  %7503 = vmatmul.mubr.f32.vlgmr.msra.gmra.mxu1 %v6359_v19  ;;  %v6461_v0 = vld [vmem:[#allocation53 + $0x38] sm:$0xff]  ;;  %v6486_v19 = vld [vmem:[#allocation53 + $0x100] sm:$0xff]  ;;  %v6459_v23 = vld [vmem:[#allocation53 + $0x28] sm:$0xff] }
0x13ee   :  { %6590 = vmatpush1.msra.mxu1 %v6484_v1  ;;  %6653 = vmatprep.mubr.f32.mxu1 %v8473_v4  ;;  %v6458_v1 = vld [vmem:[#allocation53 + $0x20] sm:$0xff] }
0x13ef   :  { %v6177_v31 = vmax.f32 %v6174_v34, 0.0  ;;  %6591 = vmatprep.subr.mxu1 %v6483_v57  ;;  %v6691_v57 = vld [vmem:[#allocation53 + $0x2f8] sm:$0xff] }
0x13f0   :  { %6592 = vmatpush1.msra.mxu1 %v6482_v41  ;;  %v6457_v34 = vld [vmem:[#allocation53 + $0x18] sm:$0xff]  ;;  %v6456_v41 = vld [vmem:[#allocation53 + $0x10] sm:$0xff] }
0x13f1   :  { %7463 = vmatmul.mubr.f32.vlgmr.msra.gmra.mxu0 %v6177_v31  ;;  %6593 = vmatprep.subr.mxu1 %v6481_v17  ;;  %v6455_v17 = vld [vmem:[#allocation53 + $0x8] sm:$0xff]  ;;  %v6454_v31 = vld [vmem:[#allocation53] sm:$0xff] }
0x13f2   :  { %6519 = vmatpush1.msra.mxu0 %v6516_v25  ;;  %6594 = vmatpush1.msra.mxu1 %v6480_v62  ;;  %v9472_v25 = vld [vmem:[#allocation37] sm:$0x3] }
0x13f3   :  { %6520 = vmatprep.subr.mxu0 %v6515_v54  ;;  %6595 = vmatprep.subr.mxu1 %v6479_v49  ;;  %v5896_v62 = vrot.slane %v9472_v25, %v8831_v21  ;;  %v7129_v54 = vld [vmem:[#allocation52] ss:$0 sm:$0xff] }
0x13f4   :  { %6521 = vmatpush1.msra.mxu0 %v6514_v27  ;;  %6596 = vmatpush1.msra.mxu1 %v6478_v47 }
0x13f5   :  { %6522 = vmatprep.subr.mxu0 %v6513_v61  ;;  %6597 = vmatprep.subr.mxu1 %v6477_v13  ;;  %v5968_v49 = vadd.f32 %v9468_v11, %v5896_v62  ;;  %v7125_v61 = vld [vmem:[#allocation46] ss:$0 sm:$0xff]  ;;  %v6685_v11 = vld [vmem:[#allocation53 + $0x2c8] sm:$0xff]  ;;  %v6708_v62 = vld [vmem:[#allocation53 + $0x380] sm:$0xff] }
0x13f6   :  { %6523 = vmatpush1.msra.mxu0 %v6512_v46  ;;  %6598 = vmatpush1.msra.mxu1 %v6476_v36  ;;  %v6690_v36 = vld [vmem:[#allocation53 + $0x2f0] sm:$0xff] }
0x13f7   :  { %6524 = vmatprep.subr.mxu0 %v6511_v29  ;;  %6599 = vmatprep.subr.mxu1 %v6475_v24  ;;  %v5971_v29 = vmax.f32 %v5968_v49, 0.0  ;;  %v6706_v49 = vld [vmem:[#allocation53 + $0x370] sm:$0xff] }
0x13f8   :  { %6525 = vmatpush1.msra.mxu0 %v6510_v26  ;;  %6600 = vmatpush1.msra.mxu1 %v6474_v50  ;;  %v6689_v26 = vld [vmem:[#allocation53 + $0x2e8] sm:$0xff] }
0x13f9   :  { %6526 = vmatprep.subr.mxu0 %v6509_v28  ;;  %6601 = vmatprep.subr.mxu1 %v6473_v51  ;;  %v6688_v28 = vld [vmem:[#allocation53 + $0x2e0] sm:$0xff]  ;;  %v6687_v51 = vld [vmem:[#allocation53 + $0x2d8] sm:$0xff] }
0x13fa   :  { %6527 = vmatpush1.msra.mxu0 %v6508_v63  ;;  %6602 = vmatpush1.msra.mxu1 %v6472_v52 }
0x13fb   :  { %6528 = vmatprep.subr.mxu0 %v6507_v16  ;;  %6603 = vmatprep.subr.mxu1 %v6471_v56  ;;  %v6686_v16 = vld [vmem:[#allocation53 + $0x2d0] sm:$0xff]  ;;  %v6684_v56 = vld [vmem:[#allocation53 + $0x2c0] sm:$0xff] }
0x13fc   :  { %6529 = vmatpush1.msra.mxu0 %v6506_v35  ;;  %6604 = vmatpush1.msra.mxu1 %v6470_v42  ;;  %v6683_v35 = vld [vmem:[#allocation53 + $0x2b8] sm:$0xff]  ;;  %v6682_v42 = vld [vmem:[#allocation53 + $0x2b0] sm:$0xff] }
0x13fd   :  { %6530 = vmatprep.subr.mxu0 %v6505_v2  ;;  %6605 = vmatprep.subr.mxu1 %v6469_v38  ;;  %v6681_v2 = vld [vmem:[#allocation53 + $0x2a8] sm:$0xff]  ;;  %v6680_v38 = vld [vmem:[#allocation53 + $0x2a0] sm:$0xff] }
0x13fe   :  { %6531 = vmatpush1.msra.mxu0 %v6504_v6  ;;  %6606 = vmatpush1.msra.mxu1 %v6468_v18  ;;  %v6679_v6 = vld [vmem:[#allocation53 + $0x298] sm:$0xff]  ;;  %v6678_v18 = vld [vmem:[#allocation53 + $0x290] sm:$0xff] }
0x13ff   :  { %6532 = vmatprep.subr.mxu0 %v6503_v12  ;;  %6607 = vmatprep.subr.mxu1 %v6467_v32  ;;  %v6677_v12 = vld [vmem:[#allocation53 + $0x288] sm:$0xff]  ;;  %v6676_v32 = vld [vmem:[#allocation53 + $0x280] sm:$0xff] }
0x1400   :  { %6533 = vmatpush1.msra.mxu0 %v6502_v5  ;;  %6608 = vmatpush1.msra.mxu1 %v6466_v14  ;;  %v6675_v5 = vld [vmem:[#allocation53 + $0x278] sm:$0xff]  ;;  %v6674_v14 = vld [vmem:[#allocation53 + $0x270] sm:$0xff] }
0x1401   :  { %6534 = vmatprep.subr.mxu0 %v6501_v55  ;;  %6609 = vmatprep.subr.mxu1 %v6465_v45  ;;  %v6673_v55 = vld [vmem:[#allocation53 + $0x268] sm:$0xff]  ;;  %v6672_v45 = vld [vmem:[#allocation53 + $0x260] sm:$0xff] }
0x1402   :  { %6535 = vmatpush1.msra.mxu0 %v6500_v39  ;;  %6610 = vmatpush1.msra.mxu1 %v6464_v53  ;;  %v6671_v39 = vld [vmem:[#allocation53 + $0x258] sm:$0xff]  ;;  %v6670_v53 = vld [vmem:[#allocation53 + $0x250] sm:$0xff] }
0x1403   :  { %6536 = vmatprep.subr.mxu0 %v6499_v40  ;;  %6611 = vmatprep.subr.mxu1 %v6463_v43  ;;  %v6669_v40 = vld [vmem:[#allocation53 + $0x248] sm:$0xff]  ;;  %v6668_v43 = vld [vmem:[#allocation53 + $0x240] sm:$0xff] }
0x1404   :  { %6537 = vmatpush1.msra.mxu0 %v6498_v58  ;;  %6582 = vmatprep.mubr.f32.mxu0 %v8473_v4  ;;  %v6667_v58 = vld [vmem:[#allocation53 + $0x238] sm:$0xff] }
0x1405   :  { %6538 = vmatprep.subr.mxu0 %v6497_v44  ;;  %6612 = vmatpush1.msra.mxu1 %v6462_v30  ;;  %v6666_v44 = vld [vmem:[#allocation53 + $0x230] sm:$0xff]  ;;  %v6721_v30 = vld [vmem:[#allocation53 + $0x3e8] sm:$0xff] }
0x1406   :  { %6539 = vmatpush1.msra.mxu0 %v6496_v3  ;;  %6613 = vmatprep.subr.mxu1 %v6461_v0  ;;  %v6665_v3 = vld [vmem:[#allocation53 + $0x228] sm:$0xff]  ;;  %v6719_v0 = vld [vmem:[#allocation53 + $0x3d8] sm:$0xff] }
0x1407   :  { %6540 = vmatprep.subr.mxu0 %v6495_v59  ;;  %6614 = vmatpush1.msra.mxu1 %v6460_v8  ;;  %v6664_v59 = vld [vmem:[#allocation53 + $0x220] sm:$0xff]  ;;  %v6717_v8 = vld [vmem:[#allocation53 + $0x3c8] sm:$0xff] }
0x1408   :  { %6541 = vmatpush1.msra.mxu0 %v6494_v22  ;;  %6615 = vmatprep.subr.mxu1 %v6459_v23  ;;  %v6663_v22 = vld [vmem:[#allocation53 + $0x218] sm:$0xff] }
0x1409   :  { %6542 = vmatprep.subr.mxu0 %v6493_v9  ;;  %6616 = vmatpush1.msra.mxu1 %v6458_v1  ;;  %v6662_v9 = vld [vmem:[#allocation53 + $0x210] sm:$0xff]  ;;  %v6715_v23 = vld [vmem:[#allocation53 + $0x3b8] sm:$0xff] }
0x140a   :  { %6543 = vmatpush1.msra.mxu0 %v6492_v37  ;;  %6617 = vmatprep.subr.mxu1 %v6457_v34  ;;  %v6661_v37 = vld [vmem:[#allocation53 + $0x208] sm:$0xff]  ;;  %v6714_v1 = vld [vmem:[#allocation53 + $0x3b0] sm:$0xff]  ;;  %v6712_v34 = vld [vmem:[#allocation53 + $0x3a0] sm:$0xff] }
0x140b   :  { %6544 = vmatprep.subr.mxu0 %v6491_v48  ;;  %6618 = vmatpush1.msra.mxu1 %v6456_v41  ;;  %v6660_v48 = vld [vmem:[#allocation53 + $0x200] sm:$0xff]  ;;  %v6711_v41 = vld [vmem:[#allocation53 + $0x398] sm:$0xff] }
0x140c   :  { %6545 = vmatpush1.msra.mxu0 %v6490_v60  ;;  %6619 = vmatprep.subr.mxu1 %v6455_v17  ;;  %v6723_v60 = vld [vmem:[#allocation53 + $0x3f8] sm:$0xff]  ;;  %v6710_v17 = vld [vmem:[#allocation53 + $0x390] sm:$0xff] }
0x140d   :  { %6546 = vmatprep.subr.mxu0 %v6489_v15  ;;  %6620 = vmatpush1.msra.mxu1 %v6454_v31  ;;  %v6722_v15 = vld [vmem:[#allocation53 + $0x3f0] sm:$0xff]  ;;  %v6709_v31 = vld [vmem:[#allocation53 + $0x388] sm:$0xff] }
0x140e   :  { %6547 = vmatpush1.msra.mxu0 %v6488_v33  ;;  %v6720_v33 = vld [vmem:[#allocation53 + $0x3e0] sm:$0xff] }
0x140f   :  { %6548 = vmatprep.subr.mxu0 %v6487_v7  ;;  %v6718_v7 = vld [vmem:[#allocation53 + $0x3d0] sm:$0xff] }
0x1410   :  { %6549 = vmatpush1.msra.mxu0 %v6486_v19  ;;  %v6716_v19 = vld [vmem:[#allocation53 + $0x3c0] sm:$0xff] }
0x1411   :  { %6724 = vmatprep.subr.mxu0 %v6691_v57  ;;  %v6713_v57 = vld [vmem:[#allocation53 + $0x3a8] sm:$0xff] }
0x14ad   :  { %v6449_v27 = vpop.f32.mrf.mxu1 }
0x14ae   :  { %v6450_v47 = vadd.f32 %v7129_v54, %v6449_v27  ;;  %v6707_v54 = vld [vmem:[#allocation53 + $0x378] sm:$0xff]  ;;  %v6705_v27 = vld [vmem:[#allocation53 + $0x368] sm:$0xff] }
0x14af   :  { %v7504_v13 = vpop.f32.mrf.mxu1 }
0x14b0   :  { %v6453_v46 = vmax.f32 %v6450_v47, 0.0  ;;  %v6704_v47 = vld [vmem:[#allocation53 + $0x360] sm:$0xff]  ;;  %v6702_v13 = vld [vmem:[#allocation53 + $0x350] sm:$0xff] }
0x14b1   :  { %v6267_v24 = vpop.f32.mrf.mxu0 }
0x14b2   :  { %v6268_v50 = vadd.f32 %v7125_v61, %v6267_v24  ;;  %6583 = vmatmul.mubr.f32.vlgmr.msra.gmra.mxu0 %v6453_v46  ;;  %v6703_v61 = vld [vmem:[#allocation53 + $0x358] sm:$0xff]  ;;  %v6701_v46 = vld [vmem:[#allocation53 + $0x348] sm:$0xff]  ;;  %v5892_v24 = vrot.slane %v9472_v25, %v8769_v10  ;;  %v6692_v25 = vld [vmem:[#allocation53 + $0x300] sm:$0xff] }
0x14b3   :  { %6725 = vmatpush1.msra.mxu0 %v6690_v36  ;;  %6788 = vmatprep.mubr.f32.mxu0 %v5971_v29  ;;  %v7464_v63 = vpop.f32.mrf.mxu0  ;;  %v6700_v36 = vld [vmem:[#allocation53 + $0x340] sm:$0xff]  ;;  %v6699_v29 = vld [vmem:[#allocation53 + $0x338] sm:$0xff] }
0x14b4   :  { %v6271_v52 = vmax.f32 %v6268_v50, 0.0  ;;  %6726 = vmatprep.subr.mxu0 %v6689_v26  ;;  %v6698_v26 = vld [vmem:[#allocation53 + $0x330] sm:$0xff]  ;;  %v6697_v50 = vld [vmem:[#allocation53 + $0x328] sm:$0xff]  ;;  %v5966_v63 = vadd.f32 %v9466_v20, %v5892_v24  ;;  %v6828_v20 = vld [vmem:[%s9599_s2 + $0x78] sm:$0xff] }
0x14b5   :  { %6727 = vmatpush1.msra.mxu0 %v6688_v28  ;;  %v6696_v28 = vld [vmem:[#allocation53 + $0x320] sm:$0xff] }
0x14b6   :  { %6728 = vmatprep.subr.mxu0 %v6687_v51  ;;  %6654 = vmatmul.mubr.f32.vlgmr.msra.gmra.mxu1 %v6271_v52  ;;  %v6695_v51 = vld [vmem:[#allocation53 + $0x318] sm:$0xff]  ;;  %v6694_v52 = vld [vmem:[#allocation53 + $0x310] sm:$0xff] }
0x14b7   :  { %6729 = vmatpush1.msra.mxu0 %v6686_v16  ;;  %v6693_v16 = vld [vmem:[#allocation53 + $0x308] sm:$0xff]  ;;  %v6926_v24 = vld [vmem:[%s8677_s17 + $0x18] sm:$0xff] }
0x14b8   :  { %6730 = vmatprep.subr.mxu0 %v6685_v11  ;;  %v5970_v11 = vmax.f32 %v5966_v63, 0.0  ;;  %v7130_v63 = vld [vmem:[#allocation56] ss:$0 sm:$0xff] }
0x14b9   :  { %6731 = vmatpush1.msra.mxu0 %v6684_v56  ;;  %v6844_v56 = vld [vmem:[%s9599_s2 + $0xf8] sm:$0xff] }
0x14ba   :  { %6732 = vmatprep.subr.mxu0 %v6683_v35  ;;  %v6843_v35 = vld [vmem:[%s9599_s2 + $0xf0] sm:$0xff]  ;;  %7263 = vmatprep.subr.mxu1 %v6844_v56  ;;  %v7131_v56 = vld [vmem:[#allocation2] ss:$0 sm:$0xff] }
0x14bb   :  { %6733 = vmatpush1.msra.mxu0 %v6682_v42  ;;  %v6827_v42 = vld [vmem:[%s9599_s2 + $0x70] sm:$0xff]  ;;  %7264 = vmatpush3.msra.mxu1 %v6828_v20 }
0x14bc   :  { %6734 = vmatprep.subr.mxu0 %v6681_v2  ;;  %v6842_v2 = vld [vmem:[%s9599_s2 + $0xe8] sm:$0xff]  ;;  %7265 = vmatprep.subr.mxu1 %v6843_v35 }
0x14bd   :  { %6735 = vmatpush1.msra.mxu0 %v6680_v38  ;;  %v6826_v38 = vld [vmem:[%s9599_s2 + $0x68] sm:$0xff]  ;;  %7266 = vmatpush3.msra.mxu1 %v6827_v42 }
0x14be   :  { %6736 = vmatprep.subr.mxu0 %v6679_v6  ;;  %v6841_v6 = vld [vmem:[%s9599_s2 + $0xe0] sm:$0xff]  ;;  %7267 = vmatprep.subr.mxu1 %v6842_v2 }
0x14bf   :  { %6737 = vmatpush1.msra.mxu0 %v6678_v18  ;;  %v6825_v18 = vld [vmem:[%s9599_s2 + $0x60] sm:$0xff]  ;;  %7268 = vmatpush3.msra.mxu1 %v6826_v38 }
0x14c0   :  { %6738 = vmatprep.subr.mxu0 %v6677_v12  ;;  %v6840_v12 = vld [vmem:[%s9599_s2 + $0xd8] sm:$0xff]  ;;  %7269 = vmatprep.subr.mxu1 %v6841_v6 }
0x14c1   :  { %6739 = vmatpush1.msra.mxu0 %v6676_v32  ;;  %v6824_v32 = vld [vmem:[%s9599_s2 + $0x58] sm:$0xff]  ;;  %7270 = vmatpush3.msra.mxu1 %v6825_v18 }
0x14c2   :  { %6740 = vmatprep.subr.mxu0 %v6675_v5  ;;  %v6839_v5 = vld [vmem:[%s9599_s2 + $0xd0] sm:$0xff]  ;;  %7271 = vmatprep.subr.mxu1 %v6840_v12 }
0x14c3   :  { %6741 = vmatpush1.msra.mxu0 %v6674_v14  ;;  %v6823_v14 = vld [vmem:[%s9599_s2 + $0x50] sm:$0xff]  ;;  %7272 = vmatpush3.msra.mxu1 %v6824_v32 }
0x14c4   :  { %6742 = vmatprep.subr.mxu0 %v6673_v55  ;;  %v6838_v55 = vld [vmem:[%s9599_s2 + $0xc8] sm:$0xff]  ;;  %7273 = vmatprep.subr.mxu1 %v6839_v5 }
0x14c5   :  { %6743 = vmatpush1.msra.mxu0 %v6672_v45  ;;  %v6822_v45 = vld [vmem:[%s9599_s2 + $0x48] sm:$0xff]  ;;  %7274 = vmatpush3.msra.mxu1 %v6823_v14 }
0x14c6   :  { %6744 = vmatprep.subr.mxu0 %v6671_v39  ;;  %v6837_v39 = vld [vmem:[%s9599_s2 + $0xc0] sm:$0xff]  ;;  %7275 = vmatprep.subr.mxu1 %v6838_v55 }
0x14c7   :  { %6745 = vmatpush1.msra.mxu0 %v6670_v53  ;;  %v6821_v53 = vld [vmem:[%s9599_s2 + $0x40] sm:$0xff]  ;;  %7276 = vmatpush3.msra.mxu1 %v6822_v45 }
0x14c8   :  { %6746 = vmatprep.subr.mxu0 %v6669_v40  ;;  %v6836_v40 = vld [vmem:[%s9599_s2 + $0xb8] sm:$0xff]  ;;  %7277 = vmatprep.subr.mxu1 %v6837_v39 }
0x14c9   :  { %6747 = vmatpush1.msra.mxu0 %v6668_v43  ;;  %v6820_v43 = vld [vmem:[%s9599_s2 + $0x38] sm:$0xff]  ;;  %7278 = vmatpush3.msra.mxu1 %v6821_v53 }
0x14ca   :  { %6748 = vmatprep.subr.mxu0 %v6667_v58  ;;  %v6835_v58 = vld [vmem:[%s9599_s2 + $0xb0] sm:$0xff]  ;;  %7279 = vmatprep.subr.mxu1 %v6836_v40 }
0x14cb   :  { %6749 = vmatpush1.msra.mxu0 %v6666_v44  ;;  %v6819_v44 = vld [vmem:[%s9599_s2 + $0x30] sm:$0xff]  ;;  %7280 = vmatpush3.msra.mxu1 %v6820_v43 }
0x14cc   :  { %6750 = vmatprep.subr.mxu0 %v6665_v3  ;;  %v6834_v3 = vld [vmem:[%s9599_s2 + $0xa8] sm:$0xff]  ;;  %7281 = vmatprep.subr.mxu1 %v6835_v58 }
0x14cd   :  { %6751 = vmatpush1.msra.mxu0 %v6664_v59  ;;  %v6818_v59 = vld [vmem:[%s9599_s2 + $0x28] sm:$0xff]  ;;  %7282 = vmatpush3.msra.mxu1 %v6819_v44 }
0x14ce   :  { %6752 = vmatprep.subr.mxu0 %v6663_v22  ;;  %7283 = vmatprep.subr.mxu1 %v6834_v3  ;;  %v6833_v22 = vld [vmem:[%s9599_s2 + $0xa0] sm:$0xff] }
0x14cf   :  { %6753 = vmatpush1.msra.mxu0 %v6662_v9  ;;  %7284 = vmatpush3.msra.mxu1 %v6818_v59  ;;  %v6817_v9 = vld [vmem:[%s9599_s2 + $0x20] sm:$0xff] }
0x14d0   :  { %6754 = vmatprep.subr.mxu0 %v6661_v37  ;;  %7285 = vmatprep.subr.mxu1 %v6833_v22  ;;  %v6832_v37 = vld [vmem:[%s9599_s2 + $0x98] sm:$0xff] }
0x14d1   :  { %6755 = vmatpush1.msra.mxu0 %v6660_v48  ;;  %7286 = vmatpush3.msra.mxu1 %v6817_v9  ;;  %v6816_v48 = vld [vmem:[%s9599_s2 + $0x18] sm:$0xff] }
0x14d2   :  { %6756 = vmatprep.subr.mxu0 %v6723_v60  ;;  %7287 = vmatprep.subr.mxu1 %v6832_v37  ;;  %v6831_v60 = vld [vmem:[%s9599_s2 + $0x90] sm:$0xff] }
0x14d3   :  { %6757 = vmatpush2.msra.mxu0 %v6722_v15  ;;  %7288 = vmatpush3.msra.mxu1 %v6816_v48  ;;  %v6815_v15 = vld [vmem:[%s9599_s2 + $0x10] sm:$0xff] }
0x14d4   :  { %6758 = vmatprep.subr.mxu0 %v6721_v30  ;;  %7289 = vmatprep.subr.mxu1 %v6831_v60  ;;  %v6830_v30 = vld [vmem:[%s9599_s2 + $0x88] sm:$0xff] }
0x14d5   :  { %6759 = vmatpush2.msra.mxu0 %v6720_v33  ;;  %7290 = vmatpush3.msra.mxu1 %v6815_v15  ;;  %v6814_v33 = vld [vmem:[%s9599_s2 + $0x8] sm:$0xff] }
0x14d6   :  { %6760 = vmatprep.subr.mxu0 %v6719_v0  ;;  %7291 = vmatprep.subr.mxu1 %v6830_v30  ;;  %v6829_v0 = vld [vmem:[%s9599_s2 + $0x80] sm:$0xff] }
0x14d7   :  { %6761 = vmatpush2.msra.mxu0 %v6718_v7  ;;  %7292 = vmatpush3.msra.mxu1 %v6814_v33  ;;  %v6813_v7 = vld [vmem:[%s9599_s2] sm:$0xff] }
0x14d8   :  { %6762 = vmatprep.subr.mxu0 %v6717_v8  ;;  %7293 = vmatprep.subr.mxu1 %v6829_v0 }
0x14d9   :  { %6763 = vmatpush2.msra.mxu0 %v6716_v19  ;;  %7294 = vmatpush3.msra.mxu1 %v6813_v7 }
0x14da   :  { %6764 = vmatprep.subr.mxu0 %v6715_v23  ;;  %7505 = vmatprep.subr.mxu1 %v8473_v4  ;;  %v6797_v23 = vld [vmem:[#allocation55] sm:$0x3] }
0x14db   :  { %6765 = vmatpush2.msra.mxu0 %v6714_v1 }
0x14dc   :  { %6766 = vmatprep.subr.mxu0 %v6713_v57 }
0x14dd   :  { %6767 = vmatpush2.msra.mxu0 %v6712_v34 }
0x14de   :  { %6768 = vmatprep.subr.mxu0 %v6711_v41 }
0x14df   :  { %6769 = vmatpush2.msra.mxu0 %v6710_v17  ;;  %v6802_v17 = vrot.slane %v6797_v23, %v8769_v10  ;;  %v6928_v10 = vld [vmem:[%s8677_s17 + $0x28] sm:$0xff] }
0x14e0   :  { %6770 = vmatprep.subr.mxu0 %v6709_v31 }
0x14e1   :  { %6771 = vmatpush2.msra.mxu0 %v6708_v62 }
0x14e2   :  { %6772 = vmatprep.subr.mxu0 %v6707_v54  ;;  %v6806_v54 = vrot.slane %v6797_v23, %v8831_v21  ;;  %v6927_v21 = vld [vmem:[%s8677_s17 + $0x20] sm:$0xff] }
0x14e3   :  { %6773 = vmatpush2.msra.mxu0 %v6706_v49 }
0x14e4   :  { %6774 = vmatprep.subr.mxu0 %v6705_v27 }
0x14e5   :  { %6775 = vmatpush2.msra.mxu0 %v6704_v47 }
0x14e6   :  { %6776 = vmatprep.subr.mxu0 %v6703_v61 }
0x14e7   :  { %6777 = vmatpush2.msra.mxu0 %v6702_v13 }
0x14e8   :  { %6778 = vmatprep.subr.mxu0 %v6701_v46 }
0x14e9   :  { %6779 = vmatpush2.msra.mxu0 %v6700_v36  ;;  %v6930_v36 = vld [vmem:[%s8677_s17 + $0x38] sm:$0xff] }
0x14ea   :  { %6780 = vmatprep.subr.mxu0 %v6699_v29  ;;  %v6929_v29 = vld [vmem:[%s8677_s17 + $0x30] sm:$0xff] }
0x14eb   :  { %6781 = vmatpush2.msra.mxu0 %v6698_v26  ;;  %v6925_v26 = vld [vmem:[%s8677_s17 + $0x10] sm:$0xff] }
0x14ec   :  { %6782 = vmatprep.subr.mxu0 %v6697_v50  ;;  %v6924_v50 = vld [vmem:[%s8677_s17 + $0x8] sm:$0xff] }
0x14ed   :  { %6783 = vmatpush2.msra.mxu0 %v6696_v28  ;;  %v6923_v28 = vld [vmem:[%s8677_s17] sm:$0xff] }
0x14ee   :  { %6784 = vmatprep.subr.mxu0 %v6695_v51 }
0x14ef   :  { %6785 = vmatpush2.msra.mxu0 %v6694_v52 }
0x14f0   :  { %6786 = vmatprep.subr.mxu0 %v6693_v16 }
0x14f1   :  { %6787 = vmatpush2.msra.mxu0 %v6692_v25 }
0x14f2   :  { %6789 = vmatmul.mubr.f32.vlgmr.msra.gmra.mxu0 %v5970_v11 }
0x1572   :  { %v6584_v8 = vpop.f32.mrf.mxu0 }
0x1574   :  { %v6586_v1 = vpop.f32.mrf.mxu0 }
0x1576   :  { %v6655_v19 = vpop.f32.mrf.mxu1 }
0x1577   :  { %v6656_v34 = vadd.f32 %v6655_v19, %v6584_v8 }
0x1578   :  { %v6657_v57 = vpop.f32.mrf.mxu1 }
0x1579   :  { %v6658_v31 = vadd.f32 %v6657_v57, %v6586_v1 }
0x15b2   :  { %v6790_v41 = vpop.f32.mrf.mxu0 }
0x15b3   :  { %v6795_v62 = vadd.f32 %v6790_v41, %v6656_v34 }
0x15b4   :  { %v6792_v49 = vpop.f32.mrf.mxu0 }
0x15b5   :  { %v6796_v27 = vadd.f32 %v6792_v49, %v6658_v31  ;;  %v6809_v47 = vadd.f32 %v6802_v17, %v6795_v62 }
0x15b7   :  { %v6810_v61 = vadd.f32 %v6806_v54, %v6796_v27  ;;  %v6811_v46 = vmax.f32 %v6809_v47, 0.0 }
0x15b9   :  { %v6812_v13 = vmax.f32 %v6810_v61, 0.0 }
0x15bb   :  { %6916 = vmatprep.mubr.f32.mxu1 %v6812_v13 }
0x15bc   :  { %6917 = vmatmul.mubr.f32.vlgmr.msra.gmra.mxu1 %v6811_v46 }
0x15bd   :  { %7506 = vmatpush3.msra.mxu1 %v6930_v36  ;;  %7521 = vmatprep.mubr.msk.f32.mxu1 %vm8474_vm2, %v8473_v4 }
0x15be   :  { %7507 = vmatprep.subr.mxu1 %v8473_v4 }
0x15bf   :  { %7508 = vmatpush3.msra.mxu1 %v6929_v29 }
0x15c0   :  { %7509 = vmatprep.subr.mxu1 %v8473_v4 }
0x15c1   :  { %7510 = vmatpush3.msra.mxu1 %v6928_v10 }
0x15c2   :  { %7511 = vmatprep.subr.mxu1 %v8473_v4 }
0x15c3   :  { %7512 = vmatpush3.msra.mxu1 %v6927_v21 }
0x15c4   :  { %7513 = vmatprep.subr.mxu1 %v8473_v4 }
0x15c5   :  { %7514 = vmatpush3.msra.mxu1 %v6926_v24 }
0x15c6   :  { %7515 = vmatprep.subr.mxu1 %v8473_v4 }
0x15c7   :  { %7516 = vmatpush3.msra.mxu1 %v6925_v26 }
0x15c8   :  { %7517 = vmatprep.subr.mxu1 %v8473_v4 }
0x15c9   :  { %7518 = vmatpush3.msra.mxu1 %v6924_v50 }
0x15ca   :  { %7519 = vmatprep.subr.mxu1 %v8473_v4 }
0x15cb   :  { %7520 = vmatpush3.msra.mxu1 %v6923_v28 }
0x167c   :  { %v7295_v51 = vpop.f32.mrf.mxu1 }
0x167e   :  { %v7296_v52 = vpop.f32.mrf.mxu1 }
0x167f   :  { %v7297_v16 = vadd.f32 %v7296_v52, %v7295_v51 }
0x1681   :  { %v6919_v25 = vadd.f32 %v7297_v16, %v7130_v63 }
0x1683   :  { %v6922_v11 = vmax.f32 %v6919_v25, 0.0 }
0x1685   :  { %7522 = vmatmul.mubr.msk.f32.vlgmr.msra.gmra.mxu1 %vm884_vm4, %v6922_v11 }
0x1745   :  { %v7007_v20 = vpop.f32.mrf.mxu1 }
0x1746   :  { %v7008_v35 = vadd.f32 %v7131_v56, %v7007_v20 }
0x1747   :  { %v7523_v42 = vpop.f32.mrf.mxu1 }
0x1748   :  { %7012 = vst.msk [vmem:[%s8685_s5] sm:$0x3] %vm7011_vm8, %v7008_v35 }
0x1749   :  { %7017 = vsyncpa [#allocation4], 1 }
0x174a   :  { %7018 = vsyncpa [#allocation6], 1 }
0x174b   :  { %7019 = vsyncpa [#allocation9], 1 }
0x174c   :  { %7020 = vsyncpa [#allocation12], 1 }
0x174d   :  { %7021 = vsyncpa [#allocation15], 1 }
0x174e   :  { %7022 = vsyncpa [#allocation18], 1 }
0x174f   :  { %7023 = vsyncpa [#allocation21], 1 }
0x1750   :  { %7024 = vsyncpa [#allocation24], 1 }
0x1751   :  { %7025 = vsyncpa [#allocation27], 1 }
0x1752   :  { %7026 = vsyncpa [#allocation30], 1 }
0x1753   :  { %7027 = vsyncpa [#allocation33], 1 }
0x1754   :  { %7028 = vsyncpa [#allocation36], 1 }
0x1755   :  { %7029 = vsyncpa [#allocation39], 1 }
0x1756   :  { %7030 = vsyncpa [#allocation42], 1 }
0x1757   :  { %7031 = vsyncpa [#allocation45], 1 }
0x1758   :  { %7032 = vsyncpa [#allocation48], 1 }
0x1759   :  { %7033 = vsyncpa [#allocation51], 1 }
0x175a   :  { %7034 = vsyncpa [#allocation54], 1 }
0x175b   :  { %7035 = vsyncpa [#allocation57], 1 }

</bundles_post_ra>
